<compile_context>
chip_gen: v5e
topology: v5e:2x2
jax: 0.10.0
libtpu: 0.0.40
codegen_flags: <defaults>
</compile_context>

<pallas_src>
import functools

import jax
import jax.numpy as jnp
from jax import lax
from jax.experimental import pallas as pl
from jax.experimental.pallas import tpu as pltpu


def _round_up(x, m):
    return (x + m - 1) // m * m


# ---------------------------------------------------------------------------
# Kernel 1: direct 3x3x3 / stride-1 / pad-1 conv + folded-BN bias
#           (+ optional residual add, optional ReLU)
#
#   x_ref  : (1, D+2, H+2, Wb+2, Cin)  bf16   -- padded activations, resident
#                                                in VMEM across the depth axis
#   w_ref  : (27, Cin, Coutp)          bf16   -- BN scale folded into columns
#   b_ref  : (1, Coutp)                f32
#   res_ref: (1, td*H*Wb, Coutp)       f32    -- only for the has_res variant
#   o_ref  : (1, td*H*Wb, Coutp)       f32
#   acc_ref: (td*H*Wb, Coutp)          f32 VMEM scratch
# ---------------------------------------------------------------------------
def _conv3x3x3_kernel(x_ref, w_ref, b_ref, *rest, td, H, Wb, relu, has_res):
    if has_res:
        res_ref, o_ref, acc_ref = rest
    else:
        o_ref, acc_ref = rest

    d0 = pl.program_id(1) * td          # first output depth of this block
    cin = x_ref.shape[-1]
    acc_ref[...] = jnp.zeros_like(acc_ref)

    # 27 taps: shifted windows of the VMEM-resident padded activation volume,
    # each a (td*H*Wb, Cin) x (Cin, Coutp) bf16 matmul accumulated in f32.
    for kd in range(3):
        for kh in range(3):
            for kw in range(3):
                tap = kd * 9 + kh * 3 + kw
                lhs = x_ref[0, pl.ds(d0 + kd, td), kh:kh + H, kw:kw + Wb, :]
                lhs = lhs.reshape(td * H * Wb, cin)
                acc_ref[...] += jnp.dot(lhs, w_ref[tap],
                                        preferred_element_type=jnp.float32)

    out = acc_ref[...] + b_ref[...]
    if has_res:
        out = out + res_ref[0]
    if relu:
        out = jnp.maximum(out, 0.0)
    o_ref[0] = out


def conv3x3x3_bn(x_ndhwc, w_oidhw, bn_scale, bn_bias, residual=None, relu=True):
    """Stride-1, pad-1 3x3x3 conv with folded BatchNorm, optional residual+ReLU.

    x_ndhwc : [N, D, H, W, Cin] f32
    w_oidhw : [Cout, Cin, 3, 3, 3] (PyTorch layout)
    residual: optional [N, D*H*Wb, Coutp] f32 (Wb = round_up(W, 8),
              Coutp = round_up(Cout, 128))
    returns : [N, D, H, W, Cout] f32
    """
    N, D, H, W, Cin = x_ndhwc.shape
    Cout = w_oidhw.shape[0]
    Coutp = _round_up(Cout, 128)       # lane-dense output columns
    Wb = _round_up(W, 8)               # sublane-aligned spatial width

    # Pad: halo of 1 in D/H, halo of 1 + extra right-pad in W so that every
    # in-kernel window of width Wb stays in bounds.  bf16 for the MXU.
    xp = jnp.pad(x_ndhwc, ((0, 0), (1, 1), (1, 1), (1, Wb + 1 - W), (0, 0)))
    xp = xp.astype(jnp.bfloat16)
    Dp, Hp, Wp = D + 2, H + 2, Wb + 2

    # Per-tap weight matrices [27, Cin, Coutp] with BN scale folded in.
    w = jnp.transpose(w_oidhw, (2, 3, 4, 1, 0)).reshape(27, Cin, Cout)
    w = w * bn_scale.reshape(1, 1, Cout)
    w = jnp.pad(w, ((0, 0), (0, 0), (0, Coutp - Cout))).astype(jnp.bfloat16)
    b = jnp.pad(bn_bias.reshape(1, Cout),
                ((0, 0), (0, Coutp - Cout))).astype(jnp.float32)

    # Depth tile: largest divisor of D keeping the f32 accumulator <= 1 MiB.
    td = 1
    for cand in range(D, 0, -1):
        if D % cand == 0 and cand * H * Wb * Coutp * 4 <= (1 << 20):
            td = cand
            break
    M = td * H * Wb
    grid = (N, D // td)

    in_specs = [
        # whole padded volume of one batch element; index ignores the depth
        # grid axis so it is DMA'd once per n and stays resident in VMEM.
        pl.BlockSpec((1, Dp, Hp, Wp, Cin), lambda n, d: (n, 0, 0, 0, 0)),
        pl.BlockSpec((27, Cin, Coutp), lambda n, d: (0, 0, 0)),
        pl.BlockSpec((1, Coutp), lambda n, d: (0, 0)),
    ]
    args = [xp, w, b]
    has_res = residual is not None
    if has_res:
        in_specs.append(pl.BlockSpec((1, M, Coutp), lambda n, d: (n, d, 0)))
        args.append(residual)

    kernel = functools.partial(_conv3x3x3_kernel, td=td, H=H, Wb=Wb,
                               relu=relu, has_res=has_res)
    out = pl.pallas_call(
        kernel,
        out_shape=jax.ShapeDtypeStruct((N, D * H * Wb, Coutp), jnp.float32),
        grid=grid,
        in_specs=in_specs,
        out_specs=pl.BlockSpec((1, M, Coutp), lambda n, d: (n, d, 0)),
        scratch_shapes=[pltpu.VMEM((M, Coutp), jnp.float32)],
        compiler_params=pltpu.CompilerParams(
            dimension_semantics=("parallel", "arbitrary")),
    )(*args)
    # TODO(synk): for very large volumes, add depth-halo manual DMA so the whole
    # padded volume does not need to be VMEM-resident per batch element.
    return out.reshape(N, D, H, Wb, Coutp)[:, :, :, :W, :Cout]


# ---------------------------------------------------------------------------
# Kernel 2: fused matmul + folded-BN bias (+ optional ReLU), no residual.
# Used for the strided conv1 (im2col, modest expansion since the output volume
# is /stride^3) and the 1x1x1 shortcut conv (no expansion at all).
# ---------------------------------------------------------------------------
def _matmul_bn_kernel(x_ref, w_ref, b_ref, o_ref, *, relu):
    out = jnp.dot(x_ref[...], w_ref[...],
                  preferred_element_type=jnp.float32) + b_ref[...]
    if relu:
        out = jnp.maximum(out, 0.0)
    o_ref[...] = out


def matmul_bn(x_mat, w_mat, bn_bias, relu):
    """x: [M, K], w: [K, Cout] (BN scale pre-folded), bias: [Cout].
    Returns [M, Coutp] f32 with Coutp = round_up(Cout, 128)."""
    M, K = x_mat.shape
    Cout = w_mat.shape[1]
    Coutp = _round_up(Cout, 128)
    tm = min(256, _round_up(M, 8))
    Mp = _round_up(M, tm)

    x = jnp.pad(x_mat, ((0, Mp - M), (0, 0))).astype(jnp.bfloat16)
    w = jnp.pad(w_mat, ((0, 0), (0, Coutp - Cout))).astype(jnp.bfloat16)
    b = jnp.pad(bn_bias.reshape(1, Cout),
                ((0, 0), (0, Coutp - Cout))).astype(jnp.float32)

    out = pl.pallas_call(
        functools.partial(_matmul_bn_kernel, relu=relu),
        out_shape=jax.ShapeDtypeStruct((Mp, Coutp), jnp.float32),
        grid=(Mp // tm,),
        in_specs=[
            pl.BlockSpec((tm, K), lambda i: (i, 0)),
            pl.BlockSpec((K, Coutp), lambda i: (0, 0)),
            pl.BlockSpec((1, Coutp), lambda i: (0, 0)),
        ],
        out_specs=pl.BlockSpec((tm, Coutp), lambda i: (i, 0)),
        compiler_params=pltpu.CompilerParams(dimension_semantics=("parallel",)),
    )(x, w, b)
    return out[:M]


# ---------------------------------------------------------------------------
# JAX glue
# ---------------------------------------------------------------------------
def bn_fold(gamma, beta, mean, var, eps=1e-5):
    scale = gamma / jnp.sqrt(var + eps)
    bias = beta - mean * scale
    return scale.astype(jnp.float32), bias.astype(jnp.float32)


def _im2col_3x3x3(x_ndhwc, stride):
    """im2col for the strided 3x3x3 conv only (pad 1)."""
    N, D, H, W, C = x_ndhwc.shape
    Do = (D - 1) // stride + 1
    Ho = (H - 1) // stride + 1
    Wo = (W - 1) // stride + 1
    xp = jnp.pad(x_ndhwc, ((0, 0), (1, 1), (1, 1), (1, 1), (0, 0)))
    cols = []
    for kd in range(3):
        for kh in range(3):
            for kw in range(3):
                cols.append(xp[:, kd:kd + stride * (Do - 1) + 1:stride,
                               kh:kh + stride * (Ho - 1) + 1:stride,
                               kw:kw + stride * (Wo - 1) + 1:stride, :])
    patches = jnp.concatenate(cols, axis=-1)
    return patches.reshape(N * Do * Ho * Wo, 27 * C), (Do, Ho, Wo)


@functools.partial(jax.jit, static_argnames=("stride",))
def residual_unit3d(x_ncdhw, params, stride):
    """ResidualUnit3d forward (inference-mode BatchNorm), Pallas-backed."""
    x = jnp.transpose(x_ncdhw, (0, 2, 3, 4, 1)).astype(jnp.float32)  # NDHWC
    N, D, H, W, Cin = x.shape
    Cout = params["w1"].shape[0]
    Coutp = _round_up(Cout, 128)

    s1, b1 = bn_fold(params["bn1_gamma"], params["bn1_beta"],
                     params["bn1_mean"], params["bn1_var"])
    s2, b2 = bn_fold(params["bn2_gamma"], params["bn2_beta"],
                     params["bn2_mean"], params["bn2_var"])

    # ---- left branch: conv1 (3x3x3, stride) + BN1 + ReLU --------------------
    if stride == 1:
        y1 = conv3x3x3_bn(x, params["w1"], s1, b1, residual=None, relu=True)
        Do, Ho, Wo = D, H, W
    else:
        p1, (Do, Ho, Wo) = _im2col_3x3x3(x, stride)
        w1m = jnp.transpose(params["w1"], (2, 3, 4, 1, 0)).reshape(27 * Cin, Cout)
        w1m = w1m * s1.reshape(1, Cout)
        y1 = matmul_bn(p1, w1m, b1, relu=True)            # [M1, Coutp]
        y1 = y1[:, :Cout].reshape(N, Do, Ho, Wo, Cout)

    M1 = N * Do * Ho * Wo
    Wb = _round_up(Wo, 8)

    # ---- shortcut branch ----------------------------------------------------
    if stride != 1 or Cin != Cout:
        ss, bs = bn_fold(params["bns_gamma"], params["bns_beta"],
                         params["bns_mean"], params["bns_var"])
        x_sub = x[:, ::stride, ::stride, ::stride, :].reshape(M1, Cin)
        wsm = params["ws"].reshape(Cout, Cin).T * ss.reshape(1, Cout)
        short = matmul_bn(x_sub, wsm, bs, relu=False)      # [M1, Coutp]
        short = short.reshape(N, Do, Ho, Wo, Coutp)
    else:
        short = jnp.pad(x, ((0, 0),) * 4 + ((0, Coutp - Cout),))
    # Residual in the layout the fused conv2 kernel expects: [N, Do*Ho*Wb, Coutp]
    short = jnp.pad(short, ((0, 0), (0, 0), (0, 0), (0, Wb - Wo), (0, 0)))
    short = short.reshape(N, Do * Ho * Wb, Coutp).astype(jnp.float32)

    # ---- conv2 (3x3x3, stride 1) + BN2, fused residual add + final ReLU -----
    out = conv3x3x3_bn(y1, params["w2"], s2, b2, residual=short, relu=True)
    return jnp.transpose(out, (0, 4, 1, 2, 3))             # back to NCDHW


# ---------------------------------------------------------------------------
# Pure-JAX f32 reference (for correctness check)
# ---------------------------------------------------------------------------
def _conv3d_ref(x_ndhwc, w_oidhw, stride, pad):
    w = jnp.transpose(w_oidhw, (2, 3, 4, 1, 0))  # DHWIO
    return lax.conv_general_dilated(
        x_ndhwc, w, window_strides=(stride,) * 3, padding=[(pad, pad)] * 3,
        dimension_numbers=("NDHWC", "DHWIO", "NDHWC"),
        precision=lax.Precision.HIGHEST)


def _bn_ref(y, gamma, beta, mean, var, eps=1e-5):
    return (y - mean) / jnp.sqrt(var + eps) * gamma + beta


def residual_unit3d_ref(x_ncdhw, params, stride):
    x = jnp.transpose(x_ncdhw, (0, 2, 3, 4, 1)).astype(jnp.float32)
    Cin = x.shape[-1]
    Cout = params["w1"].shape[0]
    y = _conv3d_ref(x, params["w1"], stride, 1)
    y = jnp.maximum(_bn_ref(y, params["bn1_gamma"], params["bn1_beta"],
                            params["bn1_mean"], params["bn1_var"]), 0.0)
    y = _conv3d_ref(y, params["w2"], 1, 1)
    y = _bn_ref(y, params["bn2_gamma"], params["bn2_beta"],
                params["bn2_mean"], params["bn2_var"])
    if stride != 1 or Cin != Cout:
        sc = _conv3d_ref(x, params["ws"], stride, 0)
        sc = _bn_ref(sc, params["bns_gamma"], params["bns_beta"],
                     params["bns_mean"], params["bns_var"])
    else:
        sc = x
    out = jnp.maximum(y + sc, 0.0)
    return jnp.transpose(out, (0, 4, 1, 2, 3))


# ---------------------------------------------------------------------------
# Deterministic parameter init
# ---------------------------------------------------------------------------
def make_params(key, cin, cout):
    ks = jax.random.split(key, 16)

    def bn(k0, k1, k2, k3, c):
        return (0.5 + jax.random.uniform(k0, (c,)),            # gamma
                0.1 * jax.random.normal(k1, (c,)),              # beta
                0.1 * jax.random.normal(k2, (c,)),              # running_mean
                0.5 + jax.random.uniform(k3, (c,)))             # running_var

    g1, b1, m1, v1 = bn(ks[0], ks[1], ks[2], ks[3], cout)
    g2, b2, m2, v2 = bn(ks[4], ks[5], ks[6], ks[7], cout)
    gs, bs, ms, vs = bn(ks[8], ks[9], ks[10], ks[11], cout)
    return dict(
        w1=0.1 * jax.random.normal(ks[12], (cout, cin, 3, 3, 3), jnp.float32),
        w2=0.1 * jax.random.normal(ks[13], (cout, cout, 3, 3, 3), jnp.float32),
        ws=0.1 * jax.random.normal(ks[14], (cout, cin, 1, 1, 1), jnp.float32),
        bn1_gamma=g1, bn1_beta=b1, bn1_mean=m1, bn1_var=v1,
        bn2_gamma=g2, bn2_beta=b2, bn2_mean=m2, bn2_var=v2,
        bns_gamma=gs, bns_beta=bs, bns_mean=ms, bns_var=vs,
    )


if __name__ == "__main__":
    key = jax.random.PRNGKey(0)
    k_x, k_p = jax.random.split(key)

    N, Cin, Cout, S, stride = 2, 4, 8, 8, 2
    x = jax.random.normal(k_x, (N, Cin, S, S, S), jnp.float32)   # NCDHW
    params = make_params(k_p, Cin, Cout)

    out = jax.block_until_ready(residual_unit3d(x, params, stride=stride))
    ref = jax.block_until_ready(residual_unit3d_ref(x, params, stride))

    assert out.shape == ref.shape == (N, Cout, S // stride, S // stride, S // stride)
    # bf16 MXU inputs (f32 accumulate) -> slightly looser tolerance than f32.
    assert jnp.allclose(out, ref, rtol=2e-2, atol=2e-2), (
        float(jnp.max(jnp.abs(out - ref))))

    print("KERNEL_OK")
</pallas_src>

<mosaic_0001>
module attributes {stable_mosaic.version = 11 : i64} {
  func.func @_matmul_bn_kernel(%arg0: i32, %arg1: memref<128x4xbf16, #tpu.memory_space<vmem>>, %arg2: memref<4x128xbf16, #tpu.memory_space<vmem>>, %arg3: memref<1x128xf32, #tpu.memory_space<vmem>>, %arg4: memref<128x128xf32, #tpu.memory_space<vmem>>) attributes {dimension_semantics = [#tpu.dimension_semantics<parallel>], iteration_bounds = array<i64: 1>, scalar_prefetch = 0 : i64, scratch_operands = 0 : i64, tpu.core_type = #tpu.core_type<tc>, window_params = [{transform_indices = @transform_0, window_bounds = array<i64: 128, 4>}, {pipeline_mode = #tpu.pipeline_mode<synchronous>, transform_indices = @transform_1, window_bounds = array<i64: 4, 128>}, {pipeline_mode = #tpu.pipeline_mode<synchronous>, transform_indices = @transform_2, window_bounds = array<i64: 1, 128>}, {transform_indices = @transform_3, window_bounds = array<i64: 128, 128>}]} {
    %c0 = arith.constant 0 : index
    %c0_0 = arith.constant 0 : index
    %0 = vector.load %arg1[%c0, %c0_0] : memref<128x4xbf16, #tpu.memory_space<vmem>>, vector<128x4xbf16>
    %c0_1 = arith.constant 0 : index
    %c0_2 = arith.constant 0 : index
    %1 = vector.load %arg2[%c0_1, %c0_2] : memref<4x128xbf16, #tpu.memory_space<vmem>>, vector<4x128xbf16>
    %cst = arith.constant dense<0.000000e+00> : vector<128x128xf32>
    %2 = tpu.matmul %0, %1, %cst {dimension_numbers = #tpu.dot_dimension_numbers<[1], [0], [0], [1], [0, 0, 1, 1], [], []>} : vector<128x4xbf16>, vector<4x128xbf16>, vector<128x128xf32> -> vector<128x128xf32>
    %c0_3 = arith.constant 0 : index
    %c0_4 = arith.constant 0 : index
    %3 = vector.load %arg3[%c0_3, %c0_4] : memref<1x128xf32, #tpu.memory_space<vmem>>, vector<1x128xf32>
    %4 = vector.broadcast %3 : vector<1x128xf32> to vector<128x128xf32>
    %5 = arith.addf %2, %4 : vector<128x128xf32>
    %c0_5 = arith.constant 0 : index
    %c0_6 = arith.constant 0 : index
    %6 = vector.load %arg4[%c0_5, %c0_6] : memref<128x128xf32, #tpu.memory_space<vmem>>, vector<128x128xf32>
    tpu.vector_store %arg4[%c0_5, %c0_6], %5 {strides = array<i32>} : memref<128x128xf32, #tpu.memory_space<vmem>>, vector<128x128xf32>,
    return
  }
  func.func @transform_0(%arg0: i32) -> (i32, i32) {
    %c0_i32 = arith.constant 0 : i32
    %c0_i32_0 = arith.constant 0 : i32
    return %arg0, %c0_i32 : i32, i32
  }
  func.func @transform_1(%arg0: i32) -> (i32, i32) {
    %c0_i32 = arith.constant 0 : i32
    %c0_i32_0 = arith.constant 0 : i32
    %c0_i32_1 = arith.constant 0 : i32
    return %c0_i32, %c0_i32_0 : i32, i32
  }
  func.func @transform_2(%arg0: i32) -> (i32, i32) {
    %c0_i32 = arith.constant 0 : i32
    %c0_i32_0 = arith.constant 0 : i32
    %c0_i32_1 = arith.constant 0 : i32
    return %c0_i32, %c0_i32_0 : i32, i32
  }
  func.func @transform_3(%arg0: i32) -> (i32, i32) {
    %c0_i32 = arith.constant 0 : i32
    %c0_i32_0 = arith.constant 0 : i32
    return %arg0, %c0_i32 : i32, i32
  }
}

module attributes {stable_mosaic.version = 11 : i64} {
  func.func @_matmul_bn_kernel(%arg0: i32, %arg1: memref<128x108xbf16, #tpu.memory_space<vmem>>, %arg2: memref<108x128xbf16, #tpu.memory_space<vmem>>, %arg3: memref<1x128xf32, #tpu.memory_space<vmem>>, %arg4: memref<128x128xf32, #tpu.memory_space<vmem>>) attributes {dimension_semantics = [#tpu.dimension_semantics<parallel>], iteration_bounds = array<i64: 1>, scalar_prefetch = 0 : i64, scratch_operands = 0 : i64, tpu.core_type = #tpu.core_type<tc>, window_params = [{transform_indices = @transform_0, window_bounds = array<i64: 128, 108>}, {pipeline_mode = #tpu.pipeline_mode<synchronous>, transform_indices = @transform_1, window_bounds = array<i64: 108, 128>}, {pipeline_mode = #tpu.pipeline_mode<synchronous>, transform_indices = @transform_2, window_bounds = array<i64: 1, 128>}, {transform_indices = @transform_3, window_bounds = array<i64: 128, 128>}]} {
    %c0 = arith.constant 0 : index
    %c0_0 = arith.constant 0 : index
    %0 = vector.load %arg1[%c0, %c0_0] : memref<128x108xbf16, #tpu.memory_space<vmem>>, vector<128x108xbf16>
    %c0_1 = arith.constant 0 : index
    %c0_2 = arith.constant 0 : index
    %1 = vector.load %arg2[%c0_1, %c0_2] : memref<108x128xbf16, #tpu.memory_space<vmem>>, vector<108x128xbf16>
    %cst = arith.constant dense<0.000000e+00> : vector<128x128xf32>
    %2 = tpu.matmul %0, %1, %cst {dimension_numbers = #tpu.dot_dimension_numbers<[1], [0], [0], [1], [0, 0, 1, 1], [], []>} : vector<128x108xbf16>, vector<108x128xbf16>, vector<128x128xf32> -> vector<128x128xf32>
    %c0_3 = arith.constant 0 : index
    %c0_4 = arith.constant 0 : index
    %3 = vector.load %arg3[%c0_3, %c0_4] : memref<1x128xf32, #tpu.memory_space<vmem>>, vector<1x128xf32>
    %4 = vector.broadcast %3 : vector<1x128xf32> to vector<128x128xf32>
    %5 = arith.addf %2, %4 : vector<128x128xf32>
    %cst_5 = arith.constant 0.000000e+00 : f32
    %6 = vector.broadcast %cst_5 : f32 to vector<128x128xf32>
    %7 = arith.maximumf %5, %6 : vector<128x128xf32>
    %c0_6 = arith.constant 0 : index
    %c0_7 = arith.constant 0 : index
    %8 = vector.load %arg4[%c0_6, %c0_7] : memref<128x128xf32, #tpu.memory_space<vmem>>, vector<128x128xf32>
    tpu.vector_store %arg4[%c0_6, %c0_7], %7 {strides = array<i32>} : memref<128x128xf32, #tpu.memory_space<vmem>>, vector<128x128xf32>,
    return
  }
  func.func @transform_0(%arg0: i32) -> (i32, i32) {
    %c0_i32 = arith.constant 0 : i32
    %c0_i32_0 = arith.constant 0 : i32
    return %arg0, %c0_i32 : i32, i32
  }
  func.func @transform_1(%arg0: i32) -> (i32, i32) {
    %c0_i32 = arith.constant 0 : i32
    %c0_i32_0 = arith.constant 0 : i32
    %c0_i32_1 = arith.constant 0 : i32
    return %c0_i32, %c0_i32_0 : i32, i32
  }
  func.func @transform_2(%arg0: i32) -> (i32, i32) {
    %c0_i32 = arith.constant 0 : i32
    %c0_i32_0 = arith.constant 0 : i32
    %c0_i32_1 = arith.constant 0 : i32
    return %c0_i32, %c0_i32_0 : i32, i32
  }
  func.func @transform_3(%arg0: i32) -> (i32, i32) {
    %c0_i32 = arith.constant 0 : i32
    %c0_i32_0 = arith.constant 0 : i32
    return %arg0, %c0_i32 : i32, i32
  }
}

module attributes {stable_mosaic.version = 11 : i64} {
  func.func @_conv3x3x3_kernel(%arg0: i32, %arg1: i32, %arg2: memref<1x6x6x10x8xbf16, #tpu.memory_space<vmem>>, %arg3: memref<27x8x128xbf16, #tpu.memory_space<vmem>>, %arg4: memref<1x128xf32, #tpu.memory_space<vmem>>, %arg5: memref<1x128x128xf32, #tpu.memory_space<vmem>>, %arg6: memref<1x128x128xf32, #tpu.memory_space<vmem>>, %arg7: memref<128x128xf32, #tpu.memory_space<vmem>>) attributes {dimension_semantics = [#tpu.dimension_semantics<parallel>, #tpu.dimension_semantics<arbitrary>], iteration_bounds = array<i64: 2, 1>, scalar_prefetch = 0 : i64, scratch_operands = 1 : i64, tpu.core_type = #tpu.core_type<tc>, window_params = [{transform_indices = @transform_0, window_bounds = array<i64: 1, 6, 6, 10, 8>}, {pipeline_mode = #tpu.pipeline_mode<synchronous>, transform_indices = @transform_1, window_bounds = array<i64: 27, 8, 128>}, {pipeline_mode = #tpu.pipeline_mode<synchronous>, transform_indices = @transform_2, window_bounds = array<i64: 1, 128>}, {transform_indices = @transform_3, window_bounds = array<i64: 1, 128, 128>}, {transform_indices = @transform_4, window_bounds = array<i64: 1, 128, 128>}]} {
    %c4_i32 = arith.constant 4 : i32
    %0 = arith.muli %arg1, %c4_i32 : i32
    %cst = arith.constant 0.000000e+00 : f32
    %1 = vector.broadcast %cst : f32 to vector<128x128xf32>
    %c0 = arith.constant 0 : index
    %c0_0 = arith.constant 0 : index
    %2 = vector.load %arg7[%c0, %c0_0] : memref<128x128xf32, #tpu.memory_space<vmem>>, vector<128x128xf32>
    tpu.vector_store %arg7[%c0, %c0_0], %1 {strides = array<i32>} : memref<128x128xf32, #tpu.memory_space<vmem>>, vector<128x128xf32>,
    %c0_i32 = arith.constant 0 : i32
    %3 = arith.addi %0, %c0_i32 : i32
    %c0_1 = arith.constant 0 : index
    %4 = arith.index_cast %3 : i32 to index
    %c0_2 = arith.constant 0 : index
    %c0_3 = arith.constant 0 : index
    %c0_4 = arith.constant 0 : index
    %5 = vector.load %arg2[%c0_1, %4, %c0_2, %c0_3, %c0_4] : memref<1x6x6x10x8xbf16, #tpu.memory_space<vmem>>, vector<1x4x4x8x8xbf16>
    %6 = vector.shape_cast %5 : vector<1x4x4x8x8xbf16> to vector<4x4x8x8xbf16>
    %7 = vector.shape_cast %6 : vector<4x4x8x8xbf16> to vector<128x8xbf16>
    %c0_5 = arith.constant 0 : index
    %c0_6 = arith.constant 0 : index
    %8 = vector.load %arg7[%c0_5, %c0_6] : memref<128x128xf32, #tpu.memory_space<vmem>>, vector<128x128xf32>
    %c0_7 = arith.constant 0 : index
    %c0_8 = arith.constant 0 : index
    %c0_9 = arith.constant 0 : index
    %9 = vector.load %arg3[%c0_7, %c0_8, %c0_9] : memref<27x8x128xbf16, #tpu.memory_space<vmem>>, vector<1x8x128xbf16>
    %10 = vector.shape_cast %9 : vector<1x8x128xbf16> to vector<8x128xbf16>
    %cst_10 = arith.constant dense<0.000000e+00> : vector<128x128xf32>
    %11 = tpu.matmul %7, %10, %cst_10 {dimension_numbers = #tpu.dot_dimension_numbers<[1], [0], [0], [1], [0, 0, 1, 1], [], []>} : vector<128x8xbf16>, vector<8x128xbf16>, vector<128x128xf32> -> vector<128x128xf32>
    %12 = arith.addf %8, %11 : vector<128x128xf32>
    %c0_11 = arith.constant 0 : index
    %c0_12 = arith.constant 0 : index
    %13 = vector.load %arg7[%c0_11, %c0_12] : memref<128x128xf32, #tpu.memory_space<vmem>>, vector<128x128xf32>
    tpu.vector_store %arg7[%c0_11, %c0_12], %12 {strides = array<i32>} : memref<128x128xf32, #tpu.memory_space<vmem>>, vector<128x128xf32>,
    %c0_i32_13 = arith.constant 0 : i32
    %14 = arith.addi %0, %c0_i32_13 : i32
    %c0_14 = arith.constant 0 : index
    %15 = arith.index_cast %14 : i32 to index
    %c0_15 = arith.constant 0 : index
    %c1 = arith.constant 1 : index
    %c0_16 = arith.constant 0 : index
    %16 = vector.load %arg2[%c0_14, %15, %c0_15, %c1, %c0_16] : memref<1x6x6x10x8xbf16, #tpu.memory_space<vmem>>, vector<1x4x4x8x8xbf16>
    %17 = vector.shape_cast %16 : vector<1x4x4x8x8xbf16> to vector<4x4x8x8xbf16>
    %18 = vector.shape_cast %17 : vector<4x4x8x8xbf16> to vector<128x8xbf16>
    %c0_17 = arith.constant 0 : index
    %c0_18 = arith.constant 0 : index
    %19 = vector.load %arg7[%c0_17, %c0_18] : memref<128x128xf32, #tpu.memory_space<vmem>>, vector<128x128xf32>
    %c1_19 = arith.constant 1 : index
    %c0_20 = arith.constant 0 : index
    %c0_21 = arith.constant 0 : index
    %20 = vector.load %arg3[%c1_19, %c0_20, %c0_21] : memref<27x8x128xbf16, #tpu.memory_space<vmem>>, vector<1x8x128xbf16>
    %21 = vector.shape_cast %20 : vector<1x8x128xbf16> to vector<8x128xbf16>
    %cst_22 = arith.constant dense<0.000000e+00> : vector<128x128xf32>
    %22 = tpu.matmul %18, %21, %cst_22 {dimension_numbers = #tpu.dot_dimension_numbers<[1], [0], [0], [1], [0, 0, 1, 1], [], []>} : vector<128x8xbf16>, vector<8x128xbf16>, vector<128x128xf32> -> vector<128x128xf32>
    %23 = arith.addf %19, %22 : vector<128x128xf32>
    %c0_23 = arith.constant 0 : index
    %c0_24 = arith.constant 0 : index
    %24 = vector.load %arg7[%c0_23, %c0_24] : memref<128x128xf32, #tpu.memory_space<vmem>>, vector<128x128xf32>
    tpu.vector_store %arg7[%c0_23, %c0_24], %23 {strides = array<i32>} : memref<128x128xf32, #tpu.memory_space<vmem>>, vector<128x128xf32>,
    %c0_i32_25 = arith.constant 0 : i32
    %25 = arith.addi %0, %c0_i32_25 : i32
    %c0_26 = arith.constant 0 : index
    %26 = arith.index_cast %25 : i32 to index
    %c0_27 = arith.constant 0 : index
    %c2 = arith.constant 2 : index
    %c0_28 = arith.constant 0 : index
    %27 = vector.load %arg2[%c0_26, %26, %c0_27, %c2, %c0_28] : memref<1x6x6x10x8xbf16, #tpu.memory_space<vmem>>, vector<1x4x4x8x8xbf16>
    %28 = vector.shape_cast %27 : vector<1x4x4x8x8xbf16> to vector<4x4x8x8xbf16>
    %29 = vector.shape_cast %28 : vector<4x4x8x8xbf16> to vector<128x8xbf16>
    %c0_29 = arith.constant 0 : index
    %c0_30 = arith.constant 0 : index
    %30 = vector.load %arg7[%c0_29, %c0_30] : memref<128x128xf32, #tpu.memory_space<vmem>>, vector<128x128xf32>
    %c2_31 = arith.constant 2 : index
    %c0_32 = arith.constant 0 : index
    %c0_33 = arith.constant 0 : index
    %31 = vector.load %arg3[%c2_31, %c0_32, %c0_33] : memref<27x8x128xbf16, #tpu.memory_space<vmem>>, vector<1x8x128xbf16>
    %32 = vector.shape_cast %31 : vector<1x8x128xbf16> to vector<8x128xbf16>
    %cst_34 = arith.constant dense<0.000000e+00> : vector<128x128xf32>
    %33 = tpu.matmul %29, %32, %cst_34 {dimension_numbers = #tpu.dot_dimension_numbers<[1], [0], [0], [1], [0, 0, 1, 1], [], []>} : vector<128x8xbf16>, vector<8x128xbf16>, vector<128x128xf32> -> vector<128x128xf32>
    %34 = arith.addf %30, %33 : vector<128x128xf32>
    %c0_35 = arith.constant 0 : index
    %c0_36 = arith.constant 0 : index
    %35 = vector.load %arg7[%c0_35, %c0_36] : memref<128x128xf32, #tpu.memory_space<vmem>>, vector<128x128xf32>
    tpu.vector_store %arg7[%c0_35, %c0_36], %34 {strides = array<i32>} : memref<128x128xf32, #tpu.memory_space<vmem>>, vector<128x128xf32>,
    %c0_i32_37 = arith.constant 0 : i32
    %36 = arith.addi %0, %c0_i32_37 : i32
    %c0_38 = arith.constant 0 : index
    %37 = arith.index_cast %36 : i32 to index
    %c1_39 = arith.constant 1 : index
    %c0_40 = arith.constant 0 : index
    %c0_41 = arith.constant 0 : index
    %38 = vector.load %arg2[%c0_38, %37, %c1_39, %c0_40, %c0_41] : memref<1x6x6x10x8xbf16, #tpu.memory_space<vmem>>, vector<1x4x4x8x8xbf16>
    %39 = vector.shape_cast %38 : vector<1x4x4x8x8xbf16> to vector<4x4x8x8xbf16>
    %40 = vector.shape_cast %39 : vector<4x4x8x8xbf16> to vector<128x8xbf16>
    %c0_42 = arith.constant 0 : index
    %c0_43 = arith.constant 0 : index
    %41 = vector.load %arg7[%c0_42, %c0_43] : memref<128x128xf32, #tpu.memory_space<vmem>>, vector<128x128xf32>
    %c3 = arith.constant 3 : index
    %c0_44 = arith.constant 0 : index
    %c0_45 = arith.constant 0 : index
    %42 = vector.load %arg3[%c3, %c0_44, %c0_45] : memref<27x8x128xbf16, #tpu.memory_space<vmem>>, vector<1x8x128xbf16>
    %43 = vector.shape_cast %42 : vector<1x8x128xbf16> to vector<8x128xbf16>
    %cst_46 = arith.constant dense<0.000000e+00> : vector<128x128xf32>
    %44 = tpu.matmul %40, %43, %cst_46 {dimension_numbers = #tpu.dot_dimension_numbers<[1], [0], [0], [1], [0, 0, 1, 1], [], []>} : vector<128x8xbf16>, vector<8x128xbf16>, vector<128x128xf32> -> vector<128x128xf32>
    %45 = arith.addf %41, %44 : vector<128x128xf32>
    %c0_47 = arith.constant 0 : index
    %c0_48 = arith.constant 0 : index
    %46 = vector.load %arg7[%c0_47, %c0_48] : memref<128x128xf32, #tpu.memory_space<vmem>>, vector<128x128xf32>
    tpu.vector_store %arg7[%c0_47, %c0_48], %45 {strides = array<i32>} : memref<128x128xf32, #tpu.memory_space<vmem>>, vector<128x128xf32>,
    %c0_i32_49 = arith.constant 0 : i32
    %47 = arith.addi %0, %c0_i32_49 : i32
    %c0_50 = arith.constant 0 : index
    %48 = arith.index_cast %47 : i32 to index
    %c1_51 = arith.constant 1 : index
    %c1_52 = arith.constant 1 : index
    %c0_53 = arith.constant 0 : index
    %49 = vector.load %arg2[%c0_50, %48, %c1_51, %c1_52, %c0_53] : memref<1x6x6x10x8xbf16, #tpu.memory_space<vmem>>, vector<1x4x4x8x8xbf16>
    %50 = vector.shape_cast %49 : vector<1x4x4x8x8xbf16> to vector<4x4x8x8xbf16>
    %51 = vector.shape_cast %50 : vector<4x4x8x8xbf16> to vector<128x8xbf16>
    %c0_54 = arith.constant 0 : index
    %c0_55 = arith.constant 0 : index
    %52 = vector.load %arg7[%c0_54, %c0_55] : memref<128x128xf32, #tpu.memory_space<vmem>>, vector<128x128xf32>
    %c4 = arith.constant 4 : index
    %c0_56 = arith.constant 0 : index
    %c0_57 = arith.constant 0 : index
    %53 = vector.load %arg3[%c4, %c0_56, %c0_57] : memref<27x8x128xbf16, #tpu.memory_space<vmem>>, vector<1x8x128xbf16>
    %54 = vector.shape_cast %53 : vector<1x8x128xbf16> to vector<8x128xbf16>
    %cst_58 = arith.constant dense<0.000000e+00> : vector<128x128xf32>
    %55 = tpu.matmul %51, %54, %cst_58 {dimension_numbers = #tpu.dot_dimension_numbers<[1], [0], [0], [1], [0, 0, 1, 1], [], []>} : vector<128x8xbf16>, vector<8x128xbf16>, vector<128x128xf32> -> vector<128x128xf32>
    %56 = arith.addf %52, %55 : vector<128x128xf32>
    %c0_59 = arith.constant 0 : index
    %c0_60 = arith.constant 0 : index
    %57 = vector.load %arg7[%c0_59, %c0_60] : memref<128x128xf32, #tpu.memory_space<vmem>>, vector<128x128xf32>
    tpu.vector_store %arg7[%c0_59, %c0_60], %56 {strides = array<i32>} : memref<128x128xf32, #tpu.memory_space<vmem>>, vector<128x128xf32>,
    %c0_i32_61 = arith.constant 0 : i32
    %58 = arith.addi %0, %c0_i32_61 : i32
    %c0_62 = arith.constant 0 : index
    %59 = arith.index_cast %58 : i32 to index
    %c1_63 = arith.constant 1 : index
    %c2_64 = arith.constant 2 : index
    %c0_65 = arith.constant 0 : index
    %60 = vector.load %arg2[%c0_62, %59, %c1_63, %c2_64, %c0_65] : memref<1x6x6x10x8xbf16, #tpu.memory_space<vmem>>, vector<1x4x4x8x8xbf16>
    %61 = vector.shape_cast %60 : vector<1x4x4x8x8xbf16> to vector<4x4x8x8xbf16>
    %62 = vector.shape_cast %61 : vector<4x4x8x8xbf16> to vector<128x8xbf16>
    %c0_66 = arith.constant 0 : index
    %c0_67 = arith.constant 0 : index
    %63 = vector.load %arg7[%c0_66, %c0_67] : memref<128x128xf32, #tpu.memory_space<vmem>>, vector<128x128xf32>
    %c5 = arith.constant 5 : index
    %c0_68 = arith.constant 0 : index
    %c0_69 = arith.constant 0 : index
    %64 = vector.load %arg3[%c5, %c0_68, %c0_69] : memref<27x8x128xbf16, #tpu.memory_space<vmem>>, vector<1x8x128xbf16>
    %65 = vector.shape_cast %64 : vector<1x8x128xbf16> to vector<8x128xbf16>
    %cst_70 = arith.constant dense<0.000000e+00> : vector<128x128xf32>
    %66 = tpu.matmul %62, %65, %cst_70 {dimension_numbers = #tpu.dot_dimension_numbers<[1], [0], [0], [1], [0, 0, 1, 1], [], []>} : vector<128x8xbf16>, vector<8x128xbf16>, vector<128x128xf32> -> vector<128x128xf32>
    %67 = arith.addf %63, %66 : vector<128x128xf32>
    %c0_71 = arith.constant 0 : index
    %c0_72 = arith.constant 0 : index
    %68 = vector.load %arg7[%c0_71, %c0_72] : memref<128x128xf32, #tpu.memory_space<vmem>>, vector<128x128xf32>
    tpu.vector_store %arg7[%c0_71, %c0_72], %67 {strides = array<i32>} : memref<128x128xf32, #tpu.memory_space<vmem>>, vector<128x128xf32>,
    %c0_i32_73 = arith.constant 0 : i32
    %69 = arith.addi %0, %c0_i32_73 : i32
    %c0_74 = arith.constant 0 : index
    %70 = arith.index_cast %69 : i32 to index
    %c2_75 = arith.constant 2 : index
    %c0_76 = arith.constant 0 : index
    %c0_77 = arith.constant 0 : index
    %71 = vector.load %arg2[%c0_74, %70, %c2_75, %c0_76, %c0_77] : memref<1x6x6x10x8xbf16, #tpu.memory_space<vmem>>, vector<1x4x4x8x8xbf16>
    %72 = vector.shape_cast %71 : vector<1x4x4x8x8xbf16> to vector<4x4x8x8xbf16>
    %73 = vector.shape_cast %72 : vector<4x4x8x8xbf16> to vector<128x8xbf16>
    %c0_78 = arith.constant 0 : index
    %c0_79 = arith.constant 0 : index
    %74 = vector.load %arg7[%c0_78, %c0_79] : memref<128x128xf32, #tpu.memory_space<vmem>>, vector<128x128xf32>
    %c6 = arith.constant 6 : index
    %c0_80 = arith.constant 0 : index
    %c0_81 = arith.constant 0 : index
    %75 = vector.load %arg3[%c6, %c0_80, %c0_81] : memref<27x8x128xbf16, #tpu.memory_space<vmem>>, vector<1x8x128xbf16>
    %76 = vector.shape_cast %75 : vector<1x8x128xbf16> to vector<8x128xbf16>
    %cst_82 = arith.constant dense<0.000000e+00> : vector<128x128xf32>
    %77 = tpu.matmul %73, %76, %cst_82 {dimension_numbers = #tpu.dot_dimension_numbers<[1], [0], [0], [1], [0, 0, 1, 1], [], []>} : vector<128x8xbf16>, vector<8x128xbf16>, vector<128x128xf32> -> vector<128x128xf32>
    %78 = arith.addf %74, %77 : vector<128x128xf32>
    %c0_83 = arith.constant 0 : index
    %c0_84 = arith.constant 0 : index
    %79 = vector.load %arg7[%c0_83, %c0_84] : memref<128x128xf32, #tpu.memory_space<vmem>>, vector<128x128xf32>
    tpu.vector_store %arg7[%c0_83, %c0_84], %78 {strides = array<i32>} : memref<128x128xf32, #tpu.memory_space<vmem>>, vector<128x128xf32>,
    %c0_i32_85 = arith.constant 0 : i32
    %80 = arith.addi %0, %c0_i32_85 : i32
    %c0_86 = arith.constant 0 : index
    %81 = arith.index_cast %80 : i32 to index
    %c2_87 = arith.constant 2 : index
    %c1_88 = arith.constant 1 : index
    %c0_89 = arith.constant 0 : index
    %82 = vector.load %arg2[%c0_86, %81, %c2_87, %c1_88, %c0_89] : memref<1x6x6x10x8xbf16, #tpu.memory_space<vmem>>, vector<1x4x4x8x8xbf16>
    %83 = vector.shape_cast %82 : vector<1x4x4x8x8xbf16> to vector<4x4x8x8xbf16>
    %84 = vector.shape_cast %83 : vector<4x4x8x8xbf16> to vector<128x8xbf16>
    %c0_90 = arith.constant 0 : index
    %c0_91 = arith.constant 0 : index
    %85 = vector.load %arg7[%c0_90, %c0_91] : memref<128x128xf32, #tpu.memory_space<vmem>>, vector<128x128xf32>
    %c7 = arith.constant 7 : index
    %c0_92 = arith.constant 0 : index
    %c0_93 = arith.constant 0 : index
    %86 = vector.load %arg3[%c7, %c0_92, %c0_93] : memref<27x8x128xbf16, #tpu.memory_space<vmem>>, vector<1x8x128xbf16>
    %87 = vector.shape_cast %86 : vector<1x8x128xbf16> to vector<8x128xbf16>
    %cst_94 = arith.constant dense<0.000000e+00> : vector<128x128xf32>
    %88 = tpu.matmul %84, %87, %cst_94 {dimension_numbers = #tpu.dot_dimension_numbers<[1], [0], [0], [1], [0, 0, 1, 1], [], []>} : vector<128x8xbf16>, vector<8x128xbf16>, vector<128x128xf32> -> vector<128x128xf32>
    %89 = arith.addf %85, %88 : vector<128x128xf32>
    %c0_95 = arith.constant 0 : index
    %c0_96 = arith.constant 0 : index
    %90 = vector.load %arg7[%c0_95, %c0_96] : memref<128x128xf32, #tpu.memory_space<vmem>>, vector<128x128xf32>
    tpu.vector_store %arg7[%c0_95, %c0_96], %89 {strides = array<i32>} : memref<128x128xf32, #tpu.memory_space<vmem>>, vector<128x128xf32>,
    %c0_i32_97 = arith.constant 0 : i32
    %91 = arith.addi %0, %c0_i32_97 : i32
    %c0_98 = arith.constant 0 : index
    %92 = arith.index_cast %91 : i32 to index
    %c2_99 = arith.constant 2 : index
    %c2_100 = arith.constant 2 : index
    %c0_101 = arith.constant 0 : index
    %93 = vector.load %arg2[%c0_98, %92, %c2_99, %c2_100, %c0_101] : memref<1x6x6x10x8xbf16, #tpu.memory_space<vmem>>, vector<1x4x4x8x8xbf16>
    %94 = vector.shape_cast %93 : vector<1x4x4x8x8xbf16> to vector<4x4x8x8xbf16>
    %95 = vector.shape_cast %94 : vector<4x4x8x8xbf16> to vector<128x8xbf16>
    %c0_102 = arith.constant 0 : index
    %c0_103 = arith.constant 0 : index
    %96 = vector.load %arg7[%c0_102, %c0_103] : memref<128x128xf32, #tpu.memory_space<vmem>>, vector<128x128xf32>
    %c8 = arith.constant 8 : index
    %c0_104 = arith.constant 0 : index
    %c0_105 = arith.constant 0 : index
    %97 = vector.load %arg3[%c8, %c0_104, %c0_105] : memref<27x8x128xbf16, #tpu.memory_space<vmem>>, vector<1x8x128xbf16>
    %98 = vector.shape_cast %97 : vector<1x8x128xbf16> to vector<8x128xbf16>
    %cst_106 = arith.constant dense<0.000000e+00> : vector<128x128xf32>
    %99 = tpu.matmul %95, %98, %cst_106 {dimension_numbers = #tpu.dot_dimension_numbers<[1], [0], [0], [1], [0, 0, 1, 1], [], []>} : vector<128x8xbf16>, vector<8x128xbf16>, vector<128x128xf32> -> vector<128x128xf32>
    %100 = arith.addf %96, %99 : vector<128x128xf32>
    %c0_107 = arith.constant 0 : index
    %c0_108 = arith.constant 0 : index
    %101 = vector.load %arg7[%c0_107, %c0_108] : memref<128x128xf32, #tpu.memory_space<vmem>>, vector<128x128xf32>
    tpu.vector_store %arg7[%c0_107, %c0_108], %100 {strides = array<i32>} : memref<128x128xf32, #tpu.memory_space<vmem>>, vector<128x128xf32>,
    %c1_i32 = arith.constant 1 : i32
    %102 = arith.addi %0, %c1_i32 : i32
    %c0_109 = arith.constant 0 : index
    %103 = arith.index_cast %102 : i32 to index
    %c0_110 = arith.constant 0 : index
    %c0_111 = arith.constant 0 : index
    %c0_112 = arith.constant 0 : index
    %104 = vector.load %arg2[%c0_109, %103, %c0_110, %c0_111, %c0_112] : memref<1x6x6x10x8xbf16, #tpu.memory_space<vmem>>, vector<1x4x4x8x8xbf16>
    %105 = vector.shape_cast %104 : vector<1x4x4x8x8xbf16> to vector<4x4x8x8xbf16>
    %106 = vector.shape_cast %105 : vector<4x4x8x8xbf16> to vector<128x8xbf16>
    %c0_113 = arith.constant 0 : index
    %c0_114 = arith.constant 0 : index
    %107 = vector.load %arg7[%c0_113, %c0_114] : memref<128x128xf32, #tpu.memory_space<vmem>>, vector<128x128xf32>
    %c9 = arith.constant 9 : index
    %c0_115 = arith.constant 0 : index
    %c0_116 = arith.constant 0 : index
    %108 = vector.load %arg3[%c9, %c0_115, %c0_116] : memref<27x8x128xbf16, #tpu.memory_space<vmem>>, vector<1x8x128xbf16>
    %109 = vector.shape_cast %108 : vector<1x8x128xbf16> to vector<8x128xbf16>
    %cst_117 = arith.constant dense<0.000000e+00> : vector<128x128xf32>
    %110 = tpu.matmul %106, %109, %cst_117 {dimension_numbers = #tpu.dot_dimension_numbers<[1], [0], [0], [1], [0, 0, 1, 1], [], []>} : vector<128x8xbf16>, vector<8x128xbf16>, vector<128x128xf32> -> vector<128x128xf32>
    %111 = arith.addf %107, %110 : vector<128x128xf32>
    %c0_118 = arith.constant 0 : index
    %c0_119 = arith.constant 0 : index
    %112 = vector.load %arg7[%c0_118, %c0_119] : memref<128x128xf32, #tpu.memory_space<vmem>>, vector<128x128xf32>
    tpu.vector_store %arg7[%c0_118, %c0_119], %111 {strides = array<i32>} : memref<128x128xf32, #tpu.memory_space<vmem>>, vector<128x128xf32>,
    %c1_i32_120 = arith.constant 1 : i32
    %113 = arith.addi %0, %c1_i32_120 : i32
    %c0_121 = arith.constant 0 : index
    %114 = arith.index_cast %113 : i32 to index
    %c0_122 = arith.constant 0 : index
    %c1_123 = arith.constant 1 : index
    %c0_124 = arith.constant 0 : index
    %115 = vector.load %arg2[%c0_121, %114, %c0_122, %c1_123, %c0_124] : memref<1x6x6x10x8xbf16, #tpu.memory_space<vmem>>, vector<1x4x4x8x8xbf16>
    %116 = vector.shape_cast %115 : vector<1x4x4x8x8xbf16> to vector<4x4x8x8xbf16>
    %117 = vector.shape_cast %116 : vector<4x4x8x8xbf16> to vector<128x8xbf16>
    %c0_125 = arith.constant 0 : index
    %c0_126 = arith.constant 0 : index
    %118 = vector.load %arg7[%c0_125, %c0_126] : memref<128x128xf32, #tpu.memory_space<vmem>>, vector<128x128xf32>
    %c10 = arith.constant 10 : index
    %c0_127 = arith.constant 0 : index
    %c0_128 = arith.constant 0 : index
    %119 = vector.load %arg3[%c10, %c0_127, %c0_128] : memref<27x8x128xbf16, #tpu.memory_space<vmem>>, vector<1x8x128xbf16>
    %120 = vector.shape_cast %119 : vector<1x8x128xbf16> to vector<8x128xbf16>
    %cst_129 = arith.constant dense<0.000000e+00> : vector<128x128xf32>
    %121 = tpu.matmul %117, %120, %cst_129 {dimension_numbers = #tpu.dot_dimension_numbers<[1], [0], [0], [1], [0, 0, 1, 1], [], []>} : vector<128x8xbf16>, vector<8x128xbf16>, vector<128x128xf32> -> vector<128x128xf32>
    %122 = arith.addf %118, %121 : vector<128x128xf32>
    %c0_130 = arith.constant 0 : index
    %c0_131 = arith.constant 0 : index
    %123 = vector.load %arg7[%c0_130, %c0_131] : memref<128x128xf32, #tpu.memory_space<vmem>>, vector<128x128xf32>
    tpu.vector_store %arg7[%c0_130, %c0_131], %122 {strides = array<i32>} : memref<128x128xf32, #tpu.memory_space<vmem>>, vector<128x128xf32>,
    %c1_i32_132 = arith.constant 1 : i32
    %124 = arith.addi %0, %c1_i32_132 : i32
    %c0_133 = arith.constant 0 : index
    %125 = arith.index_cast %124 : i32 to index
    %c0_134 = arith.constant 0 : index
    %c2_135 = arith.constant 2 : index
    %c0_136 = arith.constant 0 : index
    %126 = vector.load %arg2[%c0_133, %125, %c0_134, %c2_135, %c0_136] : memref<1x6x6x10x8xbf16, #tpu.memory_space<vmem>>, vector<1x4x4x8x8xbf16>
    %127 = vector.shape_cast %126 : vector<1x4x4x8x8xbf16> to vector<4x4x8x8xbf16>
    %128 = vector.shape_cast %127 : vector<4x4x8x8xbf16> to vector<128x8xbf16>
    %c0_137 = arith.constant 0 : index
    %c0_138 = arith.constant 0 : index
    %129 = vector.load %arg7[%c0_137, %c0_138] : memref<128x128xf32, #tpu.memory_space<vmem>>, vector<128x128xf32>
    %c11 = arith.constant 11 : index
    %c0_139 = arith.constant 0 : index
    %c0_140 = arith.constant 0 : index
    %130 = vector.load %arg3[%c11, %c0_139, %c0_140] : memref<27x8x128xbf16, #tpu.memory_space<vmem>>, vector<1x8x128xbf16>
    %131 = vector.shape_cast %130 : vector<1x8x128xbf16> to vector<8x128xbf16>
    %cst_141 = arith.constant dense<0.000000e+00> : vector<128x128xf32>
    %132 = tpu.matmul %128, %131, %cst_141 {dimension_numbers = #tpu.dot_dimension_numbers<[1], [0], [0], [1], [0, 0, 1, 1], [], []>} : vector<128x8xbf16>, vector<8x128xbf16>, vector<128x128xf32> -> vector<128x128xf32>
    %133 = arith.addf %129, %132 : vector<128x128xf32>
    %c0_142 = arith.constant 0 : index
    %c0_143 = arith.constant 0 : index
    %134 = vector.load %arg7[%c0_142, %c0_143] : memref<128x128xf32, #tpu.memory_space<vmem>>, vector<128x128xf32>
    tpu.vector_store %arg7[%c0_142, %c0_143], %133 {strides = array<i32>} : memref<128x128xf32, #tpu.memory_space<vmem>>, vector<128x128xf32>,
    %c1_i32_144 = arith.constant 1 : i32
    %135 = arith.addi %0, %c1_i32_144 : i32
    %c0_145 = arith.constant 0 : index
    %136 = arith.index_cast %135 : i32 to index
    %c1_146 = arith.constant 1 : index
    %c0_147 = arith.constant 0 : index
    %c0_148 = arith.constant 0 : index
    %137 = vector.load %arg2[%c0_145, %136, %c1_146, %c0_147, %c0_148] : memref<1x6x6x10x8xbf16, #tpu.memory_space<vmem>>, vector<1x4x4x8x8xbf16>
    %138 = vector.shape_cast %137 : vector<1x4x4x8x8xbf16> to vector<4x4x8x8xbf16>
    %139 = vector.shape_cast %138 : vector<4x4x8x8xbf16> to vector<128x8xbf16>
    %c0_149 = arith.constant 0 : index
    %c0_150 = arith.constant 0 : index
    %140 = vector.load %arg7[%c0_149, %c0_150] : memref<128x128xf32, #tpu.memory_space<vmem>>, vector<128x128xf32>
    %c12 = arith.constant 12 : index
    %c0_151 = arith.constant 0 : index
    %c0_152 = arith.constant 0 : index
    %141 = vector.load %arg3[%c12, %c0_151, %c0_152] : memref<27x8x128xbf16, #tpu.memory_space<vmem>>, vector<1x8x128xbf16>
    %142 = vector.shape_cast %141 : vector<1x8x128xbf16> to vector<8x128xbf16>
    %cst_153 = arith.constant dense<0.000000e+00> : vector<128x128xf32>
    %143 = tpu.matmul %139, %142, %cst_153 {dimension_numbers = #tpu.dot_dimension_numbers<[1], [0], [0], [1], [0, 0, 1, 1], [], []>} : vector<128x8xbf16>, vector<8x128xbf16>, vector<128x128xf32> -> vector<128x128xf32>
    %144 = arith.addf %140, %143 : vector<128x128xf32>
    %c0_154 = arith.constant 0 : index
    %c0_155 = arith.constant 0 : index
    %145 = vector.load %arg7[%c0_154, %c0_155] : memref<128x128xf32, #tpu.memory_space<vmem>>, vector<128x128xf32>
    tpu.vector_store %arg7[%c0_154, %c0_155], %144 {strides = array<i32>} : memref<128x128xf32, #tpu.memory_space<vmem>>, vector<128x128xf32>,
    %c1_i32_156 = arith.constant 1 : i32
    %146 = arith.addi %0, %c1_i32_156 : i32
    %c0_157 = arith.constant 0 : index
    %147 = arith.index_cast %146 : i32 to index
    %c1_158 = arith.constant 1 : index
    %c1_159 = arith.constant 1 : index
    %c0_160 = arith.constant 0 : index
    %148 = vector.load %arg2[%c0_157, %147, %c1_158, %c1_159, %c0_160] : memref<1x6x6x10x8xbf16, #tpu.memory_space<vmem>>, vector<1x4x4x8x8xbf16>
    %149 = vector.shape_cast %148 : vector<1x4x4x8x8xbf16> to vector<4x4x8x8xbf16>
    %150 = vector.shape_cast %149 : vector<4x4x8x8xbf16> to vector<128x8xbf16>
    %c0_161 = arith.constant 0 : index
    %c0_162 = arith.constant 0 : index
    %151 = vector.load %arg7[%c0_161, %c0_162] : memref<128x128xf32, #tpu.memory_space<vmem>>, vector<128x128xf32>
    %c13 = arith.constant 13 : index
    %c0_163 = arith.constant 0 : index
    %c0_164 = arith.constant 0 : index
    %152 = vector.load %arg3[%c13, %c0_163, %c0_164] : memref<27x8x128xbf16, #tpu.memory_space<vmem>>, vector<1x8x128xbf16>
    %153 = vector.shape_cast %152 : vector<1x8x128xbf16> to vector<8x128xbf16>
    %cst_165 = arith.constant dense<0.000000e+00> : vector<128x128xf32>
    %154 = tpu.matmul %150, %153, %cst_165 {dimension_numbers = #tpu.dot_dimension_numbers<[1], [0], [0], [1], [0, 0, 1, 1], [], []>} : vector<128x8xbf16>, vector<8x128xbf16>, vector<128x128xf32> -> vector<128x128xf32>
    %155 = arith.addf %151, %154 : vector<128x128xf32>
    %c0_166 = arith.constant 0 : index
    %c0_167 = arith.constant 0 : index
    %156 = vector.load %arg7[%c0_166, %c0_167] : memref<128x128xf32, #tpu.memory_space<vmem>>, vector<128x128xf32>
    tpu.vector_store %arg7[%c0_166, %c0_167], %155 {strides = array<i32>} : memref<128x128xf32, #tpu.memory_space<vmem>>, vector<128x128xf32>,
    %c1_i32_168 = arith.constant 1 : i32
    %157 = arith.addi %0, %c1_i32_168 : i32
    %c0_169 = arith.constant 0 : index
    %158 = arith.index_cast %157 : i32 to index
    %c1_170 = arith.constant 1 : index
    %c2_171 = arith.constant 2 : index
    %c0_172 = arith.constant 0 : index
    %159 = vector.load %arg2[%c0_169, %158, %c1_170, %c2_171, %c0_172] : memref<1x6x6x10x8xbf16, #tpu.memory_space<vmem>>, vector<1x4x4x8x8xbf16>
    %160 = vector.shape_cast %159 : vector<1x4x4x8x8xbf16> to vector<4x4x8x8xbf16>
    %161 = vector.shape_cast %160 : vector<4x4x8x8xbf16> to vector<128x8xbf16>
    %c0_173 = arith.constant 0 : index
    %c0_174 = arith.constant 0 : index
    %162 = vector.load %arg7[%c0_173, %c0_174] : memref<128x128xf32, #tpu.memory_space<vmem>>, vector<128x128xf32>
    %c14 = arith.constant 14 : index
    %c0_175 = arith.constant 0 : index
    %c0_176 = arith.constant 0 : index
    %163 = vector.load %arg3[%c14, %c0_175, %c0_176] : memref<27x8x128xbf16, #tpu.memory_space<vmem>>, vector<1x8x128xbf16>
    %164 = vector.shape_cast %163 : vector<1x8x128xbf16> to vector<8x128xbf16>
    %cst_177 = arith.constant dense<0.000000e+00> : vector<128x128xf32>
    %165 = tpu.matmul %161, %164, %cst_177 {dimension_numbers = #tpu.dot_dimension_numbers<[1], [0], [0], [1], [0, 0, 1, 1], [], []>} : vector<128x8xbf16>, vector<8x128xbf16>, vector<128x128xf32> -> vector<128x128xf32>
    %166 = arith.addf %162, %165 : vector<128x128xf32>
    %c0_178 = arith.constant 0 : index
    %c0_179 = arith.constant 0 : index
    %167 = vector.load %arg7[%c0_178, %c0_179] : memref<128x128xf32, #tpu.memory_space<vmem>>, vector<128x128xf32>
    tpu.vector_store %arg7[%c0_178, %c0_179], %166 {strides = array<i32>} : memref<128x128xf32, #tpu.memory_space<vmem>>, vector<128x128xf32>,
    %c1_i32_180 = arith.constant 1 : i32
    %168 = arith.addi %0, %c1_i32_180 : i32
    %c0_181 = arith.constant 0 : index
    %169 = arith.index_cast %168 : i32 to index
    %c2_182 = arith.constant 2 : index
    %c0_183 = arith.constant 0 : index
    %c0_184 = arith.constant 0 : index
    %170 = vector.load %arg2[%c0_181, %169, %c2_182, %c0_183, %c0_184] : memref<1x6x6x10x8xbf16, #tpu.memory_space<vmem>>, vector<1x4x4x8x8xbf16>
    %171 = vector.shape_cast %170 : vector<1x4x4x8x8xbf16> to vector<4x4x8x8xbf16>
    %172 = vector.shape_cast %171 : vector<4x4x8x8xbf16> to vector<128x8xbf16>
    %c0_185 = arith.constant 0 : index
    %c0_186 = arith.constant 0 : index
    %173 = vector.load %arg7[%c0_185, %c0_186] : memref<128x128xf32, #tpu.memory_space<vmem>>, vector<128x128xf32>
    %c15 = arith.constant 15 : index
    %c0_187 = arith.constant 0 : index
    %c0_188 = arith.constant 0 : index
    %174 = vector.load %arg3[%c15, %c0_187, %c0_188] : memref<27x8x128xbf16, #tpu.memory_space<vmem>>, vector<1x8x128xbf16>
    %175 = vector.shape_cast %174 : vector<1x8x128xbf16> to vector<8x128xbf16>
    %cst_189 = arith.constant dense<0.000000e+00> : vector<128x128xf32>
    %176 = tpu.matmul %172, %175, %cst_189 {dimension_numbers = #tpu.dot_dimension_numbers<[1], [0], [0], [1], [0, 0, 1, 1], [], []>} : vector<128x8xbf16>, vector<8x128xbf16>, vector<128x128xf32> -> vector<128x128xf32>
    %177 = arith.addf %173, %176 : vector<128x128xf32>
    %c0_190 = arith.constant 0 : index
    %c0_191 = arith.constant 0 : index
    %178 = vector.load %arg7[%c0_190, %c0_191] : memref<128x128xf32, #tpu.memory_space<vmem>>, vector<128x128xf32>
    tpu.vector_store %arg7[%c0_190, %c0_191], %177 {strides = array<i32>} : memref<128x128xf32, #tpu.memory_space<vmem>>, vector<128x128xf32>,
    %c1_i32_192 = arith.constant 1 : i32
    %179 = arith.addi %0, %c1_i32_192 : i32
    %c0_193 = arith.constant 0 : index
    %180 = arith.index_cast %179 : i32 to index
    %c2_194 = arith.constant 2 : index
    %c1_195 = arith.constant 1 : index
    %c0_196 = arith.constant 0 : index
    %181 = vector.load %arg2[%c0_193, %180, %c2_194, %c1_195, %c0_196] : memref<1x6x6x10x8xbf16, #tpu.memory_space<vmem>>, vector<1x4x4x8x8xbf16>
    %182 = vector.shape_cast %181 : vector<1x4x4x8x8xbf16> to vector<4x4x8x8xbf16>
    %183 = vector.shape_cast %182 : vector<4x4x8x8xbf16> to vector<128x8xbf16>
    %c0_197 = arith.constant 0 : index
    %c0_198 = arith.constant 0 : index
    %184 = vector.load %arg7[%c0_197, %c0_198] : memref<128x128xf32, #tpu.memory_space<vmem>>, vector<128x128xf32>
    %c16 = arith.constant 16 : index
    %c0_199 = arith.constant 0 : index
    %c0_200 = arith.constant 0 : index
    %185 = vector.load %arg3[%c16, %c0_199, %c0_200] : memref<27x8x128xbf16, #tpu.memory_space<vmem>>, vector<1x8x128xbf16>
    %186 = vector.shape_cast %185 : vector<1x8x128xbf16> to vector<8x128xbf16>
    %cst_201 = arith.constant dense<0.000000e+00> : vector<128x128xf32>
    %187 = tpu.matmul %183, %186, %cst_201 {dimension_numbers = #tpu.dot_dimension_numbers<[1], [0], [0], [1], [0, 0, 1, 1], [], []>} : vector<128x8xbf16>, vector<8x128xbf16>, vector<128x128xf32> -> vector<128x128xf32>
    %188 = arith.addf %184, %187 : vector<128x128xf32>
    %c0_202 = arith.constant 0 : index
    %c0_203 = arith.constant 0 : index
    %189 = vector.load %arg7[%c0_202, %c0_203] : memref<128x128xf32, #tpu.memory_space<vmem>>, vector<128x128xf32>
    tpu.vector_store %arg7[%c0_202, %c0_203], %188 {strides = array<i32>} : memref<128x128xf32, #tpu.memory_space<vmem>>, vector<128x128xf32>,
    %c1_i32_204 = arith.constant 1 : i32
    %190 = arith.addi %0, %c1_i32_204 : i32
    %c0_205 = arith.constant 0 : index
    %191 = arith.index_cast %190 : i32 to index
    %c2_206 = arith.constant 2 : index
    %c2_207 = arith.constant 2 : index
    %c0_208 = arith.constant 0 : index
    %192 = vector.load %arg2[%c0_205, %191, %c2_206, %c2_207, %c0_208] : memref<1x6x6x10x8xbf16, #tpu.memory_space<vmem>>, vector<1x4x4x8x8xbf16>
    %193 = vector.shape_cast %192 : vector<1x4x4x8x8xbf16> to vector<4x4x8x8xbf16>
    %194 = vector.shape_cast %193 : vector<4x4x8x8xbf16> to vector<128x8xbf16>
    %c0_209 = arith.constant 0 : index
    %c0_210 = arith.constant 0 : index
    %195 = vector.load %arg7[%c0_209, %c0_210] : memref<128x128xf32, #tpu.memory_space<vmem>>, vector<128x128xf32>
    %c17 = arith.constant 17 : index
    %c0_211 = arith.constant 0 : index
    %c0_212 = arith.constant 0 : index
    %196 = vector.load %arg3[%c17, %c0_211, %c0_212] : memref<27x8x128xbf16, #tpu.memory_space<vmem>>, vector<1x8x128xbf16>
    %197 = vector.shape_cast %196 : vector<1x8x128xbf16> to vector<8x128xbf16>
    %cst_213 = arith.constant dense<0.000000e+00> : vector<128x128xf32>
    %198 = tpu.matmul %194, %197, %cst_213 {dimension_numbers = #tpu.dot_dimension_numbers<[1], [0], [0], [1], [0, 0, 1, 1], [], []>} : vector<128x8xbf16>, vector<8x128xbf16>, vector<128x128xf32> -> vector<128x128xf32>
    %199 = arith.addf %195, %198 : vector<128x128xf32>
    %c0_214 = arith.constant 0 : index
    %c0_215 = arith.constant 0 : index
    %200 = vector.load %arg7[%c0_214, %c0_215] : memref<128x128xf32, #tpu.memory_space<vmem>>, vector<128x128xf32>
    tpu.vector_store %arg7[%c0_214, %c0_215], %199 {strides = array<i32>} : memref<128x128xf32, #tpu.memory_space<vmem>>, vector<128x128xf32>,
    %c2_i32 = arith.constant 2 : i32
    %201 = arith.addi %0, %c2_i32 : i32
    %c0_216 = arith.constant 0 : index
    %202 = arith.index_cast %201 : i32 to index
    %c0_217 = arith.constant 0 : index
    %c0_218 = arith.constant 0 : index
    %c0_219 = arith.constant 0 : index
    %203 = vector.load %arg2[%c0_216, %202, %c0_217, %c0_218, %c0_219] : memref<1x6x6x10x8xbf16, #tpu.memory_space<vmem>>, vector<1x4x4x8x8xbf16>
    %204 = vector.shape_cast %203 : vector<1x4x4x8x8xbf16> to vector<4x4x8x8xbf16>
    %205 = vector.shape_cast %204 : vector<4x4x8x8xbf16> to vector<128x8xbf16>
    %c0_220 = arith.constant 0 : index
    %c0_221 = arith.constant 0 : index
    %206 = vector.load %arg7[%c0_220, %c0_221] : memref<128x128xf32, #tpu.memory_space<vmem>>, vector<128x128xf32>
    %c18 = arith.constant 18 : index
    %c0_222 = arith.constant 0 : index
    %c0_223 = arith.constant 0 : index
    %207 = vector.load %arg3[%c18, %c0_222, %c0_223] : memref<27x8x128xbf16, #tpu.memory_space<vmem>>, vector<1x8x128xbf16>
    %208 = vector.shape_cast %207 : vector<1x8x128xbf16> to vector<8x128xbf16>
    %cst_224 = arith.constant dense<0.000000e+00> : vector<128x128xf32>
    %209 = tpu.matmul %205, %208, %cst_224 {dimension_numbers = #tpu.dot_dimension_numbers<[1], [0], [0], [1], [0, 0, 1, 1], [], []>} : vector<128x8xbf16>, vector<8x128xbf16>, vector<128x128xf32> -> vector<128x128xf32>
    %210 = arith.addf %206, %209 : vector<128x128xf32>
    %c0_225 = arith.constant 0 : index
    %c0_226 = arith.constant 0 : index
    %211 = vector.load %arg7[%c0_225, %c0_226] : memref<128x128xf32, #tpu.memory_space<vmem>>, vector<128x128xf32>
    tpu.vector_store %arg7[%c0_225, %c0_226], %210 {strides = array<i32>} : memref<128x128xf32, #tpu.memory_space<vmem>>, vector<128x128xf32>,
    %c2_i32_227 = arith.constant 2 : i32
    %212 = arith.addi %0, %c2_i32_227 : i32
    %c0_228 = arith.constant 0 : index
    %213 = arith.index_cast %212 : i32 to index
    %c0_229 = arith.constant 0 : index
    %c1_230 = arith.constant 1 : index
    %c0_231 = arith.constant 0 : index
    %214 = vector.load %arg2[%c0_228, %213, %c0_229, %c1_230, %c0_231] : memref<1x6x6x10x8xbf16, #tpu.memory_space<vmem>>, vector<1x4x4x8x8xbf16>
    %215 = vector.shape_cast %214 : vector<1x4x4x8x8xbf16> to vector<4x4x8x8xbf16>
    %216 = vector.shape_cast %215 : vector<4x4x8x8xbf16> to vector<128x8xbf16>
    %c0_232 = arith.constant 0 : index
    %c0_233 = arith.constant 0 : index
    %217 = vector.load %arg7[%c0_232, %c0_233] : memref<128x128xf32, #tpu.memory_space<vmem>>, vector<128x128xf32>
    %c19 = arith.constant 19 : index
    %c0_234 = arith.constant 0 : index
    %c0_235 = arith.constant 0 : index
    %218 = vector.load %arg3[%c19, %c0_234, %c0_235] : memref<27x8x128xbf16, #tpu.memory_space<vmem>>, vector<1x8x128xbf16>
    %219 = vector.shape_cast %218 : vector<1x8x128xbf16> to vector<8x128xbf16>
    %cst_236 = arith.constant dense<0.000000e+00> : vector<128x128xf32>
    %220 = tpu.matmul %216, %219, %cst_236 {dimension_numbers = #tpu.dot_dimension_numbers<[1], [0], [0], [1], [0, 0, 1, 1], [], []>} : vector<128x8xbf16>, vector<8x128xbf16>, vector<128x128xf32> -> vector<128x128xf32>
    %221 = arith.addf %217, %220 : vector<128x128xf32>
    %c0_237 = arith.constant 0 : index
    %c0_238 = arith.constant 0 : index
    %222 = vector.load %arg7[%c0_237, %c0_238] : memref<128x128xf32, #tpu.memory_space<vmem>>, vector<128x128xf32>
    tpu.vector_store %arg7[%c0_237, %c0_238], %221 {strides = array<i32>} : memref<128x128xf32, #tpu.memory_space<vmem>>, vector<128x128xf32>,
    %c2_i32_239 = arith.constant 2 : i32
    %223 = arith.addi %0, %c2_i32_239 : i32
    %c0_240 = arith.constant 0 : index
    %224 = arith.index_cast %223 : i32 to index
    %c0_241 = arith.constant 0 : index
    %c2_242 = arith.constant 2 : index
    %c0_243 = arith.constant 0 : index
    %225 = vector.load %arg2[%c0_240, %224, %c0_241, %c2_242, %c0_243] : memref<1x6x6x10x8xbf16, #tpu.memory_space<vmem>>, vector<1x4x4x8x8xbf16>
    %226 = vector.shape_cast %225 : vector<1x4x4x8x8xbf16> to vector<4x4x8x8xbf16>
    %227 = vector.shape_cast %226 : vector<4x4x8x8xbf16> to vector<128x8xbf16>
    %c0_244 = arith.constant 0 : index
    %c0_245 = arith.constant 0 : index
    %228 = vector.load %arg7[%c0_244, %c0_245] : memref<128x128xf32, #tpu.memory_space<vmem>>, vector<128x128xf32>
    %c20 = arith.constant 20 : index
    %c0_246 = arith.constant 0 : index
    %c0_247 = arith.constant 0 : index
    %229 = vector.load %arg3[%c20, %c0_246, %c0_247] : memref<27x8x128xbf16, #tpu.memory_space<vmem>>, vector<1x8x128xbf16>
    %230 = vector.shape_cast %229 : vector<1x8x128xbf16> to vector<8x128xbf16>
    %cst_248 = arith.constant dense<0.000000e+00> : vector<128x128xf32>
    %231 = tpu.matmul %227, %230, %cst_248 {dimension_numbers = #tpu.dot_dimension_numbers<[1], [0], [0], [1], [0, 0, 1, 1], [], []>} : vector<128x8xbf16>, vector<8x128xbf16>, vector<128x128xf32> -> vector<128x128xf32>
    %232 = arith.addf %228, %231 : vector<128x128xf32>
    %c0_249 = arith.constant 0 : index
    %c0_250 = arith.constant 0 : index
    %233 = vector.load %arg7[%c0_249, %c0_250] : memref<128x128xf32, #tpu.memory_space<vmem>>, vector<128x128xf32>
    tpu.vector_store %arg7[%c0_249, %c0_250], %232 {strides = array<i32>} : memref<128x128xf32, #tpu.memory_space<vmem>>, vector<128x128xf32>,
    %c2_i32_251 = arith.constant 2 : i32
    %234 = arith.addi %0, %c2_i32_251 : i32
    %c0_252 = arith.constant 0 : index
    %235 = arith.index_cast %234 : i32 to index
    %c1_253 = arith.constant 1 : index
    %c0_254 = arith.constant 0 : index
    %c0_255 = arith.constant 0 : index
    %236 = vector.load %arg2[%c0_252, %235, %c1_253, %c0_254, %c0_255] : memref<1x6x6x10x8xbf16, #tpu.memory_space<vmem>>, vector<1x4x4x8x8xbf16>
    %237 = vector.shape_cast %236 : vector<1x4x4x8x8xbf16> to vector<4x4x8x8xbf16>
    %238 = vector.shape_cast %237 : vector<4x4x8x8xbf16> to vector<128x8xbf16>
    %c0_256 = arith.constant 0 : index
    %c0_257 = arith.constant 0 : index
    %239 = vector.load %arg7[%c0_256, %c0_257] : memref<128x128xf32, #tpu.memory_space<vmem>>, vector<128x128xf32>
    %c21 = arith.constant 21 : index
    %c0_258 = arith.constant 0 : index
    %c0_259 = arith.constant 0 : index
    %240 = vector.load %arg3[%c21, %c0_258, %c0_259] : memref<27x8x128xbf16, #tpu.memory_space<vmem>>, vector<1x8x128xbf16>
    %241 = vector.shape_cast %240 : vector<1x8x128xbf16> to vector<8x128xbf16>
    %cst_260 = arith.constant dense<0.000000e+00> : vector<128x128xf32>
    %242 = tpu.matmul %238, %241, %cst_260 {dimension_numbers = #tpu.dot_dimension_numbers<[1], [0], [0], [1], [0, 0, 1, 1], [], []>} : vector<128x8xbf16>, vector<8x128xbf16>, vector<128x128xf32> -> vector<128x128xf32>
    %243 = arith.addf %239, %242 : vector<128x128xf32>
    %c0_261 = arith.constant 0 : index
    %c0_262 = arith.constant 0 : index
    %244 = vector.load %arg7[%c0_261, %c0_262] : memref<128x128xf32, #tpu.memory_space<vmem>>, vector<128x128xf32>
    tpu.vector_store %arg7[%c0_261, %c0_262], %243 {strides = array<i32>} : memref<128x128xf32, #tpu.memory_space<vmem>>, vector<128x128xf32>,
    %c2_i32_263 = arith.constant 2 : i32
    %245 = arith.addi %0, %c2_i32_263 : i32
    %c0_264 = arith.constant 0 : index
    %246 = arith.index_cast %245 : i32 to index
    %c1_265 = arith.constant 1 : index
    %c1_266 = arith.constant 1 : index
    %c0_267 = arith.constant 0 : index
    %247 = vector.load %arg2[%c0_264, %246, %c1_265, %c1_266, %c0_267] : memref<1x6x6x10x8xbf16, #tpu.memory_space<vmem>>, vector<1x4x4x8x8xbf16>
    %248 = vector.shape_cast %247 : vector<1x4x4x8x8xbf16> to vector<4x4x8x8xbf16>
    %249 = vector.shape_cast %248 : vector<4x4x8x8xbf16> to vector<128x8xbf16>
    %c0_268 = arith.constant 0 : index
    %c0_269 = arith.constant 0 : index
    %250 = vector.load %arg7[%c0_268, %c0_269] : memref<128x128xf32, #tpu.memory_space<vmem>>, vector<128x128xf32>
    %c22 = arith.constant 22 : index
    %c0_270 = arith.constant 0 : index
    %c0_271 = arith.constant 0 : index
    %251 = vector.load %arg3[%c22, %c0_270, %c0_271] : memref<27x8x128xbf16, #tpu.memory_space<vmem>>, vector<1x8x128xbf16>
    %252 = vector.shape_cast %251 : vector<1x8x128xbf16> to vector<8x128xbf16>
    %cst_272 = arith.constant dense<0.000000e+00> : vector<128x128xf32>
    %253 = tpu.matmul %249, %252, %cst_272 {dimension_numbers = #tpu.dot_dimension_numbers<[1], [0], [0], [1], [0, 0, 1, 1], [], []>} : vector<128x8xbf16>, vector<8x128xbf16>, vector<128x128xf32> -> vector<128x128xf32>
    %254 = arith.addf %250, %253 : vector<128x128xf32>
    %c0_273 = arith.constant 0 : index
    %c0_274 = arith.constant 0 : index
    %255 = vector.load %arg7[%c0_273, %c0_274] : memref<128x128xf32, #tpu.memory_space<vmem>>, vector<128x128xf32>
    tpu.vector_store %arg7[%c0_273, %c0_274], %254 {strides = array<i32>} : memref<128x128xf32, #tpu.memory_space<vmem>>, vector<128x128xf32>,
    %c2_i32_275 = arith.constant 2 : i32
    %256 = arith.addi %0, %c2_i32_275 : i32
    %c0_276 = arith.constant 0 : index
    %257 = arith.index_cast %256 : i32 to index
    %c1_277 = arith.constant 1 : index
    %c2_278 = arith.constant 2 : index
    %c0_279 = arith.constant 0 : index
    %258 = vector.load %arg2[%c0_276, %257, %c1_277, %c2_278, %c0_279] : memref<1x6x6x10x8xbf16, #tpu.memory_space<vmem>>, vector<1x4x4x8x8xbf16>
    %259 = vector.shape_cast %258 : vector<1x4x4x8x8xbf16> to vector<4x4x8x8xbf16>
    %260 = vector.shape_cast %259 : vector<4x4x8x8xbf16> to vector<128x8xbf16>
    %c0_280 = arith.constant 0 : index
    %c0_281 = arith.constant 0 : index
    %261 = vector.load %arg7[%c0_280, %c0_281] : memref<128x128xf32, #tpu.memory_space<vmem>>, vector<128x128xf32>
    %c23 = arith.constant 23 : index
    %c0_282 = arith.constant 0 : index
    %c0_283 = arith.constant 0 : index
    %262 = vector.load %arg3[%c23, %c0_282, %c0_283] : memref<27x8x128xbf16, #tpu.memory_space<vmem>>, vector<1x8x128xbf16>
    %263 = vector.shape_cast %262 : vector<1x8x128xbf16> to vector<8x128xbf16>
    %cst_284 = arith.constant dense<0.000000e+00> : vector<128x128xf32>
    %264 = tpu.matmul %260, %263, %cst_284 {dimension_numbers = #tpu.dot_dimension_numbers<[1], [0], [0], [1], [0, 0, 1, 1], [], []>} : vector<128x8xbf16>, vector<8x128xbf16>, vector<128x128xf32> -> vector<128x128xf32>
    %265 = arith.addf %261, %264 : vector<128x128xf32>
    %c0_285 = arith.constant 0 : index
    %c0_286 = arith.constant 0 : index
    %266 = vector.load %arg7[%c0_285, %c0_286] : memref<128x128xf32, #tpu.memory_space<vmem>>, vector<128x128xf32>
    tpu.vector_store %arg7[%c0_285, %c0_286], %265 {strides = array<i32>} : memref<128x128xf32, #tpu.memory_space<vmem>>, vector<128x128xf32>,
    %c2_i32_287 = arith.constant 2 : i32
    %267 = arith.addi %0, %c2_i32_287 : i32
    %c0_288 = arith.constant 0 : index
    %268 = arith.index_cast %267 : i32 to index
    %c2_289 = arith.constant 2 : index
    %c0_290 = arith.constant 0 : index
    %c0_291 = arith.constant 0 : index
    %269 = vector.load %arg2[%c0_288, %268, %c2_289, %c0_290, %c0_291] : memref<1x6x6x10x8xbf16, #tpu.memory_space<vmem>>, vector<1x4x4x8x8xbf16>
    %270 = vector.shape_cast %269 : vector<1x4x4x8x8xbf16> to vector<4x4x8x8xbf16>
    %271 = vector.shape_cast %270 : vector<4x4x8x8xbf16> to vector<128x8xbf16>
    %c0_292 = arith.constant 0 : index
    %c0_293 = arith.constant 0 : index
    %272 = vector.load %arg7[%c0_292, %c0_293] : memref<128x128xf32, #tpu.memory_space<vmem>>, vector<128x128xf32>
    %c24 = arith.constant 24 : index
    %c0_294 = arith.constant 0 : index
    %c0_295 = arith.constant 0 : index
    %273 = vector.load %arg3[%c24, %c0_294, %c0_295] : memref<27x8x128xbf16, #tpu.memory_space<vmem>>, vector<1x8x128xbf16>
    %274 = vector.shape_cast %273 : vector<1x8x128xbf16> to vector<8x128xbf16>
    %cst_296 = arith.constant dense<0.000000e+00> : vector<128x128xf32>
    %275 = tpu.matmul %271, %274, %cst_296 {dimension_numbers = #tpu.dot_dimension_numbers<[1], [0], [0], [1], [0, 0, 1, 1], [], []>} : vector<128x8xbf16>, vector<8x128xbf16>, vector<128x128xf32> -> vector<128x128xf32>
    %276 = arith.addf %272, %275 : vector<128x128xf32>
    %c0_297 = arith.constant 0 : index
    %c0_298 = arith.constant 0 : index
    %277 = vector.load %arg7[%c0_297, %c0_298] : memref<128x128xf32, #tpu.memory_space<vmem>>, vector<128x128xf32>
    tpu.vector_store %arg7[%c0_297, %c0_298], %276 {strides = array<i32>} : memref<128x128xf32, #tpu.memory_space<vmem>>, vector<128x128xf32>,
    %c2_i32_299 = arith.constant 2 : i32
    %278 = arith.addi %0, %c2_i32_299 : i32
    %c0_300 = arith.constant 0 : index
    %279 = arith.index_cast %278 : i32 to index
    %c2_301 = arith.constant 2 : index
    %c1_302 = arith.constant 1 : index
    %c0_303 = arith.constant 0 : index
    %280 = vector.load %arg2[%c0_300, %279, %c2_301, %c1_302, %c0_303] : memref<1x6x6x10x8xbf16, #tpu.memory_space<vmem>>, vector<1x4x4x8x8xbf16>
    %281 = vector.shape_cast %280 : vector<1x4x4x8x8xbf16> to vector<4x4x8x8xbf16>
    %282 = vector.shape_cast %281 : vector<4x4x8x8xbf16> to vector<128x8xbf16>
    %c0_304 = arith.constant 0 : index
    %c0_305 = arith.constant 0 : index
    %283 = vector.load %arg7[%c0_304, %c0_305] : memref<128x128xf32, #tpu.memory_space<vmem>>, vector<128x128xf32>
    %c25 = arith.constant 25 : index
    %c0_306 = arith.constant 0 : index
    %c0_307 = arith.constant 0 : index
    %284 = vector.load %arg3[%c25, %c0_306, %c0_307] : memref<27x8x128xbf16, #tpu.memory_space<vmem>>, vector<1x8x128xbf16>
    %285 = vector.shape_cast %284 : vector<1x8x128xbf16> to vector<8x128xbf16>
    %cst_308 = arith.constant dense<0.000000e+00> : vector<128x128xf32>
    %286 = tpu.matmul %282, %285, %cst_308 {dimension_numbers = #tpu.dot_dimension_numbers<[1], [0], [0], [1], [0, 0, 1, 1], [], []>} : vector<128x8xbf16>, vector<8x128xbf16>, vector<128x128xf32> -> vector<128x128xf32>
    %287 = arith.addf %283, %286 : vector<128x128xf32>
    %c0_309 = arith.constant 0 : index
    %c0_310 = arith.constant 0 : index
    %288 = vector.load %arg7[%c0_309, %c0_310] : memref<128x128xf32, #tpu.memory_space<vmem>>, vector<128x128xf32>
    tpu.vector_store %arg7[%c0_309, %c0_310], %287 {strides = array<i32>} : memref<128x128xf32, #tpu.memory_space<vmem>>, vector<128x128xf32>,
    %c2_i32_311 = arith.constant 2 : i32
    %289 = arith.addi %0, %c2_i32_311 : i32
    %c0_312 = arith.constant 0 : index
    %290 = arith.index_cast %289 : i32 to index
    %c2_313 = arith.constant 2 : index
    %c2_314 = arith.constant 2 : index
    %c0_315 = arith.constant 0 : index
    %291 = vector.load %arg2[%c0_312, %290, %c2_313, %c2_314, %c0_315] : memref<1x6x6x10x8xbf16, #tpu.memory_space<vmem>>, vector<1x4x4x8x8xbf16>
    %292 = vector.shape_cast %291 : vector<1x4x4x8x8xbf16> to vector<4x4x8x8xbf16>
    %293 = vector.shape_cast %292 : vector<4x4x8x8xbf16> to vector<128x8xbf16>
    %c0_316 = arith.constant 0 : index
    %c0_317 = arith.constant 0 : index
    %294 = vector.load %arg7[%c0_316, %c0_317] : memref<128x128xf32, #tpu.memory_space<vmem>>, vector<128x128xf32>
    %c26 = arith.constant 26 : index
    %c0_318 = arith.constant 0 : index
    %c0_319 = arith.constant 0 : index
    %295 = vector.load %arg3[%c26, %c0_318, %c0_319] : memref<27x8x128xbf16, #tpu.memory_space<vmem>>, vector<1x8x128xbf16>
    %296 = vector.shape_cast %295 : vector<1x8x128xbf16> to vector<8x128xbf16>
    %cst_320 = arith.constant dense<0.000000e+00> : vector<128x128xf32>
    %297 = tpu.matmul %293, %296, %cst_320 {dimension_numbers = #tpu.dot_dimension_numbers<[1], [0], [0], [1], [0, 0, 1, 1], [], []>} : vector<128x8xbf16>, vector<8x128xbf16>, vector<128x128xf32> -> vector<128x128xf32>
    %298 = arith.addf %294, %297 : vector<128x128xf32>
    %c0_321 = arith.constant 0 : index
    %c0_322 = arith.constant 0 : index
    %299 = vector.load %arg7[%c0_321, %c0_322] : memref<128x128xf32, #tpu.memory_space<vmem>>, vector<128x128xf32>
    tpu.vector_store %arg7[%c0_321, %c0_322], %298 {strides = array<i32>} : memref<128x128xf32, #tpu.memory_space<vmem>>, vector<128x128xf32>,
    %c0_323 = arith.constant 0 : index
    %c0_324 = arith.constant 0 : index
    %300 = vector.load %arg7[%c0_323, %c0_324] : memref<128x128xf32, #tpu.memory_space<vmem>>, vector<128x128xf32>
    %c0_325 = arith.constant 0 : index
    %c0_326 = arith.constant 0 : index
    %301 = vector.load %arg4[%c0_325, %c0_326] : memref<1x128xf32, #tpu.memory_space<vmem>>, vector<1x128xf32>
    %302 = vector.broadcast %301 : vector<1x128xf32> to vector<128x128xf32>
    %303 = arith.addf %300, %302 : vector<128x128xf32>
    %c0_327 = arith.constant 0 : index
    %c0_328 = arith.constant 0 : index
    %c0_329 = arith.constant 0 : index
    %304 = vector.load %arg5[%c0_327, %c0_328, %c0_329] : memref<1x128x128xf32, #tpu.memory_space<vmem>>, vector<1x128x128xf32>
    %305 = vector.shape_cast %304 : vector<1x128x128xf32> to vector<128x128xf32>
    %306 = arith.addf %303, %305 : vector<128x128xf32>
    %cst_330 = arith.constant 0.000000e+00 : f32
    %307 = vector.broadcast %cst_330 : f32 to vector<128x128xf32>
    %308 = arith.maximumf %306, %307 : vector<128x128xf32>
    %c0_331 = arith.constant 0 : index
    %c0_332 = arith.constant 0 : index
    %c0_333 = arith.constant 0 : index
    %309 = vector.load %arg6[%c0_331, %c0_332, %c0_333] : memref<1x128x128xf32, #tpu.memory_space<vmem>>, vector<1x128x128xf32>
    %310 = vector.shape_cast %309 : vector<1x128x128xf32> to vector<128x128xf32>
    %311 = vector.shape_cast %308 : vector<128x128xf32> to vector<1x128x128xf32>
    tpu.vector_store %arg6[%c0_331, %c0_332, %c0_333], %311 {strides = array<i32>} : memref<1x128x128xf32, #tpu.memory_space<vmem>>, vector<1x128x128xf32>,
    return
  }
  func.func @transform_0(%arg0: i32, %arg1: i32) -> (i32, i32, i32, i32, i32) {
    %c0_i32 = arith.constant 0 : i32
    %c0_i32_0 = arith.constant 0 : i32
    %c0_i32_1 = arith.constant 0 : i32
    %c0_i32_2 = arith.constant 0 : i32
    %c0_i32_3 = arith.constant 0 : i32
    return %arg0, %c0_i32, %c0_i32_0, %c0_i32_1, %c0_i32_2 : i32, i32, i32, i32, i32
  }
  func.func @transform_1(%arg0: i32, %arg1: i32) -> (i32, i32, i32) {
    %c0_i32 = arith.constant 0 : i32
    %c0_i32_0 = arith.constant 0 : i32
    %c0_i32_1 = arith.constant 0 : i32
    %c0_i32_2 = arith.constant 0 : i32
    return %c0_i32, %c0_i32_0, %c0_i32_1 : i32, i32, i32
  }
  func.func @transform_2(%arg0: i32, %arg1: i32) -> (i32, i32) {
    %c0_i32 = arith.constant 0 : i32
    %c0_i32_0 = arith.constant 0 : i32
    %c0_i32_1 = arith.constant 0 : i32
    return %c0_i32, %c0_i32_0 : i32, i32
  }
  func.func @transform_3(%arg0: i32, %arg1: i32) -> (i32, i32, i32) {
    %c0_i32 = arith.constant 0 : i32
    %c0_i32_0 = arith.constant 0 : i32
    return %arg0, %arg1, %c0_i32 : i32, i32, i32
  }
  func.func @transform_4(%arg0: i32, %arg1: i32) -> (i32, i32, i32) {
    %c0_i32 = arith.constant 0 : i32
    %c0_i32_0 = arith.constant 0 : i32
    return %arg0, %arg1, %c0_i32 : i32, i32, i32
  }
}

</mosaic_0001>

<bundles_post_ra>
// kernel: residual_unit3d.4
= control target key start
LH: loop header
LB: loop body
LE: loop exit
PB: predicated region body
PF: predicated region fallthrough
CT: control target
= control target key end

     0   :  { %vm101_vm0 = vcmask 1041408   ;;  %vm76_vm1 = vcmask 31744   ;;  %s332_s1 = inlined_call_operand.vmem [shape: bf16[4,128], index: 1, kind: input, shape index: {}]   ;;  %s333_s0 = inlined_call_operand.vmem [shape: bf16[128,4], index: 0, kind: input, shape index: {}]   ;;  %s334_s2 = inlined_call_operand.vmem [shape: f32[1,128], index: 2, kind: input, shape index: {}]   ;;  %s335_s3 = inlined_call_operand.vmem [shape: f32[128,128], index: 3, kind: output, shape index: {}]  }
   0x1   :  { %v31_v0 = vld [vmem:[%s332_s1] sm:$0x3]  ;;  %v216_v3 = vld [vmem:[%s333_s0 + $0x10] sm:$0xff]  ;;  %v215_v6 = vld [vmem:[%s333_s0 + $0x8] sm:$0xff] }
   0x2   :  { %v103_v1 = vsel %vm101_vm0, %v31_v0, 0  ;;  %v214_v2 = vld [vmem:[%s333_s0] sm:$0xff]  ;;  %v220_v5 = vld [vmem:[%s333_s0 + $0x30] sm:$0xff]  ;;  %v217_v7 = vld [vmem:[%s333_s0 + $0x18] sm:$0xff] }
   0x3   :  { %112 = vmatpush.bf16.msra.mxu0 %v103_v1  ;;  %222 = vmatpush.bf16.msra.mxu1 %v103_v1  ;;  %v218_v4 = vld [vmem:[%s333_s0 + $0x20] sm:$0xff]  ;;  %v219_v8 = vld [vmem:[%s333_s0 + $0x28] sm:$0xff]  ;;  %v221_v9 = vld [vmem:[%s333_s0 + $0x38] sm:$0xff] }
   0x4   :  { %223 = vmatpush.bf16.msra.mxu2 %v103_v1  ;;  %224 = vmatpush.bf16.msra.mxu3 %v103_v1  ;;  %v225_v10 = vld [vmem:[%s334_s2] ss:$0 sm:$0xff] }
   0x6   :  { %206 = vmatmul.msk.bf16.vlgmr.msra.gmra.mxu0 %vm76_vm1, %v214_v2  ;;  %208 = vmatmul.msk.bf16.vlgmr.msra.gmra.mxu1 %vm76_vm1, %v216_v3 }
   0x7   :  { %210 = vmatmul.msk.bf16.vlgmr.msra.gmra.mxu2 %vm76_vm1, %v218_v4  ;;  %212 = vmatmul.msk.bf16.vlgmr.msra.gmra.mxu3 %vm76_vm1, %v220_v5 }
  0x16   :  { %207 = vmatmul.msk.bf16.gmra.mxu0 %vm76_vm1, %v215_v6  ;;  %209 = vmatmul.msk.bf16.gmra.mxu1 %vm76_vm1, %v217_v7 }
  0x17   :  { %211 = vmatmul.msk.bf16.gmra.mxu2 %vm76_vm1, %v219_v8  ;;  %213 = vmatmul.msk.bf16.gmra.mxu3 %vm76_vm1, %v221_v9 }
  0x83   :  { %v114_v11 = vpop.f32.mrf.mxu0  ;;  %v124_v12 = vpop.f32.mrf.mxu1 }
  0x84   :  { %v115_v13 = vadd.f32 %v225_v10, %v114_v11  ;;  %v125_v14 = vadd.f32 %v225_v10, %v124_v12 }
  0x86   :  { %154 = vst [vmem:[%s335_s3] sm:$0xff] %v115_v13 }
  0x87   :  { %158 = vst [vmem:[%s335_s3 + $0x20] sm:$0xff] %v125_v14 }
  0x8a   :  { %v134_v15 = vpop.f32.mrf.mxu2  ;;  %v144_v16 = vpop.f32.mrf.mxu3 }
  0x8b   :  { %v135_v17 = vadd.f32 %v225_v10, %v134_v15  ;;  %v145_v18 = vadd.f32 %v225_v10, %v144_v16  ;;  %v116_v19 = vpop.f32.mrf.mxu0  ;;  %v126_v20 = vpop.f32.mrf.mxu1 }
  0x8c   :  { %v117_v21 = vadd.f32 %v225_v10, %v116_v19  ;;  %v127_v22 = vadd.f32 %v225_v10, %v126_v20 }
  0x8d   :  { %162 = vst [vmem:[%s335_s3 + $0x40] sm:$0xff] %v135_v17 }
  0x8e   :  { %166 = vst [vmem:[%s335_s3 + $0x60] sm:$0xff] %v145_v18 }
  0x8f   :  { %155 = vst [vmem:[%s335_s3 + $0x8] sm:$0xff] %v117_v21 }
  0x90   :  { %159 = vst [vmem:[%s335_s3 + $0x28] sm:$0xff] %v127_v22 }
  0x92   :  { %v136_v23 = vpop.f32.mrf.mxu2  ;;  %v146_v24 = vpop.f32.mrf.mxu3 }
  0x93   :  { %v137_v25 = vadd.f32 %v225_v10, %v136_v23  ;;  %v147_v26 = vadd.f32 %v225_v10, %v146_v24  ;;  %v119_v27 = vpop.f32.mrf.mxu0  ;;  %v129_v28 = vpop.f32.mrf.mxu1 }
  0x94   :  { %v120_v29 = vadd.f32 %v225_v10, %v119_v27  ;;  %v130_v30 = vadd.f32 %v225_v10, %v129_v28 }
  0x95   :  { %163 = vst [vmem:[%s335_s3 + $0x48] sm:$0xff] %v137_v25 }
  0x96   :  { %167 = vst [vmem:[%s335_s3 + $0x68] sm:$0xff] %v147_v26 }
  0x97   :  { %156 = vst [vmem:[%s335_s3 + $0x10] sm:$0xff] %v120_v29 }
  0x98   :  { %160 = vst [vmem:[%s335_s3 + $0x30] sm:$0xff] %v130_v30 }
  0x9a   :  { %v139_v31 = vpop.f32.mrf.mxu2  ;;  %v149_v32 = vpop.f32.mrf.mxu3 }
  0x9b   :  { %v140_v33 = vadd.f32 %v225_v10, %v139_v31  ;;  %v150_v34 = vadd.f32 %v225_v10, %v149_v32  ;;  %v121_v35 = vpop.f32.mrf.mxu0  ;;  %v131_v36 = vpop.f32.mrf.mxu1 }
  0x9c   :  { %v122_v37 = vadd.f32 %v225_v10, %v121_v35  ;;  %v132_v38 = vadd.f32 %v225_v10, %v131_v36 }
  0x9d   :  { %164 = vst [vmem:[%s335_s3 + $0x50] sm:$0xff] %v140_v33 }
  0x9e   :  { %168 = vst [vmem:[%s335_s3 + $0x70] sm:$0xff] %v150_v34 }
  0x9f   :  { %157 = vst [vmem:[%s335_s3 + $0x18] sm:$0xff] %v122_v37 }
  0xa0   :  { %161 = vst [vmem:[%s335_s3 + $0x38] sm:$0xff] %v132_v38 }
  0xa2   :  { %v141_v39 = vpop.f32.mrf.mxu2  ;;  %v151_v40 = vpop.f32.mrf.mxu3 }
  0xa3   :  { %v142_v41 = vadd.f32 %v225_v10, %v141_v39  ;;  %v152_v42 = vadd.f32 %v225_v10, %v151_v40 }
  0xa5   :  { %165 = vst [vmem:[%s335_s3 + $0x58] sm:$0xff] %v142_v41 }
  0xa6   :  { %169 = vst [vmem:[%s335_s3 + $0x78] sm:$0xff] %v152_v42 }

// kernel: residual_unit3d.3
= control target key start
LH: loop header
LB: loop body
LE: loop exit
PB: predicated region body
PF: predicated region fallthrough
CT: control target
= control target key end

     0   :  { %vm155_vm0 = vcmask 1045504   ;;  %vm130_vm1 = vcmask 883712   ;;  %s476_s1 = inlined_call_operand.vmem [shape: bf16[108,128], index: 1, kind: input, shape index: {}]   ;;  %s477_s2 = inlined_call_operand.vmem [shape: f32[1,128], index: 2, kind: input, shape index: {}]   ;;  %s478_s0 = inlined_call_operand.vmem [shape: bf16[128,108], index: 0, kind: input, shape index: {}]   ;;  %s479_s3 = inlined_call_operand.vmem [shape: f32[128,128], index: 3, kind: output, shape index: {}]  }
   0x1   :  { %v302_v0 = vld [vmem:[%s476_s1 + $0x30] sm:$0xf]  ;;  %v326_v1 = vld [vmem:[%s476_s1 + $0x30] sm:$0x30]  ;;  %v325_v4 = vld [vmem:[%s476_s1 + $0x28] sm:$0xff] }
   0x2   :  { %v303_v2 = vor.u32 %v326_v1, %v302_v0  ;;  %v324_v5 = vld [vmem:[%s476_s1 + $0x20] sm:$0xff]  ;;  %v323_v6 = vld [vmem:[%s476_s1 + $0x18] sm:$0xff]  ;;  %v322_v7 = vld [vmem:[%s476_s1 + $0x10] sm:$0xff] }
   0x3   :  { %v321_v8 = vld [vmem:[%s476_s1 + $0x8] sm:$0xff]  ;;  %v320_v9 = vld [vmem:[%s476_s1] sm:$0xff]  ;;  %v314_v11 = vld [vmem:[%s478_s0 + $0x10] sm:$0xff] }
   0x4   :  { %v157_v3 = vsel %vm155_vm0, %v303_v2, 0  ;;  %v312_v10 = vld [vmem:[%s478_s0] sm:$0xff]  ;;  %v318_v13 = vld [vmem:[%s478_s0 + $0x30] sm:$0xff]  ;;  %v313_v14 = vld [vmem:[%s478_s0 + $0x8] sm:$0xff] }
   0x5   :  { %160 = vmatpush.bf16.msra.mxu0 %v157_v3  ;;  %327 = vmatpush.bf16.msra.mxu1 %v157_v3  ;;  %v316_v12 = vld [vmem:[%s478_s0 + $0x20] sm:$0xff]  ;;  %v315_v15 = vld [vmem:[%s478_s0 + $0x18] sm:$0xff]  ;;  %v317_v16 = vld [vmem:[%s478_s0 + $0x28] sm:$0xff] }
   0x6   :  { %328 = vmatpush.bf16.msra.mxu2 %v157_v3  ;;  %329 = vmatpush.bf16.msra.mxu3 %v157_v3  ;;  %v319_v17 = vld [vmem:[%s478_s0 + $0x38] sm:$0xff]  ;;  %v348_v18 = vld [vmem:[%s477_s2] ss:$0 sm:$0xff] }
   0x9   :  { %161 = vmatpush.bf16.msra.mxu0 %v325_v4  ;;  %330 = vmatpush.bf16.msra.mxu1 %v325_v4 }
   0xa   :  { %331 = vmatpush.bf16.msra.mxu2 %v325_v4  ;;  %332 = vmatpush.bf16.msra.mxu3 %v325_v4 }
   0xd   :  { %162 = vmatpush.bf16.msra.mxu0 %v324_v5  ;;  %333 = vmatpush.bf16.msra.mxu1 %v324_v5 }
   0xe   :  { %334 = vmatpush.bf16.msra.mxu2 %v324_v5  ;;  %335 = vmatpush.bf16.msra.mxu3 %v324_v5 }
  0x11   :  { %163 = vmatpush.bf16.msra.mxu0 %v323_v6  ;;  %336 = vmatpush.bf16.msra.mxu1 %v323_v6 }
  0x12   :  { %337 = vmatpush.bf16.msra.mxu2 %v323_v6  ;;  %338 = vmatpush.bf16.msra.mxu3 %v323_v6 }
  0x15   :  { %164 = vmatpush.bf16.msra.mxu0 %v322_v7  ;;  %339 = vmatpush.bf16.msra.mxu1 %v322_v7 }
  0x16   :  { %340 = vmatpush.bf16.msra.mxu2 %v322_v7  ;;  %341 = vmatpush.bf16.msra.mxu3 %v322_v7 }
  0x19   :  { %165 = vmatpush.bf16.msra.mxu0 %v321_v8  ;;  %342 = vmatpush.bf16.msra.mxu1 %v321_v8 }
  0x1a   :  { %343 = vmatpush.bf16.msra.mxu2 %v321_v8  ;;  %344 = vmatpush.bf16.msra.mxu3 %v321_v8 }
  0x1d   :  { %166 = vmatpush.bf16.msra.mxu0 %v320_v9  ;;  %345 = vmatpush.bf16.msra.mxu1 %v320_v9 }
  0x1e   :  { %346 = vmatpush.bf16.msra.mxu2 %v320_v9  ;;  %347 = vmatpush.bf16.msra.mxu3 %v320_v9 }
  0x20   :  { %304 = vmatmul.msk.bf16.vlgmr.msra.gmra.mxu0 %vm130_vm1, %v312_v10  ;;  %306 = vmatmul.msk.bf16.vlgmr.msra.gmra.mxu1 %vm130_vm1, %v314_v11 }
  0x21   :  { %308 = vmatmul.msk.bf16.vlgmr.msra.gmra.mxu2 %vm130_vm1, %v316_v12  ;;  %310 = vmatmul.msk.bf16.vlgmr.msra.gmra.mxu3 %vm130_vm1, %v318_v13 }
  0x30   :  { %305 = vmatmul.msk.bf16.gmra.mxu0 %vm130_vm1, %v313_v14  ;;  %307 = vmatmul.msk.bf16.gmra.mxu1 %vm130_vm1, %v315_v15 }
  0x31   :  { %309 = vmatmul.msk.bf16.gmra.mxu2 %vm130_vm1, %v317_v16  ;;  %311 = vmatmul.msk.bf16.gmra.mxu3 %vm130_vm1, %v319_v17 }
  0x9d   :  { %v168_v19 = vpop.f32.mrf.mxu0  ;;  %v178_v20 = vpop.f32.mrf.mxu1 }
  0x9e   :  { %v169_v21 = vadd.f32 %v348_v18, %v168_v19  ;;  %v179_v22 = vadd.f32 %v348_v18, %v178_v20 }
  0xa0   :  { %v208_v23 = vmax.f32 %v169_v21, 0.0  ;;  %v212_v24 = vmax.f32 %v179_v22, 0.0 }
  0xa2   :  { %224 = vst [vmem:[%s479_s3] sm:$0xff] %v208_v23 }
  0xa3   :  { %228 = vst [vmem:[%s479_s3 + $0x20] sm:$0xff] %v212_v24 }
  0xa4   :  { %v188_v25 = vpop.f32.mrf.mxu2  ;;  %v198_v26 = vpop.f32.mrf.mxu3 }
  0xa5   :  { %v189_v27 = vadd.f32 %v348_v18, %v188_v25  ;;  %v199_v28 = vadd.f32 %v348_v18, %v198_v26  ;;  %v170_v29 = vpop.f32.mrf.mxu0  ;;  %v180_v30 = vpop.f32.mrf.mxu1 }
  0xa6   :  { %v171_v31 = vadd.f32 %v348_v18, %v170_v29  ;;  %v181_v32 = vadd.f32 %v348_v18, %v180_v30 }
  0xa7   :  { %v216_v33 = vmax.f32 %v189_v27, 0.0  ;;  %v220_v34 = vmax.f32 %v199_v28, 0.0 }
  0xa8   :  { %v209_v35 = vmax.f32 %v171_v31, 0.0  ;;  %v213_v36 = vmax.f32 %v181_v32, 0.0 }
  0xa9   :  { %232 = vst [vmem:[%s479_s3 + $0x40] sm:$0xff] %v216_v33 }
  0xaa   :  { %236 = vst [vmem:[%s479_s3 + $0x60] sm:$0xff] %v220_v34 }
  0xab   :  { %225 = vst [vmem:[%s479_s3 + $0x8] sm:$0xff] %v209_v35 }
  0xac   :  { %229 = vst [vmem:[%s479_s3 + $0x28] sm:$0xff] %v213_v36  ;;  %v190_v37 = vpop.f32.mrf.mxu2  ;;  %v200_v38 = vpop.f32.mrf.mxu3 }
  0xad   :  { %v191_v39 = vadd.f32 %v348_v18, %v190_v37  ;;  %v201_v40 = vadd.f32 %v348_v18, %v200_v38  ;;  %v173_v41 = vpop.f32.mrf.mxu0  ;;  %v183_v42 = vpop.f32.mrf.mxu1 }
  0xae   :  { %v174_v43 = vadd.f32 %v348_v18, %v173_v41  ;;  %v184_v44 = vadd.f32 %v348_v18, %v183_v42 }
  0xaf   :  { %v217_v45 = vmax.f32 %v191_v39, 0.0  ;;  %v221_v46 = vmax.f32 %v201_v40, 0.0 }
  0xb0   :  { %v210_v47 = vmax.f32 %v174_v43, 0.0  ;;  %v214_v48 = vmax.f32 %v184_v44, 0.0 }
  0xb1   :  { %233 = vst [vmem:[%s479_s3 + $0x48] sm:$0xff] %v217_v45 }
  0xb2   :  { %237 = vst [vmem:[%s479_s3 + $0x68] sm:$0xff] %v221_v46 }
  0xb3   :  { %226 = vst [vmem:[%s479_s3 + $0x10] sm:$0xff] %v210_v47 }
  0xb4   :  { %230 = vst [vmem:[%s479_s3 + $0x30] sm:$0xff] %v214_v48  ;;  %v193_v49 = vpop.f32.mrf.mxu2  ;;  %v203_v50 = vpop.f32.mrf.mxu3 }
  0xb5   :  { %v194_v51 = vadd.f32 %v348_v18, %v193_v49  ;;  %v204_v52 = vadd.f32 %v348_v18, %v203_v50  ;;  %v175_v53 = vpop.f32.mrf.mxu0  ;;  %v185_v54 = vpop.f32.mrf.mxu1 }
  0xb6   :  { %v176_v55 = vadd.f32 %v348_v18, %v175_v53  ;;  %v186_v56 = vadd.f32 %v348_v18, %v185_v54 }
  0xb7   :  { %v218_v57 = vmax.f32 %v194_v51, 0.0  ;;  %v222_v58 = vmax.f32 %v204_v52, 0.0 }
  0xb8   :  { %v211_v59 = vmax.f32 %v176_v55, 0.0  ;;  %v215_v60 = vmax.f32 %v186_v56, 0.0 }
  0xb9   :  { %234 = vst [vmem:[%s479_s3 + $0x50] sm:$0xff] %v218_v57 }
  0xba   :  { %238 = vst [vmem:[%s479_s3 + $0x70] sm:$0xff] %v222_v58 }
  0xbb   :  { %227 = vst [vmem:[%s479_s3 + $0x18] sm:$0xff] %v211_v59 }
  0xbc   :  { %231 = vst [vmem:[%s479_s3 + $0x38] sm:$0xff] %v215_v60  ;;  %v195_v61 = vpop.f32.mrf.mxu2  ;;  %v205_v62 = vpop.f32.mrf.mxu3 }
  0xbd   :  { %v196_v63 = vadd.f32 %v348_v18, %v195_v61  ;;  %v206_v0 = vadd.f32 %v348_v18, %v205_v62 }
  0xbf   :  { %v219_v1 = vmax.f32 %v196_v63, 0.0  ;;  %v223_v2 = vmax.f32 %v206_v0, 0.0 }
  0xc1   :  { %235 = vst [vmem:[%s479_s3 + $0x58] sm:$0xff] %v219_v1 }
  0xc2   :  { %239 = vst [vmem:[%s479_s3 + $0x78] sm:$0xff] %v223_v2 }

// kernel: residual_unit3d.5
= control target key start
LH: loop header
LB: loop body
LE: loop exit
PB: predicated region body
PF: predicated region fallthrough
CT: control target
= control target key end

     0   :  { %s9820_s15 = smov 0   ;;  %s9822_s16 = smov 0   ;;  %s12034_s0 = inlined_call_operand.vmem [shape: bf16[2,6,6,10,8], index: 0, kind: input, shape index: {}]   ;;  %s12035_s1 = inlined_call_operand.vmem [shape: bf16[27,8,128], index: 1, kind: input, shape index: {}]   ;;  %s12036_s2 = inlined_call_operand.vmem [shape: f32[1,128], index: 2, kind: input, shape index: {}]   ;;  %s12037_s3 = inlined_call_operand.vmem [shape: f32[2,128,128], index: 3, kind: input, shape index: {}]   ;;  %s12038_s4 = inlined_call_operand.vmem [shape: f32[2,128,128], index: 4, kind: output, shape index: {}]  }
   0x1   :  { %s9824_s17 = smov 0  }
   0x2 LB: > { %s26_s18 = sadd.s32 1, %s9789_s16  ;;  %p8346_p0 = scmp.ge.s32.totalorder %s9793_s17, 1  ;;  %s9793_s17 = sphi %s9824_s17, %s14_s17   ;;  %s9789_s16 = sphi %s9822_s16, %s12044_s16   ;;  %s9785_s15 = sphi %s9820_s15, %s12043_s15  }
   0x3   : > { %p28_p1 = scmp.ge.s32.totalorder %s26_s18, 2  ;;  %p193_p2 = scmp.lt.s32.totalorder %s9793_s17, 3 }
   0x5   : > { %s12046_s18 = smov (%p28_p1, %s26_s18), 0  ;;  %p194_p3 = pnand %p8346_p0, %p193_p2 }
   0x6   : > { %p232_p4 = scmp.lt.s32.totalorder (!%p194_p3), %s9785_s15, 1 }
   0x7   : > { %197 = sbr.rel (%p194_p3) target bundleno = 1030 (0x406), region = 36 }
   0xc   : > { %v310_v0 = vld [vmem:[%s12035_s1] sm:$0xf]  ;;  %vm376_vm0 = vcmask 1043456   ;;  %v8392_v2 = vld [vmem:[%s12035_s1 + $0x4] sm:$0xf]  ;;  %s12048_s15 = smov (!%p232_p4, %s9785_s15), 1 }
   0xd   : > { %v378_v1 = vsel %vm376_vm0, %v310_v0, 0  ;;  %v8417_v3 = vld [vmem:[%s12035_s1 + $0x8] sm:$0xf]  ;;  %v787_v4 = vsel %vm376_vm0, %v8392_v2, 0  ;;  %v8597_v6 = vld [vmem:[%s12035_s1 + $0x18] sm:$0xf] }
   0xe   : > { %9742 = vmatpush.bf16.msra.mxu3 %v378_v1  ;;  %387 = vmatpush.bf16.msra.mxu0 %v378_v1  ;;  %v1068_v5 = vsel %vm376_vm0, %v8417_v3, 0  ;;  %vm934_vm1 = vcmask 1042432   ;;  %vm935_vm2 = vcmask 1046532   ;;  %v2122_v7 = vsel %vm376_vm0, %v8597_v6, 0  ;;  %v8515_v8 = vld [vmem:[%s12035_s1 + $0x10] sm:$0xf] }
   0xf   : > { %1077 = vmatpush.bf16.msra.mxu2 %v1068_v5  ;;  %s9745_s29 = smul.u32 288, %s12048_s15  ;;  %796 = vmatpush.bf16.msra.mxu1 %v787_v4  ;;  %v1659_v9 = vsel %vm376_vm0, %v8515_v8, 0  ;;  %v8572_v10 = vld [vmem:[%s12035_s1 + $0x14] sm:$0xf]  ;;  %vm351_vm3 = vcmask 64512   ;;  %vm9870_vm4 = vmor %vm934_vm1, %vm935_vm2 }
  0x10   : > { %v1937_v11 = vsel %vm376_vm0, %v8572_v10, 0  ;;  %vm493_vm5 = vsmask.f32 3328  ;;  %vm494_vm6 = vsmask.f32 7440 }
  0x11   : > { %s9868_s8 = scalar_lea.vmem %s12034_s0, %s9745_s29  ;;  %vm9900_vm7 = vmor %vm493_vm5, %vm494_vm6 }
  0x12   : > { %9743 = vmatpush.bf16.msrb.mxu3 %v787_v4  ;;  %1668 = vmatpush.bf16.msrb.mxu0 %v1659_v9  ;;  %v8378_v13 = vld [vmem:[%s9868_s8 + $0x90] sm:$0xf]  ;;  %v9676_v14 = vld [vmem:[%s9868_s8 + $0x94] sm:$0xf0]  ;;  %v8354_v15 = vld [vmem:[%s9868_s8] sm:$0xf] }
  0x13   : > { %2131 = vmatpush.bf16.msrb.mxu2 %v2122_v7  ;;  %1946 = vmatpush.bf16.msrb.mxu1 %v1937_v11  ;;  %v8379_v16 = vor.u32 %v9676_v14, %v8378_v13  ;;  %v9670_v17 = vld [vmem:[%s9868_s8 + $0x4] sm:$0xf0]  ;;  %v870_v18 = vld [vmem:[%s9868_s8] sm:$0xe]  ;;  %v871_v19 = vld [vmem:[%s9868_s8 + $0x4] sm:$0x1] }
  0x14   : > { %v8355_v20 = vor.u32 %v9670_v17, %v8354_v15  ;;  %v872_v21 = vld [vmem:[%s9868_s8 + $0x8] sm:$0xe]  ;;  %v873_v22 = vld [vmem:[%s9868_s8 + $0xc] sm:$0x1]  ;;  %v8401_v23 = vrot.slane %v870_v18, 9  ;;  %v939_v24 = vrot.slane %v871_v19, 5 }
  0x15   : > { %8390 = vmatmul.msk.bf16.vlgmr.msra.gmra.mxu3 %vm351_vm3, %v8379_v16  ;;  %v8402_v25 = vrot.slane %v872_v21, 9  ;;  %v943_v26 = vrot.slane %v873_v22, 5  ;;  %v461_v27 = vld [vmem:[%s9868_s8] sm:$0xf]  ;;  %v462_v28 = vld [vmem:[%s9868_s8 + $0x4] sm:$0x1] }
  0x16   : > { %8384 = vmatmul.msk.bf16.vlgmr.msra.gmra.mxu0 %vm351_vm3, %v8355_v20  ;;  %v940_v29 = vsel %vm9870_vm4, %v8401_v23, %v939_v24  ;;  %v463_v30 = vld [vmem:[%s9868_s8 + $0x8] sm:$0xf]  ;;  %v464_v31 = vld [vmem:[%s9868_s8 + $0xc] sm:$0x1]  ;;  %v497_v32 = vshrl.u32 %v461_v27, 16  ;;  %v500_v33 = vshll.u32 %v461_v27, 16  ;;  %9744 = vmatpush.bf16.msra.mxu3 %v1068_v5 }
  0x17   : > { %v944_v34 = vsel %vm9870_vm4, %v8402_v25, %v943_v26  ;;  %v1019_v35 = vunpack.c.l.b16 %v940_v29  ;;  %v506_v36 = vshll.u32 %v462_v28, 16  ;;  %v511_v37 = vshrl.u32 %v463_v30, 16  ;;  %v8382_v44 = vld [vmem:[%s9868_s8 + $0xa0] sm:$0xf]  ;;  %v9677_v45 = vld [vmem:[%s9868_s8 + $0xa4] sm:$0xf0] }
  0x18   : > { %v1020_v38 = vunpack.c.l.b16 %v944_v34  ;;  %v499_v39 = vrot.slane %v497_v32, 4  ;;  %v502_v40 = vrot.slane %v500_v33, 5  ;;  %v514_v41 = vshll.u32 %v463_v30, 16  ;;  %v8358_v50 = vld [vmem:[%s9868_s8 + $0x10] sm:$0xf] }
  0x19   : > { %v513_v42 = vrot.slane %v511_v37, 4  ;;  %v520_v43 = vshll.u32 %v464_v31, 16  ;;  %v508_v48 = vrot.slane %v506_v36, 5  ;;  %v9671_v51 = vld [vmem:[%s9868_s8 + $0x14] sm:$0xf0]  ;;  %v8383_v0 = vor.u32 %v9677_v45, %v8382_v44 }
  0x1a   : > { %v1035_v46 = vpack.c.b16 %v1020_v38, %v1019_v35  ;;  %v503_v47 = vor.u32 %v502_v40, %v499_v39  ;;  %v516_v49 = vrot.slane %v514_v41, 5  ;;  %v874_v52 = vld [vmem:[%s9868_s8 + $0x10] sm:$0xe]  ;;  %v875_v53 = vld [vmem:[%s9868_s8 + $0x14] sm:$0x1]  ;;  %v8359_v11 = vor.u32 %v9671_v51, %v8358_v50 }
  0x1b   : > { %v522_v55 = vrot.slane %v520_v43, 5  ;;  %v876_v56 = vld [vmem:[%s9868_s8 + $0x18] sm:$0xe]  ;;  %v877_v57 = vld [vmem:[%s9868_s8 + $0x1c] sm:$0x1]  ;;  %v8403_v58 = vrot.slane %v874_v52, 9 }
  0x1c   : > { %8418 = vmatmul.msk.bf16.vlgmr.msra.gmra.mxu2 %vm351_vm3, %v1035_v46  ;;  %v504_v59 = vrot.slane %v503_v47, 4  ;;  %v517_v60 = vor.u32 %v516_v49, %v513_v42  ;;  %v947_v61 = vrot.slane %v875_v53, 5  ;;  %v8404_v62 = vrot.slane %v876_v56, 9  ;;  %v465_v63 = vld [vmem:[%s9868_s8 + $0x10] sm:$0xf] }
  0x1d   : > { %v951_v1 = vrot.slane %v877_v57, 5  ;;  %v466_v2 = vld [vmem:[%s9868_s8 + $0x14] sm:$0x1]  ;;  %v525_v3 = vshrl.u32 %v465_v63, 16  ;;  %v467_v7 = vld [vmem:[%s9868_s8 + $0x18] sm:$0xf] }
  0x1e   : > { %v509_v4 = vsel %vm9900_vm7, %v504_v59, %v508_v48  ;;  %v518_v5 = vrot.slane %v517_v60, 4  ;;  %v948_v6 = vsel %vm9870_vm4, %v8403_v58, %v947_v61  ;;  %v468_v8 = vld [vmem:[%s9868_s8 + $0x1c] sm:$0x1]  ;;  %v528_v9 = vshll.u32 %v465_v63, 16  ;;  %v485_v15 = vld [vmem:[%s9868_s8 + $0x90] sm:$0xf] }
  0x1f   : > { %v738_v10 = vunpack.c.l.b16 %v509_v4  ;;  %v952_v13 = vsel %vm9870_vm4, %v8404_v62, %v951_v1  ;;  %v527_v14 = vrot.slane %v525_v3, 4  ;;  %v1021_v17 = vunpack.c.l.b16 %v948_v6  ;;  %v486_v24 = vld [vmem:[%s9868_s8 + $0x94] sm:$0x1]  ;;  %v487_v28 = vld [vmem:[%s9868_s8 + $0x98] sm:$0xf] }
  0x20   : > { %v523_v16 = vsel %vm9900_vm7, %v518_v5, %v522_v55  ;;  %v530_v18 = vrot.slane %v528_v9, 5  ;;  %v534_v19 = vshll.u32 %v466_v2, 16  ;;  %v539_v21 = vshrl.u32 %v467_v7, 16  ;;  %v488_v29 = vld [vmem:[%s9868_s8 + $0x9c] sm:$0x1] }
  0x21   : > { %v739_v20 = vunpack.c.l.b16 %v523_v16  ;;  %v542_v22 = vshll.u32 %v467_v7, 16  ;;  %v548_v23 = vshll.u32 %v468_v8, 16  ;;  %v1022_v25 = vunpack.c.l.b16 %v952_v13  ;;  %v878_v44 = vld [vmem:[%s9868_s8 + $0x30] sm:$0xe]  ;;  %v879_v45 = vld [vmem:[%s9868_s8 + $0x34] sm:$0x1] }
  0x22   : > { %v531_v26 = vor.u32 %v530_v18, %v527_v14  ;;  %v536_v27 = vrot.slane %v534_v19, 5  ;;  %v665_v30 = vshrl.u32 %v485_v15, 16  ;;  %v541_v32 = vrot.slane %v539_v21, 4  ;;  %v469_v49 = vld [vmem:[%s9868_s8 + $0x30] sm:$0xf] }
  0x23   : > { %v754_v31 = vpack.c.b16 %v739_v20, %v738_v10  ;;  %v544_v33 = vrot.slane %v542_v22, 5  ;;  %v550_v34 = vrot.slane %v548_v23, 5  ;;  %v668_v37 = vshll.u32 %v485_v15, 16  ;;  %v880_v53 = vld [vmem:[%s9868_s8 + $0x38] sm:$0xe] }
  0x24   : > { %v532_v35 = vrot.slane %v531_v26, 4  ;;  %v667_v36 = vrot.slane %v665_v30, 4  ;;  %v674_v38 = vshll.u32 %v486_v24, 16  ;;  %v679_v40 = vshrl.u32 %v487_v28, 16  ;;  %v881_v55 = vld [vmem:[%s9868_s8 + $0x3c] sm:$0x1] }
  0x25   : > { %8393 = vmatmul.msk.bf16.vlgmr.msra.gmra.mxu1 %vm351_vm3, %v754_v31  ;;  %8391 = vmatmul.msk.bf16.gmra.mxu3 %vm351_vm3, %v8383_v0  ;;  %v545_v39 = vor.u32 %v544_v33, %v541_v32  ;;  %v682_v41 = vshll.u32 %v487_v28, 16  ;;  %v688_v42 = vshll.u32 %v488_v29, 16  ;;  %v670_v43 = vrot.slane %v668_v37, 5  ;;  %v8362_v60 = vld [vmem:[%s9868_s8 + $0x30] sm:$0xf] }
  0x26   : > { %8385 = vmatmul.msk.bf16.gmra.mxu0 %vm351_vm3, %v8359_v11  ;;  %v681_v47 = vrot.slane %v679_v40, 4  ;;  %v1036_v50 = vpack.c.b16 %v1022_v25, %v1021_v17  ;;  %v676_v52 = vrot.slane %v674_v38, 5  ;;  %v537_v56 = vsel %vm9900_vm7, %v532_v35, %v536_v27  ;;  %v9672_v62 = vld [vmem:[%s9868_s8 + $0x34] sm:$0xf0]  ;;  %v470_v10 = vld [vmem:[%s9868_s8 + $0x34] sm:$0x1] }
  0x27   : > { %v546_v46 = vrot.slane %v545_v39, 4  ;;  %v684_v48 = vrot.slane %v682_v41, 5  ;;  %v671_v51 = vor.u32 %v670_v43, %v667_v36  ;;  %v690_v59 = vrot.slane %v688_v42, 5  ;;  %v471_v5 = vld [vmem:[%s9868_s8 + $0x38] sm:$0xf] }
  0x28   : > { %v8405_v63 = vrot.slane %v878_v44, 9  ;;  %v955_v0 = vrot.slane %v879_v45, 5  ;;  %v553_v1 = vshrl.u32 %v469_v49, 16  ;;  %v8406_v3 = vrot.slane %v880_v53, 9  ;;  %v489_v13 = vld [vmem:[%s9868_s8 + $0xa0] sm:$0xf] }
  0x29   : > { %v551_v57 = vsel %vm9900_vm7, %v546_v46, %v550_v34  ;;  %v685_v58 = vor.u32 %v684_v48, %v681_v47  ;;  %v672_v61 = vrot.slane %v671_v51, 4  ;;  %v959_v4 = vrot.slane %v881_v55, 5  ;;  %v472_v20 = vld [vmem:[%s9868_s8 + $0x3c] sm:$0x1]  ;;  %v490_v23 = vld [vmem:[%s9868_s8 + $0xa4] sm:$0x1] }
  0x2a   : > { %v556_v6 = vshll.u32 %v469_v49, 16  ;;  %v740_v7 = vunpack.c.l.b16 %v537_v56  ;;  %v741_v8 = vunpack.c.l.b16 %v551_v57  ;;  %v555_v11 = vrot.slane %v553_v1, 4  ;;  %v491_v27 = vld [vmem:[%s9868_s8 + $0xa8] sm:$0xf]  ;;  %v492_v32 = vld [vmem:[%s9868_s8 + $0xac] sm:$0x1] }
  0x2b   : > { %v686_v2 = vrot.slane %v685_v58, 4  ;;  %v677_v9 = vsel %vm9900_vm7, %v672_v61, %v676_v52  ;;  %v8363_v16 = vor.u32 %v9672_v62, %v8362_v60  ;;  %v956_v19 = vsel %vm9870_vm4, %v8405_v63, %v955_v0  ;;  %v473_v52 = vld [vmem:[%s9868_s8 + $0x40] sm:$0xf]  ;;  %v475_v60 = vld [vmem:[%s9868_s8 + $0x48] sm:$0xf] }
  0x2c   : > { %8419 = vmatmul.msk.bf16.gmra.mxu2 %vm351_vm3, %v1036_v50  ;;  %v750_v15 = vunpack.c.l.b16 %v677_v9  ;;  %v558_v17 = vrot.slane %v556_v6, 5  ;;  %v567_v21 = vshrl.u32 %v471_v5, 16  ;;  %v570_v22 = vshll.u32 %v471_v5, 16  ;;  %v883_v62 = vld [vmem:[%s9868_s8 + $0x44] sm:$0x1] }
  0x2d   : > { %v691_v14 = vsel %vm9900_vm7, %v686_v2, %v690_v59  ;;  %v960_v24 = vsel %vm9870_vm4, %v8406_v3, %v959_v4  ;;  %v562_v26 = vshll.u32 %v470_v10, 16  ;;  %v693_v28 = vshrl.u32 %v489_v13, 16  ;;  %v882_v59 = vld [vmem:[%s9868_s8 + $0x40] sm:$0xe]  ;;  %v884_v63 = vld [vmem:[%s9868_s8 + $0x48] sm:$0xe] }
  0x2e   : > { %v751_v18 = vunpack.c.l.b16 %v691_v14  ;;  %v559_v25 = vor.u32 %v558_v17, %v555_v11  ;;  %v755_v29 = vpack.c.b16 %v741_v8, %v740_v7  ;;  %v569_v30 = vrot.slane %v567_v21, 4  ;;  %v885_v4 = vld [vmem:[%s9868_s8 + $0x4c] sm:$0x1] }
  0x2f   : > { %v572_v31 = vrot.slane %v570_v22, 5  ;;  %v696_v33 = vshll.u32 %v489_v13, 16  ;;  %v576_v35 = vshll.u32 %v472_v20, 16  ;;  %v695_v36 = vrot.slane %v693_v28, 4  ;;  %v474_v13 = vld [vmem:[%s9868_s8 + $0x44] sm:$0x1] }
  0x30   : > { %v760_v34 = vpack.c.b16 %v751_v18, %v750_v15  ;;  %v702_v37 = vshll.u32 %v490_v23, 16  ;;  %v707_v40 = vshrl.u32 %v491_v27, 16  ;;  %v710_v41 = vshll.u32 %v491_v27, 16 }
  0x31   : > { %v573_v38 = vor.u32 %v572_v31, %v569_v30  ;;  %v698_v39 = vrot.slane %v696_v33, 5  ;;  %v560_v42 = vrot.slane %v559_v25, 4  ;;  %v564_v43 = vrot.slane %v562_v26, 5  ;;  %v8366_v25 = vld [vmem:[%s9868_s8 + $0x40] sm:$0xf] }
  0x32   : > { %v716_v44 = vshll.u32 %v492_v32, 16  ;;  %v1023_v45 = vunpack.c.l.b16 %v956_v19  ;;  %v1024_v46 = vunpack.c.l.b16 %v960_v24  ;;  %v709_v48 = vrot.slane %v707_v40, 4  ;;  %v8442_v19 = vld [vmem:[%s12035_s1 + $0xc] sm:$0xf]  ;;  %v9673_v26 = vld [vmem:[%s9868_s8 + $0x44] sm:$0xf0] }
  0x33   : > { %v699_v47 = vor.u32 %v698_v39, %v695_v36  ;;  %v574_v49 = vrot.slane %v573_v38, 4  ;;  %v578_v50 = vrot.slane %v576_v35, 5  ;;  %v712_v51 = vrot.slane %v710_v41, 5  ;;  %v476_v24 = vld [vmem:[%s9868_s8 + $0x4c] sm:$0x1] }
  0x34   : > { %v704_v55 = vrot.slane %v702_v37, 5  ;;  %v565_v56 = vsel %vm9900_vm7, %v560_v42, %v564_v43  ;;  %v718_v58 = vrot.slane %v716_v44, 5  ;;  %v1037_v61 = vpack.c.b16 %v1024_v46, %v1023_v45  ;;  %v894_v32 = vld [vmem:[%s9868_s8 + $0x90] sm:$0xe]  ;;  %v895_v33 = vld [vmem:[%s9868_s8 + $0x94] sm:$0x1] }
  0x35   : > { %8394 = vmatmul.msk.bf16.gmra.mxu1 %vm351_vm3, %v755_v29  ;;  %8399 = vmatmul.msk.bf16.vlgmr.msrb.gmra.mxu3 %vm351_vm3, %v760_v34  ;;  %v700_v53 = vrot.slane %v699_v47, 4  ;;  %v713_v57 = vor.u32 %v712_v51, %v709_v48  ;;  %v581_v0 = vshrl.u32 %v473_v52, 16  ;;  %v584_v1 = vshll.u32 %v473_v52, 16  ;;  %v896_v38 = vld [vmem:[%s9868_s8 + $0x98] sm:$0xe] }
  0x36   : > { %8386 = vmatmul.msk.bf16.gmra.mxu0 %vm351_vm3, %v8363_v16  ;;  %v579_v2 = vsel %vm9900_vm7, %v574_v49, %v578_v50  ;;  %v742_v5 = vunpack.c.l.b16 %v565_v56  ;;  %v8407_v7 = vrot.slane %v882_v59, 9  ;;  %v595_v8 = vshrl.u32 %v475_v60, 16  ;;  %v897_v39 = vld [vmem:[%s9868_s8 + $0x9c] sm:$0x1]  ;;  %v477_v51 = vld [vmem:[%s9868_s8 + $0x60] sm:$0xf] }
  0x37   : > { %v714_v3 = vrot.slane %v713_v57, 4  ;;  %v705_v6 = vsel %vm9900_vm7, %v700_v53, %v704_v55  ;;  %v963_v10 = vrot.slane %v883_v62, 5  ;;  %v8408_v11 = vrot.slane %v884_v63, 9  ;;  %v479_v52 = vld [vmem:[%s9868_s8 + $0x68] sm:$0xf] }
  0x38   : > { %v598_v14 = vshll.u32 %v475_v60, 16  ;;  %v743_v15 = vunpack.c.l.b16 %v579_v2  ;;  %v967_v16 = vrot.slane %v885_v4, 5  ;;  %v583_v17 = vrot.slane %v581_v0, 4  ;;  %v886_v55 = vld [vmem:[%s9868_s8 + $0x60] sm:$0xe] }
  0x39   : > { %v719_v9 = vsel %vm9900_vm7, %v714_v3, %v718_v58  ;;  %v586_v18 = vrot.slane %v584_v1, 5  ;;  %v752_v20 = vunpack.c.l.b16 %v705_v6  ;;  %v597_v22 = vrot.slane %v595_v8, 4  ;;  %v887_v56 = vld [vmem:[%s9868_s8 + $0x64] sm:$0x1]  ;;  %v888_v60 = vld [vmem:[%s9868_s8 + $0x68] sm:$0xe] }
  0x3a   : > { %v753_v21 = vunpack.c.l.b16 %v719_v9  ;;  %v600_v23 = vrot.slane %v598_v14, 5  ;;  %v590_v27 = vshll.u32 %v474_v13, 16  ;;  %v1253_v28 = vsel %vm376_vm0, %v8442_v19, 0  ;;  %v9674_v13 = vld [vmem:[%s9868_s8 + $0x64] sm:$0xf0] }
  0x3b   : > { %v964_v29 = vsel %vm9870_vm4, %v8407_v7, %v963_v10  ;;  %v968_v30 = vsel %vm9870_vm4, %v8408_v11, %v967_v16  ;;  %v587_v31 = vor.u32 %v586_v18, %v583_v17  ;;  %1262 = vmatpush.bf16.msrb.mxu3 %v1253_v28  ;;  %v756_v34 = vpack.c.b16 %v743_v15, %v742_v5  ;;  %v8370_v11 = vld [vmem:[%s9868_s8 + $0x60] sm:$0xf]  ;;  %v478_v14 = vld [vmem:[%s9868_s8 + $0x64] sm:$0x1]  ;;  %v480_v15 = vld [vmem:[%s9868_s8 + $0x6c] sm:$0x1] }
  0x3c   : > { %8420 = vmatmul.msk.bf16.gmra.mxu2 %vm351_vm3, %v1037_v61  ;;  %v761_v35 = vpack.c.b16 %v753_v21, %v752_v20  ;;  %v601_v36 = vor.u32 %v600_v23, %v597_v22  ;;  %v604_v37 = vshll.u32 %v476_v24, 16  ;;  %v8367_v40 = vor.u32 %v9673_v26, %v8366_v25  ;;  %v889_v61 = vld [vmem:[%s9868_s8 + $0x6c] sm:$0x1]  ;;  %v898_v20 = vld [vmem:[%s9868_s8 + $0xa0] sm:$0xe] }
  0x3d   : > { %v1025_v41 = vunpack.c.l.b16 %v964_v29  ;;  %v1026_v42 = vunpack.c.l.b16 %v968_v30  ;;  %v592_v43 = vrot.slane %v590_v27, 5  ;;  %v8413_v44 = vrot.slane %v894_v32, 9  ;;  %v899_v21 = vld [vmem:[%s9868_s8 + $0xa4] sm:$0x1]  ;;  %v900_v25 = vld [vmem:[%s9868_s8 + $0xa8] sm:$0xe] }
  0x3e   : > { %v588_v45 = vrot.slane %v587_v31, 4  ;;  %v987_v46 = vrot.slane %v895_v33, 5  ;;  %v8414_v47 = vrot.slane %v896_v38, 9  ;;  %v991_v48 = vrot.slane %v897_v39, 5  ;;  %v901_v26 = vld [vmem:[%s9868_s8 + $0xac] sm:$0x1] }
  0x3f   : > { %v602_v49 = vrot.slane %v601_v36, 4  ;;  %v606_v50 = vrot.slane %v604_v37, 5  ;;  %v1038_v53 = vpack.c.b16 %v1026_v42, %v1025_v41  ;;  %v609_v62 = vshrl.u32 %v477_v51, 16  ;;  %v481_v39 = vld [vmem:[%s9868_s8 + $0x70] sm:$0xf] }
  0x40   : > { %v593_v57 = vsel %vm9900_vm7, %v588_v45, %v592_v43  ;;  %v988_v58 = vsel %vm9870_vm4, %v8413_v44, %v987_v46  ;;  %v992_v59 = vsel %vm9870_vm4, %v8414_v47, %v991_v48  ;;  %v612_v0 = vshll.u32 %v477_v51, 16  ;;  %v890_v42 = vld [vmem:[%s9868_s8 + $0x70] sm:$0xe]  ;;  %v483_v43 = vld [vmem:[%s9868_s8 + $0x78] sm:$0xf] }
  0x41   : > { %v607_v63 = vsel %vm9900_vm7, %v602_v49, %v606_v50  ;;  %v623_v1 = vshrl.u32 %v479_v52, 16  ;;  %v626_v2 = vshll.u32 %v479_v52, 16  ;;  %v8409_v3 = vrot.slane %v886_v55, 9  ;;  %v891_v47 = vld [vmem:[%s9868_s8 + $0x74] sm:$0x1] }
  0x42   : > { %v971_v4 = vrot.slane %v887_v56, 5  ;;  %v8410_v5 = vrot.slane %v888_v60, 9  ;;  %v975_v6 = vrot.slane %v889_v61, 5  ;;  %v744_v7 = vunpack.c.l.b16 %v593_v57  ;;  %v892_v48 = vld [vmem:[%s9868_s8 + $0x78] sm:$0xe] }
  0x43   : > { %v745_v8 = vunpack.c.l.b16 %v607_v63  ;;  %v1031_v9 = vunpack.c.l.b16 %v988_v58  ;;  %v1032_v10 = vunpack.c.l.b16 %v992_v59  ;;  %v611_v16 = vrot.slane %v609_v62, 4  ;;  %v8483_v49 = vld [vmem:[%s9868_s8 + $0x8] sm:$0xf]  ;;  %v8670_v55 = vld [vmem:[%s12035_s1 + $0x1c] sm:$0xf] }
  0x44   : > { %v614_v17 = vrot.slane %v612_v0, 5  ;;  %v625_v18 = vrot.slane %v623_v1, 4  ;;  %v628_v19 = vrot.slane %v626_v2, 5  ;;  %v8371_v22 = vor.u32 %v9674_v13, %v8370_v11  ;;  %v893_v56 = vld [vmem:[%s9868_s8 + $0x7c] sm:$0x1] }
  0x45   : > { %8395 = vmatmul.msk.bf16.gmra.mxu1 %vm351_vm3, %v756_v34  ;;  %8400 = vmatmul.msk.bf16.gmra.mxu3 %vm351_vm3, %v761_v35  ;;  %v972_v23 = vsel %vm9870_vm4, %v8409_v3, %v971_v4  ;;  %v976_v24 = vsel %vm9870_vm4, %v8410_v5, %v975_v6  ;;  %v757_v27 = vpack.c.b16 %v745_v8, %v744_v7  ;;  %v618_v29 = vshll.u32 %v478_v14, 16 }
  0x46   : > { %8387 = vmatmul.msk.bf16.gmra.mxu0 %vm351_vm3, %v8367_v40  ;;  %v1041_v28 = vpack.c.b16 %v1032_v10, %v1031_v9  ;;  %v632_v30 = vshll.u32 %v480_v15, 16  ;;  %v615_v31 = vor.u32 %v614_v17, %v611_v16  ;;  %v629_v32 = vor.u32 %v628_v19, %v625_v18  ;;  %v482_v9 = vld [vmem:[%s9868_s8 + $0x74] sm:$0x1]  ;;  %v484_v10 = vld [vmem:[%s9868_s8 + $0x7c] sm:$0x1] }
  0x47   : > { %v8415_v33 = vrot.slane %v898_v20, 9  ;;  %v995_v34 = vrot.slane %v899_v21, 5  ;;  %v1027_v35 = vunpack.c.l.b16 %v972_v23  ;;  %v1028_v36 = vunpack.c.l.b16 %v976_v24  ;;  %v8825_v20 = vld [vmem:[%s12035_s1 + $0x28] sm:$0xf]  ;;  %v8727_v21 = vld [vmem:[%s12035_s1 + $0x20] sm:$0xf] }
  0x48   : > { %v8416_v37 = vrot.slane %v900_v25, 9  ;;  %v999_v38 = vrot.slane %v901_v26, 5  ;;  %v620_v40 = vrot.slane %v618_v29, 5  ;;  %v634_v41 = vrot.slane %v632_v30, 5  ;;  %v8374_v29 = vld [vmem:[%s9868_s8 + $0x70] sm:$0xf] }
  0x49   : > { %v616_v44 = vrot.slane %v615_v31, 4  ;;  %v630_v45 = vrot.slane %v629_v32, 4  ;;  %v996_v46 = vsel %vm9870_vm4, %v8415_v33, %v995_v34  ;;  %v1039_v50 = vpack.c.b16 %v1028_v36, %v1027_v35  ;;  %v9675_v30 = vld [vmem:[%s9868_s8 + $0x74] sm:$0xf0] }
  0x4a   : > { %v1000_v51 = vsel %vm9870_vm4, %v8416_v37, %v999_v38  ;;  %v637_v52 = vshrl.u32 %v481_v39, 16  ;;  %v640_v57 = vshll.u32 %v481_v39, 16  ;;  %v651_v58 = vshrl.u32 %v483_v43, 16 }
  0x4b   : > { %v654_v59 = vshll.u32 %v483_v43, 16  ;;  %v2528_v60 = vsel %vm376_vm0, %v8670_v55, 0  ;;  %v1033_v61 = vunpack.c.l.b16 %v996_v46  ;;  %v8411_v62 = vrot.slane %v890_v42, 9 }
  0x4c   : > { %8421 = vmatmul.msk.bf16.gmra.mxu2 %vm351_vm3, %v1038_v53  ;;  %v8485_v53 = vld [vmem:[%s9868_s8 + $0x10] sm:$0xf]  ;;  %v1369_v63 = vshrl.u32 %v8483_v49, 16  ;;  %v1372_v0 = vshll.u32 %v8483_v49, 16  ;;  %v621_v1 = vsel %vm9900_vm7, %v616_v44, %v620_v40  ;;  %v635_v2 = vsel %vm9900_vm7, %v630_v45, %v634_v41 }
  0x4d   : > { %v1383_v3 = vshrl.u32 %v8485_v53, 16  ;;  %v1386_v4 = vshll.u32 %v8485_v53, 16  ;;  %v1034_v5 = vunpack.c.l.b16 %v1000_v51  ;;  %v979_v6 = vrot.slane %v891_v47, 5  ;;  %v8752_v53 = vld [vmem:[%s12035_s1 + $0x24] sm:$0xf] }
  0x4e   : > { %v8412_v7 = vrot.slane %v892_v48, 9  ;;  %v983_v8 = vrot.slane %v893_v56, 5  ;;  %v639_v11 = vrot.slane %v637_v52, 4  ;;  %v642_v13 = vrot.slane %v640_v57, 5  ;;  %v8487_v56 = vld [vmem:[%s9868_s8 + $0x18] sm:$0xf] }
  0x4f   : > { %v653_v14 = vrot.slane %v651_v58, 4  ;;  %v656_v15 = vrot.slane %v654_v59, 5  ;;  %v746_v16 = vunpack.c.l.b16 %v621_v1  ;;  %v747_v17 = vunpack.c.l.b16 %v635_v2  ;;  %v8489_v57 = vld [vmem:[%s9868_s8 + $0x20] sm:$0xf] }
  0x50   : > { %v1371_v18 = vrot.slane %v1369_v63, 4  ;;  %v1374_v19 = vrot.slane %v1372_v0, 5  ;;  %v1385_v23 = vrot.slane %v1383_v3, 4  ;;  %v1388_v24 = vrot.slane %v1386_v4, 5 }
  0x51   : > { %v3398_v25 = vsel %vm376_vm0, %v8825_v20, 0  ;;  %v2806_v26 = vsel %vm376_vm0, %v8727_v21, 0  ;;  %v980_v31 = vsel %vm9870_vm4, %v8411_v62, %v979_v6  ;;  %v984_v32 = vsel %vm9870_vm4, %v8412_v7, %v983_v8  ;;  %v9678_v8 = vld [vmem:[%s9868_s8 + $0xc] sm:$0xf0]  ;;  %v8525_v20 = vld [vmem:[%s9868_s8 + $0xc] sm:$0x1] }
  0x52   : > { %3407 = vmatpush.bf16.msra.mxu2 %v3398_v25  ;;  %2815 = vmatpush.bf16.msra.mxu0 %v2806_v26  ;;  %v646_v33 = vshll.u32 %v482_v9, 16  ;;  %v758_v34 = vpack.c.b16 %v747_v17, %v746_v16  ;;  %v643_v35 = vor.u32 %v642_v13, %v639_v11  ;;  %v660_v36 = vshll.u32 %v484_v10, 16  ;;  %v8526_v21 = vld [vmem:[%s9868_s8 + $0x10] sm:$0xe] }
  0x53   : > { %v657_v38 = vor.u32 %v656_v15, %v653_v14  ;;  %v1375_v39 = vor.u32 %v1374_v19, %v1371_v18  ;;  %v1389_v40 = vor.u32 %v1388_v24, %v1385_v23  ;;  %v8375_v42 = vor.u32 %v9675_v30, %v8374_v29  ;;  %v8488_v14 = vld [vmem:[%s9868_s8 + $0x1c] sm:$0x1]  ;;  %v8490_v15 = vld [vmem:[%s9868_s8 + $0x24] sm:$0x1]  ;;  %v8524_v19 = vld [vmem:[%s9868_s8 + $0x8] sm:$0xe] }
  0x54   : > { %v1029_v43 = vunpack.c.l.b16 %v980_v31  ;;  %v1030_v44 = vunpack.c.l.b16 %v984_v32  ;;  %v644_v45 = vrot.slane %v643_v35, 4  ;;  %v648_v46 = vrot.slane %v646_v33, 5 }
  0x55   : > { %8396 = vmatmul.msk.bf16.gmra.mxu1 %vm351_vm3, %v757_v27  ;;  %8424 = vmatmul.msk.bf16.vlgmr.msra.gmra.mxu3 %vm351_vm3, %v1041_v28  ;;  %v8486_v27 = vld [vmem:[%s9868_s8 + $0x14] sm:$0x1]  ;;  %v1042_v28 = vpack.c.b16 %v1034_v5, %v1033_v61  ;;  %v662_v47 = vrot.slane %v660_v36, 5  ;;  %v658_v49 = vrot.slane %v657_v38, 4  ;;  %v1390_v51 = vrot.slane %v1389_v40, 4 }
  0x56   : > { %8388 = vmatmul.msk.bf16.gmra.mxu0 %vm351_vm3, %v8371_v22  ;;  %2537 = vmatpush.bf16.msra.mxu3 %v2528_v60  ;;  %v8484_v22 = vld [vmem:[%s9868_s8 + $0xc] sm:$0x1]  ;;  %v1392_v41 = vshll.u32 %v8486_v27, 16  ;;  %v2992_v55 = vsel %vm376_vm0, %v8752_v53, 0  ;;  %v1040_v58 = vpack.c.b16 %v1030_v44, %v1029_v43  ;;  %v649_v59 = vsel %vm9900_vm7, %v644_v45, %v648_v46  ;;  %v8445_v5 = vld [vmem:[%s9868_s8 + $0x8] sm:$0xf] }
  0x57   : > { %v1378_v37 = vshll.u32 %v8484_v22, 16  ;;  %3001 = vmatpush.bf16.msra.mxu1 %v2992_v55  ;;  %v663_v60 = vsel %vm9900_vm7, %v658_v49, %v662_v47  ;;  %v1397_v63 = vshrl.u32 %v8487_v56, 16  ;;  %v1400_v0 = vshll.u32 %v8487_v56, 16  ;;  %v8527_v22 = vld [vmem:[%s9868_s8 + $0x14] sm:$0x1] }
  0x58   : > { %v1394_v52 = vrot.slane %v1392_v41, 5  ;;  %v1411_v1 = vshrl.u32 %v8489_v57, 16  ;;  %v1414_v2 = vshll.u32 %v8489_v57, 16  ;;  %v748_v3 = vunpack.c.l.b16 %v649_v59  ;;  %v8600_v27 = vld [vmem:[%s9868_s8 + $0x10] sm:$0xf] }
  0x59   : > { %v1380_v48 = vrot.slane %v1378_v37, 5  ;;  %v749_v4 = vunpack.c.l.b16 %v663_v60  ;;  %v1399_v9 = vrot.slane %v1397_v63, 4  ;;  %v1402_v10 = vrot.slane %v1400_v0, 5  ;;  %v8491_v38 = vld [vmem:[%s9868_s8 + $0x38] sm:$0xf] }
  0x5a   : > { %v1395_v62 = vsel %vm9900_vm7, %v1390_v51, %v1394_v52  ;;  %v1413_v11 = vrot.slane %v1411_v1, 4  ;;  %v1416_v13 = vrot.slane %v1414_v2, 5  ;;  %v8446_v17 = vor.u32 %v9678_v8, %v8445_v5  ;;  %v9679_v51 = vld [vmem:[%s9868_s8 + $0x1c] sm:$0xf0]  ;;  %v8528_v59 = vld [vmem:[%s9868_s8 + $0x18] sm:$0xe] }
  0x5b   : > { %v1611_v7 = vunpack.c.l.b16 %v1395_v62  ;;  %v759_v16 = vpack.c.b16 %v749_v4, %v748_v3  ;;  %v1403_v23 = vor.u32 %v1402_v10, %v1399_v9  ;;  %v1406_v24 = vshll.u32 %v8488_v14, 16  ;;  %v8492_v60 = vld [vmem:[%s9868_s8 + $0x3c] sm:$0x1]  ;;  %v8530_v1 = vld [vmem:[%s9868_s8 + $0x20] sm:$0xe] }
  0x5c   : > { %8422 = vmatmul.msk.bf16.gmra.mxu2 %vm351_vm3, %v1039_v50  ;;  %v1376_v50 = vrot.slane %v1375_v39, 4  ;;  %v1417_v25 = vor.u32 %v1416_v13, %v1413_v11  ;;  %v1420_v26 = vshll.u32 %v8490_v15, 16  ;;  %v8556_v29 = vrot.slane %v8524_v19, 9  ;;  %v8493_v39 = vld [vmem:[%s9868_s8 + $0x40] sm:$0xf] }
  0x5d   : > { %v1808_v30 = vrot.slane %v8525_v20, 5  ;;  %v8557_v31 = vrot.slane %v8526_v21, 9  ;;  %v1812_v32 = vrot.slane %v8527_v22, 5  ;;  %v1404_v33 = vrot.slane %v1403_v23, 4  ;;  %v8529_v0 = vld [vmem:[%s9868_s8 + $0x1c] sm:$0x1] }
  0x5e   : > { %v1381_v61 = vsel %vm9900_vm7, %v1376_v50, %v1380_v48  ;;  %v1418_v35 = vrot.slane %v1417_v25, 4  ;;  %v1422_v36 = vrot.slane %v1420_v26, 5  ;;  %v1425_v44 = vshrl.u32 %v8491_v38, 16  ;;  %v8449_v50 = vld [vmem:[%s9868_s8 + $0x18] sm:$0xf] }
  0x5f   : > { %v1610_v6 = vunpack.c.l.b16 %v1381_v61  ;;  %v1809_v40 = vsel %vm9870_vm4, %v8556_v29, %v1808_v30  ;;  %v1813_v41 = vsel %vm9870_vm4, %v8557_v31, %v1812_v32  ;;  %v1428_v45 = vshll.u32 %v8491_v38, 16  ;;  %v8494_v61 = vld [vmem:[%s9868_s8 + $0x44] sm:$0x1]  ;;  %v8604_v13 = vld [vmem:[%s9868_s8 + $0x20] sm:$0xf] }
  0x60   : > { %v1423_v43 = vsel %vm9900_vm7, %v1418_v35, %v1422_v36  ;;  %v1439_v46 = vshrl.u32 %v8493_v39, 16  ;;  %v1442_v47 = vshll.u32 %v8493_v39, 16  ;;  %v1888_v48 = vunpack.c.l.b16 %v1809_v40  ;;  %v8531_v2 = vld [vmem:[%s9868_s8 + $0x24] sm:$0x1]  ;;  %v9687_v14 = vld [vmem:[%s9868_s8 + $0x24] sm:$0xf0] }
  0x61   : > { %v1626_v18 = vpack.c.b16 %v1611_v7, %v1610_v6  ;;  %v1889_v49 = vunpack.c.l.b16 %v1813_v41  ;;  %v1613_v53 = vunpack.c.l.b16 %v1423_v43  ;;  %v1427_v55 = vrot.slane %v1425_v44, 4  ;;  %v8495_v15 = vld [vmem:[%s9868_s8 + $0x48] sm:$0xf]  ;;  %v8453_v32 = vld [vmem:[%s9868_s8 + $0x38] sm:$0xf] }
  0x62   : > { %v1430_v56 = vrot.slane %v1428_v45, 5  ;;  %v1441_v57 = vrot.slane %v1439_v46, 4  ;;  %v8450_v63 = vor.u32 %v9679_v51, %v8449_v50  ;;  %v1434_v5 = vshll.u32 %v8492_v60, 16  ;;  %v8496_v40 = vld [vmem:[%s9868_s8 + $0x4c] sm:$0x1] }
  0x63   : > { %v1904_v62 = vpack.c.b16 %v1889_v49, %v1888_v48  ;;  %v1448_v7 = vshll.u32 %v8494_v61, 16  ;;  %v8558_v8 = vrot.slane %v8528_v59, 9  ;;  %v1816_v9 = vrot.slane %v8529_v0, 5  ;;  %v8498_v41 = vld [vmem:[%s9868_s8 + $0x54] sm:$0x1] }
  0x64   : > { %v1431_v4 = vor.u32 %v1430_v56, %v1427_v55  ;;  %v8559_v10 = vrot.slane %v8530_v1, 9  ;;  %v1820_v11 = vrot.slane %v8531_v2, 5  ;;  %v8605_v21 = vor.u32 %v9687_v14, %v8604_v13  ;;  %v8532_v44 = vld [vmem:[%s9868_s8 + $0x38] sm:$0xe]  ;;  %v8533_v45 = vld [vmem:[%s9868_s8 + $0x3c] sm:$0x1] }
  0x65   : > { %8397 = vmatmul.msk.bf16.gmra.mxu1 %vm351_vm3, %v758_v34  ;;  %8425 = vmatmul.msk.bf16.gmra.mxu3 %vm351_vm3, %v1042_v28  ;;  %v9686_v28 = vld [vmem:[%s9868_s8 + $0x14] sm:$0xf0]  ;;  %v1408_v34 = vrot.slane %v1406_v24, 5  ;;  %v1450_v20 = vrot.slane %v1448_v7, 5  ;;  %v1817_v22 = vsel %vm9870_vm4, %v8558_v8, %v1816_v9  ;;  %v1453_v24 = vshrl.u32 %v8495_v15, 16 }
  0x66   : > { %8389 = vmatmul.msk.bf16.gmra.mxu0 %vm351_vm3, %v8375_v42  ;;  %v8601_v37 = vor.u32 %v9686_v28, %v8600_v27  ;;  %v1821_v23 = vsel %vm9870_vm4, %v8559_v10, %v1820_v11  ;;  %v1456_v25 = vshll.u32 %v8495_v15, 16  ;;  %v1890_v30 = vunpack.c.l.b16 %v1817_v22  ;;  %v8534_v46 = vld [vmem:[%s9868_s8 + $0x40] sm:$0xe]  ;;  %v9688_v60 = vld [vmem:[%s9868_s8 + $0x44] sm:$0xf0] }
  0x67   : > { %v1409_v42 = vsel %vm9900_vm7, %v1404_v33, %v1408_v34  ;;  %v1891_v31 = vunpack.c.l.b16 %v1821_v23  ;;  %v9680_v33 = vld [vmem:[%s9868_s8 + $0x3c] sm:$0xf0]  ;;  %v1455_v34 = vrot.slane %v1453_v24, 4  ;;  %v1462_v49 = vshll.u32 %v8496_v40, 16  ;;  %v8499_v1 = vld [vmem:[%s9868_s8 + $0x68] sm:$0xf] }
  0x68   : > { %v1612_v52 = vunpack.c.l.b16 %v1409_v42  ;;  %v1458_v35 = vrot.slane %v1456_v25, 5  ;;  %v8454_v43 = vor.u32 %v9680_v33, %v8453_v32  ;;  %v1476_v51 = vshll.u32 %v8498_v41, 16  ;;  %v8608_v55 = vld [vmem:[%s9868_s8 + $0x40] sm:$0xf]  ;;  %v8501_v2 = vld [vmem:[%s9868_s8 + $0x70] sm:$0xf] }
  0x69   : > { %v1905_v42 = vpack.c.b16 %v1891_v31, %v1890_v30  ;;  %v8560_v56 = vrot.slane %v8532_v44, 9  ;;  %v1481_v9 = vshrl.u32 %v8499_v1, 16  ;;  %v1484_v10 = vshll.u32 %v8499_v1, 16  ;;  %v8536_v32 = vld [vmem:[%s9868_s8 + $0x48] sm:$0xe] }
  0x6a   : > { %v1627_v3 = vpack.c.b16 %v1613_v53, %v1612_v52  ;;  %v1459_v48 = vor.u32 %v1458_v35, %v1455_v34  ;;  %v1478_v0 = vrot.slane %v1476_v51, 5  ;;  %v1495_v11 = vshrl.u32 %v8501_v2, 16  ;;  %v8537_v33 = vld [vmem:[%s9868_s8 + $0x4c] sm:$0x1]  ;;  %v8538_v35 = vld [vmem:[%s9868_s8 + $0x50] sm:$0xe] }
  0x6b   : > { %v1498_v13 = vshll.u32 %v8501_v2, 16  ;;  %v1486_v22 = vrot.slane %v1484_v10, 5  ;;  %v8562_v44 = vrot.slane %v8536_v32, 9 }
  0x6c   : > { %8423 = vmatmul.msk.bf16.gmra.mxu2 %vm351_vm3, %v1040_v58  ;;  %v1444_v58 = vrot.slane %v1442_v47, 5  ;;  %v8535_v47 = vld [vmem:[%s9868_s8 + $0x44] sm:$0x1]  ;;  %v1460_v61 = vrot.slane %v1459_v48, 4  ;;  %v1497_v23 = vrot.slane %v1495_v11, 4  ;;  %v8563_v48 = vrot.slane %v8538_v35, 9 }
  0x6d   : > { %v1828_v59 = vrot.slane %v8535_v47, 5  ;;  %v1500_v24 = vrot.slane %v1498_v13, 5  ;;  %v1832_v47 = vrot.slane %v8537_v33, 5  ;;  %v8461_v11 = vld [vmem:[%s9868_s8 + $0x68] sm:$0xf] }
  0x6e   : > { %v1445_v6 = vor.u32 %v1444_v58, %v1441_v57  ;;  %v1824_v57 = vrot.slane %v8533_v45, 5  ;;  %v8561_v58 = vrot.slane %v8534_v46, 9  ;;  %v9689_v46 = vld [vmem:[%s9868_s8 + $0x54] sm:$0xf0]  ;;  %v9682_v13 = vld [vmem:[%s9868_s8 + $0x6c] sm:$0xf0] }
  0x70   : > { %v1446_v19 = vrot.slane %v1445_v6, 4  ;;  %v1829_v6 = vsel %vm9870_vm4, %v8561_v58, %v1828_v59  ;;  %v8505_v59 = vld [vmem:[%s9868_s8 + $0x80] sm:$0xf] }
  0x72   : > { %v1451_v29 = vsel %vm9900_vm7, %v1446_v19, %v1450_v20  ;;  %v9681_v20 = vld [vmem:[%s9868_s8 + $0x4c] sm:$0xf0] }
  0x73   : > { %v1615_v39 = vunpack.c.l.b16 %v1451_v29 }
  0x75   : > { %8398 = vmatmul.msk.bf16.gmra.mxu1 %vm351_vm3, %v759_v16  ;;  %8475 = vmatmul.msk.bf16.vlgmr.msrb.gmra.mxu3 %vm351_vm3, %v8446_v17  ;;  %v8497_v16 = vld [vmem:[%s9868_s8 + $0x50] sm:$0xf]  ;;  %v1432_v17 = vrot.slane %v1431_v4, 4  ;;  %v8609_v4 = vor.u32 %v9688_v60, %v8608_v55  ;;  %v1833_v60 = vsel %vm9870_vm4, %v8562_v44, %v1832_v47  ;;  %v9690_v47 = vld [vmem:[%s9868_s8 + $0x74] sm:$0xf0] }
  0x76   : > { %8516 = vmatmul.msk.bf16.vlgmr.msrb.gmra.mxu0 %vm351_vm3, %v1626_v18  ;;  %v1436_v18 = vrot.slane %v1434_v5, 5  ;;  %v1467_v26 = vshrl.u32 %v8497_v16, 16  ;;  %v1470_v27 = vshll.u32 %v8497_v16, 16  ;;  %v1825_v5 = vsel %vm9870_vm4, %v8560_v56, %v1824_v57  ;;  %v8503_v56 = vld [vmem:[%s9868_s8 + $0x78] sm:$0xf] }
  0x77   : > { %v1892_v15 = vunpack.c.l.b16 %v1825_v5  ;;  %v1893_v16 = vunpack.c.l.b16 %v1829_v6  ;;  %v1509_v1 = vshrl.u32 %v8503_v56, 16  ;;  %v1512_v5 = vshll.u32 %v8503_v56, 16 }
  0x78   : > { %v1437_v28 = vsel %vm9900_vm7, %v1432_v17, %v1436_v18  ;;  %v1469_v36 = vrot.slane %v1467_v26, 4  ;;  %v8457_v17 = vld [vmem:[%s9868_s8 + $0x48] sm:$0xf]  ;;  %v8500_v26 = vld [vmem:[%s9868_s8 + $0x6c] sm:$0x1]  ;;  %v1523_v6 = vshrl.u32 %v8505_v59, 16 }
  0x79   : > { %v1614_v38 = vunpack.c.l.b16 %v1437_v28  ;;  %v1906_v29 = vpack.c.b16 %v1893_v16, %v1892_v15  ;;  %v8458_v30 = vor.u32 %v9681_v20, %v8457_v17  ;;  %v8504_v17 = vld [vmem:[%s9868_s8 + $0x7c] sm:$0x1] }
  0x7a   : > { %v1525_v20 = vrot.slane %v1523_v6, 4  ;;  %v1518_v33 = vshll.u32 %v8504_v17, 16 }
  0x7b   : > { %v1628_v52 = vpack.c.b16 %v1615_v39, %v1614_v38  ;;  %v1490_v38 = vshll.u32 %v8500_v26, 16  ;;  %v1501_v39 = vor.u32 %v1500_v24, %v1497_v23  ;;  %v8540_v23 = vld [vmem:[%s9868_s8 + $0x68] sm:$0xe]  ;;  %v8506_v24 = vld [vmem:[%s9868_s8 + $0x84] sm:$0x1]  ;;  %v8462_v26 = vor.u32 %v9682_v13, %v8461_v11 }
  0x7c   : > { %8630 = vmatmul.msk.bf16.vlgmr.msrb.gmra.mxu2 %vm351_vm3, %v8601_v37  ;;  %v1472_v37 = vrot.slane %v1470_v27, 5  ;;  %v8502_v27 = vld [vmem:[%s9868_s8 + $0x74] sm:$0x1]  ;;  %v9683_v11 = vld [vmem:[%s9868_s8 + $0x7c] sm:$0xf0] }
  0x7d   : > { %v1504_v40 = vshll.u32 %v8502_v27, 16  ;;  %v1492_v51 = vrot.slane %v1490_v38, 5  ;;  %v8541_v27 = vld [vmem:[%s9868_s8 + $0x6c] sm:$0x1]  ;;  %v1532_v38 = vshll.u32 %v8506_v24, 16 }
  0x7e   : > { %v1473_v50 = vor.u32 %v1472_v37, %v1469_v36  ;;  %v8539_v36 = vld [vmem:[%s9868_s8 + $0x54] sm:$0x1] }
  0x85   : > { %8573 = vmatmul.msk.bf16.vlgmr.msrb.gmra.mxu1 %vm351_vm3, %v1904_v62  ;;  %8476 = vmatmul.msk.bf16.gmra.mxu3 %vm351_vm3, %v8450_v63  ;;  %v1464_v62 = vrot.slane %v1462_v49, 5  ;;  %v1474_v63 = vrot.slane %v1473_v50, 4  ;;  %v1836_v49 = vrot.slane %v8539_v36, 5 }
  0x86   : > { %8517 = vmatmul.msk.bf16.gmra.mxu0 %vm351_vm3, %v1627_v3 }
  0x87   : > { %v1465_v7 = vsel %vm9900_vm7, %v1460_v61, %v1464_v62  ;;  %v1479_v8 = vsel %vm9900_vm7, %v1474_v63, %v1478_v0  ;;  %v1837_v62 = vsel %vm9870_vm4, %v8563_v48, %v1836_v49  ;;  %v8507_v48 = vld [vmem:[%s9868_s8 + $0x98] sm:$0xf] }
  0x88   : > { %v1616_v18 = vunpack.c.l.b16 %v1465_v7  ;;  %v1617_v19 = vunpack.c.l.b16 %v1479_v8  ;;  %v1526_v7 = vshll.u32 %v8505_v59, 16  ;;  %v1895_v10 = vunpack.c.l.b16 %v1837_v62 }
  0x89   : > { %v1540_v62 = vshll.u32 %v8507_v48, 16 }
  0x8a   : > { %v1629_v31 = vpack.c.b16 %v1617_v19, %v1616_v18  ;;  %v1511_v18 = vrot.slane %v1509_v1, 4  ;;  %v1514_v19 = vrot.slane %v1512_v5, 5 }
  0x8c   : > { %8631 = vmatmul.msk.bf16.gmra.mxu2 %vm351_vm3, %v8605_v21  ;;  %v1483_v21 = vrot.slane %v1481_v9, 4  ;;  %v1894_v9 = vunpack.c.l.b16 %v1833_v60  ;;  %v1515_v36 = vor.u32 %v1514_v19, %v1511_v18  ;;  %v1537_v60 = vshrl.u32 %v8507_v48, 16 }
  0x8e   : > { %v1487_v37 = vor.u32 %v1486_v22, %v1483_v21  ;;  %v1528_v21 = vrot.slane %v1526_v7, 5  ;;  %v1539_v13 = vrot.slane %v1537_v60, 4 }
  0x90   : > { %v1488_v50 = vrot.slane %v1487_v37, 4  ;;  %v1529_v37 = vor.u32 %v1528_v21, %v1525_v20  ;;  %v8510_v20 = vld [vmem:[%s9868_s8 + $0xa4] sm:$0x1] }
  0x92   : > { %v1493_v63 = vsel %vm9900_vm7, %v1488_v50, %v1492_v51  ;;  %v1516_v50 = vrot.slane %v1515_v36, 4  ;;  %v1520_v51 = vrot.slane %v1518_v33, 5  ;;  %v1560_v36 = vshll.u32 %v8510_v20, 16  ;;  %v8514_v20 = vld [vmem:[%s9868_s8 + $0xb4] sm:$0x1] }
  0x93   : > { %v389_v53 = vpop.f32.mrf.mxu0  ;;  %v1618_v15 = vunpack.c.l.b16 %v1493_v63 }
  0x94   : > { %v1521_v6 = vsel %vm9900_vm7, %v1516_v50, %v1520_v51  ;;  %v9691_v51 = vld [vmem:[%s9868_s8 + $0x84] sm:$0xf0] }
  0x95   : > { %8574 = vmatmul.msk.bf16.gmra.mxu1 %vm351_vm3, %v1905_v42  ;;  %8477 = vmatmul.msk.bf16.gmra.mxu3 %vm351_vm3, %v8454_v43  ;;  %v8612_v43 = vld [vmem:[%s9868_s8 + $0x50] sm:$0xf]  ;;  %v1620_v18 = vunpack.c.l.b16 %v1521_v6 }
  0x96   : > { %8518 = vmatmul.msk.bf16.gmra.mxu0 %vm351_vm3, %v1628_v52  ;;  %v1502_v52 = vrot.slane %v1501_v39, 4  ;;  %v8613_v58 = vor.u32 %v9689_v46, %v8612_v43  ;;  %v8564_v39 = vrot.slane %v8540_v23, 9  ;;  %v8616_v46 = vld [vmem:[%s9868_s8 + $0x70] sm:$0xf] }
  0x97   : > { %v8617_v56 = vor.u32 %v9690_v47, %v8616_v46  ;;  %v8511_v46 = vld [vmem:[%s9868_s8 + $0xa8] sm:$0xf] }
  0x98   : > { %v10140_v3 = vpop.f32.mrf.mxu3 }
  0x9b   : > { %v391_v14 = vpop.f32.mrf.mxu0 }
  0x9c   : > { %8632 = vmatmul.msk.bf16.gmra.mxu2 %vm351_vm3, %v8609_v4 }
  0x9f   : > { %v1079_v25 = vpop.f32.mrf.mxu2 }
  0xa0   : > { %v10155_v28 = vpop.f32.mrf.mxu3 }
  0xa2   : > { %v798_v34 = vpop.f32.mrf.mxu1 }
  0xa3   : > { %v838_v41 = vadd.f32 %v798_v34, %v389_v53  ;;  %v394_v42 = vpop.f32.mrf.mxu0  ;;  %v1506_v53 = vrot.slane %v1504_v40, 5  ;;  %v1840_v40 = vrot.slane %v8541_v27, 5  ;;  %v8545_v27 = vld [vmem:[%s9868_s8 + $0x7c] sm:$0x1] }
  0xa4   : > { %v1848_v47 = vrot.slane %v8545_v27, 5 }
  0xa5   : > { %v10162_v45 = vadd.f32 %v1079_v25, %v838_v41  ;;  %8575 = vmatmul.msk.bf16.gmra.mxu1 %vm351_vm3, %v1906_v29  ;;  %8478 = vmatmul.msk.bf16.gmra.mxu3 %vm351_vm3, %v8458_v30  ;;  %v1507_v0 = vsel %vm9900_vm7, %v1502_v52, %v1506_v53  ;;  %v1907_v25 = vpack.c.b16 %v1895_v10, %v1894_v9  ;;  %v8542_v29 = vld [vmem:[%s9868_s8 + $0x70] sm:$0xe]  ;;  %v8543_v30 = vld [vmem:[%s9868_s8 + $0x74] sm:$0x1]  ;;  %v1530_v52 = vrot.slane %v1529_v37, 4 }
  0xa6   : > { %8519 = vmatmul.msk.bf16.gmra.mxu0 %vm351_vm3, %v1629_v31  ;;  %v1619_v16 = vunpack.c.l.b16 %v1507_v0  ;;  %v8565_v41 = vrot.slane %v8542_v29, 9  ;;  %v1844_v43 = vrot.slane %v8543_v30, 5  ;;  %v1534_v53 = vrot.slane %v1532_v38, 5  ;;  %v8465_v10 = vld [vmem:[%s9868_s8 + $0x78] sm:$0xf] }
  0xa7   : > { %v1081_v55 = vpop.f32.mrf.mxu2 }
  0xa8   : > { %v10169_v57 = vpop.f32.mrf.mxu3  ;;  %v1630_v32 = vpack.c.b16 %v1619_v16, %v1618_v15  ;;  %v1845_v59 = vsel %vm9870_vm4, %v8565_v41, %v1844_v43  ;;  %v1535_v7 = vsel %vm9900_vm7, %v1530_v52, %v1534_v53  ;;  %v1542_v16 = vrot.slane %v1540_v62, 5  ;;  %v8620_v41 = vld [vmem:[%s9868_s8 + $0x80] sm:$0xf] }
  0xa9   : > { %v1621_v19 = vunpack.c.l.b16 %v1535_v7 }
  0xaa   : > { %v800_v61 = vpop.f32.mrf.mxu1  ;;  %v1543_v33 = vor.u32 %v1542_v16, %v1539_v13 }
  0xab   : > { %v839_v2 = vadd.f32 %v800_v61, %v391_v14  ;;  %v396_v4 = vpop.f32.mrf.mxu0  ;;  %v1631_v38 = vpack.c.b16 %v1621_v19, %v1620_v18 }
  0xac   : > { %8633 = vmatmul.msk.bf16.gmra.mxu2 %vm351_vm3, %v8613_v58  ;;  %v1841_v58 = vsel %vm9870_vm4, %v8564_v39, %v1840_v40  ;;  %v1544_v52 = vrot.slane %v1543_v33, 4 }
  0xad   : > { %v10181_v8 = vadd.f32 %v1081_v55, %v839_v2  ;;  %v1896_v9 = vunpack.c.l.b16 %v1841_v58  ;;  %v1568_v58 = vshll.u32 %v8511_v46, 16 }
  0xaf   : > { %v1084_v14 = vpop.f32.mrf.mxu2  ;;  %v1570_v13 = vrot.slane %v1568_v58, 5  ;;  %v8640_v58 = vld [vmem:[%s9868_s8 + $0x18] sm:$0xf] }
  0xb0   : > { %v10186_v22 = vpop.f32.mrf.mxu3 }
  0xb2   : > { %v803_v31 = vpop.f32.mrf.mxu1 }
  0xb3   : > { %v840_v34 = vadd.f32 %v803_v31, %v394_v42  ;;  %v10193_v35 = vpop.f32.mrf.mxu0  ;;  %v8509_v42 = vld [vmem:[%s9868_s8 + $0xa0] sm:$0xf] }
  0xb4   : > { %v1551_v63 = vshrl.u32 %v8509_v42, 16  ;;  %v1554_v0 = vshll.u32 %v8509_v42, 16  ;;  %v8546_v31 = vld [vmem:[%s9868_s8 + $0x80] sm:$0xe] }
  0xb5   : > { %v10195_v44 = vadd.f32 %v1084_v14, %v840_v34  ;;  %8576 = vmatmul.msk.bf16.gmra.mxu1 %vm351_vm3, %v1907_v25  ;;  %8479 = vmatmul.msk.bf16.gmra.mxu3 %vm351_vm3, %v8462_v26  ;;  %v8466_v25 = vor.u32 %v9683_v11, %v8465_v10  ;;  %v8544_v26 = vld [vmem:[%s9868_s8 + $0x78] sm:$0xe]  ;;  %v8567_v48 = vrot.slane %v8546_v31, 9  ;;  %v8512_v11 = vld [vmem:[%s9868_s8 + $0xac] sm:$0x1] }
  0xb6   : > { %8520 = vmatmul.msk.bf16.gmra.mxu0 %vm351_vm3, %v1630_v32  ;;  %v1553_v14 = vrot.slane %v1551_v63, 4  ;;  %v1556_v17 = vrot.slane %v1554_v0, 5  ;;  %v8547_v32 = vld [vmem:[%s9868_s8 + $0x84] sm:$0x1]  ;;  %v8566_v43 = vrot.slane %v8544_v26, 9  ;;  %v8621_v63 = vor.u32 %v9691_v51, %v8620_v41 }
  0xb7   : > { %v1086_v49 = vpop.f32.mrf.mxu2  ;;  %v8550_v26 = vld [vmem:[%s9868_s8 + $0xa0] sm:$0xe]  ;;  %v1574_v27 = vshll.u32 %v8512_v11, 16  ;;  %v8551_v31 = vld [vmem:[%s9868_s8 + $0xa4] sm:$0x1] }
  0xb8   : > { %v828_v55 = vpop.f32.mrf.mxu3  ;;  %v1557_v34 = vor.u32 %v1556_v17, %v1553_v14  ;;  %v1849_v0 = vsel %vm9870_vm4, %v8566_v43, %v1848_v47  ;;  %v8639_v11 = vld [vmem:[%s9868_s8 + $0x14] sm:$0x1] }
  0xb9   : > { %v10209_v61 = vadd.f32 %v828_v55, %v10140_v3  ;;  %v1897_v3 = vunpack.c.l.b16 %v1845_v59  ;;  %v1565_v55 = vshrl.u32 %v8511_v46, 16  ;;  %v1898_v14 = vunpack.c.l.b16 %v1849_v0  ;;  %v8552_v0 = vld [vmem:[%s9868_s8 + $0xa8] sm:$0xe] }
  0xba   : > { %v805_v1 = vpop.f32.mrf.mxu1  ;;  %v1558_v53 = vrot.slane %v1557_v34, 4  ;;  %v1588_v34 = vshll.u32 %v8514_v20, 16 }
  0xbb   : > { %v841_v2 = vadd.f32 %v805_v1, %v396_v4  ;;  %v10211_v5 = vpop.f32.mrf.mxu0  ;;  %v8508_v4 = vld [vmem:[%s9868_s8 + $0x9c] sm:$0x1]  ;;  %v1908_v24 = vpack.c.b16 %v1897_v3, %v1896_v9  ;;  %v1567_v3 = vrot.slane %v1565_v55, 4 }
  0xbc   : > { %8634 = vmatmul.msk.bf16.gmra.mxu2 %vm351_vm3, %v8617_v56  ;;  %v1546_v29 = vshll.u32 %v8508_v4, 16 }
  0xbd   : > { %v10220_v15 = vadd.f32 %v1086_v49, %v841_v2  ;;  %v8513_v49 = vld [vmem:[%s9868_s8 + $0xb0] sm:$0xf] }
  0xbe   : > { %v1548_v42 = vrot.slane %v1546_v29, 5  ;;  %v1579_v59 = vshrl.u32 %v8513_v49, 16  ;;  %v1582_v60 = vshll.u32 %v8513_v49, 16  ;;  %v1576_v49 = vrot.slane %v1574_v27, 5  ;;  %v10301_v27 = vld [vmem:[%s9868_s8 + $0xa8] sm:$0xf] }
  0xbf   : > { %v1089_v21 = vpop.f32.mrf.mxu2 }
  0xc0   : > { %v830_v23 = vpop.f32.mrf.mxu3  ;;  %v1549_v6 = vsel %vm9900_vm7, %v1544_v52, %v1548_v42  ;;  %v1581_v4 = vrot.slane %v1579_v59, 4  ;;  %v1584_v16 = vrot.slane %v1582_v60, 5  ;;  %v1860_v42 = vrot.slane %v8551_v31, 5  ;;  %v8624_v60 = vld [vmem:[%s9868_s8 + $0xa0] sm:$0xf] }
  0xc1   : > { %v10227_v30 = vadd.f32 %v830_v23, %v10155_v28  ;;  %v1852_v28 = vrot.slane %v8547_v32, 5  ;;  %v1622_v18 = vunpack.c.l.b16 %v1549_v6  ;;  %v9684_v23 = vld [vmem:[%s9868_s8 + $0x9c] sm:$0xf0]  ;;  %v1571_v32 = vor.u32 %v1570_v13, %v1567_v3 }
  0xc2   : > { %v808_v37 = vpop.f32.mrf.mxu1  ;;  %v1585_v33 = vor.u32 %v1584_v16, %v1581_v4  ;;  %v2252_v13 = vshrl.u32 %v8640_v58, 16  ;;  %v2255_v4 = vshll.u32 %v8640_v58, 16 }
  0xc3   : > { %v842_v39 = vadd.f32 %v808_v37, %v10193_v35  ;;  %v10232_v40 = vpop.f32.mrf.mxu0  ;;  %v1562_v35 = vrot.slane %v1560_v36, 5  ;;  %v1853_v2 = vsel %vm9870_vm4, %v8567_v48, %v1852_v28  ;;  %v8638_v36 = vld [vmem:[%s9868_s8 + $0x10] sm:$0xf]  ;;  %v8569_v48 = vrot.slane %v8550_v26, 9 }
  0xc4   : > { %v1899_v17 = vunpack.c.l.b16 %v1853_v2  ;;  %v2238_v51 = vshrl.u32 %v8638_v36, 16  ;;  %v2241_v52 = vshll.u32 %v8638_v36, 16  ;;  %v1572_v55 = vrot.slane %v1571_v32, 4  ;;  %v8553_v2 = vld [vmem:[%s9868_s8 + $0xac] sm:$0x1] }
  0xc5   : > { %v10237_v50 = vadd.f32 %v1089_v21, %v842_v39  ;;  %8577 = vmatmul.msk.bf16.gmra.mxu1 %vm351_vm3, %v1908_v24  ;;  %8480 = vmatmul.msk.bf16.gmra.mxu3 %vm351_vm3, %v8466_v25  ;;  %v1563_v7 = vsel %vm9900_vm7, %v1558_v53, %v1562_v35  ;;  %v8548_v24 = vld [vmem:[%s9868_s8 + $0x98] sm:$0xe]  ;;  %v8549_v25 = vld [vmem:[%s9868_s8 + $0x9c] sm:$0x1] }
  0xc6   : > { %8521 = vmatmul.msk.bf16.gmra.mxu0 %vm351_vm3, %v1631_v38  ;;  %v1623_v19 = vunpack.c.l.b16 %v1563_v7  ;;  %v1909_v38 = vpack.c.b16 %v1899_v17, %v1898_v14  ;;  %v8568_v46 = vrot.slane %v8548_v24, 9  ;;  %v1856_v47 = vrot.slane %v8549_v25, 5  ;;  %v8641_v25 = vld [vmem:[%s9868_s8 + $0x1c] sm:$0x1] }
  0xc7   : > { %v1091_v56 = vpop.f32.mrf.mxu2  ;;  %v2240_v6 = vrot.slane %v2238_v51, 4  ;;  %v2243_v7 = vrot.slane %v2241_v52, 5  ;;  %v1577_v3 = vsel %vm9900_vm7, %v1572_v55, %v1576_v49  ;;  %v1864_v24 = vrot.slane %v8553_v2, 5  ;;  %v8882_v55 = vld [vmem:[%s12035_s1 + $0x2c] sm:$0xf] }
  0xc8   : > { %v833_v62 = vpop.f32.mrf.mxu3  ;;  %v1632_v41 = vpack.c.b16 %v1623_v19, %v1622_v18  ;;  %v8554_v18 = vld [vmem:[%s9868_s8 + $0xb0] sm:$0xe]  ;;  %v10306_v31 = vunpack.c.l.b16 %v1577_v3 }
  0xc9   : > { %v10246_v1 = vadd.f32 %v833_v62, %v10169_v57  ;;  %v9692_v62 = vld [vmem:[%s9868_s8 + $0xa4] sm:$0xf0] }
  0xca   : > { %v810_v9 = vpop.f32.mrf.mxu1  ;;  %v8625_v14 = vor.u32 %v9692_v62, %v8624_v60  ;;  %v8680_v60 = vld [vmem:[%s9868_s8 + $0x14] sm:$0x1]  ;;  %v3676_v62 = vsel %vm376_vm0, %v8882_v55, 0 }
  0xcb   : > { %v843_v10 = vadd.f32 %v810_v9, %v10211_v5  ;;  %v10255_v57 = vpop.f32.mrf.mxu0  ;;  %v8469_v5 = vld [vmem:[%s9868_s8 + $0x98] sm:$0xf]  ;;  %3685 = vmatpush.bf16.msrb.mxu3 %v3676_v62 }
  0xcc   : > { %8635 = vmatmul.msk.bf16.gmra.mxu2 %vm351_vm3, %v8621_v63  ;;  %v8470_v39 = vor.u32 %v9684_v23, %v8469_v5  ;;  %v1857_v63 = vsel %vm9870_vm4, %v8568_v46, %v1856_v47  ;;  %v8555_v5 = vld [vmem:[%s9868_s8 + $0xb4] sm:$0x1]  ;;  %v8570_v23 = vrot.slane %v8552_v0, 9  ;;  %v2257_v46 = vrot.slane %v2255_v4, 5 }
  0xcd   : > { %v10260_v21 = vadd.f32 %v1091_v56, %v843_v10  ;;  %v1586_v56 = vrot.slane %v1585_v33, 4  ;;  %v1900_v17 = vunpack.c.l.b16 %v1857_v63  ;;  %v2244_v33 = vor.u32 %v2243_v7, %v2240_v6  ;;  %v8681_v6 = vld [vmem:[%s9868_s8 + $0x18] sm:$0xe]  ;;  %v8682_v7 = vld [vmem:[%s9868_s8 + $0x1c] sm:$0x1] }
  0xce   : > { %v1868_v47 = vrot.slane %v8555_v5, 5  ;;  %v10328_v52 = vsel %vm9870_vm4, %v8570_v23, %v1864_v24  ;;  %v8642_v5 = vld [vmem:[%s9868_s8 + $0x20] sm:$0xf] }
  0xcf   : > { %v1094_v29 = vpop.f32.mrf.mxu2 }
  0xd0   : > { %v835_v37 = vpop.f32.mrf.mxu3 }
  0xd1   : > { %v10270_v43 = vadd.f32 %v835_v37, %v10186_v22  ;;  %v1590_v22 = vrot.slane %v1588_v34, 5  ;;  %v10314_v37 = vld [vmem:[%s9868_s8 + $0xb0] sm:$0xf] }
  0xd2   : > { %v813_v28 = vpop.f32.mrf.mxu1 }
  0xd3   : > { %v844_v53 = vadd.f32 %v813_v28, %v10232_v40  ;;  %v10273_v35 = vpop.f32.mrf.mxu0  ;;  %v1861_v40 = vsel %vm9870_vm4, %v8569_v48, %v1860_v42  ;;  %v1591_v10 = vsel %vm9900_vm7, %v1586_v56, %v1590_v22  ;;  %v2261_v48 = vshll.u32 %v8641_v25, 16  ;;  %v8793_v28 = vld [vmem:[%s9868_s8 + $0x30] sm:$0xf]  ;;  %v8795_v42 = vld [vmem:[%s9868_s8 + $0x38] sm:$0xf] }
  0xd4   : > { %v1901_v20 = vunpack.c.l.b16 %v1861_v40  ;;  %v10308_v32 = vunpack.c.l.b16 %v1591_v10  ;;  %v9037_v56 = vld [vmem:[%s12035_s1 + $0x38] sm:$0xf]  ;;  %v2245_v22 = vrot.slane %v2244_v33, 4  ;;  %v3111_v3 = vshll.u32 %v8793_v28, 16  ;;  %v8794_v33 = vld [vmem:[%s9868_s8 + $0x34] sm:$0x1] }
  0xd5   : > { %v10276_v59 = vadd.f32 %v1094_v29, %v844_v53  ;;  %8578 = vmatmul.msk.bf16.gmra.mxu1 %vm351_vm3, %v1909_v38  ;;  %8481 = vmatmul.msk.bf16.gmra.mxu3 %vm351_vm3, %v8470_v39  ;;  %v10304_v29 = vld [vmem:[%s9868_s8 + $0xac] sm:$0xf0]  ;;  %v10317_v38 = vld [vmem:[%s9868_s8 + $0xb4] sm:$0xf0]  ;;  %v8571_v39 = vrot.slane %v8554_v18, 9  ;;  %v4545_v63 = vsel %vm376_vm0, %v9037_v56, 0 }
  0xd6   : > { %8522 = vmatmul.msk.bf16.gmra.mxu0 %vm351_vm3, %v1632_v41  ;;  %v2254_v41 = vrot.slane %v2252_v13, 4  ;;  %v8474_v51 = vor.u32 %v10304_v29, %v10301_v27  ;;  %v8679_v53 = vld [vmem:[%s9868_s8 + $0x10] sm:$0xe]  ;;  %v1633_v0 = vpack.c.b16 %v10308_v32, %v10306_v31  ;;  %4554 = vmatpush.bf16.msrb.mxu2 %v4545_v63  ;;  %v3122_v4 = vshrl.u32 %v8795_v42, 16  ;;  %v8644_v29 = vld [vmem:[%s9868_s8 + $0x28] sm:$0xf] }
  0xd7   : > { %v1096_v9 = vpop.f32.mrf.mxu2  ;;  %v10348_v13 = vsel %vm9870_vm4, %v8571_v39, %v1868_v47  ;;  %v2263_v18 = vrot.slane %v2261_v48, 5  ;;  %v2677_v25 = vrot.slane %v8680_v60, 5  ;;  %v2681_v27 = vrot.slane %v8682_v7, 5  ;;  %v8796_v39 = vld [vmem:[%s9868_s8 + $0x3c] sm:$0x1] }
  0xd8   : > { %v1109_v16 = vpop.f32.mrf.mxu3  ;;  %v2258_v2 = vor.u32 %v2257_v46, %v2254_v41  ;;  %v3124_v41 = vrot.slane %v3122_v4, 4  ;;  %v2266_v47 = vshrl.u32 %v8642_v5, 16  ;;  %v2269_v48 = vshll.u32 %v8642_v5, 16 }
  0xd9   : > { %v10296_v19 = vadd.f32 %v1109_v16, %v10209_v61  ;;  %v2247_v61 = vshll.u32 %v8639_v11, 16  ;;  %v8629_v11 = vor.u32 %v10317_v38, %v10314_v37  ;;  %v3125_v16 = vshll.u32 %v8795_v42, 16 }
  0xda   : > { %v815_v26 = vpop.f32.mrf.mxu1  ;;  %v1903_v42 = vunpack.c.l.b16 %v10348_v13  ;;  %v2280_v55 = vshrl.u32 %v8644_v29, 16  ;;  %v2283_v56 = vshll.u32 %v8644_v29, 16 }
  0xdb   : > { %v845_v34 = vadd.f32 %v815_v26, %v10255_v57  ;;  %v10311_v36 = vpop.f32.mrf.mxu0  ;;  %v1910_v57 = vpack.c.b16 %v1901_v20, %v1900_v17  ;;  %v2249_v58 = vrot.slane %v2247_v61, 5  ;;  %v1902_v17 = vunpack.c.l.b16 %v10328_v52 }
  0xdc   : > { %8636 = vmatmul.msk.bf16.gmra.mxu2 %vm351_vm3, %v8625_v14  ;;  %v8711_v20 = vrot.slane %v8679_v53, 9  ;;  %v8712_v26 = vrot.slane %v8681_v6, 9  ;;  %v3127_v46 = vrot.slane %v3125_v16, 5  ;;  %v8980_v53 = vld [vmem:[%s12035_s1 + $0x34] sm:$0xf]  ;;  %v2282_v5 = vrot.slane %v2280_v55, 4 }
  0xdd   : > { %v10322_v49 = vadd.f32 %v1096_v9, %v845_v34  ;;  %v3108_v9 = vshrl.u32 %v8793_v28, 16  ;;  %v2250_v24 = vsel %vm9900_vm7, %v2245_v22, %v2249_v58  ;;  %v3113_v34 = vrot.slane %v3111_v3, 5  ;;  %v8643_v16 = vld [vmem:[%s9868_s8 + $0x24] sm:$0x1] }
  0xde   : > { %v3117_v22 = vshll.u32 %v8794_v33, 16  ;;  %v4267_v58 = vsel %vm376_vm0, %v8980_v53, 0  ;;  %v10379_v62 = vunpack.c.l.b16 %v2250_v24  ;;  %v2682_v63 = vsel %vm9870_vm4, %v8712_v26, %v2681_v27 }
  0xdf   : > { %v1099_v40 = vpop.f32.mrf.mxu2  ;;  %v3110_v61 = vrot.slane %v3108_v9, 4  ;;  %4276 = vmatpush.bf16.msrb.mxu1 %v4267_v58  ;;  %v3128_v9 = vor.u32 %v3127_v46, %v3124_v41  ;;  %v2268_v3 = vrot.slane %v2266_v47, 4  ;;  %v2275_v41 = vshll.u32 %v8643_v16, 16  ;;  %v8685_v58 = vld [vmem:[%s9868_s8 + $0x28] sm:$0xe] }
  0xe0   : > { %v1111_v10 = vpop.f32.mrf.mxu3  ;;  %v3119_v26 = vrot.slane %v3117_v22, 5  ;;  %v1911_v37 = vpack.c.b16 %v1903_v42, %v1902_v17 }
  0xe1   : > { %v10351_v14 = vadd.f32 %v1111_v10, %v10227_v30  ;;  %v2259_v30 = vrot.slane %v2258_v2, 4  ;;  %v3131_v2 = vshll.u32 %v8796_v39, 16  ;;  %v2271_v10 = vrot.slane %v2269_v48, 5  ;;  %v8683_v48 = vld [vmem:[%s9868_s8 + $0x20] sm:$0xe] }
  0xe2   : > { %v818_v23 = vpop.f32.mrf.mxu1  ;;  %v8713_v42 = vrot.slane %v8683_v48, 9 }
  0xe3   : > { %v846_v31 = vadd.f32 %v818_v23, %v10273_v35  ;;  %v10359_v32 = vpop.f32.mrf.mxu0  ;;  %v8907_v35 = vld [vmem:[%s12035_s1 + $0x30] sm:$0xf]  ;;  %v2264_v7 = vsel %vm9900_vm7, %v2259_v30, %v2263_v18  ;;  %v2285_v23 = vrot.slane %v2283_v56, 5  ;;  %v3133_v33 = vrot.slane %v3131_v2, 5 }
  0xe4   : > { %v2480_v30 = vunpack.c.l.b16 %v2264_v7  ;;  %v2272_v39 = vor.u32 %v2271_v10, %v2268_v3  ;;  %v8686_v7 = vld [vmem:[%s9868_s8 + $0x2c] sm:$0x1] }
  0xe5   : > { %v10363_v28 = vadd.f32 %v1099_v40, %v846_v31  ;;  %8579 = vmatmul.msk.bf16.gmra.mxu1 %vm351_vm3, %v1910_v57  ;;  %8482 = vmatmul.msk.bf16.gmra.mxu3 %vm351_vm3, %v8474_v51  ;;  %v2678_v57 = vsel %vm9870_vm4, %v8711_v20, %v2677_v25  ;;  %v3861_v51 = vsel %vm376_vm0, %v8907_v35, 0  ;;  %v3114_v40 = vor.u32 %v3113_v34, %v3110_v61  ;;  %v8645_v20 = vld [vmem:[%s9868_s8 + $0x2c] sm:$0x1]  ;;  %v8799_v61 = vld [vmem:[%s9868_s8 + $0x48] sm:$0xf] }
  0xe6   : > { %8523 = vmatmul.msk.bf16.gmra.mxu0 %vm351_vm3, %v1633_v0  ;;  %v8797_v0 = vld [vmem:[%s9868_s8 + $0x40] sm:$0xf]  ;;  %v2757_v4 = vunpack.c.l.b16 %v2678_v57  ;;  %v2758_v25 = vunpack.c.l.b16 %v2682_v63  ;;  %v3129_v34 = vrot.slane %v3128_v9, 4  ;;  %v2289_v46 = vshll.u32 %v8645_v20, 16  ;;  %v8684_v35 = vld [vmem:[%s9868_s8 + $0x24] sm:$0x1] }
  0xe7   : > { %v1101_v60 = vpop.f32.mrf.mxu2  ;;  %3870 = vmatpush.bf16.msrb.mxu0 %v3861_v51  ;;  %v3136_v27 = vshrl.u32 %v8797_v0, 16  ;;  %v3139_v29 = vshll.u32 %v8797_v0, 16  ;;  %v3150_v56 = vshrl.u32 %v8799_v61, 16  ;;  %v3153_v57 = vshll.u32 %v8799_v61, 16  ;;  %v8646_v9 = vld [vmem:[%s9868_s8 + $0x40] sm:$0xf] }
  0xe8   : > { %v1114_v6 = vpop.f32.mrf.mxu3  ;;  %v2495_v38 = vpack.c.b16 %v2480_v30, %v10379_v62  ;;  %v2273_v2 = vrot.slane %v2272_v39, 4  ;;  %v2277_v0 = vrot.slane %v2275_v41, 5  ;;  %v2685_v62 = vrot.slane %v8684_v35, 5 }
  0xe9   : > { %v10387_v13 = vadd.f32 %v1114_v6, %v10246_v1  ;;  %v3115_v1 = vrot.slane %v3114_v40, 4  ;;  %v3138_v53 = vrot.slane %v3136_v27, 4  ;;  %v3141_v55 = vrot.slane %v3139_v29, 5  ;;  %v8800_v27 = vld [vmem:[%s9868_s8 + $0x4c] sm:$0x1] }
  0xea   : > { %v820_v24 = vpop.f32.mrf.mxu1  ;;  %v3134_v40 = vsel %vm9900_vm7, %v3129_v34, %v3133_v33  ;;  %v2291_v6 = vrot.slane %v2289_v46, 5  ;;  %v3152_v16 = vrot.slane %v3150_v56, 4  ;;  %v3155_v20 = vrot.slane %v3153_v57, 5 }
  0xeb   : > { %v847_v18 = vadd.f32 %v820_v24, %v10311_v36  ;;  %v10392_v31 = vpop.f32.mrf.mxu0  ;;  %v2286_v36 = vor.u32 %v2285_v23, %v2282_v5  ;;  %v3120_v51 = vsel %vm9900_vm7, %v3115_v1, %v3119_v26  ;;  %v3142_v10 = vor.u32 %v3141_v55, %v3138_v53 }
  0xec   : > { %8637 = vmatmul.msk.bf16.gmra.mxu2 %vm351_vm3, %v8629_v11  ;;  %v2773_v11 = vpack.c.b16 %v2758_v25, %v2757_v4  ;;  %v3349_v24 = vunpack.c.l.b16 %v3120_v51  ;;  %v8714_v25 = vrot.slane %v8685_v58, 9  ;;  %v2689_v26 = vrot.slane %v8686_v7, 5  ;;  %v8647_v58 = vld [vmem:[%s9868_s8 + $0x44] sm:$0x1] }
  0xed   : > { %v10399_v47 = vadd.f32 %v1101_v60, %v847_v18  ;;  %v8798_v60 = vld [vmem:[%s9868_s8 + $0x44] sm:$0x1]  ;;  %v2287_v17 = vrot.slane %v2286_v36, 4  ;;  %v3350_v29 = vunpack.c.l.b16 %v3134_v40  ;;  %v8648_v18 = vld [vmem:[%s9868_s8 + $0x48] sm:$0xf]  ;;  %v2294_v30 = vshrl.u32 %v8646_v9, 16 }
  0xee   : > { %v3145_v4 = vshll.u32 %v8798_v60, 16  ;;  %v2297_v1 = vshll.u32 %v8646_v9, 16  ;;  %v2686_v61 = vsel %vm9870_vm4, %v8713_v42, %v2685_v62  ;;  %v3143_v34 = vrot.slane %v3142_v10, 4  ;;  %v8801_v60 = vld [vmem:[%s9868_s8 + $0x60] sm:$0xf] }
  0xef   : > { %v1104_v22 = vpop.f32.mrf.mxu2  ;;  %v3156_v41 = vor.u32 %v3155_v20, %v3152_v16  ;;  %v3159_v46 = vshll.u32 %v8800_v27, 16  ;;  %v2690_v48 = vsel %vm9870_vm4, %v8714_v25, %v2689_v26  ;;  %v2308_v35 = vshrl.u32 %v8648_v18, 16  ;;  %v8755_v40 = vld [vmem:[%s9868_s8 + $0x30] sm:$0xf]  ;;  %v9694_v9 = vld [vmem:[%s9868_s8 + $0x34] sm:$0xf0] }
  0xf0   : > { %v1116_v63 = vpop.f32.mrf.mxu3  ;;  %v3147_v39 = vrot.slane %v3145_v4, 5  ;;  %v2311_v53 = vshll.u32 %v8648_v18, 16  ;;  %v3365_v56 = vpack.c.b16 %v3350_v29, %v3349_v24  ;;  %v2296_v57 = vrot.slane %v2294_v30, 4 }
  0xf1   : > { %v10414_v52 = vadd.f32 %v1116_v63, %v10270_v43  ;;  %v2278_v43 = vsel %vm9900_vm7, %v2273_v2, %v2277_v0  ;;  %v2759_v51 = vunpack.c.l.b16 %v2686_v61  ;;  %v2760_v2 = vunpack.c.l.b16 %v2690_v48  ;;  %v8687_v61 = vld [vmem:[%s9868_s8 + $0x40] sm:$0xe]  ;;  %v8690_v48 = vld [vmem:[%s9868_s8 + $0x4c] sm:$0x1] }
  0xf2   : > { %v823_v3 = vpop.f32.mrf.mxu1  ;;  %v3148_v0 = vsel %vm9900_vm7, %v3143_v34, %v3147_v39  ;;  %v3161_v7 = vrot.slane %v3159_v46, 5  ;;  %v2310_v10 = vrot.slane %v2308_v35, 4  ;;  %v2313_v4 = vrot.slane %v2311_v53, 5  ;;  %v8688_v34 = vld [vmem:[%s9868_s8 + $0x44] sm:$0x1] }
  0xf3   : > { %v848_v5 = vadd.f32 %v823_v3, %v10359_v32  ;;  %v1670_v23 = vpop.f32.mrf.mxu0  ;;  %v2292_v32 = vsel %vm9900_vm7, %v2287_v17, %v2291_v6  ;;  %v3157_v6 = vrot.slane %v3156_v41, 4  ;;  %v8803_v17 = vld [vmem:[%s9868_s8 + $0x68] sm:$0xf]  ;;  %v8649_v3 = vld [vmem:[%s9868_s8 + $0x4c] sm:$0x1]  ;;  %v2303_v20 = vshll.u32 %v8647_v58, 16 }
  0xf4   : > { %v3167_v24 = vshll.u32 %v8801_v60, 16  ;;  %v3178_v26 = vshrl.u32 %v8803_v17, 16  ;;  %v8756_v27 = vor.u32 %v9694_v9, %v8755_v40  ;;  %v2317_v29 = vshll.u32 %v8649_v3, 16  ;;  %v8689_v39 = vld [vmem:[%s9868_s8 + $0x48] sm:$0xe] }
  0xf5   : > { %v10422_v33 = vadd.f32 %v1104_v22, %v848_v5  ;;  %8580 = vmatmul.msk.bf16.gmra.mxu1 %vm351_vm3, %v1911_v37  ;;  %8671 = vmatmul.msk.bf16.vlgmr.msra.gmra.mxu3 %vm351_vm3, %v2495_v38  ;;  %v2299_v22 = vrot.slane %v2297_v1, 5  ;;  %v10434_v38 = vunpack.c.l.b16 %v2278_v43  ;;  %v3164_v5 = vshrl.u32 %v8801_v60, 16  ;;  %v8804_v40 = vld [vmem:[%s9868_s8 + $0x6c] sm:$0x1] }
  0xf6   : > { %8728 = vmatmul.msk.bf16.vlgmr.msra.gmra.mxu0 %vm351_vm3, %v2773_v11  ;;  %v10436_v11 = vunpack.c.l.b16 %v2292_v32  ;;  %v2774_v30 = vpack.c.b16 %v2760_v2, %v2759_v51  ;;  %v10454_v1 = vunpack.c.l.b16 %v3148_v0  ;;  %v2314_v32 = vor.u32 %v2313_v4, %v2310_v10 }
  0xf7   : > { %v1106_v36 = vpop.f32.mrf.mxu2  ;;  %v2300_v16 = vor.u32 %v2299_v22, %v2296_v57  ;;  %v3166_v35 = vrot.slane %v3164_v5, 4  ;;  %v3169_v53 = vrot.slane %v3167_v24, 5  ;;  %v8802_v57 = vld [vmem:[%s9868_s8 + $0x64] sm:$0x1]  ;;  %v3180_v22 = vrot.slane %v3178_v26, 4 }
  0xf8   : > { %v1264_v55 = vpop.f32.mrf.mxu3  ;;  %v2496_v18 = vpack.c.b16 %v10436_v11, %v10434_v38  ;;  %v8650_v38 = vld [vmem:[%s9868_s8 + $0x50] sm:$0xf]  ;;  %v2319_v51 = vrot.slane %v2317_v29, 5  ;;  %v8715_v58 = vrot.slane %v8687_v61, 9  ;;  %v2693_v60 = vrot.slane %v8688_v34, 5 }
  0xf9   : > { %v1304_v37 = vadd.f32 %v1264_v55, %v10162_v45  ;;  %v2301_v46 = vrot.slane %v2300_v16, 4  ;;  %v3170_v9 = vor.u32 %v3169_v53, %v3166_v35  ;;  %v2322_v3 = vshrl.u32 %v8650_v38, 16 }
  0xfa   : > { %v825_v63 = vpop.f32.mrf.mxu1  ;;  %v2325_v10 = vshll.u32 %v8650_v38, 16  ;;  %v8653_v38 = vld [vmem:[%s9868_s8 + $0x5c] sm:$0x1] }
  0xfb   : > { %v849_v45 = vadd.f32 %v825_v63, %v10392_v31  ;;  %v1672_v42 = vpop.f32.mrf.mxu0  ;;  %v1710_v62 = vadd.f32 %v1670_v23, %v1304_v37  ;;  %v3181_v31 = vshll.u32 %v8803_v17, 16  ;;  %v3162_v23 = vsel %vm9900_vm7, %v3157_v6, %v3161_v7 }
  0xfc   : > { %8826 = vmatmul.msk.bf16.vlgmr.msra.gmra.mxu2 %vm351_vm3, %v3365_v56  ;;  %v3352_v56 = vunpack.c.l.b16 %v3162_v23  ;;  %v8716_v63 = vrot.slane %v8689_v39, 9  ;;  %v2315_v7 = vrot.slane %v2314_v32, 4  ;;  %v2697_v17 = vrot.slane %v8690_v48, 5 }
  0xfd   : > { %v10448_v25 = vadd.f32 %v1106_v36, %v849_v45  ;;  %v2305_v36 = vrot.slane %v2303_v20, 5  ;;  %v3183_v37 = vrot.slane %v3181_v31, 5  ;;  %v8652_v45 = vld [vmem:[%s9868_s8 + $0x58] sm:$0xf]  ;;  %v3187_v20 = vshll.u32 %v8804_v40, 16 }
  0xfe   : > { %v2339_v5 = vshll.u32 %v8652_v45, 16  ;;  %v2320_v31 = vsel %vm9900_vm7, %v2315_v7, %v2319_v51  ;;  %v2698_v23 = vsel %vm9870_vm4, %v8716_v63, %v2697_v17  ;;  %v2345_v17 = vshll.u32 %v8653_v38, 16 }
  0xff   : > { %v2133_v43 = vpop.f32.mrf.mxu2  ;;  %v3184_v16 = vor.u32 %v3183_v37, %v3180_v22  ;;  %v2306_v26 = vsel %vm9900_vm7, %v2301_v46, %v2305_v36  ;;  %v3189_v34 = vrot.slane %v3187_v20, 5  ;;  %v10482_v46 = vunpack.c.l.b16 %v2320_v31  ;;  %v8651_v36 = vld [vmem:[%s9868_s8 + $0x54] sm:$0x1]  ;;  %v9695_v22 = vld [vmem:[%s9868_s8 + $0x44] sm:$0xf0] }
 0x100   : > { %v1266_v41 = vpop.f32.mrf.mxu3  ;;  %v2341_v35 = vrot.slane %v2339_v5, 5  ;;  %v2762_v37 = vunpack.c.l.b16 %v2698_v23  ;;  %v2331_v40 = vshll.u32 %v8651_v36, 16  ;;  %v8694_v20 = vld [vmem:[%s9868_s8 + $0x5c] sm:$0x1] }
 0x101   : > { %v1305_v55 = vadd.f32 %v1266_v41, %v10181_v8  ;;  %v3173_v8 = vshll.u32 %v8802_v57, 16  ;;  %v3185_v61 = vrot.slane %v3184_v16, 4  ;;  %v10480_v41 = vunpack.c.l.b16 %v2306_v26  ;;  %v8759_v57 = vld [vmem:[%s9868_s8 + $0x40] sm:$0xf]  ;;  %v8693_v16 = vld [vmem:[%s9868_s8 + $0x58] sm:$0xe] }
 0x102   : > { %v1948_v11 = vpop.f32.mrf.mxu1 }
 0x103   : > { %v1988_v2 = vadd.f32 %v1948_v11, %v1710_v62  ;;  %v1675_v0 = vpop.f32.mrf.mxu0  ;;  %v1711_v6 = vadd.f32 %v1672_v42, %v1305_v55  ;;  %v3366_v62 = vpack.c.b16 %v3352_v56, %v10454_v1  ;;  %v2336_v42 = vshrl.u32 %v8652_v45, 16  ;;  %v8691_v45 = vld [vmem:[%s9868_s8 + $0x50] sm:$0xe] }
 0x104   : > { %v2327_v1 = vrot.slane %v2325_v10, 5  ;;  %v3190_v63 = vsel %vm9900_vm7, %v3185_v61, %v3189_v34  ;;  %v2347_v61 = vrot.slane %v2345_v17, 5  ;;  %v8718_v34 = vrot.slane %v8693_v16, 9 }
 0x105   : > { %v10465_v4 = vadd.f32 %v2133_v43, %v1988_v2  ;;  %8785 = vmatmul.msk.bf16.vlgmr.msra.gmra.mxu1 %vm351_vm3, %v8756_v27  ;;  %8672 = vmatmul.msk.bf16.gmra.mxu3 %vm351_vm3, %v2496_v18  ;;  %v2694_v27 = vsel %vm9870_vm4, %v8715_v58, %v2693_v60  ;;  %v3171_v43 = vrot.slane %v3170_v9, 4  ;;  %v3175_v18 = vrot.slane %v3173_v8, 5  ;;  %v8805_v58 = vld [vmem:[%s9868_s8 + $0x70] sm:$0xf]  ;;  %v8807_v2 = vld [vmem:[%s9868_s8 + $0x78] sm:$0xf] }
 0x106   : > { %8729 = vmatmul.msk.bf16.gmra.mxu0 %vm351_vm3, %v2774_v30  ;;  %v2324_v30 = vrot.slane %v2322_v3, 4  ;;  %v2338_v48 = vrot.slane %v2336_v42, 4  ;;  %v8692_v9 = vld [vmem:[%s9868_s8 + $0x54] sm:$0x1]  ;;  %v3195_v42 = vshll.u32 %v8805_v58, 16  ;;  %v3206_v31 = vshrl.u32 %v8807_v2, 16 }
 0x107   : > { %v2135_v24 = vpop.f32.mrf.mxu2  ;;  %v3176_v11 = vsel %vm9900_vm7, %v3171_v43, %v3175_v18  ;;  %v8717_v43 = vrot.slane %v8691_v45, 9  ;;  %v2701_v18 = vrot.slane %v8692_v9, 5 }
 0x108   : > { %v1269_v29 = vpop.f32.mrf.mxu3  ;;  %v2328_v51 = vor.u32 %v2327_v1, %v2324_v30  ;;  %v2342_v7 = vor.u32 %v2341_v35, %v2338_v48  ;;  %v10501_v10 = vunpack.c.l.b16 %v3176_v11  ;;  %v8654_v30 = vld [vmem:[%s9868_s8 + $0x70] sm:$0xf]  ;;  %v8806_v48 = vld [vmem:[%s9868_s8 + $0x74] sm:$0x1] }
 0x109   : > { %v1306_v32 = vadd.f32 %v1269_v29, %v10195_v44  ;;  %v2761_v44 = vunpack.c.l.b16 %v2694_v27  ;;  %v3209_v27 = vshll.u32 %v8807_v2, 16  ;;  %v2333_v29 = vrot.slane %v2331_v40, 5 }
 0x10a   : > { %v1950_v39 = vpop.f32.mrf.mxu1  ;;  %v2329_v26 = vrot.slane %v2328_v51, 4  ;;  %v2353_v38 = vshll.u32 %v8654_v30, 16 }
 0x10b   : > { %v1989_v53 = vadd.f32 %v1950_v39, %v1711_v6  ;;  %v1677_v55 = vpop.f32.mrf.mxu0  ;;  %v1712_v56 = vadd.f32 %v1675_v0, %v1306_v32  ;;  %v8760_v0 = vor.u32 %v9695_v22, %v8759_v57  ;;  %v2497_v6 = vpack.c.b16 %v10482_v46, %v10480_v41  ;;  %v8656_v57 = vld [vmem:[%s9868_s8 + $0x78] sm:$0xf]  ;;  %v8808_v22 = vld [vmem:[%s9868_s8 + $0x7c] sm:$0x1] }
 0x10c   : > { %8827 = vmatmul.msk.bf16.gmra.mxu2 %vm351_vm3, %v3366_v62  ;;  %v2775_v3 = vpack.c.b16 %v2762_v37, %v2761_v44  ;;  %v3192_v62 = vshrl.u32 %v8805_v58, 16  ;;  %v2343_v32 = vrot.slane %v2342_v7, 4  ;;  %v2705_v39 = vrot.slane %v8694_v20, 5 }
 0x10d   : > { %v10492_v60 = vadd.f32 %v2135_v24, %v1989_v53  ;;  %v10505_v24 = vunpack.c.l.b16 %v3190_v63  ;;  %v3197_v53 = vrot.slane %v3195_v42, 5  ;;  %v3211_v44 = vrot.slane %v3209_v27, 5 }
 0x10e   : > { %v3194_v35 = vrot.slane %v3192_v62, 4  ;;  %v2350_v37 = vshrl.u32 %v8654_v30, 16  ;;  %v2348_v51 = vsel %vm9900_vm7, %v2343_v32, %v2347_v61  ;;  %v3201_v58 = vshll.u32 %v8806_v48, 16  ;;  %v8811_v61 = vld [vmem:[%s9868_s8 + $0x98] sm:$0xf] }
 0x10f   : > { %v2138_v8 = vpop.f32.mrf.mxu2  ;;  %v2364_v63 = vshrl.u32 %v8656_v57, 16  ;;  %v2367_v40 = vshll.u32 %v8656_v57, 16  ;;  %v3215_v7 = vshll.u32 %v8808_v22, 16  ;;  %v3367_v45 = vpack.c.b16 %v10505_v24, %v10501_v10  ;;  %v8809_v24 = vld [vmem:[%s9868_s8 + $0x90] sm:$0xf] }
 0x110   : > { %v1271_v5 = vpop.f32.mrf.mxu3  ;;  %v10530_v62 = vunpack.c.l.b16 %v2348_v51  ;;  %v3220_v57 = vshrl.u32 %v8809_v24, 16 }
 0x111   : > { %v1307_v23 = vadd.f32 %v1271_v5, %v10220_v15  ;;  %v3208_v15 = vrot.slane %v3206_v31, 4  ;;  %v8655_v5 = vld [vmem:[%s9868_s8 + $0x74] sm:$0x1]  ;;  %v2369_v10 = vrot.slane %v2367_v40, 5  ;;  %v3217_v32 = vrot.slane %v3215_v7, 5 }
 0x112   : > { %v1953_v1 = vpop.f32.mrf.mxu1  ;;  %v2359_v48 = vshll.u32 %v8655_v5, 16  ;;  %v8810_v5 = vld [vmem:[%s9868_s8 + $0x94] sm:$0x1] }
 0x113   : > { %v1990_v41 = vadd.f32 %v1953_v1, %v1712_v56  ;;  %v1680_v46 = vpop.f32.mrf.mxu0  ;;  %v1713_v36 = vadd.f32 %v1677_v55, %v1307_v23  ;;  %v2334_v56 = vsel %vm9900_vm7, %v2329_v26, %v2333_v29  ;;  %v2702_v55 = vsel %vm9870_vm4, %v8717_v43, %v2701_v18  ;;  %v8657_v26 = vld [vmem:[%s9868_s8 + $0x7c] sm:$0x1] }
 0x114   : > { %v3212_v9 = vor.u32 %v3211_v44, %v3208_v15  ;;  %v10528_v20 = vunpack.c.l.b16 %v2334_v56  ;;  %v2763_v42 = vunpack.c.l.b16 %v2702_v55  ;;  %v3203_v23 = vrot.slane %v3201_v58, 5  ;;  %v8696_v58 = vld [vmem:[%s9868_s8 + $0x74] sm:$0x1] }
 0x115   : > { %v10512_v11 = vadd.f32 %v2138_v8, %v1990_v41  ;;  %8786 = vmatmul.msk.bf16.gmra.mxu1 %vm351_vm3, %v8760_v0  ;;  %8673 = vmatmul.msk.bf16.gmra.mxu3 %vm351_vm3, %v2497_v6  ;;  %v2706_v0 = vsel %vm9870_vm4, %v8718_v34, %v2705_v39  ;;  %v3198_v6 = vor.u32 %v3197_v53, %v3194_v35  ;;  %v2352_v8 = vrot.slane %v2350_v37, 4  ;;  %v9696_v34 = vld [vmem:[%s9868_s8 + $0x64] sm:$0xf0] }
 0x116   : > { %8730 = vmatmul.msk.bf16.gmra.mxu0 %vm351_vm3, %v2775_v3  ;;  %v2355_v3 = vrot.slane %v2353_v38, 5  ;;  %v2764_v27 = vunpack.c.l.b16 %v2706_v0  ;;  %v2366_v29 = vrot.slane %v2364_v63, 4  ;;  %v3213_v39 = vrot.slane %v3212_v9, 4  ;;  %v8697_v63 = vld [vmem:[%s9868_s8 + $0x78] sm:$0xe] }
 0x117   : > { %v2140_v2 = vpop.f32.mrf.mxu2  ;;  %v3199_v1 = vrot.slane %v3198_v6, 4  ;;  %v2373_v35 = vshll.u32 %v8657_v26, 16  ;;  %v3234_v15 = vshrl.u32 %v8811_v61, 16  ;;  %v3237_v44 = vshll.u32 %v8811_v61, 16 }
 0x118   : > { %v1274_v17 = vpop.f32.mrf.mxu3  ;;  %v2356_v41 = vor.u32 %v2355_v3, %v2352_v8  ;;  %v2370_v22 = vor.u32 %v2369_v10, %v2366_v29  ;;  %v2498_v56 = vpack.c.b16 %v10530_v62, %v10528_v20  ;;  %v2776_v55 = vpack.c.b16 %v2764_v27, %v2763_v42 }
 0x119   : > { %v1308_v16 = vadd.f32 %v1274_v17, %v10237_v50  ;;  %v8763_v50 = vld [vmem:[%s9868_s8 + $0x60] sm:$0xf]  ;;  %v3204_v51 = vsel %vm9900_vm7, %v3199_v1, %v3203_v23  ;;  %v2361_v6 = vrot.slane %v2359_v48, 5  ;;  %v2375_v7 = vrot.slane %v2373_v35, 5  ;;  %v8698_v17 = vld [vmem:[%s9868_s8 + $0x7c] sm:$0x1] }
 0x11a   : > { %v1955_v31 = vpop.f32.mrf.mxu1  ;;  %v8764_v38 = vor.u32 %v9696_v34, %v8763_v50  ;;  %v2357_v0 = vrot.slane %v2356_v41, 4  ;;  %v3222_v8 = vrot.slane %v3220_v57, 4  ;;  %v2371_v62 = vrot.slane %v2370_v22, 4  ;;  %v8660_v1 = vld [vmem:[%s9868_s8 + $0x88] sm:$0xf] }
 0x11b   : > { %v1991_v43 = vadd.f32 %v1955_v31, %v1713_v36  ;;  %v1682_v18 = vpop.f32.mrf.mxu0  ;;  %v1714_v30 = vadd.f32 %v1680_v46, %v1308_v16  ;;  %v3223_v36 = vshll.u32 %v8809_v24, 16  ;;  %v8695_v46 = vld [vmem:[%s9868_s8 + $0x70] sm:$0xe]  ;;  %v8658_v16 = vld [vmem:[%s9868_s8 + $0x80] sm:$0xf]  ;;  %v2709_v42 = vrot.slane %v8696_v58, 5 }
 0x11c   : > { %8828 = vmatmul.msk.bf16.gmra.mxu2 %vm351_vm3, %v3367_v45  ;;  %v8719_v9 = vrot.slane %v8695_v46, 9  ;;  %v3236_v26 = vrot.slane %v3234_v15, 4  ;;  %v3239_v31 = vrot.slane %v3237_v44, 5  ;;  %v8720_v10 = vrot.slane %v8697_v63, 9 }
 0x11d   : > { %v10539_v53 = vadd.f32 %v2140_v2, %v1991_v43  ;;  %v3218_v2 = vsel %vm9900_vm7, %v3213_v39, %v3217_v32  ;;  %v3225_v3 = vrot.slane %v3223_v36, 5  ;;  %v2713_v24 = vrot.slane %v8698_v17, 5  ;;  %v8812_v43 = vld [vmem:[%s9868_s8 + $0x9c] sm:$0x1] }
 0x11e   : > { %v3355_v50 = vunpack.c.l.b16 %v3204_v51  ;;  %v2378_v32 = vshrl.u32 %v8658_v16, 16  ;;  %v2381_v61 = vshll.u32 %v8658_v16, 16  ;;  %v2362_v39 = vsel %vm9900_vm7, %v2357_v0, %v2361_v6 }
 0x11f   : > { %v2143_v37 = vpop.f32.mrf.mxu2  ;;  %v3229_v41 = vshll.u32 %v8810_v5, 16  ;;  %v3240_v48 = vor.u32 %v3239_v31, %v3236_v26  ;;  %v3243_v35 = vshll.u32 %v8812_v43, 16  ;;  %v2376_v36 = vsel %vm9900_vm7, %v2371_v62, %v2375_v7  ;;  %v8661_v62 = vld [vmem:[%s9868_s8 + $0x8c] sm:$0x1]  ;;  %v8767_v5 = vld [vmem:[%s9868_s8 + $0x70] sm:$0xf] }
 0x120   : > { %v1276_v40 = vpop.f32.mrf.mxu3  ;;  %v2714_v22 = vsel %vm9870_vm4, %v8720_v10, %v2713_v24  ;;  %v2392_v46 = vshrl.u32 %v8660_v1, 16  ;;  %v2395_v15 = vshll.u32 %v8660_v1, 16  ;;  %v10573_v6 = vunpack.c.l.b16 %v2376_v36  ;;  %v9697_v26 = vld [vmem:[%s9868_s8 + $0x74] sm:$0xf0] }
 0x121   : > { %v1309_v45 = vadd.f32 %v1276_v40, %v10260_v21  ;;  %v3356_v21 = vunpack.c.l.b16 %v3218_v2  ;;  %v3231_v40 = vrot.slane %v3229_v41, 5  ;;  %v8813_v2 = vld [vmem:[%s9868_s8 + $0xa0] sm:$0xf]  ;;  %v2766_v7 = vunpack.c.l.b16 %v2714_v22 }
 0x122   : > { %v1958_v20 = vpop.f32.mrf.mxu1  ;;  %v3241_v17 = vrot.slane %v3240_v48, 4  ;;  %v3251_v10 = vshll.u32 %v8813_v2, 16  ;;  %v2401_v1 = vshll.u32 %v8661_v62, 16  ;;  %v8700_v48 = vld [vmem:[%s9868_s8 + $0x84] sm:$0x1] }
 0x123   : > { %v1992_v27 = vadd.f32 %v1958_v20, %v1714_v30  ;;  %v1685_v23 = vpop.f32.mrf.mxu0  ;;  %v1715_v29 = vadd.f32 %v1682_v18, %v1309_v45  ;;  %v3226_v30 = vor.u32 %v3225_v3, %v3222_v8  ;;  %v2710_v18 = vsel %vm9870_vm4, %v8719_v9, %v2709_v42  ;;  %v8815_v9 = vld [vmem:[%s9868_s8 + $0xa8] sm:$0xf]  ;;  %v8659_v20 = vld [vmem:[%s9868_s8 + $0x84] sm:$0x1] }
 0x124   : > { %v2765_v58 = vunpack.c.l.b16 %v2710_v18  ;;  %v3245_v45 = vrot.slane %v3243_v35, 5  ;;  %v2394_v42 = vrot.slane %v2392_v46, 4  ;;  %v3265_v43 = vshll.u32 %v8815_v9, 16  ;;  %v8699_v18 = vld [vmem:[%s9868_s8 + $0x80] sm:$0xe] }
 0x125   : > { %v10556_v34 = vadd.f32 %v2143_v37, %v1992_v27  ;;  %8787 = vmatmul.msk.bf16.gmra.mxu1 %vm351_vm3, %v8764_v38  ;;  %8674 = vmatmul.msk.bf16.gmra.mxu3 %vm351_vm3, %v2498_v56  ;;  %v3368_v37 = vpack.c.b16 %v3356_v21, %v3355_v50  ;;  %v10569_v38 = vunpack.c.l.b16 %v2362_v39  ;;  %v2380_v56 = vrot.slane %v2378_v32, 4  ;;  %v8701_v35 = vld [vmem:[%s9868_s8 + $0x88] sm:$0xe]  ;;  %v8702_v46 = vld [vmem:[%s9868_s8 + $0x8c] sm:$0x1] }
 0x126   : > { %8731 = vmatmul.msk.bf16.gmra.mxu0 %vm351_vm3, %v2776_v55  ;;  %v2383_v55 = vrot.slane %v2381_v61, 5  ;;  %v3227_v63 = vrot.slane %v3226_v30, 4  ;;  %v3248_v27 = vshrl.u32 %v8813_v2, 16  ;;  %v3246_v50 = vsel %vm9900_vm7, %v3241_v17, %v3245_v45  ;;  %v8664_v62 = vld [vmem:[%s9868_s8 + $0xa8] sm:$0xf] }
 0x127   : > { %v2145_v57 = vpop.f32.mrf.mxu2  ;;  %v2387_v21 = vshll.u32 %v8659_v20, 16  ;;  %v8768_v61 = vor.u32 %v9697_v26, %v8767_v5  ;;  %v2499_v39 = vpack.c.b16 %v10573_v6, %v10569_v38  ;;  %v2777_v30 = vpack.c.b16 %v2766_v7, %v2765_v58  ;;  %v8662_v7 = vld [vmem:[%s9868_s8 + $0xa0] sm:$0xf] }
 0x128   : > { %v1279_v44 = vpop.f32.mrf.mxu3  ;;  %v2384_v31 = vor.u32 %v2383_v55, %v2380_v56  ;;  %v3358_v56 = vunpack.c.l.b16 %v3246_v50  ;;  %v8814_v55 = vld [vmem:[%s9868_s8 + $0xa4] sm:$0x1]  ;;  %v3267_v38 = vrot.slane %v3265_v43, 5  ;;  %v2403_v2 = vrot.slane %v2401_v1, 5 }
 0x129   : > { %v1310_v51 = vadd.f32 %v1279_v44, %v10276_v59  ;;  %v2397_v59 = vrot.slane %v2395_v15, 5  ;;  %v3250_v15 = vrot.slane %v3248_v27, 4  ;;  %v3253_v44 = vrot.slane %v3251_v10, 5 }
 0x12a   : > { %v1960_v0 = vpop.f32.mrf.mxu1  ;;  %v2385_v22 = vrot.slane %v2384_v31, 4  ;;  %v2717_v6 = vrot.slane %v8700_v48, 5  ;;  %v8722_v20 = vrot.slane %v8701_v35, 9  ;;  %v2406_v27 = vshrl.u32 %v8662_v7, 16 }
 0x12b   : > { %v1993_v8 = vadd.f32 %v1960_v0, %v1715_v29  ;;  %v1687_v3 = vpop.f32.mrf.mxu0  ;;  %v1716_v16 = vadd.f32 %v1685_v23, %v1310_v51  ;;  %v3232_v29 = vsel %vm9900_vm7, %v3227_v63, %v3231_v40  ;;  %v3262_v23 = vshrl.u32 %v8815_v9, 16  ;;  %v8816_v51 = vld [vmem:[%s9868_s8 + $0xac] sm:$0x1] }
 0x12c   : > { %8829 = vmatmul.msk.bf16.gmra.mxu2 %vm351_vm3, %v3368_v37  ;;  %v2398_v41 = vor.u32 %v2397_v59, %v2394_v42  ;;  %v3357_v36 = vunpack.c.l.b16 %v3232_v29  ;;  %v2389_v40 = vrot.slane %v2387_v21, 5  ;;  %v8721_v0 = vrot.slane %v8699_v18, 9 }
 0x12d   : > { %v10581_v24 = vadd.f32 %v2145_v57, %v1993_v8  ;;  %v3264_v63 = vrot.slane %v3262_v23, 4  ;;  %v2721_v42 = vrot.slane %v8702_v46, 5  ;;  %v3257_v59 = vshll.u32 %v8814_v55, 16  ;;  %v8665_v55 = vld [vmem:[%s9868_s8 + $0xac] sm:$0x1] }
 0x12e   : > { %v2399_v8 = vrot.slane %v2398_v41, 4  ;;  %v3271_v5 = vshll.u32 %v8816_v51, 16  ;;  %v2409_v10 = vshll.u32 %v8662_v7, 16  ;;  %v3369_v23 = vpack.c.b16 %v3358_v56, %v3357_v36  ;;  %v8663_v36 = vld [vmem:[%s9868_s8 + $0xa4] sm:$0x1] }
 0x12f   : > { %v2148_v32 = vpop.f32.mrf.mxu2  ;;  %v3268_v31 = vor.u32 %v3267_v38, %v3264_v63  ;;  %v2390_v43 = vsel %vm9900_vm7, %v2385_v22, %v2389_v40  ;;  %v2718_v21 = vsel %vm9870_vm4, %v8721_v0, %v2717_v6  ;;  %v2408_v48 = vrot.slane %v2406_v27, 4  ;;  %v8817_v51 = vld [vmem:[%s9868_s8 + $0xc0] sm:$0xf]  ;;  %v8819_v40 = vld [vmem:[%s9868_s8 + $0xc8] sm:$0xf] }
 0x130   : > { %v1281_v57 = vpop.f32.mrf.mxu3  ;;  %v2404_v50 = vsel %vm9900_vm7, %v2399_v8, %v2403_v2  ;;  %v2411_v35 = vrot.slane %v2409_v10, 5  ;;  %v2489_v56 = vunpack.c.l.b16 %v2390_v43  ;;  %v8771_v0 = vld [vmem:[%s9868_s8 + $0x90] sm:$0xf]  ;;  %v9698_v6 = vld [vmem:[%s9868_s8 + $0x94] sm:$0xf0]  ;;  %v2429_v8 = vshll.u32 %v8665_v55, 16 }
 0x131   : > { %v1311_v37 = vadd.f32 %v1281_v57, %v10322_v49  ;;  %v3254_v49 = vor.u32 %v3253_v44, %v3250_v15  ;;  %v3269_v18 = vrot.slane %v3268_v31, 4  ;;  %v2490_v63 = vunpack.c.l.b16 %v2404_v50 }
 0x132   : > { %v1963_v58 = vpop.f32.mrf.mxu1  ;;  %v8772_v31 = vor.u32 %v9698_v6, %v8771_v0 }
 0x133   : > { %v1994_v17 = vadd.f32 %v1963_v58, %v1716_v16  ;;  %v1690_v45 = vpop.f32.mrf.mxu0  ;;  %v1717_v9 = vadd.f32 %v1687_v3, %v1311_v37  ;;  %v2420_v16 = vshrl.u32 %v8664_v62, 16  ;;  %v2423_v3 = vshll.u32 %v8664_v62, 16 }
 0x134   : > { %v3279_v62 = vshll.u32 %v8817_v51, 16  ;;  %v2500_v27 = vpack.c.b16 %v2490_v63, %v2489_v56 }
 0x135   : > { %v10598_v26 = vadd.f32 %v2148_v32, %v1994_v17  ;;  %8788 = vmatmul.msk.bf16.gmra.mxu1 %vm351_vm3, %v8768_v61  ;;  %8675 = vmatmul.msk.bf16.gmra.mxu3 %vm351_vm3, %v2499_v39  ;;  %v2722_v32 = vsel %vm9870_vm4, %v8722_v20, %v2721_v42  ;;  %v3255_v61 = vrot.slane %v3254_v49, 4  ;;  %v3259_v39 = vrot.slane %v3257_v59, 5 }
 0x136   : > { %8732 = vmatmul.msk.bf16.gmra.mxu0 %vm351_vm3, %v2777_v30  ;;  %v3273_v30 = vrot.slane %v3271_v5, 5  ;;  %v2422_v22 = vrot.slane %v2420_v16, 4  ;;  %v2425_v46 = vrot.slane %v2423_v3, 5  ;;  %v2768_v38 = vunpack.c.l.b16 %v2722_v32  ;;  %v8703_v3 = vld [vmem:[%s9868_s8 + $0xa0] sm:$0xe] }
 0x137   : > { %v2150_v29 = vpop.f32.mrf.mxu2  ;;  %v3260_v58 = vsel %vm9900_vm7, %v3255_v61, %v3259_v39  ;;  %v2412_v17 = vor.u32 %v2411_v35, %v2408_v48  ;;  %v3276_v20 = vshrl.u32 %v8817_v51, 16  ;;  %v3290_v49 = vshrl.u32 %v8819_v40, 16  ;;  %v8706_v32 = vld [vmem:[%s9868_s8 + $0xac] sm:$0x1] }
 0x138   : > { %v1284_v1 = vpop.f32.mrf.mxu3  ;;  %v3274_v7 = vsel %vm9900_vm7, %v3269_v18, %v3273_v30  ;;  %v3293_v59 = vshll.u32 %v8819_v40, 16  ;;  %v3359_v16 = vunpack.c.l.b16 %v3260_v58  ;;  %v2431_v30 = vrot.slane %v2429_v8, 5  ;;  %v8820_v51 = vld [vmem:[%s9868_s8 + $0xcc] sm:$0x1]  ;;  %v8666_v58 = vld [vmem:[%s9868_s8 + $0xb0] sm:$0xf] }
 0x139   : > { %v1312_v41 = vadd.f32 %v1284_v1, %v10363_v28  ;;  %v2767_v28 = vunpack.c.l.b16 %v2718_v21  ;;  %v3360_v43 = vunpack.c.l.b16 %v3274_v7  ;;  %v2413_v50 = vrot.slane %v2412_v17, 4  ;;  %v8705_v1 = vld [vmem:[%s9868_s8 + $0xa8] sm:$0xe]  ;;  %v8668_v7 = vld [vmem:[%s9868_s8 + $0xb8] sm:$0xf] }
 0x13a   : > { %v1965_v57 = vpop.f32.mrf.mxu1  ;;  %v3281_v18 = vrot.slane %v3279_v62, 5  ;;  %v8724_v56 = vrot.slane %v8705_v1, 9  ;;  %v2729_v55 = vrot.slane %v8706_v32, 5  ;;  %v3299_v6 = vshll.u32 %v8820_v51, 16 }
 0x13b   : > { %v1995_v15 = vadd.f32 %v1965_v57, %v1717_v9  ;;  %v1692_v44 = vpop.f32.mrf.mxu0  ;;  %v1718_v37 = vadd.f32 %v1690_v45, %v1312_v41  ;;  %v2415_v45 = vshll.u32 %v8663_v36, 16  ;;  %v2426_v9 = vor.u32 %v2425_v46, %v2422_v22  ;;  %v8818_v36 = vld [vmem:[%s9868_s8 + $0xc4] sm:$0x1] }
 0x13c   : > { %8830 = vmatmul.msk.bf16.gmra.mxu2 %vm351_vm3, %v3369_v23  ;;  %v2778_v10 = vpack.c.b16 %v2768_v38, %v2767_v28  ;;  %v3278_v41 = vrot.slane %v3276_v20, 4  ;;  %v3292_v22 = vrot.slane %v3290_v49, 4  ;;  %v3295_v46 = vrot.slane %v3293_v59, 5 }
 0x13d   : > { %v10619_v2 = vadd.f32 %v2150_v29, %v1995_v15  ;;  %v8704_v29 = vld [vmem:[%s9868_s8 + $0xa4] sm:$0x1]  ;;  %v2417_v21 = vrot.slane %v2415_v45, 5  ;;  %v2427_v39 = vrot.slane %v2426_v9, 4  ;;  %v8723_v15 = vrot.slane %v8703_v3, 9 }
 0x13e   : > { %v3282_v28 = vor.u32 %v3281_v18, %v3278_v41  ;;  %v3285_v38 = vshll.u32 %v8818_v36, 16  ;;  %v3296_v0 = vor.u32 %v3295_v46, %v3292_v22  ;;  %v3370_v45 = vpack.c.b16 %v3360_v43, %v3359_v16  ;;  %v8821_v41 = vld [vmem:[%s9868_s8 + $0xd0] sm:$0xf]  ;;  %v8823_v18 = vld [vmem:[%s9868_s8 + $0xd8] sm:$0xf] }
 0x13f   : > { %v2153_v42 = vpop.f32.mrf.mxu2  ;;  %v2730_v20 = vsel %vm9870_vm4, %v8724_v56, %v2729_v55  ;;  %v2434_v49 = vshrl.u32 %v8666_v58, 16  ;;  %v2437_v59 = vshll.u32 %v8666_v58, 16  ;;  %v2451_v16 = vshll.u32 %v8668_v7, 16  ;;  %v8669_v56 = vld [vmem:[%s9868_s8 + $0xbc] sm:$0x1] }
 0x140   : > { %v1286_v5 = vpop.f32.mrf.mxu3  ;;  %v3297_v43 = vrot.slane %v3296_v0, 4  ;;  %v3304_v51 = vshrl.u32 %v8821_v41, 16 }
 0x141   : > { %v1313_v23 = vadd.f32 %v1286_v5, %v10399_v47  ;;  %v2725_v47 = vrot.slane %v8704_v29, 5 }
 0x142   : > { %v1968_v61 = vpop.f32.mrf.mxu1 }
 0x143   : > { %v1996_v48 = vadd.f32 %v1968_v61, %v1718_v37  ;;  %v1695_v35 = vpop.f32.mrf.mxu0  ;;  %v1719_v57 = vadd.f32 %v1692_v44, %v1313_v23  ;;  %v2418_v37 = vsel %vm9900_vm7, %v2413_v50, %v2417_v21  ;;  %v2432_v44 = vsel %vm9900_vm7, %v2427_v39, %v2431_v30  ;;  %v8775_v21 = vld [vmem:[%s9868_s8 + $0xa0] sm:$0xf] }
 0x144   : > { %v10643_v9 = vunpack.c.l.b16 %v2418_v37  ;;  %v2726_v8 = vsel %vm9870_vm4, %v8723_v15, %v2725_v47  ;;  %v3301_v50 = vrot.slane %v3299_v6, 5  ;;  %v2770_v61 = vunpack.c.l.b16 %v2730_v20  ;;  %v8667_v47 = vld [vmem:[%s9868_s8 + $0xb4] sm:$0x1] }
 0x145   : > { %v10632_v63 = vadd.f32 %v2153_v42, %v1996_v48  ;;  %8789 = vmatmul.msk.bf16.gmra.mxu1 %vm351_vm3, %v8772_v31  ;;  %8676 = vmatmul.msk.bf16.gmra.mxu3 %vm351_vm3, %v2500_v27  ;;  %v2492_v42 = vunpack.c.l.b16 %v2432_v44  ;;  %v3283_v31 = vrot.slane %v3282_v28, 4  ;;  %v3287_v27 = vrot.slane %v3285_v38, 5 }
 0x146   : > { %8733 = vmatmul.msk.bf16.gmra.mxu0 %vm351_vm3, %v2778_v10  ;;  %v2448_v10 = vshrl.u32 %v8668_v7, 16  ;;  %v2769_v1 = vunpack.c.l.b16 %v2726_v8  ;;  %v2436_v39 = vrot.slane %v2434_v49, 4  ;;  %v2439_v30 = vrot.slane %v2437_v59, 5  ;;  %v8708_v49 = vld [vmem:[%s9868_s8 + $0xb4] sm:$0x1] }
 0x147   : > { %v2155_v40 = vpop.f32.mrf.mxu2  ;;  %v3288_v48 = vsel %vm9900_vm7, %v3283_v31, %v3287_v27  ;;  %v2501_v46 = vpack.c.b16 %v2492_v42, %v10643_v9  ;;  %v3302_v15 = vsel %vm9900_vm7, %v3297_v43, %v3301_v50  ;;  %v3307_v37 = vshll.u32 %v8821_v41, 16  ;;  %v8707_v42 = vld [vmem:[%s9868_s8 + $0xb0] sm:$0xe]  ;;  %v8709_v59 = vld [vmem:[%s9868_s8 + $0xb8] sm:$0xe] }
 0x148   : > { %v1289_v17 = vpop.f32.mrf.mxu3  ;;  %v3318_v44 = vshrl.u32 %v8823_v18, 16  ;;  %v3321_v28 = vshll.u32 %v8823_v18, 16  ;;  %v2779_v58 = vpack.c.b16 %v2770_v61, %v2769_v1  ;;  %v2440_v0 = vor.u32 %v2439_v30, %v2436_v39  ;;  %v8822_v43 = vld [vmem:[%s9868_s8 + $0xd4] sm:$0x1] }
 0x149   : > { %v1314_v62 = vadd.f32 %v1289_v17, %v10422_v33  ;;  %v9699_v33 = vld [vmem:[%s9868_s8 + $0xa4] sm:$0xf0]  ;;  %v3362_v7 = vunpack.c.l.b16 %v3302_v15  ;;  %v2443_v17 = vshll.u32 %v8667_v47, 16  ;;  %v2457_v9 = vshll.u32 %v8669_v56, 16 }
 0x14a   : > { %v1970_v5 = vpop.f32.mrf.mxu1  ;;  %v8776_v22 = vor.u32 %v9699_v33, %v8775_v21  ;;  %v3306_v31 = vrot.slane %v3304_v51, 4  ;;  %v3309_v27 = vrot.slane %v3307_v37, 5  ;;  %v8725_v61 = vrot.slane %v8707_v42, 9 }
 0x14b   : > { %v1997_v3 = vadd.f32 %v1970_v5, %v1719_v57  ;;  %v1697_v29 = vpop.f32.mrf.mxu0  ;;  %v1720_v23 = vadd.f32 %v1695_v35, %v1314_v62  ;;  %v2450_v35 = vrot.slane %v2448_v10, 4  ;;  %v2453_v57 = vrot.slane %v2451_v16, 5  ;;  %v8710_v5 = vld [vmem:[%s9868_s8 + $0xbc] sm:$0x1] }
 0x14c   : > { %8831 = vmatmul.msk.bf16.gmra.mxu2 %vm351_vm3, %v3370_v45  ;;  %v3323_v10 = vrot.slane %v3321_v28, 5  ;;  %v2445_v50 = vrot.slane %v2443_v17, 5  ;;  %v2459_v33 = vrot.slane %v2457_v9, 5  ;;  %v2733_v39 = vrot.slane %v8708_v49, 5  ;;  %v9217_v17 = vld [vmem:[%s12035_s1 + $0x48] sm:$0xf] }
 0x14d   : > { %v10653_v32 = vadd.f32 %v2155_v40, %v1997_v3  ;;  %v3361_v40 = vunpack.c.l.b16 %v3288_v48  ;;  %v2454_v45 = vor.u32 %v2453_v57, %v2450_v35  ;;  %v2441_v3 = vrot.slane %v2440_v0, 4  ;;  %v9700_v9 = vld [vmem:[%s9868_s8 + $0xc4] sm:$0xf0] }
 0x14e   : > { %v8726_v30 = vrot.slane %v8709_v59, 9  ;;  %v2737_v41 = vrot.slane %v8710_v5, 5  ;;  %v3310_v48 = vor.u32 %v3309_v27, %v3306_v31  ;;  %v3313_v35 = vshll.u32 %v8822_v43, 16  ;;  %v8834_v27 = vld [vmem:[%s9868_s8 + $0x30] sm:$0xe] }
 0x14f   : > { %v2158_v36 = vpop.f32.mrf.mxu2  ;;  %v2455_v21 = vrot.slane %v2454_v45, 4  ;;  %v2446_v15 = vsel %vm9900_vm7, %v2441_v3, %v2445_v50  ;;  %v2734_v37 = vsel %vm9870_vm4, %v8725_v61, %v2733_v39  ;;  %v8779_v45 = vld [vmem:[%s9868_s8 + $0xc0] sm:$0xf]  ;;  %v5600_v42 = vsel %vm376_vm0, %v9217_v17, 0  ;;  %v8835_v43 = vld [vmem:[%s9868_s8 + $0x34] sm:$0x1] }
 0x150   : > { %v1291_v55 = vpop.f32.mrf.mxu3  ;;  %v3315_v28 = vrot.slane %v3313_v35, 5  ;;  %v2493_v0 = vunpack.c.l.b16 %v2446_v15  ;;  %5609 = vmatpush.bf16.msra.mxu2 %v5600_v42  ;;  %v8948_v35 = vld [vmem:[%s9868_s8 + $0x38] sm:$0xf] }
 0x151   : > { %v1315_v38 = vadd.f32 %v1291_v55, %v10448_v25  ;;  %v3320_v25 = vrot.slane %v3318_v44, 4  ;;  %v2460_v47 = vsel %vm9900_vm7, %v2455_v21, %v2459_v33  ;;  %v2738_v44 = vsel %vm9870_vm4, %v8726_v30, %v2737_v41  ;;  %v8989_v15 = vld [vmem:[%s9868_s8 + $0x38] sm:$0xe] }
 0x152   : > { %v1973_v6 = vpop.f32.mrf.mxu1  ;;  %v8866_v41 = vrot.slane %v8834_v27, 9  ;;  %v8949_v27 = vld [vmem:[%s9868_s8 + $0x3c] sm:$0x1] }
 0x153   : > { %v1998_v8 = vadd.f32 %v1973_v6, %v1720_v23  ;;  %v1700_v20 = vpop.f32.mrf.mxu0  ;;  %v1721_v62 = vadd.f32 %v1697_v29, %v1315_v38  ;;  %v8824_v23 = vld [vmem:[%s9868_s8 + $0xdc] sm:$0x1]  ;;  %v3371_v29 = vpack.c.b16 %v3362_v7, %v3361_v40  ;;  %v3324_v57 = vor.u32 %v3323_v10, %v3320_v25 }
 0x154   : > { %v2494_v6 = vunpack.c.l.b16 %v2460_v47  ;;  %v9062_v7 = vld [vmem:[%s12035_s1 + $0x3c] sm:$0xf]  ;;  %v8780_v10 = vor.u32 %v9700_v9, %v8779_v45 }
 0x155   : > { %v10669_v16 = vadd.f32 %v2158_v36, %v1998_v8  ;;  %8790 = vmatmul.msk.bf16.gmra.mxu1 %vm351_vm3, %v8776_v22  ;;  %8677 = vmatmul.msk.bf16.gmra.mxu3 %vm351_vm3, %v2501_v46  ;;  %v3327_v36 = vshll.u32 %v8824_v23, 16  ;;  %v3325_v38 = vrot.slane %v3324_v57, 4  ;;  %v2771_v8 = vunpack.c.l.b16 %v2734_v37  ;;  %v8836_v23 = vld [vmem:[%s9868_s8 + $0x38] sm:$0xe]  ;;  %v8990_v47 = vld [vmem:[%s9868_s8 + $0x3c] sm:$0x1] }
 0x156   : > { %8734 = vmatmul.msk.bf16.gmra.mxu0 %vm351_vm3, %v2779_v58  ;;  %v2502_v3 = vpack.c.b16 %v2494_v6, %v2493_v0  ;;  %v8991_v37 = vld [vmem:[%s9868_s8 + $0x40] sm:$0xe] }
 0x157   : > { %v2160_v1 = vpop.f32.mrf.mxu2  ;;  %v3329_v58 = vrot.slane %v3327_v36, 5  ;;  %v9135_v36 = vld [vmem:[%s12035_s1 + $0x40] sm:$0xf] }
 0x158   : > { %v1294_v18 = vpop.f32.mrf.mxu3 }
 0x159   : > { %v1316_v22 = vadd.f32 %v1294_v18, %v10296_v19  ;;  %v3311_v19 = vrot.slane %v3310_v48, 4  ;;  %v3330_v31 = vsel %vm9900_vm7, %v3325_v38, %v3329_v58  ;;  %v3547_v18 = vrot.slane %v8835_v43, 5 }
 0x15a   : > { %v1975_v46 = vpop.f32.mrf.mxu1  ;;  %v3364_v30 = vunpack.c.l.b16 %v3330_v31 }
 0x15b   : > { %v1999_v56 = vadd.f32 %v1975_v46, %v1721_v62  ;;  %v1702_v55 = vpop.f32.mrf.mxu0  ;;  %v1722_v51 = vadd.f32 %v1700_v20, %v1316_v22  ;;  %v2772_v20 = vunpack.c.l.b16 %v2738_v44  ;;  %v4730_v62 = vsel %vm376_vm0, %v9062_v7, 0  ;;  %v8950_v22 = vld [vmem:[%s9868_s8 + $0x40] sm:$0xf]  ;;  %v9192_v46 = vld [vmem:[%s12035_s1 + $0x44] sm:$0xf] }
 0x15c   : > { %8832 = vmatmul.msk.bf16.gmra.mxu2 %vm351_vm3, %v3371_v29  ;;  %4739 = vmatpush.bf16.msra.mxu3 %v4730_v62  ;;  %v3316_v5 = vsel %vm9900_vm7, %v3311_v19, %v3315_v28  ;;  %v8837_v29 = vld [vmem:[%s9868_s8 + $0x3c] sm:$0x1]  ;;  %v8992_v44 = vld [vmem:[%s9868_s8 + $0x44] sm:$0x1]  ;;  %v3977_v19 = vshrl.u32 %v8948_v35, 16  ;;  %v3980_v28 = vshll.u32 %v8948_v35, 16  ;;  %v3548_v17 = vsel %vm9870_vm4, %v8866_v41, %v3547_v18 }
 0x15d   : > { %v10686_v40 = vadd.f32 %v2160_v1, %v1999_v56  ;;  %v2780_v21 = vpack.c.b16 %v2772_v20, %v2771_v8  ;;  %v3363_v39 = vunpack.c.l.b16 %v3316_v5  ;;  %v3551_v48 = vrot.slane %v8837_v29, 5  ;;  %v8951_v29 = vld [vmem:[%s9868_s8 + $0x44] sm:$0x1] }
 0x15e   : > { %v5136_v56 = vsel %vm376_vm0, %v9135_v36, 0  ;;  %v3991_v0 = vshrl.u32 %v8950_v22, 16  ;;  %v3994_v6 = vshll.u32 %v8950_v22, 16  ;;  %v9021_v8 = vrot.slane %v8989_v15, 9  ;;  %v8838_v15 = vld [vmem:[%s9868_s8 + $0x40] sm:$0xe] }
 0x15f   : > { %v2163_v49 = vpop.f32.mrf.mxu2  ;;  %5145 = vmatpush.bf16.msra.mxu0 %v5136_v56  ;;  %v3372_v58 = vpack.c.b16 %v3364_v30, %v3363_v39  ;;  %v4416_v20 = vrot.slane %v8990_v47, 5  ;;  %v9022_v62 = vrot.slane %v8991_v37, 9  ;;  %v4420_v42 = vrot.slane %v8992_v44, 5  ;;  %v9702_v39 = vld [vmem:[%s9868_s8 + $0x3c] sm:$0xf0] }
 0x160   : > { %v1296_v59 = vpop.f32.mrf.mxu3  ;;  %v3982_v31 = vrot.slane %v3980_v28, 5  ;;  %v3627_v43 = vunpack.c.l.b16 %v3548_v17  ;;  %v3986_v18 = vshll.u32 %v8949_v27, 16  ;;  %v4000_v35 = vshll.u32 %v8951_v29, 16  ;;  %v8839_v47 = vld [vmem:[%s9868_s8 + $0x44] sm:$0x1] }
 0x161   : > { %v1317_v25 = vadd.f32 %v1296_v59, %v10351_v14  ;;  %v8867_v14 = vrot.slane %v8836_v23, 9  ;;  %v4421_v30 = vsel %vm9870_vm4, %v9022_v62, %v4420_v42  ;;  %v8840_v44 = vld [vmem:[%s9868_s8 + $0x48] sm:$0xe]  ;;  %v8868_v17 = vrot.slane %v8838_v15, 9  ;;  %v8954_v42 = vld [vmem:[%s9868_s8 + $0x50] sm:$0xf] }
 0x162   : > { %v1978_v50 = vpop.f32.mrf.mxu1  ;;  %v4497_v37 = vunpack.c.l.b16 %v4421_v30  ;;  %v8996_v30 = vld [vmem:[%s9868_s8 + $0x54] sm:$0x1] }
 0x163   : > { %v2000_v33 = vadd.f32 %v1978_v50, %v1722_v51  ;;  %v1705_v1 = vpop.f32.mrf.mxu0  ;;  %v1723_v61 = vadd.f32 %v1702_v55, %v1317_v25  ;;  %v5414_v55 = vsel %vm376_vm0, %v9192_v46, 0  ;;  %v3552_v45 = vsel %vm9870_vm4, %v8867_v14, %v3551_v48  ;;  %v8783_v50 = vld [vmem:[%s9868_s8 + $0xd0] sm:$0xf] }
 0x164   : > { %5423 = vmatpush.bf16.msra.mxu1 %v5414_v55  ;;  %v3993_v25 = vrot.slane %v3991_v0, 4  ;;  %v3628_v23 = vunpack.c.l.b16 %v3552_v45  ;;  %v3555_v45 = vrot.slane %v8839_v47, 5 }
 0x165   : > { %v10708_v57 = vadd.f32 %v2163_v49, %v2000_v33  ;;  %8791 = vmatmul.msk.bf16.gmra.mxu1 %vm351_vm3, %v8780_v10  ;;  %8678 = vmatmul.msk.bf16.gmra.mxu3 %vm351_vm3, %v2502_v3  ;;  %v3996_v10 = vrot.slane %v3994_v6, 5  ;;  %v3988_v6 = vrot.slane %v3986_v18, 5 }
 0x166   : > { %8735 = vmatmul.msk.bf16.gmra.mxu0 %vm351_vm3, %v2780_v21  ;;  %v9701_v21 = vld [vmem:[%s9868_s8 + $0xd4] sm:$0xf0]  ;;  %v3643_v46 = vpack.c.b16 %v3628_v23, %v3627_v43  ;;  %v3556_v23 = vsel %vm9870_vm4, %v8868_v17, %v3555_v45 }
 0x167   : > { %v2165_v51 = vpop.f32.mrf.mxu2  ;;  %v3997_v48 = vor.u32 %v3996_v10, %v3993_v25  ;;  %v8784_v22 = vor.u32 %v9701_v21, %v8783_v50  ;;  %v8995_v21 = vld [vmem:[%s9868_s8 + $0x50] sm:$0xe] }
 0x168   : > { %v1299_v38 = vpop.f32.mrf.mxu3  ;;  %v9024_v47 = vrot.slane %v8995_v21, 9 }
 0x169   : > { %v1318_v7 = vadd.f32 %v1299_v38, %v10387_v13  ;;  %v3979_v13 = vrot.slane %v3977_v19, 4  ;;  %v8841_v19 = vld [vmem:[%s9868_s8 + $0x4c] sm:$0x1] }
 0x16a   : > { %v1980_v9 = vpop.f32.mrf.mxu1  ;;  %v3559_v62 = vrot.slane %v8841_v19, 5 }
 0x16b   : > { %v2001_v49 = vadd.f32 %v1980_v9, %v1723_v61  ;;  %v1707_v59 = vpop.f32.mrf.mxu0  ;;  %v1724_v5 = vadd.f32 %v1705_v1, %v1318_v7  ;;  %v8910_v61 = vld [vmem:[%s9868_s8 + $0x38] sm:$0xf]  ;;  %v4417_v1 = vsel %vm9870_vm4, %v9021_v8, %v4416_v20  ;;  %v3983_v41 = vor.u32 %v3982_v31, %v3979_v13  ;;  %v8952_v9 = vld [vmem:[%s9868_s8 + $0x48] sm:$0xf]  ;;  %v8994_v13 = vld [vmem:[%s9868_s8 + $0x4c] sm:$0x1] }
 0x16c   : > { %8833 = vmatmul.msk.bf16.gmra.mxu2 %vm351_vm3, %v3372_v58  ;;  %v8911_v55 = vor.u32 %v9702_v39, %v8910_v61  ;;  %v4002_v7 = vrot.slane %v4000_v35, 5  ;;  %v8869_v20 = vrot.slane %v8840_v44, 9  ;;  %v4005_v31 = vshrl.u32 %v8952_v9, 16 }
 0x16d   : > { %v10733_v3 = vadd.f32 %v2165_v51, %v2001_v49  ;;  %v4496_v51 = vunpack.c.l.b16 %v4417_v1  ;;  %v3984_v0 = vrot.slane %v3983_v41, 4  ;;  %v4008_v27 = vshll.u32 %v8952_v9, 16 }
 0x16e   : > { %v3560_v50 = vsel %vm9870_vm4, %v8869_v20, %v3559_v62  ;;  %v4022_v61 = vshll.u32 %v8954_v42, 16  ;;  %v4424_v18 = vrot.slane %v8994_v13, 5 }
 0x16f   : > { %v2168_v33 = vpop.f32.mrf.mxu2  ;;  %v4512_v10 = vpack.c.b16 %v4497_v37, %v4496_v51  ;;  %v3630_v15 = vunpack.c.l.b16 %v3560_v50  ;;  %v4428_v51 = vrot.slane %v8996_v30, 5  ;;  %v8955_v37 = vld [vmem:[%s9868_s8 + $0x54] sm:$0x1] }
 0x170   : > { %v1301_v14 = vpop.f32.mrf.mxu3  ;;  %v4024_v19 = vrot.slane %v4022_v61, 5  ;;  %v4028_v45 = vshll.u32 %v8955_v37, 16 }
 0x171   : > { %v1319_v36 = vadd.f32 %v1301_v14, %v10414_v52  ;;  %v3998_v52 = vrot.slane %v3997_v48, 4  ;;  %v4429_v62 = vsel %vm9870_vm4, %v9024_v47, %v4428_v51 }
 0x172   : > { %v1983_v56 = vpop.f32.mrf.mxu1  ;;  %v4499_v21 = vunpack.c.l.b16 %v4429_v62 }
 0x173   : > { %v2002_v28 = vadd.f32 %v1983_v56, %v1724_v5  ;;  %v2817_v38 = vpop.f32.mrf.mxu0  ;;  %v1725_v58 = vadd.f32 %v1707_v59, %v1319_v36  ;;  %v3989_v59 = vsel %vm9900_vm7, %v3984_v0, %v3988_v6  ;;  %v8993_v5 = vld [vmem:[%s9868_s8 + $0x48] sm:$0xe]  ;;  %v4003_v43 = vsel %vm9900_vm7, %v3998_v52, %v4002_v7  ;;  %v8953_v56 = vld [vmem:[%s9868_s8 + $0x4c] sm:$0x1] }
 0x174   : > { %v4218_v1 = vunpack.c.l.b16 %v3989_v59  ;;  %v9023_v41 = vrot.slane %v8993_v5, 9  ;;  %v4007_v36 = vrot.slane %v4005_v31, 4  ;;  %v4014_v52 = vshll.u32 %v8953_v56, 16  ;;  %v8843_v59 = vld [vmem:[%s9868_s8 + $0x64] sm:$0x1] }
 0x175   : > { %v10750_v8 = vadd.f32 %v2168_v33, %v2002_v28  ;;  %8792 = vmatmul.msk.bf16.gmra.mxu1 %vm351_vm3, %v8784_v22  ;;  %8883 = vmatmul.msk.bf16.vlgmr.msrb.gmra.mxu3 %vm351_vm3, %v3643_v46  ;;  %v4019_v33 = vshrl.u32 %v8954_v42, 16  ;;  %v4219_v22 = vunpack.c.l.b16 %v4003_v43  ;;  %v3629_v46 = vunpack.c.l.b16 %v3556_v23 }
 0x176   : > { %8940 = vmatmul.msk.bf16.vlgmr.msrb.gmra.mxu0 %vm351_vm3, %v8911_v55  ;;  %v4425_v0 = vsel %vm9870_vm4, %v9023_v41, %v4424_v18  ;;  %v4016_v50 = vrot.slane %v4014_v52, 5 }
 0x177   : > { %v2170_v49 = vpop.f32.mrf.mxu2  ;;  %v4021_v44 = vrot.slane %v4019_v33, 4  ;;  %v4234_v17 = vpack.c.b16 %v4219_v22, %v4218_v1  ;;  %v3644_v20 = vpack.c.b16 %v3630_v15, %v3629_v46  ;;  %v4498_v31 = vunpack.c.l.b16 %v4425_v0  ;;  %v8958_v1 = vld [vmem:[%s9868_s8 + $0x70] sm:$0xf] }
 0x178   : > { %v2539_v25 = vpop.f32.mrf.mxu3  ;;  %v4030_v33 = vrot.slane %v4028_v45, 5  ;;  %v4047_v22 = vshrl.u32 %v8958_v1, 16  ;;  %v4050_v46 = vshll.u32 %v8958_v1, 16  ;;  %v8999_v0 = vld [vmem:[%s9868_s8 + $0x70] sm:$0xe] }
 0x179   : > { %v2579_v29 = vadd.f32 %v2539_v25, %v10465_v4  ;;  %v4010_v4 = vrot.slane %v4008_v27, 5  ;;  %v4025_v42 = vor.u32 %v4024_v19, %v4021_v44  ;;  %v8844_v27 = vld [vmem:[%s9868_s8 + $0x68] sm:$0xe]  ;;  %v8845_v25 = vld [vmem:[%s9868_s8 + $0x6c] sm:$0x1]  ;;  %v4513_v47 = vpack.c.b16 %v4499_v21, %v4498_v31 }
 0x17a   : > { %v1985_v39 = vpop.f32.mrf.mxu1  ;;  %v8871_v18 = vrot.slane %v8844_v27, 9  ;;  %v8997_v19 = vld [vmem:[%s9868_s8 + $0x68] sm:$0xe]  ;;  %v4049_v62 = vrot.slane %v4047_v22, 4 }
 0x17b   : > { %v2003_v14 = vadd.f32 %v1985_v39, %v1725_v58  ;;  %v2819_v48 = vpop.f32.mrf.mxu0  ;;  %v2857_v35 = vadd.f32 %v2817_v38, %v2579_v29  ;;  %v8914_v38 = vld [vmem:[%s9868_s8 + $0x48] sm:$0xf]  ;;  %v9703_v58 = vld [vmem:[%s9868_s8 + $0x4c] sm:$0xf0]  ;;  %v4011_v6 = vor.u32 %v4010_v4, %v4007_v36  ;;  %v3563_v39 = vrot.slane %v8843_v59, 5 }
 0x17c   : > { %9038 = vmatmul.msk.bf16.vlgmr.msrb.gmra.mxu2 %vm351_vm3, %v4512_v10  ;;  %v8915_v13 = vor.u32 %v9703_v58, %v8914_v38  ;;  %v4026_v41 = vrot.slane %v4025_v42, 4  ;;  %v4052_v42 = vrot.slane %v4050_v46, 5 }
 0x17d   : > { %v10771_v55 = vadd.f32 %v2170_v49, %v2003_v14  ;;  %v8842_v49 = vld [vmem:[%s9868_s8 + $0x60] sm:$0xe]  ;;  %v4012_v29 = vrot.slane %v4011_v6, 4  ;;  %v3567_v14 = vrot.slane %v8845_v25, 5  ;;  %v9000_v6 = vld [vmem:[%s9868_s8 + $0x74] sm:$0x1] }
 0x17e   : > { %v8870_v61 = vrot.slane %v8842_v49, 9  ;;  %v4031_v51 = vsel %vm9900_vm7, %v4026_v41, %v4030_v33  ;;  %v9026_v25 = vrot.slane %v8999_v0, 9  ;;  %v4053_v33 = vor.u32 %v4052_v42, %v4049_v62 }
 0x17f   : > { %v3409_v28 = vpop.f32.mrf.mxu2  ;;  %v4017_v4 = vsel %vm9900_vm7, %v4012_v29, %v4016_v50  ;;  %v3568_v44 = vsel %vm9870_vm4, %v8871_v18, %v3567_v14  ;;  %v4221_v49 = vunpack.c.l.b16 %v4031_v51  ;;  %v9704_v29 = vld [vmem:[%s9868_s8 + $0x6c] sm:$0xf0]  ;;  %v8847_v18 = vld [vmem:[%s9868_s8 + $0x74] sm:$0x1] }
 0x180   : > { %v2541_v7 = vpop.f32.mrf.mxu3  ;;  %v3564_v37 = vsel %vm9870_vm4, %v8870_v61, %v3563_v39  ;;  %v4220_v58 = vunpack.c.l.b16 %v4017_v4  ;;  %v8846_v61 = vld [vmem:[%s9868_s8 + $0x70] sm:$0xe] }
 0x181   : > { %v2580_v9 = vadd.f32 %v2541_v7, %v10492_v60  ;;  %v8956_v60 = vld [vmem:[%s9868_s8 + $0x68] sm:$0xf]  ;;  %v3631_v59 = vunpack.c.l.b16 %v3564_v37 }
 0x182   : > { %v3003_v5 = vpop.f32.mrf.mxu1  ;;  %v4235_v1 = vpack.c.b16 %v4221_v49, %v4220_v58  ;;  %v9001_v49 = vld [vmem:[%s9868_s8 + $0x78] sm:$0xe] }
 0x183   : > { %v3043_v10 = vadd.f32 %v3003_v5, %v2857_v35  ;;  %v2822_v43 = vpop.f32.mrf.mxu0  ;;  %v2858_v23 = vadd.f32 %v2819_v48, %v2580_v9  ;;  %v4033_v48 = vshrl.u32 %v8956_v60, 16  ;;  %v4036_v35 = vshll.u32 %v8956_v60, 16  ;;  %v8957_v9 = vld [vmem:[%s9868_s8 + $0x6c] sm:$0x1] }
 0x184   : > { %v3632_v5 = vunpack.c.l.b16 %v3568_v44  ;;  %v4042_v50 = vshll.u32 %v8957_v9, 16  ;;  %v4054_v44 = vrot.slane %v4053_v33, 4 }
 0x185   : > { %v10787_v30 = vadd.f32 %v3409_v28, %v3043_v10  ;;  %8981 = vmatmul.msk.bf16.vlgmr.msrb.gmra.mxu1 %vm351_vm3, %v4234_v17  ;;  %8884 = vmatmul.msk.bf16.gmra.mxu3 %vm351_vm3, %v3644_v20  ;;  %v8998_v28 = vld [vmem:[%s9868_s8 + $0x6c] sm:$0x1]  ;;  %v4035_v52 = vrot.slane %v4033_v48, 4  ;;  %v4038_v7 = vrot.slane %v4036_v35, 5  ;;  %v8959_v20 = vld [vmem:[%s9868_s8 + $0x74] sm:$0x1] }
 0x186   : > { %8941 = vmatmul.msk.bf16.gmra.mxu0 %vm351_vm3, %v8915_v13  ;;  %v9025_v13 = vrot.slane %v8997_v19, 9  ;;  %v4432_v27 = vrot.slane %v8998_v28, 5  ;;  %v4436_v10 = vrot.slane %v9000_v6, 5  ;;  %v4056_v60 = vshll.u32 %v8959_v20, 16  ;;  %v8848_v19 = vld [vmem:[%s9868_s8 + $0x78] sm:$0xe] }
 0x187   : > { %v3411_v36 = vpop.f32.mrf.mxu2  ;;  %v3645_v41 = vpack.c.b16 %v3632_v5, %v3631_v59  ;;  %v4044_v46 = vrot.slane %v4042_v50, 5  ;;  %v3571_v28 = vrot.slane %v8847_v18, 5  ;;  %v8960_v6 = vld [vmem:[%s9868_s8 + $0x78] sm:$0xf]  ;;  %v9002_v59 = vld [vmem:[%s9868_s8 + $0x7c] sm:$0x1] }
 0x188   : > { %v2544_v15 = vpop.f32.mrf.mxu3  ;;  %v4433_v35 = vsel %vm9870_vm4, %v9025_v13, %v4432_v27  ;;  %v4061_v5 = vshrl.u32 %v8960_v6, 16  ;;  %v4064_v13 = vshll.u32 %v8960_v6, 16 }
 0x189   : > { %v2581_v56 = vadd.f32 %v2544_v15, %v10512_v11  ;;  %v4058_v15 = vrot.slane %v4056_v60, 5 }
 0x18a   : > { %v3005_v38 = vpop.f32.mrf.mxu1 }
 0x18b   : > { %v3044_v17 = vadd.f32 %v3005_v38, %v2858_v23  ;;  %v2824_v11 = vpop.f32.mrf.mxu0  ;;  %v2859_v45 = vadd.f32 %v2822_v43, %v2581_v56  ;;  %v8918_v23 = vld [vmem:[%s9868_s8 + $0x68] sm:$0xf]  ;;  %v4039_v43 = vor.u32 %v4038_v7, %v4035_v52  ;;  %v4500_v38 = vunpack.c.l.b16 %v4433_v35 }
 0x18c   : > { %9039 = vmatmul.msk.bf16.gmra.mxu2 %vm351_vm3, %v4513_v47  ;;  %v8919_v48 = vor.u32 %v9704_v29, %v8918_v23  ;;  %v8872_v47 = vrot.slane %v8846_v61, 9  ;;  %v8873_v52 = vrot.slane %v8848_v19, 9  ;;  %v4059_v9 = vsel %vm9900_vm7, %v4054_v44, %v4058_v15 }
 0x18d   : > { %v10808_v31 = vadd.f32 %v3411_v36, %v3044_v17  ;;  %v4437_v36 = vsel %vm9870_vm4, %v9026_v25, %v4436_v10  ;;  %v4040_v22 = vrot.slane %v4039_v43, 4  ;;  %v8962_v17 = vld [vmem:[%s9868_s8 + $0x80] sm:$0xf]  ;;  %v9004_v10 = vld [vmem:[%s9868_s8 + $0x84] sm:$0x1]  ;;  %v4223_v60 = vunpack.c.l.b16 %v4059_v9 }
 0x18e   : > { %v4501_v58 = vunpack.c.l.b16 %v4437_v36  ;;  %v3572_v20 = vsel %vm9870_vm4, %v8872_v47, %v3571_v28  ;;  %v9003_v25 = vld [vmem:[%s9868_s8 + $0x80] sm:$0xe]  ;;  %v4075_v23 = vshrl.u32 %v8962_v17, 16  ;;  %v4078_v29 = vshll.u32 %v8962_v17, 16 }
 0x18f   : > { %v3414_v21 = vpop.f32.mrf.mxu2  ;;  %v3633_v33 = vunpack.c.l.b16 %v3572_v20  ;;  %v9028_v18 = vrot.slane %v9003_v25, 9  ;;  %v4063_v35 = vrot.slane %v4061_v5, 4  ;;  %v4066_v36 = vrot.slane %v4064_v13, 5 }
 0x190   : > { %v2546_v39 = vpop.f32.mrf.mxu3  ;;  %v4514_v42 = vpack.c.b16 %v4501_v58, %v4500_v38  ;;  %v4077_v15 = vrot.slane %v4075_v23, 4  ;;  %v4080_v47 = vrot.slane %v4078_v29, 5 }
 0x191   : > { %v2582_v14 = vadd.f32 %v2546_v39, %v10539_v53  ;;  %v8849_v53 = vld [vmem:[%s9868_s8 + $0x7c] sm:$0x1]  ;;  %v4067_v38 = vor.u32 %v4066_v36, %v4063_v35 }
 0x192   : > { %v3008_v4 = vpop.f32.mrf.mxu1  ;;  %v3575_v7 = vrot.slane %v8849_v53, 5  ;;  %v4081_v17 = vor.u32 %v4080_v47, %v4077_v15  ;;  %v9006_v15 = vld [vmem:[%s9868_s8 + $0x9c] sm:$0x1]  ;;  %v9007_v47 = vld [vmem:[%s9868_s8 + $0xa0] sm:$0xe] }
 0x193   : > { %v3045_v56 = vadd.f32 %v3008_v4, %v2859_v45  ;;  %v2827_v51 = vpop.f32.mrf.mxu0  ;;  %v2860_v37 = vadd.f32 %v2824_v11, %v2582_v14  ;;  %v4045_v45 = vsel %vm9900_vm7, %v4040_v22, %v4044_v46  ;;  %v4444_v14 = vrot.slane %v9004_v10, 5  ;;  %v8963_v46 = vld [vmem:[%s9868_s8 + $0x84] sm:$0x1]  ;;  %v8964_v10 = vld [vmem:[%s9868_s8 + $0x98] sm:$0xf] }
 0x194   : > { %v4222_v50 = vunpack.c.l.b16 %v4045_v45  ;;  %v4084_v58 = vshll.u32 %v8963_v46, 16  ;;  %v8851_v45 = vld [vmem:[%s9868_s8 + $0x94] sm:$0x1]  ;;  %v4068_v23 = vrot.slane %v4067_v38, 4 }
 0x195   : > { %v10821_v0 = vadd.f32 %v3414_v21, %v3045_v56  ;;  %8982 = vmatmul.msk.bf16.gmra.mxu1 %vm351_vm3, %v4235_v1  ;;  %8885 = vmatmul.msk.bf16.gmra.mxu3 %vm351_vm3, %v3645_v41  ;;  %v3576_v21 = vsel %vm9870_vm4, %v8873_v52, %v3575_v7  ;;  %v9027_v41 = vrot.slane %v9001_v49, 9  ;;  %v4445_v28 = vsel %vm9870_vm4, %v9028_v18, %v4444_v14  ;;  %v8853_v49 = vld [vmem:[%s9868_s8 + $0x9c] sm:$0x1] }
 0x196   : > { %8942 = vmatmul.msk.bf16.gmra.mxu0 %vm351_vm3, %v8919_v48  ;;  %v8961_v48 = vld [vmem:[%s9868_s8 + $0x7c] sm:$0x1]  ;;  %v3634_v22 = vunpack.c.l.b16 %v3576_v21  ;;  %v4236_v52 = vpack.c.b16 %v4223_v60, %v4222_v50  ;;  %v4082_v60 = vrot.slane %v4081_v17, 4  ;;  %v9030_v17 = vrot.slane %v9007_v47, 9  ;;  %v8857_v47 = vld [vmem:[%s9868_s8 + $0xac] sm:$0x1] }
 0x197   : > { %v3416_v11 = vpop.f32.mrf.mxu2  ;;  %v4070_v19 = vshll.u32 %v8961_v48, 16  ;;  %v9005_v48 = vld [vmem:[%s9868_s8 + $0x98] sm:$0xe] }
 0x198   : > { %v2549_v62 = vpop.f32.mrf.mxu3  ;;  %v3646_v7 = vpack.c.b16 %v3634_v22, %v3633_v33  ;;  %v3583_v33 = vrot.slane %v8853_v49, 5 }
 0x199   : > { %v2583_v27 = vadd.f32 %v2549_v62, %v10556_v34  ;;  %v4440_v34 = vrot.slane %v9002_v59, 5  ;;  %v4072_v25 = vrot.slane %v4070_v19, 5 }
 0x19a   : > { %v3010_v43 = vpop.f32.mrf.mxu1 }
 0x19b   : > { %v3046_v61 = vadd.f32 %v3010_v43, %v2860_v37  ;;  %v2829_v39 = vpop.f32.mrf.mxu0  ;;  %v2861_v1 = vadd.f32 %v2827_v51, %v2583_v27  ;;  %v8922_v51 = vld [vmem:[%s9868_s8 + $0x78] sm:$0xf]  ;;  %v9705_v37 = vld [vmem:[%s9868_s8 + $0x7c] sm:$0xf0]  ;;  %v4441_v44 = vsel %vm9870_vm4, %v9027_v41, %v4440_v34  ;;  %v4503_v27 = vunpack.c.l.b16 %v4445_v28 }
 0x19c   : > { %9040 = vmatmul.msk.bf16.gmra.mxu2 %vm351_vm3, %v4514_v42  ;;  %v8923_v20 = vor.u32 %v9705_v37, %v8922_v51  ;;  %v4502_v62 = vunpack.c.l.b16 %v4441_v44  ;;  %v8852_v42 = vld [vmem:[%s9868_s8 + $0x98] sm:$0xe]  ;;  %v3579_v43 = vrot.slane %v8851_v45, 5  ;;  %v8966_v41 = vld [vmem:[%s9868_s8 + $0xa0] sm:$0xf]  ;;  %v4073_v14 = vsel %vm9900_vm7, %v4068_v23, %v4072_v25 }
 0x19d   : > { %v10843_v4 = vadd.f32 %v3416_v11, %v3046_v61  ;;  %v8850_v11 = vld [vmem:[%s9868_s8 + $0x90] sm:$0xe]  ;;  %v8875_v21 = vrot.slane %v8852_v42, 9  ;;  %v4089_v61 = vshrl.u32 %v8964_v10, 16  ;;  %v4103_v19 = vshrl.u32 %v8966_v41, 16 }
 0x19e   : > { %v8874_v29 = vrot.slane %v8850_v11, 9  ;;  %v4515_v18 = vpack.c.b16 %v4503_v27, %v4502_v62  ;;  %v8967_v42 = vld [vmem:[%s9868_s8 + $0xa4] sm:$0x1]  ;;  %v8926_v25 = vld [vmem:[%s9868_s8 + $0x98] sm:$0xf] }
 0x19f   : > { %v3419_v56 = vpop.f32.mrf.mxu2  ;;  %v3584_v46 = vsel %vm9870_vm4, %v8875_v21, %v3583_v33  ;;  %v4091_v37 = vrot.slane %v4089_v61, 4 }
 0x1a0   : > { %v2551_v53 = vpop.f32.mrf.mxu3  ;;  %v3580_v22 = vsel %vm9870_vm4, %v8874_v29, %v3579_v43  ;;  %v3636_v62 = vunpack.c.l.b16 %v3584_v46  ;;  %v4112_v43 = vshll.u32 %v8967_v42, 16 }
 0x1a1   : > { %v2584_v6 = vadd.f32 %v2551_v53, %v10581_v24  ;;  %v4086_v24 = vrot.slane %v4084_v58, 5  ;;  %v4106_v53 = vshll.u32 %v8966_v41, 16  ;;  %v4224_v58 = vunpack.c.l.b16 %v4073_v14  ;;  %v8855_v14 = vld [vmem:[%s9868_s8 + $0xa4] sm:$0x1] }
 0x1a2   : > { %v3013_v9 = vpop.f32.mrf.mxu1 }
 0x1a3   : > { %v3047_v59 = vadd.f32 %v3013_v9, %v2861_v1  ;;  %v2832_v5 = vpop.f32.mrf.mxu0  ;;  %v2862_v13 = vadd.f32 %v2829_v39, %v2584_v6  ;;  %v4092_v39 = vshll.u32 %v8964_v10, 16  ;;  %v4087_v36 = vsel %vm9900_vm7, %v4082_v60, %v4086_v24  ;;  %v8965_v6 = vld [vmem:[%s9868_s8 + $0x9c] sm:$0x1]  ;;  %v9706_v10 = vld [vmem:[%s9868_s8 + $0x9c] sm:$0xf0] }
 0x1a4   : > { %v4225_v9 = vunpack.c.l.b16 %v4087_v36 }
 0x1a5   : > { %v10858_v50 = vadd.f32 %v3419_v56, %v3047_v59  ;;  %8983 = vmatmul.msk.bf16.gmra.mxu1 %vm351_vm3, %v4236_v52  ;;  %8886 = vmatmul.msk.bf16.gmra.mxu3 %vm351_vm3, %v3646_v7  ;;  %v9008_v56 = vld [vmem:[%s9868_s8 + $0xa4] sm:$0x1]  ;;  %v4094_v44 = vrot.slane %v4092_v39, 5  ;;  %v9029_v52 = vrot.slane %v9005_v48, 9  ;;  %v4448_v7 = vrot.slane %v9006_v15, 5 }
 0x1a6   : > { %8943 = vmatmul.msk.bf16.gmra.mxu0 %vm351_vm3, %v8923_v20  ;;  %v4452_v11 = vrot.slane %v9008_v56, 5  ;;  %v3635_v20 = vunpack.c.l.b16 %v3580_v22  ;;  %v4098_v59 = vshll.u32 %v8965_v6, 16  ;;  %v4237_v21 = vpack.c.b16 %v4225_v9, %v4224_v58  ;;  %v8856_v15 = vld [vmem:[%s9868_s8 + $0xa8] sm:$0xe]  ;;  %v9012_v9 = vld [vmem:[%s9868_s8 + $0xb4] sm:$0x1] }
 0x1a7   : > { %v3421_v1 = vpop.f32.mrf.mxu2  ;;  %v4095_v49 = vor.u32 %v4094_v44, %v4091_v37  ;;  %v4449_v24 = vsel %vm9870_vm4, %v9029_v52, %v4448_v7  ;;  %v8927_v39 = vor.u32 %v9706_v10, %v8926_v25  ;;  %v3587_v37 = vrot.slane %v8855_v14, 5  ;;  %v8968_v44 = vld [vmem:[%s9868_s8 + $0xa8] sm:$0xf]  ;;  %v9010_v7 = vld [vmem:[%s9868_s8 + $0xac] sm:$0x1] }
 0x1a8   : > { %v2554_v34 = vpop.f32.mrf.mxu3  ;;  %v4453_v29 = vsel %vm9870_vm4, %v9030_v17, %v4452_v11  ;;  %v3647_v33 = vpack.c.b16 %v3636_v62, %v3635_v20  ;;  %v4100_v41 = vrot.slane %v4098_v59, 5  ;;  %v4504_v22 = vunpack.c.l.b16 %v4449_v24  ;;  %v9009_v52 = vld [vmem:[%s9868_s8 + $0xa8] sm:$0xe]  ;;  %v9011_v17 = vld [vmem:[%s9868_s8 + $0xb0] sm:$0xe] }
 0x1a9   : > { %v2585_v35 = vadd.f32 %v2554_v34, %v10598_v26  ;;  %v4505_v46 = vunpack.c.l.b16 %v4453_v29  ;;  %v4117_v20 = vshrl.u32 %v8968_v44, 16  ;;  %v4120_v62 = vshll.u32 %v8968_v44, 16 }
 0x1aa   : > { %v3015_v51 = vpop.f32.mrf.mxu1  ;;  %v4456_v24 = vrot.slane %v9010_v7, 5 }
 0x1ab   : > { %v3048_v26 = vadd.f32 %v3015_v51, %v2862_v13  ;;  %v2834_v28 = vpop.f32.mrf.mxu0  ;;  %v2863_v38 = vadd.f32 %v2832_v5, %v2585_v35  ;;  %v4105_v13 = vrot.slane %v4103_v19, 4  ;;  %v4108_v5 = vrot.slane %v4106_v53, 5  ;;  %v8970_v19 = vld [vmem:[%s9868_s8 + $0xb0] sm:$0xf] }
 0x1ac   : > { %9041 = vmatmul.msk.bf16.gmra.mxu2 %vm351_vm3, %v4515_v18  ;;  %v8854_v18 = vld [vmem:[%s9868_s8 + $0xa0] sm:$0xe]  ;;  %v4516_v6 = vpack.c.b16 %v4505_v46, %v4504_v22  ;;  %v4131_v42 = vshrl.u32 %v8970_v19, 16  ;;  %v8930_v22 = vld [vmem:[%s9868_s8 + $0xa8] sm:$0xf] }
 0x1ad   : > { %v10879_v45 = vadd.f32 %v3421_v1, %v3048_v26  ;;  %v4096_v1 = vrot.slane %v4095_v49, 4  ;;  %v4109_v34 = vor.u32 %v4108_v5, %v4105_v13  ;;  %v8876_v51 = vrot.slane %v8854_v18, 9 }
 0x1ae   : > { %v4134_v49 = vshll.u32 %v8970_v19, 16 }
 0x1af   : > { %v3424_v27 = vpop.f32.mrf.mxu2  ;;  %v4101_v53 = vsel %vm9900_vm7, %v4096_v1, %v4100_v41  ;;  %v4110_v26 = vrot.slane %v4109_v34, 4  ;;  %v3588_v5 = vsel %vm9870_vm4, %v8876_v51, %v3587_v37  ;;  %v4122_v1 = vrot.slane %v4120_v62, 5  ;;  %v8972_v37 = vld [vmem:[%s9868_s8 + $0xc8] sm:$0xf] }
 0x1b0   : > { %v2556_v23 = vpop.f32.mrf.mxu3  ;;  %v4226_v13 = vunpack.c.l.b16 %v4101_v53  ;;  %v4133_v41 = vrot.slane %v4131_v42, 4  ;;  %v4136_v34 = vrot.slane %v4134_v49, 5  ;;  %v4145_v62 = vshrl.u32 %v8972_v37, 16 }
 0x1b1   : > { %v2586_v60 = vadd.f32 %v2556_v23, %v10619_v2  ;;  %v4114_v2 = vrot.slane %v4112_v43, 5  ;;  %v9031_v23 = vrot.slane %v9009_v52, 9  ;;  %v8859_v52 = vld [vmem:[%s9868_s8 + $0xc4] sm:$0x1]  ;;  %v4148_v42 = vshll.u32 %v8972_v37, 16 }
 0x1b2   : > { %v3018_v61 = vpop.f32.mrf.mxu1  ;;  %v4137_v53 = vor.u32 %v4136_v34, %v4133_v41  ;;  %v8973_v34 = vld [vmem:[%s9868_s8 + $0xcc] sm:$0x1] }
 0x1b3   : > { %v3049_v48 = vadd.f32 %v3018_v61, %v2863_v38  ;;  %v2837_v35 = vpop.f32.mrf.mxu0  ;;  %v2864_v36 = vadd.f32 %v2834_v28, %v2586_v60  ;;  %v8877_v28 = vrot.slane %v8856_v15, 9  ;;  %v3591_v38 = vrot.slane %v8857_v47, 5  ;;  %v8971_v61 = vld [vmem:[%s9868_s8 + $0xb4] sm:$0x1] }
 0x1b4   : > { %v4115_v25 = vsel %vm9900_vm7, %v4110_v26, %v4114_v2  ;;  %v4457_v15 = vsel %vm9870_vm4, %v9031_v23, %v4456_v24  ;;  %v4140_v51 = vshll.u32 %v8971_v61, 16  ;;  %v3595_v24 = vrot.slane %v8859_v52, 5 }
 0x1b5   : > { %v10893_v56 = vadd.f32 %v3424_v27, %v3049_v48  ;;  %8984 = vmatmul.msk.bf16.gmra.mxu1 %vm351_vm3, %v4237_v21  ;;  %8887 = vmatmul.msk.bf16.gmra.mxu3 %vm351_vm3, %v3647_v33  ;;  %v3592_v10 = vsel %vm9870_vm4, %v8877_v28, %v3591_v38  ;;  %v9032_v21 = vrot.slane %v9011_v17, 9  ;;  %v8969_v33 = vld [vmem:[%s9868_s8 + $0xac] sm:$0x1]  ;;  %v4227_v14 = vunpack.c.l.b16 %v4115_v25 }
 0x1b6   : > { %8944 = vmatmul.msk.bf16.gmra.mxu0 %vm351_vm3, %v8927_v39  ;;  %v4119_v39 = vrot.slane %v4117_v20, 4  ;;  %v3637_v48 = vunpack.c.l.b16 %v3588_v5  ;;  %v4126_v2 = vshll.u32 %v8969_v33, 16  ;;  %v4506_v17 = vunpack.c.l.b16 %v4457_v15  ;;  %v8861_v20 = vld [vmem:[%s9868_s8 + $0xcc] sm:$0x1]  ;;  %v9016_v15 = vld [vmem:[%s9868_s8 + $0xd4] sm:$0x1] }
 0x1b7   : > { %v3426_v58 = vpop.f32.mrf.mxu2  ;;  %v4238_v28 = vpack.c.b16 %v4227_v14, %v4226_v13  ;;  %v8974_v13 = vld [vmem:[%s9868_s8 + $0xd0] sm:$0xf]  ;;  %v4147_v33 = vrot.slane %v4145_v62, 4  ;;  %v4150_v61 = vrot.slane %v4148_v42, 5  ;;  %v8934_v42 = vld [vmem:[%s9868_s8 + $0xc8] sm:$0xf] }
 0x1b8   : > { %v2559_v11 = vpop.f32.mrf.mxu3  ;;  %v4123_v19 = vor.u32 %v4122_v1, %v4119_v39  ;;  %v4159_v39 = vshrl.u32 %v8974_v13, 16  ;;  %v4162_v1 = vshll.u32 %v8974_v13, 16 }
 0x1b9   : > { %v2587_v59 = vadd.f32 %v2559_v11, %v10632_v63  ;;  %v4460_v63 = vrot.slane %v9012_v9, 5  ;;  %v8860_v9 = vld [vmem:[%s9868_s8 + $0xc8] sm:$0xe] }
 0x1ba   : > { %v3020_v27 = vpop.f32.mrf.mxu1  ;;  %v4124_v25 = vrot.slane %v4123_v19, 4  ;;  %v4151_v19 = vor.u32 %v4150_v61, %v4147_v33 }
 0x1bb   : > { %v3050_v29 = vadd.f32 %v3020_v27, %v2864_v36  ;;  %v2839_v43 = vpop.f32.mrf.mxu0  ;;  %v2865_v60 = vadd.f32 %v2837_v35, %v2587_v59  ;;  %v3638_v36 = vunpack.c.l.b16 %v3592_v10  ;;  %v9707_v35 = vld [vmem:[%s9868_s8 + $0xac] sm:$0xf0]  ;;  %v4461_v47 = vsel %vm9870_vm4, %v9032_v21, %v4460_v63  ;;  %v9013_v63 = vld [vmem:[%s9868_s8 + $0xc8] sm:$0xe] }
 0x1bc   : > { %9042 = vmatmul.msk.bf16.gmra.mxu2 %vm351_vm3, %v4516_v6  ;;  %v8858_v6 = vld [vmem:[%s9868_s8 + $0xc0] sm:$0xe]  ;;  %v4507_v11 = vunpack.c.l.b16 %v4461_v47  ;;  %v4128_v27 = vrot.slane %v4126_v2, 5  ;;  %v4138_v10 = vrot.slane %v4137_v53, 4  ;;  %v8879_v21 = vrot.slane %v8860_v9, 9 }
 0x1bd   : > { %v10916_v18 = vadd.f32 %v3426_v58, %v3050_v29  ;;  %v3648_v38 = vpack.c.b16 %v3638_v36, %v3637_v48  ;;  %v8931_v58 = vor.u32 %v9707_v35, %v8930_v22  ;;  %v8878_v23 = vrot.slane %v8858_v6, 9 }
 0x1be   : > { %v4517_v48 = vpack.c.b16 %v4507_v11, %v4506_v17  ;;  %v4129_v36 = vsel %vm9900_vm7, %v4124_v25, %v4128_v27  ;;  %v4154_v53 = vshll.u32 %v8973_v34, 16  ;;  %v8863_v27 = vld [vmem:[%s9868_s8 + $0xd4] sm:$0x1] }
 0x1bf   : > { %v3429_v46 = vpop.f32.mrf.mxu2  ;;  %v3596_v35 = vsel %vm9870_vm4, %v8878_v23, %v3595_v24  ;;  %v4228_v17 = vunpack.c.l.b16 %v4129_v36  ;;  %v3603_v61 = vrot.slane %v8863_v27, 5 }
 0x1c0   : > { %v2561_v44 = vpop.f32.mrf.mxu3  ;;  %v4156_v13 = vrot.slane %v4154_v53, 5  ;;  %v9103_v53 = vld [vmem:[%s9868_s8 + $0x40] sm:$0xf] }
 0x1c1   : > { %v2588_v26 = vadd.f32 %v2561_v44, %v10653_v32  ;;  %v4142_v32 = vrot.slane %v4140_v51, 5  ;;  %v9033_v51 = vrot.slane %v9013_v63, 9  ;;  %v8864_v63 = vld [vmem:[%s9868_s8 + $0xd8] sm:$0xe] }
 0x1c2   : > { %v3023_v7 = vpop.f32.mrf.mxu1 }
 0x1c3   : > { %v3051_v49 = vadd.f32 %v3023_v7, %v2865_v60  ;;  %v2842_v59 = vpop.f32.mrf.mxu0  ;;  %v2866_v5 = vadd.f32 %v2839_v43, %v2588_v26  ;;  %v3599_v60 = vrot.slane %v8861_v20, 5  ;;  %v9014_v43 = vld [vmem:[%s9868_s8 + $0xcc] sm:$0x1]  ;;  %v4143_v22 = vsel %vm9900_vm7, %v4138_v10, %v4142_v32 }
 0x1c4   : > { %v4464_v37 = vrot.slane %v9014_v43, 5  ;;  %v4161_v26 = vrot.slane %v4159_v39, 4  ;;  %v4468_v7 = vrot.slane %v9016_v15, 5  ;;  %v4229_v11 = vunpack.c.l.b16 %v4143_v22  ;;  %v8865_v43 = vld [vmem:[%s9868_s8 + $0xdc] sm:$0x1] }
 0x1c5   : > { %v10931_v29 = vadd.f32 %v3429_v46, %v3051_v49  ;;  %8985 = vmatmul.msk.bf16.gmra.mxu1 %vm351_vm3, %v4238_v28  ;;  %8888 = vmatmul.msk.bf16.gmra.mxu3 %vm351_vm3, %v3648_v38  ;;  %v9015_v46 = vld [vmem:[%s9868_s8 + $0xd0] sm:$0xe]  ;;  %v3600_v2 = vsel %vm9870_vm4, %v8879_v21, %v3599_v60  ;;  %v4164_v28 = vrot.slane %v4162_v1, 5  ;;  %v3639_v20 = vunpack.c.l.b16 %v3596_v35 }
 0x1c6   : > { %8945 = vmatmul.msk.bf16.gmra.mxu0 %vm351_vm3, %v8931_v58  ;;  %v9034_v52 = vrot.slane %v9015_v46, 9  ;;  %v3640_v62 = vunpack.c.l.b16 %v3600_v2  ;;  %v4465_v49 = vsel %vm9870_vm4, %v9033_v51, %v4464_v37  ;;  %v4152_v32 = vrot.slane %v4151_v19, 4  ;;  %v8976_v37 = vld [vmem:[%s9868_s8 + $0xd8] sm:$0xf]  ;;  %v8978_v19 = vld [vmem:[%s9868_s8 + $0xe0] sm:$0xf] }
 0x1c7   : > { %v3431_v41 = vpop.f32.mrf.mxu2  ;;  %v4165_v25 = vor.u32 %v4164_v28, %v4161_v26  ;;  %v4239_v60 = vpack.c.b16 %v4229_v11, %v4228_v17  ;;  %v4508_v34 = vunpack.c.l.b16 %v4465_v49  ;;  %v8881_v2 = vrot.slane %v8864_v63, 9  ;;  %v9019_v11 = vld [vmem:[%s9868_s8 + $0xe0] sm:$0xe] }
 0x1c8   : > { %v2564_v14 = vpop.f32.mrf.mxu3  ;;  %v4469_v24 = vsel %vm9870_vm4, %v9034_v52, %v4468_v7  ;;  %v3649_v1 = vpack.c.b16 %v3640_v62, %v3639_v20  ;;  %v4157_v36 = vsel %vm9900_vm7, %v4152_v32, %v4156_v13  ;;  %v9105_v52 = vld [vmem:[%s9868_s8 + $0x48] sm:$0xf]  ;;  %v9020_v20 = vld [vmem:[%s9868_s8 + $0xe4] sm:$0x1]  ;;  %v4173_v62 = vshrl.u32 %v8976_v37, 16 }
 0x1c9   : > { %v2589_v47 = vadd.f32 %v2564_v14, %v10669_v16  ;;  %v8975_v16 = vld [vmem:[%s9868_s8 + $0xd4] sm:$0x1]  ;;  %v4166_v22 = vrot.slane %v4165_v25, 4  ;;  %v4190_v27 = vshll.u32 %v8978_v19, 16  ;;  %v4849_v32 = vshll.u32 %v9103_v53, 16 }
 0x1ca   : > { %v3025_v44 = vpop.f32.mrf.mxu1  ;;  %v4168_v10 = vshll.u32 %v8975_v16, 16  ;;  %v9036_v63 = vrot.slane %v9019_v11, 9 }
 0x1cb   : > { %v3052_v38 = vadd.f32 %v3025_v44, %v2866_v5  ;;  %v2844_v58 = vpop.f32.mrf.mxu0  ;;  %v2867_v6 = vadd.f32 %v2842_v59, %v2589_v47  ;;  %v8862_v5 = vld [vmem:[%s9868_s8 + $0xd0] sm:$0xe] }
 0x1cc   : > { %9043 = vmatmul.msk.bf16.gmra.mxu2 %vm351_vm3, %v4517_v48  ;;  %v9708_v59 = vld [vmem:[%s9868_s8 + $0xcc] sm:$0xf0]  ;;  %v8880_v33 = vrot.slane %v8862_v5, 9  ;;  %v4509_v48 = vunpack.c.l.b16 %v4469_v24  ;;  %v4170_v35 = vrot.slane %v4168_v10, 5  ;;  %v4187_v5 = vshrl.u32 %v8978_v19, 16 }
 0x1cd   : > { %v10952_v9 = vadd.f32 %v3431_v41, %v3052_v38  ;;  %v8935_v41 = vor.u32 %v9708_v59, %v8934_v42  ;;  %v10981_v38 = vunpack.c.l.b16 %v4157_v36  ;;  %v4176_v42 = vshll.u32 %v8976_v37, 16  ;;  %v9104_v36 = vld [vmem:[%s9868_s8 + $0x44] sm:$0x1]  ;;  %v9106_v19 = vld [vmem:[%s9868_s8 + $0x4c] sm:$0x1] }
 0x1ce   : > { %v10969_v51 = vsel %vm9870_vm4, %v8880_v33, %v3603_v61  ;;  %v4518_v26 = vpack.c.b16 %v4509_v48, %v4508_v34  ;;  %v4171_v28 = vsel %vm9900_vm7, %v4166_v22, %v4170_v35  ;;  %v4846_v59 = vshrl.u32 %v9103_v53, 16 }
 0x1cf   : > { %v3434_v23 = vpop.f32.mrf.mxu2  ;;  %v3641_v17 = vunpack.c.l.b16 %v10969_v51  ;;  %v10992_v25 = vunpack.c.l.b16 %v4171_v28  ;;  %v4860_v10 = vshrl.u32 %v9105_v52, 16  ;;  %v4175_v34 = vrot.slane %v4173_v62, 4  ;;  %v9445_v51 = vld [vmem:[%s12035_s1 + $0x58] sm:$0xf] }
 0x1d0   : > { %v2566_v21 = vpop.f32.mrf.mxu3  ;;  %v4192_v48 = vrot.slane %v4190_v27, 5  ;;  %v4848_v22 = vrot.slane %v4846_v59, 4  ;;  %v4851_v35 = vrot.slane %v4849_v32, 5  ;;  %v4869_v32 = vshll.u32 %v9106_v19, 16 }
 0x1d1   : > { %v2590_v39 = vadd.f32 %v2566_v21, %v10686_v40  ;;  %v3607_v40 = vrot.slane %v8865_v43, 5  ;;  %v4476_v43 = vrot.slane %v9020_v20, 5  ;;  %v4240_v37 = vpack.c.b16 %v10992_v25, %v10981_v38 }
 0x1d2   : > { %v3028_v14 = vpop.f32.mrf.mxu1 }
 0x1d3   : > { %v3053_v46 = vadd.f32 %v3028_v14, %v2867_v6  ;;  %v2847_v15 = vpop.f32.mrf.mxu0  ;;  %v2868_v47 = vadd.f32 %v2844_v58, %v2590_v39  ;;  %v9017_v58 = vld [vmem:[%s9868_s8 + $0xd8] sm:$0xe]  ;;  %v9018_v6 = vld [vmem:[%s9868_s8 + $0xdc] sm:$0x1]  ;;  %v3608_v16 = vsel %vm9870_vm4, %v8881_v2, %v3607_v40  ;;  %v4178_v14 = vrot.slane %v4176_v42, 5 }
 0x1d4   : > { %v9035_v21 = vrot.slane %v9017_v58, 9  ;;  %v3642_v2 = vunpack.c.l.b16 %v3608_v16  ;;  %v8938_v58 = vld [vmem:[%s9868_s8 + $0xd8] sm:$0xf]  ;;  %v4852_v42 = vor.u32 %v4851_v35, %v4848_v22  ;;  %v9107_v22 = vld [vmem:[%s9868_s8 + $0x50] sm:$0xf] }
 0x1d5   : > { %v10972_v44 = vadd.f32 %v3434_v23, %v3053_v46  ;;  %8986 = vmatmul.msk.bf16.gmra.mxu1 %vm351_vm3, %v4239_v60  ;;  %8889 = vmatmul.msk.bf16.gmra.mxu3 %vm351_vm3, %v3649_v1  ;;  %v4863_v23 = vshll.u32 %v9105_v52, 16  ;;  %v4472_v60 = vrot.slane %v9018_v6, 5  ;;  %v8977_v1 = vld [vmem:[%s9868_s8 + $0xdc] sm:$0x1]  ;;  %v9709_v6 = vld [vmem:[%s9868_s8 + $0xdc] sm:$0xf0]  ;;  %v4179_v38 = vor.u32 %v4178_v14, %v4175_v34 }
 0x1d6   : > { %8946 = vmatmul.msk.bf16.gmra.mxu0 %vm351_vm3, %v8935_v41  ;;  %v8979_v41 = vld [vmem:[%s9868_s8 + $0xe4] sm:$0x1]  ;;  %v4182_v16 = vshll.u32 %v8977_v1, 16  ;;  %v3650_v27 = vpack.c.b16 %v3642_v2, %v3641_v17  ;;  %v8939_v25 = vor.u32 %v9709_v6, %v8938_v58  ;;  %v4871_v17 = vrot.slane %v4869_v32, 5  ;;  %v9109_v35 = vld [vmem:[%s9868_s8 + $0x58] sm:$0xf] }
 0x1d7   : > { %v3436_v7 = vpop.f32.mrf.mxu2  ;;  %v4865_v40 = vrot.slane %v4863_v23, 5  ;;  %v4473_v52 = vsel %vm9870_vm4, %v9035_v21, %v4472_v60  ;;  %v4196_v11 = vshll.u32 %v8979_v41, 16  ;;  %v4853_v41 = vrot.slane %v4852_v42, 4 }
 0x1d8   : > { %v2569_v49 = vpop.f32.mrf.mxu3  ;;  %v4888_v58 = vshrl.u32 %v9109_v35, 16  ;;  %v4891_v6 = vshll.u32 %v9109_v35, 16 }
 0x1d9   : > { %v2591_v13 = vadd.f32 %v2569_v49, %v10708_v57  ;;  %v4189_v57 = vrot.slane %v4187_v5, 4  ;;  %v4855_v49 = vshll.u32 %v9104_v36, 16 }
 0x1da   : > { %v3030_v24 = vpop.f32.mrf.mxu1  ;;  %v4893_v32 = vrot.slane %v4891_v6, 5 }
 0x1db   : > { %v3054_v33 = vadd.f32 %v3030_v24, %v2868_v47  ;;  %v2849_v61 = vpop.f32.mrf.mxu0  ;;  %v2869_v39 = vadd.f32 %v2847_v15, %v2591_v13  ;;  %v4862_v47 = vrot.slane %v4860_v10, 4  ;;  %v9290_v15 = vld [vmem:[%s12035_s1 + $0x4c] sm:$0xf]  ;;  %v4193_v62 = vor.u32 %v4192_v48, %v4189_v57 }
 0x1dc   : > { %9044 = vmatmul.msk.bf16.gmra.mxu2 %vm351_vm3, %v4518_v26  ;;  %v6006_v53 = vsel %vm376_vm0, %v9290_v15, 0  ;;  %v6875_v26 = vsel %vm376_vm0, %v9445_v51, 0  ;;  %v4510_v10 = vunpack.c.l.b16 %v4473_v52  ;;  %v4857_v34 = vrot.slane %v4855_v49, 5  ;;  %v9710_v49 = vld [vmem:[%s9868_s8 + $0x44] sm:$0xf0] }
 0x1dd   : > { %v10998_v46 = vadd.f32 %v3436_v7, %v3054_v33  ;;  %v4477_v7 = vsel %vm9870_vm4, %v9036_v63, %v4476_v43  ;;  %6015 = vmatpush.bf16.msrb.mxu3 %v6006_v53  ;;  %6884 = vmatpush.bf16.msrb.mxu2 %v6875_v26  ;;  %v4866_v59 = vor.u32 %v4865_v40, %v4862_v47  ;;  %v4184_v63 = vrot.slane %v4182_v16, 5 }
 0x1de   : > { %v4511_v23 = vunpack.c.l.b16 %v4477_v7  ;;  %v4198_v43 = vrot.slane %v4196_v11, 5  ;;  %v4180_v33 = vrot.slane %v4179_v38, 4  ;;  %v4194_v1 = vrot.slane %v4193_v62, 4  ;;  %v9065_v38 = vld [vmem:[%s9868_s8 + $0x40] sm:$0xf] }
 0x1df   : > { %v3439_v28 = vpop.f32.mrf.mxu2  ;;  %v4874_v26 = vshrl.u32 %v9107_v22, 16 }
 0x1e0   : > { %v2571_v20 = vpop.f32.mrf.mxu3  ;;  %v4519_v47 = vpack.c.b16 %v4511_v23, %v4510_v10  ;;  %v4185_v40 = vsel %vm9900_vm7, %v4180_v33, %v4184_v63  ;;  %v4199_v51 = vsel %vm9900_vm7, %v4194_v1, %v4198_v43  ;;  %v9110_v10 = vld [vmem:[%s9868_s8 + $0x5c] sm:$0x1]  ;;  %v9144_v43 = vld [vmem:[%s9868_s8 + $0x40] sm:$0xe]  ;;  %v9145_v33 = vld [vmem:[%s9868_s8 + $0x44] sm:$0x1] }
 0x1e1   : > { %v2592_v5 = vadd.f32 %v2571_v20, %v10733_v3  ;;  %v4867_v3 = vrot.slane %v4866_v59, 4  ;;  %v4232_v16 = vunpack.c.l.b16 %v4185_v40  ;;  %v4233_v20 = vunpack.c.l.b16 %v4199_v51 }
 0x1e2   : > { %v3033_v13 = vpop.f32.mrf.mxu1  ;;  %v4890_v59 = vrot.slane %v4888_v58, 4 }
 0x1e3   : > { %v3055_v24 = vadd.f32 %v3033_v13, %v2869_v39  ;;  %v2852_v21 = vpop.f32.mrf.mxu0  ;;  %v2870_v60 = vadd.f32 %v2849_v61, %v2592_v5  ;;  %v9347_v61 = vld [vmem:[%s12035_s1 + $0x50] sm:$0xf]  ;;  %v9372_v39 = vld [vmem:[%s12035_s1 + $0x54] sm:$0xf]  ;;  %v4872_v19 = vsel %vm9900_vm7, %v4867_v3, %v4871_v17  ;;  %v4876_v5 = vrot.slane %v4874_v26, 4 }
 0x1e4   : > { %v6284_v57 = vsel %vm376_vm0, %v9347_v61, 0  ;;  %v6469_v48 = vsel %vm376_vm0, %v9372_v39, 0  ;;  %v5088_v42 = vunpack.c.l.b16 %v4872_v19  ;;  %v4894_v61 = vor.u32 %v4893_v32, %v4890_v59 }
 0x1e5   : > { %v11018_v14 = vadd.f32 %v3439_v28, %v3055_v24  ;;  %8987 = vmatmul.msk.bf16.gmra.mxu1 %vm351_vm3, %v4240_v37  ;;  %8890 = vmatmul.msk.bf16.gmra.mxu3 %vm351_vm3, %v3650_v27  ;;  %v4858_v37 = vsel %vm9900_vm7, %v4853_v41, %v4857_v34  ;;  %v4877_v28 = vshll.u32 %v9107_v22, 16  ;;  %v9146_v41 = vld [vmem:[%s9868_s8 + $0x48] sm:$0xe]  ;;  %v9147_v34 = vld [vmem:[%s9868_s8 + $0x4c] sm:$0x1]  ;;  %v4897_v39 = vshll.u32 %v9110_v10, 16 }
 0x1e6   : > { %8947 = vmatmul.msk.bf16.gmra.mxu0 %vm351_vm3, %v8939_v25  ;;  %6478 = vmatpush.bf16.msrb.mxu1 %v6469_v48  ;;  %v5087_v62 = vunpack.c.l.b16 %v4858_v37  ;;  %v9108_v25 = vld [vmem:[%s9868_s8 + $0x54] sm:$0x1]  ;;  %v9220_v22 = vld [vmem:[%s9868_s8 + $0x60] sm:$0xf]  ;;  %v9177_v40 = vrot.slane %v9146_v41, 9  ;;  %v4895_v19 = vrot.slane %v4894_v61, 4 }
 0x1e7   : > { %v3441_v36 = vpop.f32.mrf.mxu2  ;;  %6293 = vmatpush.bf16.msrb.mxu0 %v6284_v57  ;;  %v4879_v27 = vrot.slane %v4877_v28, 5  ;;  %v4883_v17 = vshll.u32 %v9108_v25, 16  ;;  %v9111_v28 = vld [vmem:[%s9868_s8 + $0x70] sm:$0xf]  ;;  %v9114_v61 = vld [vmem:[%s9868_s8 + $0x7c] sm:$0x1] }
 0x1e8   : > { %v2574_v2 = vpop.f32.mrf.mxu3  ;;  %v5103_v63 = vpack.c.b16 %v5088_v42, %v5087_v62  ;;  %v4902_v42 = vshrl.u32 %v9111_v28, 16 }
 0x1e9   : > { %v2593_v15 = vadd.f32 %v2574_v2, %v10750_v8  ;;  %v4880_v3 = vor.u32 %v4879_v27, %v4876_v5  ;;  %v9718_v2 = vld [vmem:[%s9868_s8 + $0x64] sm:$0xf0]  ;;  %v4885_v37 = vrot.slane %v4883_v17, 5  ;;  %v9148_v17 = vld [vmem:[%s9868_s8 + $0x50] sm:$0xe] }
 0x1ea   : > { %v3035_v53 = vpop.f32.mrf.mxu1  ;;  %v9221_v6 = vor.u32 %v9718_v2, %v9220_v22  ;;  %v9150_v22 = vld [vmem:[%s9868_s8 + $0x58] sm:$0xe] }
 0x1eb   : > { %v3056_v52 = vadd.f32 %v3035_v53, %v2870_v60  ;;  %v2854_v7 = vpop.f32.mrf.mxu0  ;;  %v2871_v8 = vadd.f32 %v2852_v21, %v2593_v15  ;;  %v4241_v21 = vpack.c.b16 %v4233_v20, %v4232_v16  ;;  %v9066_v60 = vor.u32 %v9710_v49, %v9065_v38 }
 0x1ec   : > { %9045 = vmatmul.msk.bf16.gmra.mxu2 %vm351_vm3, %v4519_v47  ;;  %v5285_v47 = vrot.slane %v9145_v33, 5  ;;  %v5289_v15 = vrot.slane %v9147_v34, 5  ;;  %v4881_v51 = vrot.slane %v4880_v3, 4  ;;  %v4899_v53 = vrot.slane %v4897_v39, 5 }
 0x1ed   : > { %v11043_v11 = vadd.f32 %v3441_v36, %v3056_v52  ;;  %v9113_v52 = vld [vmem:[%s9868_s8 + $0x78] sm:$0xf]  ;;  %v4905_v49 = vshll.u32 %v9111_v28, 16  ;;  %v9178_v28 = vrot.slane %v9148_v17, 9 }
 0x1ee   : > { %v5290_v16 = vsel %vm9870_vm4, %v9177_v40, %v5289_v15  ;;  %v4886_v38 = vsel %vm9900_vm7, %v4881_v51, %v4885_v37  ;;  %v4900_v62 = vsel %vm9900_vm7, %v4895_v19, %v4899_v53  ;;  %v4916_v59 = vshrl.u32 %v9113_v52, 16  ;;  %v9712_v17 = vld [vmem:[%s9868_s8 + $0x74] sm:$0xf0] }
 0x1ef   : > { %v3444_v13 = vpop.f32.mrf.mxu2  ;;  %v4919_v32 = vshll.u32 %v9113_v52, 16  ;;  %v5366_v10 = vunpack.c.l.b16 %v5290_v16  ;;  %v9115_v16 = vld [vmem:[%s9868_s8 + $0x80] sm:$0xf] }
 0x1f0   : > { %v2576_v23 = vpop.f32.mrf.mxu3  ;;  %v4918_v41 = vrot.slane %v4916_v59, 4 }
 0x1f1   : > { %v2594_v24 = vadd.f32 %v2576_v23, %v10771_v55  ;;  %v9176_v55 = vrot.slane %v9144_v43, 9  ;;  %v9069_v23 = vld [vmem:[%s9868_s8 + $0x50] sm:$0xf]  ;;  %v4907_v43 = vrot.slane %v4905_v49, 5  ;;  %v4921_v34 = vrot.slane %v4919_v32, 5 }
 0x1f2   : > { %v3038_v1 = vpop.f32.mrf.mxu1 }
 0x1f3   : > { %v3057_v57 = vadd.f32 %v3038_v1, %v2871_v8  ;;  %v3872_v48 = vpop.f32.mrf.mxu0  ;;  %v2872_v36 = vadd.f32 %v2854_v7, %v2594_v24  ;;  %v5286_v8 = vsel %vm9870_vm4, %v9176_v55, %v5285_v47  ;;  %v9711_v24 = vld [vmem:[%s9868_s8 + $0x54] sm:$0xf0]  ;;  %v9112_v1 = vld [vmem:[%s9868_s8 + $0x74] sm:$0x1]  ;;  %v9151_v55 = vld [vmem:[%s9868_s8 + $0x5c] sm:$0x1]  ;;  %v4922_v53 = vor.u32 %v4921_v34, %v4918_v41 }
 0x1f4   : > { %v5365_v25 = vunpack.c.l.b16 %v5286_v8  ;;  %v4911_v15 = vshll.u32 %v9112_v1, 16  ;;  %v9719_v8 = vld [vmem:[%s9868_s8 + $0x74] sm:$0xf0] }
 0x1f5   : > { %v11055_v35 = vadd.f32 %v3444_v13, %v3057_v57  ;;  %8988 = vmatmul.msk.bf16.gmra.mxu1 %vm351_vm3, %v4241_v21  ;;  %9095 = vmatmul.msk.bf16.vlgmr.msra.gmra.mxu3 %vm351_vm3, %v9066_v60  ;;  %v5089_v21 = vunpack.c.l.b16 %v4886_v38  ;;  %v5090_v60 = vunpack.c.l.b16 %v4900_v62  ;;  %v4923_v49 = vrot.slane %v4922_v53, 4  ;;  %v9153_v53 = vld [vmem:[%s9868_s8 + $0x74] sm:$0x1] }
 0x1f6   : > { %9136 = vmatmul.msk.bf16.vlgmr.msra.gmra.mxu0 %vm351_vm3, %v5103_v63  ;;  %v4904_v63 = vrot.slane %v4902_v42, 4  ;;  %v5381_v57 = vpack.c.b16 %v5366_v10, %v5365_v25  ;;  %v4913_v42 = vrot.slane %v4911_v15, 5  ;;  %v4930_v25 = vshrl.u32 %v9115_v16, 16 }
 0x1f7   : > { %v3446_v26 = vpop.f32.mrf.mxu2  ;;  %v5104_v47 = vpack.c.b16 %v5090_v60, %v5089_v21 }
 0x1f8   : > { %v3687_v58 = vpop.f32.mrf.mxu3  ;;  %v4908_v40 = vor.u32 %v4907_v43, %v4904_v63 }
 0x1f9   : > { %v3727_v7 = vadd.f32 %v3687_v58, %v10787_v30  ;;  %v9179_v58 = vrot.slane %v9150_v22, 9 }
 0x1fa   : > { %v3040_v20 = vpop.f32.mrf.mxu1  ;;  %v4909_v62 = vrot.slane %v4908_v40, 4 }
 0x1fb   : > { %v3058_v5 = vadd.f32 %v3040_v20, %v2872_v36  ;;  %v3874_v30 = vpop.f32.mrf.mxu0  ;;  %v3912_v27 = vadd.f32 %v3872_v48, %v3727_v7  ;;  %v9070_v48 = vor.u32 %v9711_v24, %v9069_v23  ;;  %v9149_v36 = vld [vmem:[%s9868_s8 + $0x54] sm:$0x1]  ;;  %v9224_v7 = vld [vmem:[%s9868_s8 + $0x70] sm:$0xf]  ;;  %v9117_v20 = vld [vmem:[%s9868_s8 + $0x88] sm:$0xf] }
 0x1fc   : > { %9250 = vmatmul.msk.bf16.vlgmr.msra.gmra.mxu2 %vm351_vm3, %v9221_v6  ;;  %v5297_v6 = vrot.slane %v9151_v55, 5  ;;  %v4933_v23 = vshll.u32 %v9115_v16, 16  ;;  %v4944_v24 = vshrl.u32 %v9117_v20, 16  ;;  %v4947_v21 = vshll.u32 %v9117_v20, 16 }
 0x1fd   : > { %v11073_v13 = vadd.f32 %v3446_v26, %v3058_v5  ;;  %v4925_v26 = vshll.u32 %v9114_v61, 16  ;;  %v4914_v1 = vsel %vm9900_vm7, %v4909_v62, %v4913_v42  ;;  %v4932_v61 = vrot.slane %v4930_v25, 4  ;;  %v9720_v25 = vld [vmem:[%s9868_s8 + $0x94] sm:$0xf0] }
 0x1fe   : > { %v5298_v32 = vsel %vm9870_vm4, %v9179_v58, %v5297_v6  ;;  %v4949_v22 = vrot.slane %v4947_v21, 5  ;;  %v5091_v55 = vunpack.c.l.b16 %v4914_v1  ;;  %v9155_v58 = vld [vmem:[%s9868_s8 + $0x7c] sm:$0x1] }
 0x1ff   : > { %v4556_v33 = vpop.f32.mrf.mxu2  ;;  %v4927_v5 = vrot.slane %v4925_v26, 5 }
 0x200   : > { %v3689_v3 = vpop.f32.mrf.mxu3 }
 0x201   : > { %v3728_v39 = vadd.f32 %v3689_v3, %v10808_v31  ;;  %v5293_v31 = vrot.slane %v9149_v36, 5  ;;  %v4928_v41 = vsel %vm9900_vm7, %v4923_v49, %v4927_v5  ;;  %v5368_v3 = vunpack.c.l.b16 %v5298_v32  ;;  %v9228_v5 = vld [vmem:[%s9868_s8 + $0x90] sm:$0xf] }
 0x202   : > { %v4278_v2 = vpop.f32.mrf.mxu1  ;;  %v4946_v36 = vrot.slane %v4944_v24, 4 }
 0x203   : > { %v4318_v51 = vadd.f32 %v4278_v2, %v3912_v27  ;;  %v3877_v37 = vpop.f32.mrf.mxu0  ;;  %v3913_v19 = vadd.f32 %v3874_v30, %v3728_v39  ;;  %v9225_v27 = vor.u32 %v9719_v8, %v9224_v7  ;;  %v5294_v59 = vsel %vm9870_vm4, %v9178_v28, %v5293_v31  ;;  %v9154_v31 = vld [vmem:[%s9868_s8 + $0x78] sm:$0xe] }
 0x204   : > { %v5367_v34 = vunpack.c.l.b16 %v5294_v59  ;;  %v5092_v2 = vunpack.c.l.b16 %v4928_v41  ;;  %v4950_v7 = vor.u32 %v4949_v22, %v4946_v36  ;;  %v5305_v59 = vrot.slane %v9155_v58, 5 }
 0x205   : > { %v11084_v52 = vadd.f32 %v4556_v33, %v4318_v51  ;;  %9193 = vmatmul.msk.bf16.vlgmr.msra.gmra.mxu1 %vm351_vm3, %v5381_v57  ;;  %9096 = vmatmul.msk.bf16.gmra.mxu3 %vm351_vm3, %v9070_v48  ;;  %v9116_v57 = vld [vmem:[%s9868_s8 + $0x84] sm:$0x1]  ;;  %v4935_v48 = vrot.slane %v4933_v23, 5 }
 0x206   : > { %9137 = vmatmul.msk.bf16.gmra.mxu0 %vm351_vm3, %v5104_v47  ;;  %v9118_v47 = vld [vmem:[%s9868_s8 + $0x8c] sm:$0x1]  ;;  %v5382_v51 = vpack.c.b16 %v5368_v3, %v5367_v34  ;;  %v4939_v26 = vshll.u32 %v9116_v57, 16  ;;  %v5105_v20 = vpack.c.b16 %v5092_v2, %v5091_v55  ;;  %v4951_v23 = vrot.slane %v4950_v7, 4 }
 0x207   : > { %v4558_v38 = vpop.f32.mrf.mxu2  ;;  %v4936_v6 = vor.u32 %v4935_v48, %v4932_v61  ;;  %v4953_v8 = vshll.u32 %v9118_v47, 16  ;;  %v9122_v7 = vld [vmem:[%s9868_s8 + $0xac] sm:$0x1] }
 0x208   : > { %v3692_v30 = vpop.f32.mrf.mxu3  ;;  %v4941_v32 = vrot.slane %v4939_v26, 5 }
 0x209   : > { %v3729_v10 = vadd.f32 %v3692_v30, %v10821_v0  ;;  %v9073_v0 = vld [vmem:[%s9868_s8 + $0x70] sm:$0xf]  ;;  %v5301_v30 = vrot.slane %v9153_v53, 5  ;;  %v4955_v24 = vrot.slane %v4953_v8, 5 }
 0x20a   : > { %v4280_v60 = vpop.f32.mrf.mxu1 }
 0x20b   : > { %v4319_v63 = vadd.f32 %v4280_v60, %v3913_v19  ;;  %v3879_v43 = vpop.f32.mrf.mxu0  ;;  %v3914_v33 = vadd.f32 %v3877_v37, %v3729_v10  ;;  %v9074_v37 = vor.u32 %v9712_v17, %v9073_v0  ;;  %v9152_v19 = vld [vmem:[%s9868_s8 + $0x70] sm:$0xe]  ;;  %v4937_v10 = vrot.slane %v4936_v6, 4  ;;  %v9119_v60 = vld [vmem:[%s9868_s8 + $0xa0] sm:$0xf] }
 0x20c   : > { %9251 = vmatmul.msk.bf16.gmra.mxu2 %vm351_vm3, %v9225_v27  ;;  %v9180_v49 = vrot.slane %v9152_v19, 9  ;;  %v9181_v27 = vrot.slane %v9154_v31, 9  ;;  %v4956_v0 = vsel %vm9900_vm7, %v4951_v23, %v4955_v24  ;;  %v4958_v61 = vshrl.u32 %v9119_v60, 16  ;;  %v9713_v19 = vld [vmem:[%s9868_s8 + $0x84] sm:$0xf0] }
 0x20d   : > { %v11105_v39 = vadd.f32 %v4558_v38, %v4319_v63  ;;  %v9121_v63 = vld [vmem:[%s9868_s8 + $0xa8] sm:$0xf]  ;;  %v4942_v3 = vsel %vm9900_vm7, %v4937_v10, %v4941_v32  ;;  %v4961_v57 = vshll.u32 %v9119_v60, 16  ;;  %v9120_v6 = vld [vmem:[%s9868_s8 + $0xa4] sm:$0x1]  ;;  %v4981_v10 = vshll.u32 %v9122_v7, 16 }
 0x20e   : > { %v5302_v1 = vsel %vm9870_vm4, %v9180_v49, %v5301_v30  ;;  %v5306_v34 = vsel %vm9870_vm4, %v9181_v27, %v5305_v59  ;;  %v4972_v48 = vshrl.u32 %v9121_v63, 16  ;;  %v4975_v36 = vshll.u32 %v9121_v63, 16  ;;  %v9157_v49 = vld [vmem:[%s9868_s8 + $0x84] sm:$0x1]  ;;  %v9158_v30 = vld [vmem:[%s9868_s8 + $0x88] sm:$0xe] }
 0x20f   : > { %v4561_v40 = vpop.f32.mrf.mxu2  ;;  %v5369_v2 = vunpack.c.l.b16 %v5302_v1  ;;  %v4960_v53 = vrot.slane %v4958_v61, 4  ;;  %v4963_v26 = vrot.slane %v4961_v57, 5  ;;  %v9159_v27 = vld [vmem:[%s9868_s8 + $0x8c] sm:$0x1]  ;;  %v4967_v32 = vshll.u32 %v9120_v6, 16 }
 0x210   : > { %v3694_v15 = vpop.f32.mrf.mxu3  ;;  %v4977_v31 = vrot.slane %v4975_v36, 5  ;;  %v9232_v60 = vld [vmem:[%s9868_s8 + $0xa0] sm:$0xf]  ;;  %v9183_v1 = vrot.slane %v9158_v30, 9  ;;  %v9123_v57 = vld [vmem:[%s9868_s8 + $0xb0] sm:$0xf] }
 0x211   : > { %v3730_v28 = vadd.f32 %v3694_v15, %v10843_v4  ;;  %v9077_v15 = vld [vmem:[%s9868_s8 + $0x80] sm:$0xf]  ;;  %v4964_v59 = vor.u32 %v4963_v26, %v4960_v53 }
 0x212   : > { %v4283_v16 = vpop.f32.mrf.mxu1 }
 0x213   : > { %v4320_v38 = vadd.f32 %v4283_v16, %v3914_v33  ;;  %v3882_v62 = vpop.f32.mrf.mxu0  ;;  %v3915_v42 = vadd.f32 %v3879_v43, %v3730_v28  ;;  %v9229_v33 = vor.u32 %v9720_v25, %v9228_v5  ;;  %v4974_v28 = vrot.slane %v4972_v48, 4 }
 0x215   : > { %v11115_v4 = vadd.f32 %v4561_v40, %v4320_v38  ;;  %9194 = vmatmul.msk.bf16.gmra.mxu1 %vm351_vm3, %v5382_v51  ;;  %9097 = vmatmul.msk.bf16.gmra.mxu3 %vm351_vm3, %v9074_v37  ;;  %v5370_v40 = vunpack.c.l.b16 %v5306_v34  ;;  %v5093_v51 = vunpack.c.l.b16 %v4942_v3  ;;  %v5094_v37 = vunpack.c.l.b16 %v4956_v0 }
 0x216   : > { %9138 = vmatmul.msk.bf16.gmra.mxu0 %vm351_vm3, %v5105_v20  ;;  %v9078_v38 = vor.u32 %v9713_v19, %v9077_v15  ;;  %v4978_v25 = vor.u32 %v4977_v31, %v4974_v28  ;;  %v4965_v34 = vrot.slane %v4964_v59, 4  ;;  %v4969_v3 = vrot.slane %v4967_v32, 5  ;;  %v9160_v32 = vld [vmem:[%s9868_s8 + $0xa0] sm:$0xe] }
 0x217   : > { %v4563_v21 = vpop.f32.mrf.mxu2  ;;  %v5383_v20 = vpack.c.b16 %v5370_v40, %v5369_v2  ;;  %v4989_v19 = vshll.u32 %v9123_v57, 16 }
 0x218   : > { %v3697_v43 = vpop.f32.mrf.mxu3  ;;  %v4979_v0 = vrot.slane %v4978_v25, 4  ;;  %v4970_v15 = vsel %vm9900_vm7, %v4965_v34, %v4969_v3  ;;  %v9126_v25 = vld [vmem:[%s9868_s8 + $0xbc] sm:$0x1] }
 0x219   : > { %v3731_v41 = vadd.f32 %v3697_v43, %v10858_v50  ;;  %v9721_v43 = vld [vmem:[%s9868_s8 + $0xa4] sm:$0xf0] }
 0x21a   : > { %v4285_v17 = vpop.f32.mrf.mxu1  ;;  %v9233_v36 = vor.u32 %v9721_v43, %v9232_v60  ;;  %v9162_v60 = vld [vmem:[%s9868_s8 + $0xa8] sm:$0xe] }
 0x21b   : > { %v4321_v22 = vadd.f32 %v4285_v17, %v3915_v42  ;;  %v3884_v55 = vpop.f32.mrf.mxu0  ;;  %v3916_v50 = vadd.f32 %v3882_v62, %v3731_v41  ;;  %v5106_v62 = vpack.c.b16 %v5094_v37, %v5093_v51  ;;  %v9156_v42 = vld [vmem:[%s9868_s8 + $0x80] sm:$0xe]  ;;  %v5313_v41 = vrot.slane %v9159_v27, 5 }
 0x21c   : > { %9252 = vmatmul.msk.bf16.gmra.mxu2 %vm351_vm3, %v9229_v33  ;;  %v5309_v33 = vrot.slane %v9157_v49, 5  ;;  %v4983_v17 = vrot.slane %v4981_v10, 5  ;;  %v4986_v37 = vshrl.u32 %v9123_v57, 16  ;;  %v9184_v57 = vrot.slane %v9160_v32, 9  ;;  %v9715_v32 = vld [vmem:[%s9868_s8 + $0xb4] sm:$0xf0] }
 0x21d   : > { %v11133_v47 = vadd.f32 %v4563_v21, %v4321_v22  ;;  %v9125_v22 = vld [vmem:[%s9868_s8 + $0xb8] sm:$0xf]  ;;  %v5314_v2 = vsel %vm9870_vm4, %v9183_v1, %v5313_v41 }
 0x21e   : > { %v4984_v51 = vsel %vm9900_vm7, %v4979_v0, %v4983_v17  ;;  %v5000_v28 = vshrl.u32 %v9125_v22, 16  ;;  %v5003_v31 = vshll.u32 %v9125_v22, 16  ;;  %v5372_v7 = vunpack.c.l.b16 %v5314_v2  ;;  %v9127_v2 = vld [vmem:[%s9868_s8 + $0xd0] sm:$0xf] }
 0x21f   : > { %v4566_v58 = vpop.f32.mrf.mxu2 }
 0x220   : > { %v3699_v8 = vpop.f32.mrf.mxu3  ;;  %v5002_v30 = vrot.slane %v5000_v28, 4  ;;  %v5005_v27 = vrot.slane %v5003_v31, 5 }
 0x221   : > { %v3732_v16 = vadd.f32 %v3699_v8, %v10879_v45  ;;  %v9182_v45 = vrot.slane %v9156_v42, 9  ;;  %v9081_v8 = vld [vmem:[%s9868_s8 + $0xa0] sm:$0xf]  ;;  %v4991_v42 = vrot.slane %v4989_v19, 5 }
 0x222   : > { %v4288_v5 = vpop.f32.mrf.mxu1  ;;  %v5006_v17 = vor.u32 %v5005_v27, %v5002_v30 }
 0x223   : > { %v4322_v23 = vadd.f32 %v4288_v5, %v3916_v50  ;;  %v3887_v24 = vpop.f32.mrf.mxu0  ;;  %v3917_v21 = vadd.f32 %v3884_v55, %v3732_v16  ;;  %v5310_v50 = vsel %vm9870_vm4, %v9182_v45, %v5309_v33  ;;  %v9714_v16 = vld [vmem:[%s9868_s8 + $0xa4] sm:$0xf0]  ;;  %v9124_v5 = vld [vmem:[%s9868_s8 + $0xb4] sm:$0x1]  ;;  %v9163_v45 = vld [vmem:[%s9868_s8 + $0xac] sm:$0x1] }
 0x224   : > { %v5371_v6 = vunpack.c.l.b16 %v5310_v50  ;;  %v4995_v41 = vshll.u32 %v9124_v5, 16  ;;  %v9722_v50 = vld [vmem:[%s9868_s8 + $0xc4] sm:$0xf0]  ;;  %v5007_v19 = vrot.slane %v5006_v17, 4  ;;  %v9165_v17 = vld [vmem:[%s9868_s8 + $0xb4] sm:$0x1] }
 0x225   : > { %v11145_v63 = vadd.f32 %v4566_v58, %v4322_v23  ;;  %9195 = vmatmul.msk.bf16.gmra.mxu1 %vm351_vm3, %v5383_v20  ;;  %9098 = vmatmul.msk.bf16.gmra.mxu3 %vm351_vm3, %v9078_v38  ;;  %v5095_v20 = vunpack.c.l.b16 %v4970_v15  ;;  %v5096_v38 = vunpack.c.l.b16 %v4984_v51 }
 0x226   : > { %9139 = vmatmul.msk.bf16.gmra.mxu0 %vm351_vm3, %v5106_v62  ;;  %v4988_v62 = vrot.slane %v4986_v37, 4  ;;  %v5384_v23 = vpack.c.b16 %v5372_v7, %v5371_v6  ;;  %v4997_v37 = vrot.slane %v4995_v41, 5  ;;  %v5014_v6 = vshrl.u32 %v9127_v2, 16 }
 0x227   : > { %v4568_v61 = vpop.f32.mrf.mxu2  ;;  %v5107_v33 = vpack.c.b16 %v5096_v38, %v5095_v20 }
 0x228   : > { %v3702_v48 = vpop.f32.mrf.mxu3  ;;  %v4992_v1 = vor.u32 %v4991_v42, %v4988_v62 }
 0x229   : > { %v3733_v55 = vadd.f32 %v3702_v48, %v10893_v56  ;;  %v9185_v48 = vrot.slane %v9162_v60, 9 }
 0x22a   : > { %v4290_v40 = vpop.f32.mrf.mxu1  ;;  %v4993_v51 = vrot.slane %v4992_v1, 4 }
 0x22b   : > { %v4323_v53 = vadd.f32 %v4290_v40, %v3917_v21  ;;  %v3889_v56 = vpop.f32.mrf.mxu0  ;;  %v3918_v26 = vadd.f32 %v3887_v24, %v3733_v55  ;;  %v9082_v24 = vor.u32 %v9714_v16, %v9081_v8  ;;  %v9161_v21 = vld [vmem:[%s9868_s8 + $0xa4] sm:$0x1]  ;;  %v9236_v55 = vld [vmem:[%s9868_s8 + $0xc0] sm:$0xf]  ;;  %v9129_v40 = vld [vmem:[%s9868_s8 + $0xd8] sm:$0xf] }
 0x22c   : > { %9253 = vmatmul.msk.bf16.gmra.mxu2 %vm351_vm3, %v9233_v36  ;;  %v5321_v36 = vrot.slane %v9163_v45, 5  ;;  %v5017_v8 = vshll.u32 %v9127_v2, 16  ;;  %v5028_v16 = vshrl.u32 %v9129_v40, 16  ;;  %v5031_v20 = vshll.u32 %v9129_v40, 16 }
 0x22d   : > { %v11163_v58 = vadd.f32 %v4568_v61, %v4323_v53  ;;  %v5009_v61 = vshll.u32 %v9126_v25, 16  ;;  %v4998_v5 = vsel %vm9900_vm7, %v4993_v51, %v4997_v37  ;;  %v5016_v25 = vrot.slane %v5014_v6, 4 }
 0x22e   : > { %v5322_v31 = vsel %vm9870_vm4, %v9185_v48, %v5321_v36  ;;  %v5033_v60 = vrot.slane %v5031_v20, 5  ;;  %v5097_v45 = vunpack.c.l.b16 %v4998_v5  ;;  %v9167_v48 = vld [vmem:[%s9868_s8 + $0xbc] sm:$0x1] }
 0x22f   : > { %v4571_v49 = vpop.f32.mrf.mxu2  ;;  %v5011_v53 = vrot.slane %v5009_v61, 5  ;;  %v5329_v6 = vrot.slane %v9167_v48, 5 }
 0x230   : > { %v3704_v59 = vpop.f32.mrf.mxu3 }
 0x231   : > { %v3734_v10 = vadd.f32 %v3704_v59, %v10916_v18  ;;  %v5317_v18 = vrot.slane %v9161_v21, 5  ;;  %v5012_v30 = vsel %vm9900_vm7, %v5007_v19, %v5011_v53  ;;  %v5374_v59 = vunpack.c.l.b16 %v5322_v31  ;;  %v9131_v53 = vld [vmem:[%s9868_s8 + $0xe0] sm:$0xf] }
 0x232   : > { %v4293_v43 = vpop.f32.mrf.mxu1  ;;  %v5030_v21 = vrot.slane %v5028_v16, 4 }
 0x233   : > { %v4324_v34 = vadd.f32 %v4293_v43, %v3918_v26  ;;  %v3892_v3 = vpop.f32.mrf.mxu0  ;;  %v3919_v0 = vadd.f32 %v3889_v56, %v3734_v10  ;;  %v9237_v26 = vor.u32 %v9722_v50, %v9236_v55  ;;  %v5318_v28 = vsel %vm9870_vm4, %v9184_v57, %v5317_v18  ;;  %v9166_v18 = vld [vmem:[%s9868_s8 + $0xb8] sm:$0xe] }
 0x234   : > { %v5373_v27 = vunpack.c.l.b16 %v5318_v28  ;;  %v5098_v43 = vunpack.c.l.b16 %v5012_v30  ;;  %v5034_v55 = vor.u32 %v5033_v60, %v5030_v21  ;;  %v5325_v28 = vrot.slane %v9165_v17, 5 }
 0x235   : > { %v11174_v22 = vadd.f32 %v4571_v49, %v4324_v34  ;;  %9196 = vmatmul.msk.bf16.gmra.mxu1 %vm351_vm3, %v5384_v23  ;;  %9099 = vmatmul.msk.bf16.gmra.mxu3 %vm351_vm3, %v9082_v24  ;;  %v9128_v23 = vld [vmem:[%s9868_s8 + $0xd4] sm:$0x1]  ;;  %v5019_v24 = vrot.slane %v5017_v8, 5  ;;  %v9187_v31 = vrot.slane %v9166_v18, 9  ;;  %v9723_v8 = vld [vmem:[%s9868_s8 + $0xd4] sm:$0xf0] }
 0x236   : > { %9140 = vmatmul.msk.bf16.gmra.mxu0 %vm351_vm3, %v5107_v33  ;;  %v9130_v33 = vld [vmem:[%s9868_s8 + $0xdc] sm:$0x1]  ;;  %v5385_v34 = vpack.c.b16 %v5374_v59, %v5373_v27  ;;  %v5023_v61 = vshll.u32 %v9128_v23, 16  ;;  %v5108_v40 = vpack.c.b16 %v5098_v43, %v5097_v45  ;;  %v5035_v20 = vrot.slane %v5034_v55, 4  ;;  %v9168_v55 = vld [vmem:[%s9868_s8 + $0xd0] sm:$0xe] }
 0x237   : > { %v4573_v15 = vpop.f32.mrf.mxu2  ;;  %v5020_v36 = vor.u32 %v5019_v24, %v5016_v25  ;;  %v5037_v50 = vshll.u32 %v9130_v33, 16  ;;  %v5330_v25 = vsel %vm9870_vm4, %v9187_v31, %v5329_v6  ;;  %v9188_v6 = vrot.slane %v9168_v55, 9 }
 0x238   : > { %v3707_v56 = vpop.f32.mrf.mxu3  ;;  %v5376_v17 = vunpack.c.l.b16 %v5330_v25 }
 0x239   : > { %v3735_v7 = vadd.f32 %v3707_v56, %v10931_v29  ;;  %v9085_v29 = vld [vmem:[%s9868_s8 + $0xb0] sm:$0xf]  ;;  %v9133_v56 = vld [vmem:[%s9868_s8 + $0xe8] sm:$0xf]  ;;  %v5021_v16 = vrot.slane %v5020_v36, 4 }
 0x23a   : > { %v4295_v38 = vpop.f32.mrf.mxu1  ;;  %v5059_v5 = vshll.u32 %v9133_v56, 16  ;;  %v9716_v36 = vld [vmem:[%s9868_s8 + $0xd4] sm:$0xf0] }
 0x23b   : > { %v4325_v62 = vadd.f32 %v4295_v38, %v3919_v0  ;;  %v3894_v42 = vpop.f32.mrf.mxu0  ;;  %v3920_v49 = vadd.f32 %v3892_v3, %v3735_v7  ;;  %v9086_v3 = vor.u32 %v9715_v32, %v9085_v29  ;;  %v9164_v0 = vld [vmem:[%s9868_s8 + $0xb0] sm:$0xe]  ;;  %v5025_v7 = vrot.slane %v5023_v61, 5 }
 0x23c   : > { %9254 = vmatmul.msk.bf16.gmra.mxu2 %vm351_vm3, %v9237_v26  ;;  %v9186_v19 = vrot.slane %v9164_v0, 9  ;;  %v9240_v26 = vld [vmem:[%s9868_s8 + $0xd0] sm:$0xf]  ;;  %v5039_v38 = vrot.slane %v5037_v50, 5  ;;  %v5061_v33 = vrot.slane %v5059_v5, 5 }
 0x23d   : > { %v11195_v10 = vadd.f32 %v4573_v15, %v4325_v62  ;;  %v5042_v62 = vshrl.u32 %v9131_v53, 16  ;;  %v9241_v59 = vor.u32 %v9723_v8, %v9240_v26  ;;  %v5026_v23 = vsel %vm9900_vm7, %v5021_v16, %v5025_v7  ;;  %v9089_v61 = vld [vmem:[%s9868_s8 + $0xd0] sm:$0xf]  ;;  %v9169_v50 = vld [vmem:[%s9868_s8 + $0xd4] sm:$0x1] }
 0x23e   : > { %v5326_v29 = vsel %vm9870_vm4, %v9186_v19, %v5325_v28  ;;  %v5040_v24 = vsel %vm9900_vm7, %v5035_v20, %v5039_v38  ;;  %v9090_v28 = vor.u32 %v9716_v36, %v9089_v61  ;;  %v9258_v7 = vld [vmem:[%s9868_s8 + $0x60] sm:$0xf]  ;;  %v5333_v16 = vrot.slane %v9169_v50, 5  ;;  %v9261_v50 = vld [vmem:[%s9868_s8 + $0x6c] sm:$0x1] }
 0x23f   : > { %v4576_v1 = vpop.f32.mrf.mxu2  ;;  %v5044_v60 = vrot.slane %v5042_v62, 4  ;;  %v5375_v0 = vunpack.c.l.b16 %v5326_v29  ;;  %v5100_v18 = vunpack.c.l.b16 %v5040_v24  ;;  %v5719_v25 = vshll.u32 %v9258_v7, 16 }
 0x240   : > { %v3709_v41 = vpop.f32.mrf.mxu3 }
 0x241   : > { %v3736_v57 = vadd.f32 %v3709_v41, %v10952_v9  ;;  %v5386_v26 = vpack.c.b16 %v5376_v17, %v5375_v0  ;;  %v11257_v0 = vld [vmem:[%s9868_s8 + $0xec] sm:$0x1]  ;;  %v9259_v17 = vld [vmem:[%s9868_s8 + $0x64] sm:$0x1] }
 0x242   : > { %v4298_v2 = vpop.f32.mrf.mxu1 }
 0x243   : > { %v4326_v15 = vadd.f32 %v4298_v2, %v3920_v49  ;;  %v3897_v51 = vpop.f32.mrf.mxu0  ;;  %v3921_v37 = vadd.f32 %v3894_v42, %v3736_v57  ;;  %v5045_v42 = vshll.u32 %v9131_v53, 16  ;;  %v5056_v49 = vshrl.u32 %v9133_v56, 16  ;;  %v9170_v2 = vld [vmem:[%s9868_s8 + $0xd8] sm:$0xe] }
 0x244   : > { %v5099_v57 = vunpack.c.l.b16 %v5026_v23  ;;  %v9189_v20 = vrot.slane %v9170_v2, 9  ;;  %v9244_v23 = vld [vmem:[%s9868_s8 + $0xf0] sm:$0xf] }
 0x245   : > { %v11207_v9 = vadd.f32 %v4576_v1, %v4326_v15  ;;  %9197 = vmatmul.msk.bf16.gmra.mxu1 %vm351_vm3, %v5385_v34  ;;  %9100 = vmatmul.msk.bf16.gmra.mxu3 %vm351_vm3, %v9086_v3  ;;  %v5047_v45 = vrot.slane %v5045_v42, 5  ;;  %v5058_v43 = vrot.slane %v5056_v49, 4  ;;  %v9132_v34 = vld [vmem:[%s9868_s8 + $0xe4] sm:$0x1]  ;;  %v9134_v3 = vld [vmem:[%s9868_s8 + $0xec] sm:$0x1] }
 0x246   : > { %9141 = vmatmul.msk.bf16.gmra.mxu0 %vm351_vm3, %v5108_v40  ;;  %v9171_v40 = vld [vmem:[%s9868_s8 + $0xdc] sm:$0x1]  ;;  %v5065_v19 = vshll.u32 %v9134_v3, 16  ;;  %v5109_v31 = vpack.c.b16 %v5100_v18, %v5099_v57  ;;  %v5721_v57 = vrot.slane %v5719_v25, 5 }
 0x247   : > { %v4578_v30 = vpop.f32.mrf.mxu2  ;;  %v5048_v15 = vor.u32 %v5047_v45, %v5044_v60  ;;  %v5337_v38 = vrot.slane %v9171_v40, 5  ;;  %v9260_v45 = vld [vmem:[%s9868_s8 + $0x68] sm:$0xf] }
 0x248   : > { %v3712_v27 = vpop.f32.mrf.mxu3  ;;  %v5730_v2 = vshrl.u32 %v9260_v45, 16  ;;  %v5733_v40 = vshll.u32 %v9260_v45, 16 }
 0x249   : > { %v3737_v32 = vadd.f32 %v3712_v27, %v10972_v44  ;;  %v5049_v42 = vrot.slane %v5048_v15, 4  ;;  %v5338_v60 = vsel %vm9870_vm4, %v9189_v20, %v5337_v38  ;;  %v9093_v38 = vld [vmem:[%s9868_s8 + $0xe0] sm:$0xf] }
 0x24a   : > { %v4300_v21 = vpop.f32.mrf.mxu1  ;;  %v5378_v55 = vunpack.c.l.b16 %v5338_v60 }
 0x24b   : > { %v4327_v44 = vadd.f32 %v4300_v21, %v3921_v37  ;;  %v3899_v1 = vpop.f32.mrf.mxu0  ;;  %v3922_v41 = vadd.f32 %v3897_v51, %v3737_v32  ;;  %v5051_v37 = vshll.u32 %v9132_v34, 16  ;;  %v5062_v51 = vor.u32 %v5061_v33, %v5058_v43 }
 0x24c   : > { %9255 = vmatmul.msk.bf16.gmra.mxu2 %vm351_vm3, %v9241_v59  ;;  %v5716_v32 = vshrl.u32 %v9258_v7, 16  ;;  %v5334_v21 = vsel %vm9870_vm4, %v9188_v6, %v5333_v16  ;;  %v5725_v6 = vshll.u32 %v9259_v17, 16  ;;  %v9415_v7 = vld [vmem:[%s9868_s8 + $0x70] sm:$0xf] }
 0x24d   : > { %v11226_v48 = vadd.f32 %v4578_v30, %v4327_v44  ;;  %v5053_v49 = vrot.slane %v5051_v37, 5  ;;  %v5063_v5 = vrot.slane %v5062_v51, 4  ;;  %v5067_v30 = vrot.slane %v5065_v19, 5  ;;  %v9172_v44 = vld [vmem:[%s9868_s8 + $0xe0] sm:$0xe] }
 0x24e   : > { %v5718_v61 = vrot.slane %v5716_v32, 4  ;;  %v5377_v36 = vunpack.c.l.b16 %v5334_v21  ;;  %v9190_v19 = vrot.slane %v9172_v44, 9  ;;  %v9657_v21 = vld [vmem:[%s12035_s1 + $0x68] sm:$0xf] }
 0x24f   : > { %v4581_v53 = vpop.f32.mrf.mxu2  ;;  %v5054_v43 = vsel %vm9900_vm7, %v5049_v42, %v5053_v49  ;;  %v5068_v33 = vsel %vm9900_vm7, %v5063_v5, %v5067_v30  ;;  %v5739_v42 = vshll.u32 %v9261_v50, 16  ;;  %v5732_v49 = vrot.slane %v5730_v2, 4  ;;  %v11274_v30 = vld [vmem:[%s9868_s8 + $0x60] sm:$0xe]  ;;  %v11294_v44 = vld [vmem:[%s9868_s8 + $0x68] sm:$0xe] }
 0x250   : > { %v3714_v56 = vpop.f32.mrf.mxu3  ;;  %v11262_v37 = vunpack.c.l.b16 %v5054_v43  ;;  %v11264_v51 = vunpack.c.l.b16 %v5068_v33  ;;  %v5735_v5 = vrot.slane %v5733_v40, 5  ;;  %v11291_v33 = vld [vmem:[%s9868_s8 + $0x64] sm:$0x1]  ;;  %v8022_v17 = vsel %vm376_vm0, %v9657_v21, 0 }
 0x251   : > { %v3738_v8 = vadd.f32 %v3714_v56, %v10998_v46  ;;  %v9724_v46 = vld [vmem:[%s9868_s8 + $0xf4] sm:$0xf0]  ;;  %8031 = vmatpush.bf16.msra.mxu2 %v8022_v17 }
 0x252   : > { %v4303_v62 = vpop.f32.mrf.mxu1  ;;  %v9245_v3 = vor.u32 %v9724_v46, %v9244_v23  ;;  %v5387_v23 = vpack.c.b16 %v5378_v55, %v5377_v36  ;;  %v6602_v46 = vshll.u32 %v9415_v7, 16  ;;  %v5110_v45 = vpack.c.b16 %v11264_v51, %v11262_v37  ;;  %v9302_v36 = vld [vmem:[%s9868_s8 + $0x6c] sm:$0x1]  ;;  %v9416_v51 = vld [vmem:[%s9868_s8 + $0x74] sm:$0x1] }
 0x253   : > { %v4328_v27 = vadd.f32 %v4303_v62, %v3922_v41  ;;  %v3902_v59 = vpop.f32.mrf.mxu0  ;;  %v3923_v29 = vadd.f32 %v3899_v1, %v3738_v8  ;;  %v9173_v1 = vld [vmem:[%s9868_s8 + $0xe4] sm:$0x1]  ;;  %v11254_v41 = vld [vmem:[%s9868_s8 + $0xe8] sm:$0xe]  ;;  %v5722_v62 = vor.u32 %v5721_v57, %v5718_v61  ;;  %v9262_v61 = vld [vmem:[%s9868_s8 + $0x70] sm:$0xf] }
 0x254   : > { %v9331_v55 = vrot.slane %v11274_v30, 9  ;;  %v9414_v37 = vld [vmem:[%s9868_s8 + $0x6c] sm:$0x1] }
 0x255   : > { %v11237_v24 = vadd.f32 %v4581_v53, %v4328_v27  ;;  %9198 = vmatmul.msk.bf16.gmra.mxu1 %vm351_vm3, %v5386_v26  ;;  %9101 = vmatmul.msk.bf16.gmra.mxu3 %vm351_vm3, %v9090_v28  ;;  %v9413_v53 = vld [vmem:[%s9868_s8 + $0x68] sm:$0xf]  ;;  %v5341_v26 = vrot.slane %v9173_v1, 5  ;;  %v9191_v28 = vrot.slane %v11254_v41, 9 }
 0x256   : > { %9142 = vmatmul.msk.bf16.gmra.mxu0 %vm351_vm3, %v5109_v31  ;;  %v5345_v31 = vrot.slane %v11257_v0, 5  ;;  %v6585_v27 = vshrl.u32 %v9413_v53, 16  ;;  %v6588_v32 = vshll.u32 %v9413_v53, 16  ;;  %v11297_v0 = vrot.slane %v5739_v42, 5  ;;  %v9248_v42 = vld [vmem:[%s9868_s8 + $0x100] sm:$0xf] }
 0x257   : > { %v4583_v34 = vpop.f32.mrf.mxu2  ;;  %v11288_v43 = vsel %vm9870_vm4, %v9190_v19, %v5341_v26  ;;  %v6604_v53 = vrot.slane %v6602_v46, 5  ;;  %v6155_v26 = vrot.slane %v11291_v33, 5 }
 0x258   : > { %v3717_v18 = vpop.f32.mrf.mxu3  ;;  %v6587_v50 = vrot.slane %v6585_v27, 4  ;;  %v6590_v2 = vrot.slane %v6588_v32, 5  ;;  %v6594_v27 = vshll.u32 %v9414_v37, 16  ;;  %v6608_v32 = vshll.u32 %v9416_v51, 16  ;;  %v9417_v37 = vld [vmem:[%s9868_s8 + $0x78] sm:$0xf] }
 0x259   : > { %v3739_v15 = vadd.f32 %v3717_v18, %v11018_v14  ;;  %v9717_v14 = vld [vmem:[%s9868_s8 + $0xe4] sm:$0xf0]  ;;  %v5736_v18 = vor.u32 %v5735_v5, %v5732_v49 }
 0x25a   : > { %v4305_v56 = vpop.f32.mrf.mxu1  ;;  %v9094_v60 = vor.u32 %v9717_v14, %v9093_v38  ;;  %v5747_v38 = vshll.u32 %v9262_v61, 16  ;;  %v9725_v49 = vld [vmem:[%s9868_s8 + $0x104] sm:$0xf0]  ;;  %v6591_v30 = vor.u32 %v6590_v2, %v6587_v50  ;;  %v6596_v50 = vrot.slane %v6594_v27, 5 }
 0x25b   : > { %v4329_v8 = vadd.f32 %v4305_v56, %v3923_v29  ;;  %v3904_v16 = vpop.f32.mrf.mxu0  ;;  %v3924_v20 = vadd.f32 %v3902_v59, %v3739_v15  ;;  %v9502_v59 = vld [vmem:[%s12035_s1 + $0x5c] sm:$0xf]  ;;  %v6599_v29 = vshrl.u32 %v9415_v7, 16  ;;  %v11306_v15 = vsel %vm9870_vm4, %v9191_v28, %v5345_v31  ;;  %v9264_v7 = vld [vmem:[%s9868_s8 + $0x78] sm:$0xf] }
 0x25c   : > { %9256 = vmatmul.msk.bf16.gmra.mxu2 %vm351_vm3, %v9245_v3  ;;  %v7153_v1 = vsel %vm376_vm0, %v9502_v59, 0  ;;  %v5727_v3 = vrot.slane %v5725_v6, 5  ;;  %v9332_v6 = vrot.slane %v11294_v44, 9  ;;  %v6159_v31 = vrot.slane %v9302_v36, 5 }
 0x25d   : > { %v11276_v25 = vadd.f32 %v4583_v34, %v4329_v8  ;;  %v5723_v34 = vrot.slane %v5722_v62, 4  ;;  %7162 = vmatpush.bf16.msra.mxu3 %v7153_v1  ;;  %v6601_v19 = vrot.slane %v6599_v29, 4  ;;  %v5744_v8 = vshrl.u32 %v9262_v61, 16  ;;  %v9263_v61 = vld [vmem:[%s9868_s8 + $0x74] sm:$0x1] }
 0x25e   : > { %v5737_v5 = vrot.slane %v5736_v18, 4  ;;  %v5758_v46 = vshrl.u32 %v9264_v7, 16  ;;  %v5761_v21 = vshll.u32 %v9264_v7, 16  ;;  %v6160_v18 = vsel %vm9870_vm4, %v9332_v6, %v6159_v31  ;;  %v9304_v31 = vld [vmem:[%s9868_s8 + $0x74] sm:$0x1] }
 0x25f   : > { %v4586_v41 = vpop.f32.mrf.mxu2  ;;  %v5728_v28 = vsel %vm9900_vm7, %v5723_v34, %v5727_v3  ;;  %v6605_v29 = vor.u32 %v6604_v53, %v6601_v19  ;;  %v5746_v44 = vrot.slane %v5744_v8, 4  ;;  %v5379_v34 = vunpack.c.l.b16 %v11288_v43 }
 0x260   : > { %v3719_v57 = vpop.f32.mrf.mxu3  ;;  %v5380_v3 = vunpack.c.l.b16 %v11306_v15  ;;  %v11332_v17 = vunpack.c.l.b16 %v5728_v28  ;;  %v6592_v36 = vrot.slane %v6591_v30, 4  ;;  %v5742_v43 = vsel %vm9900_vm7, %v5737_v5, %v11297_v0  ;;  %v9303_v28 = vld [vmem:[%s9868_s8 + $0x70] sm:$0xe] }
 0x261   : > { %v3740_v40 = vadd.f32 %v3719_v57, %v11043_v11  ;;  %v6156_v57 = vsel %vm9870_vm4, %v9331_v55, %v6155_v26  ;;  %v6610_v15 = vrot.slane %v6608_v32, 5  ;;  %v5753_v55 = vshll.u32 %v9263_v61, 16  ;;  %v9419_v26 = vld [vmem:[%s9868_s8 + $0x80] sm:$0xf] }
 0x262   : > { %v4308_v56 = vpop.f32.mrf.mxu1  ;;  %v5760_v53 = vrot.slane %v5758_v46, 4  ;;  %v5958_v0 = vunpack.c.l.b16 %v5742_v43  ;;  %v6616_v5 = vshll.u32 %v9417_v37, 16  ;;  %v6630_v27 = vshll.u32 %v9419_v26, 16  ;;  %v9266_v43 = vld [vmem:[%s9868_s8 + $0x90] sm:$0xf] }
 0x263   : > { %v4330_v14 = vadd.f32 %v4308_v56, %v3924_v20  ;;  %v3907_v62 = vpop.f32.mrf.mxu0  ;;  %v3925_v11 = vadd.f32 %v3904_v16, %v3740_v40  ;;  %v9527_v16 = vld [vmem:[%s12035_s1 + $0x60] sm:$0xf]  ;;  %v9600_v20 = vld [vmem:[%s12035_s1 + $0x64] sm:$0xf]  ;;  %v6606_v40 = vrot.slane %v6605_v29, 4  ;;  %v5763_v56 = vrot.slane %v5761_v21, 5 }
 0x264   : > { %v7338_v33 = vsel %vm376_vm0, %v9527_v16, 0  ;;  %v5755_v29 = vrot.slane %v5753_v55, 5  ;;  %v5388_v21 = vpack.c.b16 %v5380_v3, %v5379_v34  ;;  %v6632_v3 = vrot.slane %v6630_v27, 5 }
 0x265   : > { %v11317_v59 = vadd.f32 %v4586_v41, %v4330_v14  ;;  %9199 = vmatmul.msk.bf16.gmra.mxu1 %vm351_vm3, %v5387_v23  ;;  %9102 = vmatmul.msk.bf16.gmra.mxu3 %vm351_vm3, %v9094_v60  ;;  %v7744_v23 = vsel %vm376_vm0, %v9600_v20, 0  ;;  %v5749_v60 = vrot.slane %v5747_v38, 5  ;;  %v9249_v41 = vor.u32 %v9725_v49, %v9248_v42  ;;  %v9265_v14 = vld [vmem:[%s9868_s8 + $0x7c] sm:$0x1] }
 0x266   : > { %9143 = vmatmul.msk.bf16.gmra.mxu0 %vm351_vm3, %v5110_v45  ;;  %7753 = vmatpush.bf16.msra.mxu1 %v7744_v23  ;;  %v6236_v38 = vunpack.c.l.b16 %v6160_v18  ;;  %v6597_v42 = vsel %vm9900_vm7, %v6592_v36, %v6596_v50  ;;  %v6613_v49 = vshrl.u32 %v9417_v37, 16  ;;  %v5764_v16 = vor.u32 %v5763_v56, %v5760_v53  ;;  %v9305_v23 = vld [vmem:[%s9868_s8 + $0x78] sm:$0xe] }
 0x267   : > { %v4588_v1 = vpop.f32.mrf.mxu2  ;;  %7347 = vmatpush.bf16.msra.mxu0 %v7338_v33  ;;  %v5750_v19 = vor.u32 %v5749_v60, %v5746_v44  ;;  %v5767_v20 = vshll.u32 %v9265_v14, 16  ;;  %v9333_v44 = vrot.slane %v9303_v28, 9  ;;  %v6163_v60 = vrot.slane %v9304_v31, 5 }
 0x268   : > { %v3722_v45 = vpop.f32.mrf.mxu3  ;;  %v11357_v61 = vunpack.c.l.b16 %v6597_v42  ;;  %v6618_v18 = vrot.slane %v6616_v5, 5  ;;  %v5765_v37 = vrot.slane %v5764_v16, 4  ;;  %v5772_v14 = vshrl.u32 %v9266_v43, 16 }
 0x269   : > { %v3741_v2 = vadd.f32 %v3722_v45, %v11055_v35  ;;  %v6235_v35 = vunpack.c.l.b16 %v6156_v57  ;;  %v5751_v32 = vrot.slane %v5750_v19, 4  ;;  %v9306_v45 = vld [vmem:[%s9868_s8 + $0x7c] sm:$0x1]  ;;  %v6615_v57 = vrot.slane %v6613_v49, 4  ;;  %v9420_v19 = vld [vmem:[%s9868_s8 + $0x84] sm:$0x1] }
 0x26a   : > { %v4310_v51 = vpop.f32.mrf.mxu1 }
 0x26b   : > { %v4331_v6 = vadd.f32 %v4310_v51, %v3925_v11  ;;  %v3909_v7 = vpop.f32.mrf.mxu0  ;;  %v3926_v8 = vadd.f32 %v3907_v62, %v3741_v2  ;;  %v6611_v11 = vsel %vm9900_vm7, %v6606_v40, %v6610_v15  ;;  %v6627_v62 = vshrl.u32 %v9419_v26, 16  ;;  %v9418_v2 = vld [vmem:[%s9868_s8 + $0x7c] sm:$0x1] }
 0x26c   : > { %9257 = vmatmul.msk.bf16.gmra.mxu2 %vm351_vm3, %v9249_v41  ;;  %v6251_v33 = vpack.c.b16 %v6236_v38, %v6235_v35  ;;  %v5973_v41 = vpack.c.b16 %v5958_v0, %v11332_v17  ;;  %v6827_v50 = vunpack.c.l.b16 %v6611_v11  ;;  %v5756_v15 = vsel %vm9900_vm7, %v5751_v32, %v5755_v29  ;;  %v9267_v29 = vld [vmem:[%s9868_s8 + $0x94] sm:$0x1] }
 0x26d   : > { %v11351_v30 = vadd.f32 %v4588_v1, %v4331_v6  ;;  %v6629_v34 = vrot.slane %v6627_v62, 4  ;;  %v5769_v17 = vrot.slane %v5767_v20, 5  ;;  %v9334_v51 = vrot.slane %v9305_v23, 9  ;;  %v9268_v6 = vld [vmem:[%s9868_s8 + $0x98] sm:$0xf] }
 0x26e   : > { %v6167_v26 = vrot.slane %v9306_v45, 5  ;;  %v6619_v35 = vor.u32 %v6618_v18, %v6615_v57  ;;  %v6622_v38 = vshll.u32 %v9418_v2, 16  ;;  %v5775_v0 = vshll.u32 %v9266_v43, 16  ;;  %v11386_v20 = vld [vmem:[%s9868_s8 + $0x68] sm:$0xf] }
 0x26f   : > { %v4591_v46 = vpop.f32.mrf.mxu2  ;;  %v5770_v28 = vsel %vm9900_vm7, %v5765_v37, %v5769_v17  ;;  %v5786_v31 = vshrl.u32 %v9268_v6, 16  ;;  %v5789_v49 = vshll.u32 %v9268_v6, 16  ;;  %v6842_v11 = vpack.c.b16 %v6827_v50, %v11357_v61  ;;  %v9423_v57 = vld [vmem:[%s9868_s8 + $0xa0] sm:$0xf]  ;;  %v9269_v50 = vld [vmem:[%s9868_s8 + $0x9c] sm:$0x1] }
 0x270   : > { %v3724_v1 = vpop.f32.mrf.mxu3  ;;  %v11379_v62 = vunpack.c.l.b16 %v5756_v15  ;;  %v6168_v27 = vsel %vm9870_vm4, %v9334_v51, %v6167_v26  ;;  %v5777_v23 = vrot.slane %v5775_v0, 5  ;;  %v5781_v2 = vshll.u32 %v9267_v29, 16  ;;  %v9307_v37 = vld [vmem:[%s9868_s8 + $0x90] sm:$0xe] }
 0x271   : > { %v3742_v36 = vadd.f32 %v3724_v1, %v11073_v13  ;;  %v11368_v13 = vsel %vm9870_vm4, %v9333_v44, %v6163_v60  ;;  %v9421_v44 = vld [vmem:[%s9868_s8 + $0x98] sm:$0xf]  ;;  %v11391_v1 = vld [vmem:[%s9868_s8 + $0x6c] sm:$0xf0]  ;;  %v5795_v6 = vshll.u32 %v9269_v50, 16 }
 0x272   : > { %v4313_v40 = vpop.f32.mrf.mxu1  ;;  %v6237_v32 = vunpack.c.l.b16 %v11368_v13  ;;  %v6644_v17 = vshll.u32 %v9421_v44, 16  ;;  %v6658_v13 = vshll.u32 %v9423_v57, 16 }
 0x273   : > { %v4332_v55 = vadd.f32 %v4313_v40, %v3926_v8  ;;  %v5147_v53 = vpop.f32.mrf.mxu0  ;;  %v3927_v56 = vadd.f32 %v3909_v7, %v3742_v36  ;;  %v6633_v8 = vor.u32 %v6632_v3, %v6629_v34  ;;  %v6636_v7 = vshll.u32 %v9420_v19, 16 }
 0x274   : > { %v6238_v36 = vunpack.c.l.b16 %v6168_v27  ;;  %v5788_v34 = vrot.slane %v5786_v31, 4  ;;  %v5791_v3 = vrot.slane %v5789_v49, 5  ;;  %v9424_v27 = vld [vmem:[%s9868_s8 + $0xa4] sm:$0x1] }
 0x275   : > { %v11371_v42 = vadd.f32 %v4591_v46, %v4332_v55  ;;  %9200 = vmatmul.msk.bf16.gmra.mxu1 %vm351_vm3, %v5388_v21  ;;  %9291 = vmatmul.msk.bf16.vlgmr.msrb.gmra.mxu3 %vm351_vm3, %v5973_v41  ;;  %v6620_v46 = vrot.slane %v6619_v35, 4  ;;  %v6624_v21 = vrot.slane %v6622_v38, 5  ;;  %v11393_v41 = vunpack.c.l.b16 %v5770_v28  ;;  %v9308_v35 = vld [vmem:[%s9868_s8 + $0x94] sm:$0x1] }
 0x276   : > { %9348 = vmatmul.msk.bf16.vlgmr.msrb.gmra.mxu0 %vm351_vm3, %v6251_v33  ;;  %v5774_v33 = vrot.slane %v5772_v14, 4  ;;  %v6634_v61 = vrot.slane %v6633_v8, 4  ;;  %v6638_v45 = vrot.slane %v6636_v7, 5  ;;  %v6655_v55 = vshrl.u32 %v9423_v57, 16  ;;  %v9309_v8 = vld [vmem:[%s9868_s8 + $0x98] sm:$0xe] }
 0x277   : > { %v4593_v5 = vpop.f32.mrf.mxu2  ;;  %v6625_v51 = vsel %vm9900_vm7, %v6620_v46, %v6624_v21  ;;  %v5974_v38 = vpack.c.b16 %v11393_v41, %v11379_v62  ;;  %v5783_v14 = vrot.slane %v5781_v2, 5  ;;  %v5792_v0 = vor.u32 %v5791_v3, %v5788_v34  ;;  %v9310_v7 = vld [vmem:[%s9868_s8 + $0x9c] sm:$0x1] }
 0x278   : > { %v4741_v16 = vpop.f32.mrf.mxu3  ;;  %v5778_v19 = vor.u32 %v5777_v23, %v5774_v33  ;;  %v9335_v28 = vrot.slane %v9307_v37, 9  ;;  %v6252_v49 = vpack.c.b16 %v6238_v36, %v6237_v32  ;;  %v6657_v33 = vrot.slane %v6655_v55, 4  ;;  %v9270_v23 = vld [vmem:[%s9868_s8 + $0xa0] sm:$0xf] }
 0x279   : > { %v4781_v60 = vadd.f32 %v4741_v16, %v11084_v52  ;;  %v6641_v52 = vshrl.u32 %v9421_v44, 16  ;;  %v6646_v16 = vrot.slane %v6644_v17, 5  ;;  %v6660_v62 = vrot.slane %v6658_v13, 5 }
 0x27a   : > { %v4315_v18 = vpop.f32.mrf.mxu1  ;;  %v5779_v21 = vrot.slane %v5778_v19, 4  ;;  %v9336_v41 = vrot.slane %v9309_v8, 9  ;;  %v6175_v57 = vrot.slane %v9310_v7, 5  ;;  %v6664_v36 = vshll.u32 %v9424_v27, 16  ;;  %v9271_v7 = vld [vmem:[%s9868_s8 + $0xa4] sm:$0x1] }
 0x27b   : > { %v4333_v43 = vadd.f32 %v4315_v18, %v3927_v56  ;;  %v5149_v40 = vpop.f32.mrf.mxu0  ;;  %v5187_v15 = vadd.f32 %v5147_v53, %v4781_v60  ;;  %v9376_v53 = vor.u32 %v11391_v1, %v11386_v20  ;;  %v6639_v56 = vsel %vm9900_vm7, %v6634_v61, %v6638_v45  ;;  %v9272_v61 = vld [vmem:[%s9868_s8 + $0xa8] sm:$0xf] }
 0x27c   : > { %9446 = vmatmul.msk.bf16.vlgmr.msrb.gmra.mxu2 %vm351_vm3, %v6842_v11  ;;  %v9422_v11 = vld [vmem:[%s9868_s8 + $0x9c] sm:$0x1]  ;;  %v6643_v29 = vrot.slane %v6641_v52, 4  ;;  %v6829_v46 = vunpack.c.l.b16 %v6639_v56  ;;  %v5797_v60 = vrot.slane %v5795_v6, 5  ;;  %v6171_v1 = vrot.slane %v9308_v35, 5 }
 0x27d   : > { %v11401_v26 = vadd.f32 %v4593_v5, %v4333_v43  ;;  %v11412_v5 = vunpack.c.l.b16 %v6625_v51  ;;  %v5793_v45 = vrot.slane %v5792_v0, 4  ;;  %v6650_v18 = vshll.u32 %v9422_v11, 16 }
 0x27e   : > { %v6647_v3 = vor.u32 %v6646_v16, %v6643_v29  ;;  %v5800_v43 = vshrl.u32 %v9270_v23, 16  ;;  %v6661_v37 = vor.u32 %v6660_v62, %v6657_v33  ;;  %v5803_v52 = vshll.u32 %v9270_v23, 16  ;;  %v9273_v16 = vld [vmem:[%s9868_s8 + $0xac] sm:$0x1] }
 0x27f   : > { %v5611_v31 = vpop.f32.mrf.mxu2  ;;  %v5814_v17 = vshrl.u32 %v9272_v61, 16  ;;  %v5817_v51 = vshll.u32 %v9272_v61, 16  ;;  %v6172_v55 = vsel %vm9870_vm4, %v9335_v28, %v6171_v1  ;;  %v6176_v13 = vsel %vm9870_vm4, %v9336_v41, %v6175_v57  ;;  %v9727_v1 = vld [vmem:[%s9868_s8 + $0x7c] sm:$0xf0] }
 0x280   : > { %v4743_v20 = vpop.f32.mrf.mxu3  ;;  %v6652_v6 = vrot.slane %v6650_v18, 5  ;;  %v6666_v35 = vrot.slane %v6664_v36, 5  ;;  %v6662_v8 = vrot.slane %v6661_v37, 4  ;;  %v6239_v27 = vunpack.c.l.b16 %v6172_v55 }
 0x281   : > { %v4782_v44 = vadd.f32 %v4743_v20, %v11105_v39  ;;  %v6843_v39 = vpack.c.b16 %v6829_v46, %v11412_v5  ;;  %v6240_v29 = vunpack.c.l.b16 %v6176_v13  ;;  %v9425_v20 = vld [vmem:[%s9868_s8 + $0xa8] sm:$0xf]  ;;  %v5809_v23 = vshll.u32 %v9271_v7, 16 }
 0x282   : > { %v5425_v32 = vpop.f32.mrf.mxu1  ;;  %v6667_v41 = vsel %vm9900_vm7, %v6662_v8, %v6666_v35  ;;  %v5823_v57 = vshll.u32 %v9273_v16, 16  ;;  %v6669_v18 = vshrl.u32 %v9425_v20, 16  ;;  %v6672_v36 = vshll.u32 %v9425_v20, 16  ;;  %v9276_v20 = vld [vmem:[%s9868_s8 + $0xc8] sm:$0xf] }
 0x283   : > { %v5465_v50 = vadd.f32 %v5425_v32, %v5187_v15  ;;  %v5152_v2 = vpop.f32.mrf.mxu0  ;;  %v5188_v34 = vadd.f32 %v5149_v40, %v4782_v44  ;;  %v5784_v40 = vsel %vm9900_vm7, %v5779_v21, %v5783_v14  ;;  %v5798_v15 = vsel %vm9900_vm7, %v5793_v45, %v5797_v60  ;;  %v9427_v44 = vld [vmem:[%s9868_s8 + $0xb0] sm:$0xf]  ;;  %v9379_v60 = vld [vmem:[%s9868_s8 + $0x78] sm:$0xf] }
 0x284   : > { %v5805_v14 = vrot.slane %v5803_v52, 5  ;;  %v11435_v11 = vunpack.c.l.b16 %v5784_v40  ;;  %v5962_v62 = vunpack.c.l.b16 %v5798_v15  ;;  %v6253_v52 = vpack.c.b16 %v6240_v29, %v6239_v27 }
 0x285   : > { %v11419_v19 = vadd.f32 %v5611_v31, %v5465_v50  ;;  %9405 = vmatmul.msk.bf16.vlgmr.msrb.gmra.mxu1 %vm351_vm3, %v9376_v53  ;;  %9292 = vmatmul.msk.bf16.gmra.mxu3 %vm351_vm3, %v5974_v38  ;;  %v6648_v53 = vrot.slane %v6647_v3, 4  ;;  %v5802_v38 = vrot.slane %v5800_v43, 4  ;;  %v5816_v31 = vrot.slane %v5814_v17, 4  ;;  %v9311_v50 = vld [vmem:[%s9868_s8 + $0xa0] sm:$0xe] }
 0x286   : > { %9349 = vmatmul.msk.bf16.gmra.mxu0 %vm351_vm3, %v6252_v49  ;;  %v5819_v49 = vrot.slane %v5817_v51, 5  ;;  %v9380_v43 = vor.u32 %v9727_v1, %v9379_v60  ;;  %v5975_v37 = vpack.c.b16 %v5962_v62, %v11435_v11  ;;  %v5811_v17 = vrot.slane %v5809_v23, 5  ;;  %v9312_v51 = vld [vmem:[%s9868_s8 + $0xa4] sm:$0x1] }
 0x287   : > { %v5613_v56 = vpop.f32.mrf.mxu2  ;;  %v5806_v61 = vor.u32 %v5805_v14, %v5802_v38  ;;  %v11455_v55 = vunpack.c.l.b16 %v6667_v41  ;;  %v5825_v38 = vrot.slane %v5823_v57, 5  ;;  %v6671_v8 = vrot.slane %v6669_v18, 4 }
 0x288   : > { %v4746_v0 = vpop.f32.mrf.mxu3  ;;  %v5820_v32 = vor.u32 %v5819_v49, %v5816_v31  ;;  %v6674_v7 = vrot.slane %v6672_v36, 5  ;;  %v9337_v31 = vrot.slane %v9311_v50, 9  ;;  %v6179_v49 = vrot.slane %v9312_v51, 5  ;;  %v9275_v36 = vld [vmem:[%s9868_s8 + $0xc4] sm:$0x1] }
 0x289   : > { %v4783_v28 = vadd.f32 %v4746_v0, %v11115_v4  ;;  %v6653_v4 = vsel %vm9900_vm7, %v6648_v53, %v6652_v6  ;;  %v5807_v13 = vrot.slane %v5806_v61, 4  ;;  %v9314_v53 = vld [vmem:[%s9868_s8 + $0xac] sm:$0x1]  ;;  %v9274_v6 = vld [vmem:[%s9868_s8 + $0xc0] sm:$0xf]  ;;  %v5842_v61 = vshrl.u32 %v9276_v20, 16 }
 0x28a   : > { %v5427_v5 = vpop.f32.mrf.mxu1  ;;  %v11453_v15 = vunpack.c.l.b16 %v6653_v4  ;;  %v9426_v0 = vld [vmem:[%s9868_s8 + $0xac] sm:$0x1]  ;;  %v5831_v62 = vshll.u32 %v9274_v6, 16 }
 0x28b   : > { %v5466_v46 = vadd.f32 %v5427_v5, %v5188_v34  ;;  %v5154_v21 = vpop.f32.mrf.mxu0  ;;  %v5189_v33 = vadd.f32 %v5152_v2, %v4783_v28  ;;  %v6683_v2 = vshrl.u32 %v9427_v44, 16  ;;  %v6686_v34 = vshll.u32 %v9427_v44, 16  ;;  %v9428_v28 = vld [vmem:[%s9868_s8 + $0xb4] sm:$0x1] }
 0x28c   : > { %9447 = vmatmul.msk.bf16.gmra.mxu2 %vm351_vm3, %v6843_v39  ;;  %v9313_v39 = vld [vmem:[%s9868_s8 + $0xa8] sm:$0xe]  ;;  %v5812_v23 = vsel %vm9900_vm7, %v5807_v13, %v5811_v17  ;;  %v6183_v44 = vrot.slane %v9314_v53, 5  ;;  %v6678_v60 = vshll.u32 %v9426_v0, 16  ;;  %v6692_v4 = vshll.u32 %v9428_v28, 16 }
 0x28d   : > { %v11447_v45 = vadd.f32 %v5613_v56, %v5466_v46  ;;  %v5821_v56 = vrot.slane %v5820_v32, 4  ;;  %v6685_v5 = vrot.slane %v6683_v2, 4  ;;  %v6688_v11 = vrot.slane %v6686_v34, 5  ;;  %v9277_v17 = vld [vmem:[%s9868_s8 + $0xcc] sm:$0x1] }
 0x28e   : > { %v5828_v46 = vshrl.u32 %v9274_v6, 16  ;;  %v5845_v32 = vshll.u32 %v9276_v20, 16  ;;  %v6844_v18 = vpack.c.b16 %v11455_v55, %v11453_v15  ;;  %v5833_v2 = vrot.slane %v5831_v62, 5  ;;  %v9429_v55 = vld [vmem:[%s9868_s8 + $0xc8] sm:$0xf] }
 0x28f   : > { %v5616_v3 = vpop.f32.mrf.mxu2  ;;  %v6689_v41 = vor.u32 %v6688_v11, %v6685_v5  ;;  %v6694_v15 = vrot.slane %v6692_v4, 5  ;;  %v5837_v53 = vshll.u32 %v9275_v36, 16  ;;  %v5844_v6 = vrot.slane %v5842_v61, 4  ;;  %v9316_v61 = vld [vmem:[%s9868_s8 + $0xc4] sm:$0x1] }
 0x290   : > { %v4748_v40 = vpop.f32.mrf.mxu3  ;;  %v5830_v50 = vrot.slane %v5828_v46, 4  ;;  %v6697_v11 = vshrl.u32 %v9429_v55, 16 }
 0x291   : > { %v4784_v35 = vadd.f32 %v4748_v40, %v11133_v47  ;;  %v9338_v47 = vrot.slane %v9313_v39, 9  ;;  %v6680_v40 = vrot.slane %v6678_v60, 5 }
 0x292   : > { %v5430_v14 = vpop.f32.mrf.mxu1 }
 0x293   : > { %v5467_v27 = vadd.f32 %v5430_v14, %v5189_v33  ;;  %v5157_v29 = vpop.f32.mrf.mxu0  ;;  %v5190_v16 = vadd.f32 %v5154_v21, %v4784_v35  ;;  %v5826_v33 = vsel %vm9900_vm7, %v5821_v56, %v5825_v38  ;;  %v6675_v21 = vor.u32 %v6674_v7, %v6671_v8  ;;  %v9431_v38 = vld [vmem:[%s9868_s8 + $0xd0] sm:$0xf] }
 0x294   : > { %v6690_v56 = vrot.slane %v6689_v41, 4  ;;  %v5847_v35 = vrot.slane %v5845_v32, 5  ;;  %v5834_v14 = vor.u32 %v5833_v2, %v5830_v50  ;;  %v6711_v46 = vshrl.u32 %v9431_v38, 16  ;;  %v9317_v32 = vld [vmem:[%s9868_s8 + $0xc8] sm:$0xe] }
 0x295   : > { %v11465_v1 = vadd.f32 %v5616_v3, %v5467_v27  ;;  %9406 = vmatmul.msk.bf16.gmra.mxu1 %vm351_vm3, %v9380_v43  ;;  %9293 = vmatmul.msk.bf16.gmra.mxu3 %vm351_vm3, %v5975_v37  ;;  %v11475_v3 = vunpack.c.l.b16 %v5812_v23  ;;  %v11477_v43 = vunpack.c.l.b16 %v5826_v33  ;;  %v6180_v37 = vsel %vm9870_vm4, %v9337_v31, %v6179_v49  ;;  %v9728_v49 = vld [vmem:[%s9868_s8 + $0x9c] sm:$0xf0]  ;;  %v9318_v50 = vld [vmem:[%s9868_s8 + $0xcc] sm:$0x1] }
 0x296   : > { %9350 = vmatmul.msk.bf16.gmra.mxu0 %vm351_vm3, %v6253_v52  ;;  %v6184_v52 = vsel %vm9870_vm4, %v9338_v47, %v6183_v44  ;;  %v6676_v39 = vrot.slane %v6675_v21, 4  ;;  %v5851_v31 = vshll.u32 %v9277_v17, 16  ;;  %v6241_v28 = vunpack.c.l.b16 %v6180_v37  ;;  %v9315_v44 = vld [vmem:[%s9868_s8 + $0xc0] sm:$0xe]  ;;  %v9430_v2 = vld [vmem:[%s9868_s8 + $0xcc] sm:$0x1] }
 0x297   : > { %v5618_v57 = vpop.f32.mrf.mxu2  ;;  %v6242_v5 = vunpack.c.l.b16 %v6184_v52  ;;  %v6700_v27 = vshll.u32 %v9429_v55, 16  ;;  %v6695_v62 = vsel %vm9900_vm7, %v6690_v56, %v6694_v15  ;;  %v11496_v23 = vrot.slane %v5837_v53, 5  ;;  %v9278_v56 = vld [vmem:[%s9868_s8 + $0xd0] sm:$0xf] }
 0x298   : > { %v4751_v34 = vpop.f32.mrf.mxu3  ;;  %v5848_v47 = vor.u32 %v5847_v35, %v5844_v6  ;;  %v5976_v21 = vpack.c.b16 %v11477_v43, %v11475_v3  ;;  %v5835_v4 = vrot.slane %v5834_v14, 4  ;;  %v5853_v41 = vrot.slane %v5851_v31, 5 }
 0x299   : > { %v4785_v51 = vadd.f32 %v4751_v34, %v11145_v63  ;;  %v9383_v63 = vld [vmem:[%s9868_s8 + $0x98] sm:$0xf]  ;;  %v6699_v34 = vrot.slane %v6697_v11, 4  ;;  %v6702_v37 = vrot.slane %v6700_v27, 5  ;;  %v6833_v17 = vunpack.c.l.b16 %v6695_v62 }
 0x29a   : > { %v5432_v13 = vpop.f32.mrf.mxu1  ;;  %v9384_v33 = vor.u32 %v9728_v49, %v9383_v63  ;;  %v5849_v3 = vrot.slane %v5848_v47, 4  ;;  %v9339_v43 = vrot.slane %v9315_v44, 9  ;;  %v6187_v55 = vrot.slane %v9316_v61, 5  ;;  %v9280_v49 = vld [vmem:[%s9868_s8 + $0xd8] sm:$0xf] }
 0x29b   : > { %v5468_v0 = vadd.f32 %v5432_v13, %v5190_v16  ;;  %v5159_v8 = vpop.f32.mrf.mxu0  ;;  %v5191_v7 = vadd.f32 %v5157_v29, %v4785_v51  ;;  %v6681_v16 = vsel %vm9900_vm7, %v6676_v39, %v6680_v40  ;;  %v6714_v29 = vshll.u32 %v9431_v38, 16  ;;  %v9432_v51 = vld [vmem:[%s9868_s8 + $0xd4] sm:$0x1] }
 0x29c   : > { %9448 = vmatmul.msk.bf16.gmra.mxu2 %vm351_vm3, %v6844_v18  ;;  %v6254_v18 = vpack.c.b16 %v6242_v5, %v6241_v28  ;;  %v6832_v36 = vunpack.c.l.b16 %v6681_v16  ;;  %v6713_v39 = vrot.slane %v6711_v46, 4  ;;  %v9340_v13 = vrot.slane %v9317_v32, 9 }
 0x29d   : > { %v11490_v20 = vadd.f32 %v5618_v57, %v5468_v0  ;;  %v6716_v40 = vrot.slane %v6714_v29, 5  ;;  %v6191_v38 = vrot.slane %v9318_v50, 5  ;;  %v6706_v0 = vshll.u32 %v9430_v2, 16  ;;  %v9433_v2 = vld [vmem:[%s9868_s8 + $0xd8] sm:$0xf] }
 0x29e   : > { %v6703_v14 = vor.u32 %v6702_v37, %v6699_v34  ;;  %v6720_v31 = vshll.u32 %v9432_v51, 16  ;;  %v5856_v28 = vshrl.u32 %v9278_v56, 16  ;;  %v5859_v5 = vshll.u32 %v9278_v56, 16  ;;  %v9435_v34 = vld [vmem:[%s9868_s8 + $0xe0] sm:$0xf] }
 0x29f   : > { %v5621_v60 = vpop.f32.mrf.mxu2  ;;  %v6845_v11 = vpack.c.b16 %v6833_v17, %v6832_v36  ;;  %v5854_v27 = vsel %vm9900_vm7, %v5849_v3, %v5853_v41  ;;  %v6188_v16 = vsel %vm9870_vm4, %v9339_v43, %v6187_v55  ;;  %v6192_v46 = vsel %vm9870_vm4, %v9340_v13, %v6191_v38  ;;  %v9279_v17 = vld [vmem:[%s9868_s8 + $0xd4] sm:$0x1]  ;;  %v9729_v3 = vld [vmem:[%s9868_s8 + $0xac] sm:$0xf0] }
 0x2a0   : > { %v4753_v57 = vpop.f32.mrf.mxu3  ;;  %v6708_v29 = vrot.slane %v6706_v0, 5  ;;  %v6704_v47 = vrot.slane %v6703_v14, 4  ;;  %v6722_v44 = vrot.slane %v6720_v31, 5  ;;  %v5861_v41 = vrot.slane %v5859_v5, 5 }
 0x2a1   : > { %v4786_v52 = vadd.f32 %v4753_v57, %v11163_v58  ;;  %v6717_v58 = vor.u32 %v6716_v40, %v6713_v39  ;;  %v6243_v50 = vunpack.c.l.b16 %v6188_v16  ;;  %v5966_v37 = vunpack.c.l.b16 %v5854_v27 }
 0x2a2   : > { %v5435_v15 = vpop.f32.mrf.mxu1  ;;  %v6709_v43 = vsel %vm9900_vm7, %v6704_v47, %v6708_v29  ;;  %v6725_v56 = vshrl.u32 %v9433_v2, 16  ;;  %v5865_v0 = vshll.u32 %v9279_v17, 16  ;;  %v9321_v29 = vld [vmem:[%s9868_s8 + $0xd8] sm:$0xe] }
 0x2a3   : > { %v5469_v53 = vadd.f32 %v5435_v15, %v5191_v7  ;;  %v5162_v6 = vpop.f32.mrf.mxu0  ;;  %v5192_v35 = vadd.f32 %v5159_v8, %v4786_v52  ;;  %v5840_v8 = vsel %vm9900_vm7, %v5835_v4, %v11496_v23  ;;  %v5858_v4 = vrot.slane %v5856_v28, 4  ;;  %v9387_v15 = vld [vmem:[%s9868_s8 + $0xa8] sm:$0xf]  ;;  %v9284_v17 = vld [vmem:[%s9868_s8 + $0xf8] sm:$0xf] }
 0x2a4   : > { %v5965_v36 = vunpack.c.l.b16 %v5840_v8  ;;  %v6244_v52 = vunpack.c.l.b16 %v6192_v46  ;;  %v9320_v8 = vld [vmem:[%s9868_s8 + $0xd4] sm:$0x1]  ;;  %v6834_v27 = vunpack.c.l.b16 %v6709_v43 }
 0x2a5   : > { %v11508_v63 = vadd.f32 %v5621_v60, %v5469_v53  ;;  %9407 = vmatmul.msk.bf16.gmra.mxu1 %vm351_vm3, %v9384_v33  ;;  %9294 = vmatmul.msk.bf16.gmra.mxu3 %vm351_vm3, %v5976_v21  ;;  %v5870_v60 = vshrl.u32 %v9280_v49, 16  ;;  %v5873_v33 = vshll.u32 %v9280_v49, 16  ;;  %v6718_v21 = vrot.slane %v6717_v58, 4 }
 0x2a6   : > { %9351 = vmatmul.msk.bf16.gmra.mxu0 %vm351_vm3, %v6254_v18  ;;  %v5862_v13 = vor.u32 %v5861_v41, %v5858_v4  ;;  %v6728_v53 = vshll.u32 %v9433_v2, 16  ;;  %v9388_v58 = vor.u32 %v9729_v3, %v9387_v15  ;;  %v5977_v49 = vpack.c.b16 %v5966_v37, %v5965_v36 }
 0x2a7   : > { %v5623_v7 = vpop.f32.mrf.mxu2  ;;  %v5872_v51 = vrot.slane %v5870_v60, 4  ;;  %v5875_v39 = vrot.slane %v5873_v33, 5  ;;  %v6723_v55 = vsel %vm9900_vm7, %v6718_v21, %v6722_v44  ;;  %v6255_v28 = vpack.c.b16 %v6244_v52, %v6243_v50  ;;  %v9282_v21 = vld [vmem:[%s9868_s8 + $0xf0] sm:$0xf]  ;;  %v9436_v50 = vld [vmem:[%s9868_s8 + $0xe4] sm:$0x1] }
 0x2a8   : > { %v4756_v62 = vpop.f32.mrf.mxu3  ;;  %v6835_v16 = vunpack.c.l.b16 %v6723_v55  ;;  %v5863_v46 = vrot.slane %v5862_v13, 4  ;;  %v6727_v44 = vrot.slane %v6725_v56, 4  ;;  %v6730_v60 = vrot.slane %v6728_v53, 5 }
 0x2a9   : > { %v4787_v23 = vadd.f32 %v4756_v62, %v11174_v22  ;;  %v9281_v22 = vld [vmem:[%s9868_s8 + $0xdc] sm:$0x1]  ;;  %v5876_v5 = vor.u32 %v5875_v39, %v5872_v51  ;;  %v6195_v37 = vrot.slane %v9320_v8, 5  ;;  %v9342_v52 = vrot.slane %v9321_v29, 9 }
 0x2aa   : > { %v5437_v61 = vpop.f32.mrf.mxu1  ;;  %v5879_v14 = vshll.u32 %v9281_v22, 16  ;;  %v9322_v62 = vld [vmem:[%s9868_s8 + $0xdc] sm:$0x1]  ;;  %v5884_v39 = vshrl.u32 %v9282_v21, 16  ;;  %v6748_v43 = vshll.u32 %v9436_v50, 16  ;;  %v5898_v13 = vshrl.u32 %v9284_v17, 16 }
 0x2ab   : > { %v5470_v32 = vadd.f32 %v5437_v61, %v5192_v35  ;;  %v5164_v57 = vpop.f32.mrf.mxu0  ;;  %v5193_v18 = vadd.f32 %v5162_v6, %v4787_v23  ;;  %v6739_v6 = vshrl.u32 %v9435_v34, 16  ;;  %v6742_v35 = vshll.u32 %v9435_v34, 16 }
 0x2ac   : > { %9449 = vmatmul.msk.bf16.gmra.mxu2 %vm351_vm3, %v6845_v11  ;;  %v9319_v11 = vld [vmem:[%s9868_s8 + $0xd0] sm:$0xe]  ;;  %v5881_v36 = vrot.slane %v5879_v14, 5  ;;  %v5877_v2 = vrot.slane %v5876_v5, 4  ;;  %v6199_v51 = vrot.slane %v9322_v62, 5  ;;  %v5901_v56 = vshll.u32 %v9284_v17, 16 }
 0x2ad   : > { %v11529_v40 = vadd.f32 %v5623_v7, %v5470_v32  ;;  %v6741_v33 = vrot.slane %v6739_v6, 4  ;;  %v6744_v23 = vrot.slane %v6742_v35, 5  ;;  %v5867_v32 = vrot.slane %v5865_v0, 5 }
 0x2ae   : > { %v9341_v34 = vrot.slane %v9319_v11, 9  ;;  %v6846_v6 = vpack.c.b16 %v6835_v16, %v6834_v27  ;;  %v9283_v27 = vld [vmem:[%s9868_s8 + $0xf4] sm:$0x1]  ;;  %v5900_v62 = vrot.slane %v5898_v13, 4 }
 0x2af   : > { %v5626_v38 = vpop.f32.mrf.mxu2  ;;  %v6745_v3 = vor.u32 %v6744_v23, %v6741_v33  ;;  %v5868_v35 = vsel %vm9900_vm7, %v5863_v46, %v5867_v32  ;;  %v9730_v32 = vld [vmem:[%s9868_s8 + $0xcc] sm:$0xf0]  ;;  %v5893_v50 = vshll.u32 %v9283_v27, 16 }
 0x2b0   : > { %v4758_v31 = vpop.f32.mrf.mxu3  ;;  %v6196_v0 = vsel %vm9870_vm4, %v9341_v34, %v6195_v37 }
 0x2b1   : > { %v4788_v7 = vadd.f32 %v4758_v31, %v11195_v10  ;;  %v9434_v10 = vld [vmem:[%s9868_s8 + $0xdc] sm:$0x1]  ;;  %v6200_v31 = vsel %vm9870_vm4, %v9342_v52, %v6199_v51  ;;  %v6746_v8 = vrot.slane %v6745_v3, 4  ;;  %v6245_v23 = vunpack.c.l.b16 %v6196_v0  ;;  %v9324_v0 = vld [vmem:[%s9868_s8 + $0xf4] sm:$0x1] }
 0x2b2   : > { %v5440_v47 = vpop.f32.mrf.mxu1  ;;  %v6734_v15 = vshll.u32 %v9434_v10, 16 }
 0x2b3   : > { %v5471_v4 = vadd.f32 %v5440_v47, %v5193_v18  ;;  %v5167_v41 = vpop.f32.mrf.mxu0  ;;  %v5194_v61 = vadd.f32 %v5164_v57, %v4788_v7  ;;  %v5887_v18 = vshll.u32 %v9282_v21, 16  ;;  %v6731_v57 = vor.u32 %v6730_v60, %v6727_v44  ;;  %v9437_v47 = vld [vmem:[%s9868_s8 + $0xf8] sm:$0xf]  ;;  %v9391_v44 = vld [vmem:[%s9868_s8 + $0xc8] sm:$0xf] }
 0x2b4   : > { %v6736_v11 = vrot.slane %v6734_v15, 5  ;;  %v6750_v7 = vrot.slane %v6748_v43, 5  ;;  %v5967_v60 = vunpack.c.l.b16 %v5868_v35  ;;  %v9285_v21 = vld [vmem:[%s9868_s8 + $0xfc] sm:$0x1] }
 0x2b5   : > { %v11546_v22 = vadd.f32 %v5626_v38, %v5471_v4  ;;  %9408 = vmatmul.msk.bf16.gmra.mxu1 %vm351_vm3, %v9388_v58  ;;  %9295 = vmatmul.msk.bf16.gmra.mxu3 %vm351_vm3, %v5977_v49  ;;  %v5882_v38 = vsel %vm9900_vm7, %v5877_v2, %v5881_v36  ;;  %v5886_v58 = vrot.slane %v5884_v39, 4  ;;  %v5889_v49 = vrot.slane %v5887_v18, 5 }
 0x2b6   : > { %9352 = vmatmul.msk.bf16.gmra.mxu0 %vm351_vm3, %v6255_v28  ;;  %v6732_v5 = vrot.slane %v6731_v57, 4  ;;  %v5968_v33 = vunpack.c.l.b16 %v5882_v38  ;;  %v6246_v36 = vunpack.c.l.b16 %v6200_v31  ;;  %v6753_v2 = vshrl.u32 %v9437_v47, 16 }
 0x2b7   : > { %v5628_v55 = vpop.f32.mrf.mxu2  ;;  %v5890_v10 = vor.u32 %v5889_v49, %v5886_v58  ;;  %v6751_v52 = vsel %vm9900_vm7, %v6746_v8, %v6750_v7  ;;  %v5907_v51 = vshll.u32 %v9285_v21, 16  ;;  %v9392_v18 = vor.u32 %v9730_v32, %v9391_v44  ;;  %v9326_v8 = vld [vmem:[%s9868_s8 + $0xfc] sm:$0x1] }
 0x2b8   : > { %v4761_v53 = vpop.f32.mrf.mxu3  ;;  %v6737_v37 = vsel %vm9900_vm7, %v6732_v5, %v6736_v11  ;;  %v5978_v57 = vpack.c.b16 %v5968_v33, %v5967_v60  ;;  %v6837_v38 = vunpack.c.l.b16 %v6751_v52  ;;  %v6755_v31 = vrot.slane %v6753_v2, 4  ;;  %v9438_v7 = vld [vmem:[%s9868_s8 + $0xfc] sm:$0x1]  ;;  %v9440_v60 = vld [vmem:[%s9868_s8 + $0x104] sm:$0x1] }
 0x2b9   : > { %v4789_v14 = vadd.f32 %v4761_v53, %v11207_v9  ;;  %v5903_v9 = vrot.slane %v5901_v56, 5  ;;  %v5891_v13 = vrot.slane %v5890_v10, 4  ;;  %v5895_v56 = vrot.slane %v5893_v50, 5  ;;  %v9323_v53 = vld [vmem:[%s9868_s8 + $0xf0] sm:$0xe] }
 0x2ba   : > { %v5442_v28 = vpop.f32.mrf.mxu1  ;;  %v6836_v35 = vunpack.c.l.b16 %v6737_v37  ;;  %v5909_v11 = vrot.slane %v5907_v51, 5  ;;  %v6203_v44 = vrot.slane %v9324_v0, 5  ;;  %v6762_v32 = vshll.u32 %v9438_v7, 16 }
 0x2bb   : > { %v5472_v16 = vadd.f32 %v5442_v28, %v5194_v61  ;;  %v5169_v46 = vpop.f32.mrf.mxu0  ;;  %v5195_v29 = vadd.f32 %v5167_v41, %v4789_v14  ;;  %v9439_v61 = vld [vmem:[%s9868_s8 + $0x100] sm:$0xf]  ;;  %v6756_v41 = vshll.u32 %v9437_v47, 16  ;;  %v5904_v17 = vor.u32 %v5903_v9, %v5900_v62  ;;  %v9325_v14 = vld [vmem:[%s9868_s8 + $0xf8] sm:$0xe] }
 0x2bc   : > { %9450 = vmatmul.msk.bf16.gmra.mxu2 %vm351_vm3, %v6846_v6  ;;  %v6767_v15 = vshrl.u32 %v9439_v61, 16  ;;  %v6770_v3 = vshll.u32 %v9439_v61, 16  ;;  %v9286_v62 = vld [vmem:[%s9868_s8 + $0x100] sm:$0xf]  ;;  %v9343_v47 = vrot.slane %v9323_v53, 9  ;;  %v9344_v33 = vrot.slane %v9325_v14, 9 }
 0x2bd   : > { %v11565_v4 = vadd.f32 %v5628_v55, %v5472_v16  ;;  %v6256_v55 = vpack.c.b16 %v6246_v36, %v6245_v23  ;;  %v6758_v58 = vrot.slane %v6756_v41, 5  ;;  %v6207_v23 = vrot.slane %v9326_v8, 5  ;;  %v9441_v8 = vld [vmem:[%s9868_s8 + $0x108] sm:$0xf] }
 0x2be   : > { %v6769_v27 = vrot.slane %v6767_v15, 4  ;;  %v6772_v16 = vrot.slane %v6770_v3, 5  ;;  %v6847_v10 = vpack.c.b16 %v6837_v38, %v6836_v35  ;;  %v5912_v61 = vshrl.u32 %v9286_v62, 16 }
 0x2bf   : > { %v5631_v34 = vpop.f32.mrf.mxu2  ;;  %v6759_v21 = vor.u32 %v6758_v58, %v6755_v31  ;;  %v5915_v2 = vshll.u32 %v9286_v62, 16  ;;  %v6776_v37 = vshll.u32 %v9440_v60, 16  ;;  %v6208_v3 = vsel %vm9870_vm4, %v9344_v33, %v6207_v23  ;;  %v9287_v31 = vld [vmem:[%s9868_s8 + $0x104] sm:$0x1] }
 0x2c0   : > { %v4763_v39 = vpop.f32.mrf.mxu3  ;;  %v5914_v35 = vrot.slane %v5912_v61, 4 }
 0x2c1   : > { %v4790_v43 = vadd.f32 %v4763_v39, %v11226_v48  ;;  %v5905_v48 = vrot.slane %v5904_v17, 4  ;;  %v5917_v38 = vrot.slane %v5915_v2, 5  ;;  %v6778_v14 = vrot.slane %v6776_v37, 5 }
 0x2c2   : > { %v5445_v6 = vpop.f32.mrf.mxu1 }
 0x2c3   : > { %v5473_v49 = vadd.f32 %v5445_v6, %v5195_v29  ;;  %v5172_v28 = vpop.f32.mrf.mxu0  ;;  %v5196_v5 = vadd.f32 %v5169_v46, %v4790_v43  ;;  %v5896_v29 = vsel %vm9900_vm7, %v5891_v13, %v5895_v56  ;;  %v9288_v46 = vld [vmem:[%s9868_s8 + $0x108] sm:$0xf]  ;;  %v5910_v50 = vsel %vm9900_vm7, %v5905_v48, %v5909_v11  ;;  %v9395_v6 = vld [vmem:[%s9868_s8 + $0xd8] sm:$0xf]  ;;  %v9289_v11 = vld [vmem:[%s9868_s8 + $0x10c] sm:$0x1] }
 0x2c4   : > { %v5926_v52 = vshrl.u32 %v9288_v46, 16  ;;  %v5929_v17 = vshll.u32 %v9288_v46, 16  ;;  %v5969_v39 = vunpack.c.l.b16 %v5896_v29  ;;  %v5970_v15 = vunpack.c.l.b16 %v5910_v50 }
 0x2c5   : > { %v11580_v9 = vadd.f32 %v5631_v34, %v5473_v49  ;;  %9409 = vmatmul.msk.bf16.gmra.mxu1 %vm351_vm3, %v9392_v18  ;;  %9296 = vmatmul.msk.bf16.gmra.mxu3 %vm351_vm3, %v5978_v57  ;;  %v6773_v34 = vor.u32 %v6772_v16, %v6769_v27  ;;  %v6204_v18 = vsel %vm9870_vm4, %v9343_v47, %v6203_v44  ;;  %v6760_v43 = vrot.slane %v6759_v21, 4 }
 0x2c6   : > { %9353 = vmatmul.msk.bf16.gmra.mxu0 %vm351_vm3, %v6256_v55  ;;  %v6764_v55 = vrot.slane %v6762_v32, 5  ;;  %v5928_v58 = vrot.slane %v5926_v52, 4  ;;  %v5931_v49 = vrot.slane %v5929_v17, 5  ;;  %v6248_v27 = vunpack.c.l.b16 %v6208_v3 }
 0x2c7   : > { %v5633_v36 = vpop.f32.mrf.mxu2  ;;  %v6774_v0 = vrot.slane %v6773_v34, 4  ;;  %v5979_v62 = vpack.c.b16 %v5970_v15, %v5969_v39  ;;  %v5918_v47 = vor.u32 %v5917_v38, %v5914_v35  ;;  %v5921_v44 = vshll.u32 %v9287_v31, 16  ;;  %v9327_v34 = vld [vmem:[%s9868_s8 + $0x100] sm:$0xe]  ;;  %v9444_v35 = vld [vmem:[%s9868_s8 + $0x114] sm:$0x1] }
 0x2c8   : > { %v4766_v41 = vpop.f32.mrf.mxu3  ;;  %v6765_v29 = vsel %vm9900_vm7, %v6760_v43, %v6764_v55  ;;  %v5932_v33 = vor.u32 %v5931_v49, %v5928_v58  ;;  %v5935_v23 = vshll.u32 %v9289_v11, 16  ;;  %v6781_v21 = vshrl.u32 %v9441_v8, 16  ;;  %v9330_v43 = vld [vmem:[%s9868_s8 + $0x10c] sm:$0x1] }
 0x2c9   : > { %v4791_v51 = vadd.f32 %v4766_v41, %v11237_v24  ;;  %v9731_v24 = vld [vmem:[%s9868_s8 + $0xdc] sm:$0xf0]  ;;  %v6779_v46 = vsel %vm9900_vm7, %v6774_v0, %v6778_v14  ;;  %v6838_v41 = vunpack.c.l.b16 %v6765_v29  ;;  %v5919_v39 = vrot.slane %v5918_v47, 4 }
 0x2ca   : > { %v5447_v57 = vpop.f32.mrf.mxu1  ;;  %v9396_v7 = vor.u32 %v9731_v24, %v9395_v6  ;;  %v5923_v15 = vrot.slane %v5921_v44, 5  ;;  %v5933_v3 = vrot.slane %v5932_v33, 4  ;;  %v6783_v55 = vrot.slane %v6781_v21, 4  ;;  %v9442_v6 = vld [vmem:[%s9868_s8 + $0x10c] sm:$0x1] }
 0x2cb   : > { %v5474_v13 = vadd.f32 %v5447_v57, %v5196_v5  ;;  %v5174_v56 = vpop.f32.mrf.mxu0  ;;  %v5197_v53 = vadd.f32 %v5172_v28, %v4791_v51  ;;  %v6247_v5 = vunpack.c.l.b16 %v6204_v18  ;;  %v9443_v28 = vld [vmem:[%s9868_s8 + $0x110] sm:$0xf]  ;;  %v6839_v51 = vunpack.c.l.b16 %v6779_v46  ;;  %v9328_v18 = vld [vmem:[%s9868_s8 + $0x104] sm:$0x1]  ;;  %v9329_v57 = vld [vmem:[%s9868_s8 + $0x108] sm:$0xe] }
 0x2cc   : > { %9451 = vmatmul.msk.bf16.gmra.mxu2 %vm351_vm3, %v6847_v10  ;;  %v6795_v10 = vshrl.u32 %v9443_v28, 16  ;;  %v6798_v50 = vshll.u32 %v9443_v28, 16  ;;  %v9345_v0 = vrot.slane %v9327_v34, 9  ;;  %v6211_v14 = vrot.slane %v9328_v18, 5 }
 0x2cd   : > { %v11600_v48 = vadd.f32 %v5633_v36, %v5474_v13  ;;  %v6784_v36 = vshll.u32 %v9441_v8, 16  ;;  %v6257_v2 = vpack.c.b16 %v6248_v27, %v6247_v5  ;;  %v9346_v31 = vrot.slane %v9329_v57, 9 }
 0x2ce   : > { %v6797_v24 = vrot.slane %v6795_v10, 4  ;;  %v6215_v58 = vrot.slane %v9330_v43, 5  ;;  %v6848_v11 = vpack.c.b16 %v6839_v51, %v6838_v41  ;;  %v5924_v8 = vsel %vm9900_vm7, %v5919_v39, %v5923_v15  ;;  %v9732_v10 = vld [vmem:[%s9868_s8 + $0xfc] sm:$0xf0]  ;;  %v9455_v43 = vld [vmem:[%s9868_s8 + $0x6c] sm:$0x1] }
 0x2cf   : > { %v5636_v16 = vpop.f32.mrf.mxu2  ;;  %v6790_v5 = vshll.u32 %v9442_v6, 16  ;;  %v6212_v46 = vsel %vm9870_vm4, %v9345_v0, %v6211_v14  ;;  %v5971_v21 = vunpack.c.l.b16 %v5924_v8 }
 0x2d0   : > { %v4768_v60 = vpop.f32.mrf.mxu3  ;;  %v6216_v33 = vsel %vm9870_vm4, %v9346_v31, %v6215_v58  ;;  %v6249_v41 = vunpack.c.l.b16 %v6212_v46  ;;  %v7024_v31 = vrot.slane %v9455_v43, 5  ;;  %v9570_v58 = vld [vmem:[%s9868_s8 + $0x78] sm:$0xf]  ;;  %v9530_v43 = vld [vmem:[%s9868_s8 + $0x70] sm:$0xf] }
 0x2d1   : > { %v4792_v32 = vadd.f32 %v4768_v60, %v11276_v25  ;;  %v5937_v25 = vrot.slane %v5935_v23, 5  ;;  %v9399_v23 = vld [vmem:[%s9868_s8 + $0xf8] sm:$0xf]  ;;  %v6250_v34 = vunpack.c.l.b16 %v6216_v33 }
 0x2d2   : > { %v5450_v61 = vpop.f32.mrf.mxu1 }
 0x2d3   : > { %v5475_v37 = vadd.f32 %v5450_v61, %v5197_v53  ;;  %v5177_v52 = vpop.f32.mrf.mxu0  ;;  %v5198_v17 = vadd.f32 %v5174_v56, %v4792_v32  ;;  %v6786_v53 = vrot.slane %v6784_v36, 5  ;;  %v6800_v56 = vrot.slane %v6798_v50, 5 }
 0x2d5   : > { %v11614_v13 = vadd.f32 %v5636_v16, %v5475_v37  ;;  %9410 = vmatmul.msk.bf16.gmra.mxu1 %vm351_vm3, %v9396_v7  ;;  %9297 = vmatmul.msk.bf16.gmra.mxu3 %vm351_vm3, %v5979_v62  ;;  %v5938_v7 = vsel %vm9900_vm7, %v5933_v3, %v5937_v25  ;;  %v6787_v28 = vor.u32 %v6786_v53, %v6783_v55  ;;  %v6804_v62 = vshll.u32 %v9444_v35, 16  ;;  %v9454_v25 = vld [vmem:[%s9868_s8 + $0x68] sm:$0xe] }
 0x2d6   : > { %9354 = vmatmul.msk.bf16.gmra.mxu0 %vm351_vm3, %v6257_v2  ;;  %v6801_v16 = vor.u32 %v6800_v56, %v6797_v24  ;;  %v5972_v32 = vunpack.c.l.b16 %v5938_v7  ;;  %v6258_v3 = vpack.c.b16 %v6250_v34, %v6249_v41  ;;  %v9456_v24 = vld [vmem:[%s9868_s8 + $0x70] sm:$0xe]  ;;  %v9457_v56 = vld [vmem:[%s9868_s8 + $0x74] sm:$0x1]  ;;  %v9486_v14 = vrot.slane %v9454_v25, 9 }
 0x2d7   : > { %v5638_v38 = vpop.f32.mrf.mxu2  ;;  %v6788_v50 = vrot.slane %v6787_v28, 4  ;;  %v6806_v2 = vrot.slane %v6804_v62, 5  ;;  %v9609_v7 = vld [vmem:[%s9868_s8 + $0x70] sm:$0xe]  ;;  %v9569_v34 = vld [vmem:[%s9868_s8 + $0x74] sm:$0x1] }
 0x2d8   : > { %v4771_v49 = vpop.f32.mrf.mxu3  ;;  %v6802_v61 = vrot.slane %v6801_v16, 4  ;;  %v5980_v39 = vpack.c.b16 %v5972_v32, %v5971_v21  ;;  %v9612_v21 = vld [vmem:[%s9868_s8 + $0x7c] sm:$0x1]  ;;  %v9641_v32 = vrot.slane %v9609_v7, 9 }
 0x2d9   : > { %v4793_v27 = vadd.f32 %v4771_v49, %v11317_v59  ;;  %v6792_v59 = vrot.slane %v6790_v5, 5  ;;  %v9487_v49 = vrot.slane %v9456_v24, 9  ;;  %v9610_v5 = vld [vmem:[%s9868_s8 + $0x74] sm:$0x1]  ;;  %v7463_v24 = vshll.u32 %v9569_v34, 16 }
 0x2da   : > { %v5452_v29 = vpop.f32.mrf.mxu1  ;;  %v6807_v57 = vsel %vm9900_vm7, %v6802_v61, %v6806_v2 }
 0x2db   : > { %v5476_v47 = vadd.f32 %v5452_v29, %v5198_v17  ;;  %v5179_v44 = vpop.f32.mrf.mxu0  ;;  %v5199_v60 = vadd.f32 %v5177_v52, %v4793_v27  ;;  %v9400_v17 = vor.u32 %v9732_v10, %v9399_v23  ;;  %v6793_v18 = vsel %vm9900_vm7, %v6788_v50, %v6792_v59  ;;  %v9611_v23 = vld [vmem:[%s9868_s8 + $0x78] sm:$0xe] }
 0x2dc   : > { %9452 = vmatmul.msk.bf16.gmra.mxu2 %vm351_vm3, %v6848_v11  ;;  %v6841_v35 = vunpack.c.l.b16 %v6807_v57  ;;  %v7028_v11 = vrot.slane %v9457_v56, 5  ;;  %v7468_v29 = vshrl.u32 %v9570_v58, 16  ;;  %v7893_v59 = vrot.slane %v9610_v5, 5  ;;  %v9571_v57 = vld [vmem:[%s9868_s8 + $0x7c] sm:$0x1] }
 0x2dd   : > { %v11632_v36 = vadd.f32 %v5638_v38, %v5476_v47  ;;  %v9568_v38 = vld [vmem:[%s9868_s8 + $0x70] sm:$0xf]  ;;  %v7471_v47 = vshll.u32 %v9570_v58, 16  ;;  %v9459_v5 = vld [vmem:[%s9868_s8 + $0x7c] sm:$0x1] }
 0x2de   : > { %v7454_v27 = vshrl.u32 %v9568_v38, 16  ;;  %v7457_v28 = vshll.u32 %v9568_v38, 16  ;;  %v7029_v33 = vsel %vm9870_vm4, %v9487_v49, %v7028_v11  ;;  %v9458_v49 = vld [vmem:[%s9868_s8 + $0x78] sm:$0xe] }
 0x2df   : > { %v5641_v37 = vpop.f32.mrf.mxu2 }
 0x2e0   : > { %v4773_v52 = vpop.f32.mrf.mxu3  ;;  %v7456_v2 = vrot.slane %v7454_v27, 4  ;;  %v9460_v27 = vld [vmem:[%s9868_s8 + $0x80] sm:$0xe] }
 0x2e1   : > { %v4794_v51 = vadd.f32 %v4773_v52, %v11351_v30  ;;  %v6840_v30 = vunpack.c.l.b16 %v6793_v18  ;;  %v7473_v52 = vrot.slane %v7471_v47, 5  ;;  %v7897_v18 = vrot.slane %v9612_v21, 5  ;;  %v9574_v21 = vld [vmem:[%s9868_s8 + $0x88] sm:$0xf] }
 0x2e2   : > { %v5455_v15 = vpop.f32.mrf.mxu1  ;;  %v7496_v34 = vshrl.u32 %v9574_v21, 16 }
 0x2e3   : > { %v5477_v55 = vadd.f32 %v5455_v15, %v5199_v60  ;;  %v5182_v6 = vpop.f32.mrf.mxu0  ;;  %v5200_v53 = vadd.f32 %v5179_v44, %v4794_v51  ;;  %v6849_v62 = vpack.c.b16 %v6841_v35, %v6840_v30  ;;  %v7025_v60 = vsel %vm9870_vm4, %v9486_v14, %v7024_v31  ;;  %v9403_v15 = vld [vmem:[%s9868_s8 + $0x108] sm:$0xf] }
 0x2e4   : > { %v7104_v41 = vunpack.c.l.b16 %v7025_v60  ;;  %v7105_v51 = vunpack.c.l.b16 %v7029_v33  ;;  %v7477_v35 = vshll.u32 %v9571_v57, 16 }
 0x2e5   : > { %v11645_v0 = vadd.f32 %v5641_v37, %v5477_v55  ;;  %9411 = vmatmul.msk.bf16.gmra.mxu1 %vm351_vm3, %v9400_v17  ;;  %9298 = vmatmul.msk.bf16.gmra.mxu3 %vm351_vm3, %v5980_v39  ;;  %v7470_v37 = vrot.slane %v7468_v29, 4  ;;  %v9642_v39 = vrot.slane %v9611_v23, 9  ;;  %v9734_v55 = vld [vmem:[%s9868_s8 + $0x74] sm:$0xf0]  ;;  %v9488_v23 = vrot.slane %v9458_v49, 9 }
 0x2e6   : > { %9355 = vmatmul.msk.bf16.gmra.mxu0 %vm351_vm3, %v6258_v3  ;;  %v9733_v3 = vld [vmem:[%s9868_s8 + $0x10c] sm:$0xf0]  ;;  %v7120_v31 = vpack.c.b16 %v7105_v51, %v7104_v41  ;;  %v7479_v33 = vrot.slane %v7477_v35, 5 }
 0x2e7   : > { %v5643_v8 = vpop.f32.mrf.mxu2  ;;  %v7474_v30 = vor.u32 %v7473_v52, %v7470_v37  ;;  %v9404_v14 = vor.u32 %v9733_v3, %v9403_v15  ;;  %v7898_v58 = vsel %vm9870_vm4, %v9642_v39, %v7897_v18  ;;  %v7499_v37 = vshll.u32 %v9574_v21, 16  ;;  %v9613_v3 = vld [vmem:[%s9868_s8 + $0x80] sm:$0xe] }
 0x2e8   : > { %v4776_v16 = vpop.f32.mrf.mxu3  ;;  %v7974_v60 = vunpack.c.l.b16 %v7898_v58 }
 0x2e9   : > { %v4795_v44 = vadd.f32 %v4776_v16, %v11371_v42  ;;  %v7459_v42 = vrot.slane %v7457_v28, 5  ;;  %v9461_v28 = vld [vmem:[%s9868_s8 + $0x84] sm:$0x1]  ;;  %v7501_v58 = vrot.slane %v7499_v37, 5 }
 0x2ea   : > { %v5457_v46 = vpop.f32.mrf.mxu1 }
 0x2eb   : > { %v5478_v10 = vadd.f32 %v5457_v46, %v5200_v53  ;;  %v5184_v50 = vpop.f32.mrf.mxu0  ;;  %v5201_v61 = vadd.f32 %v5182_v6, %v4795_v44  ;;  %v7894_v6 = vsel %vm9870_vm4, %v9641_v32, %v7893_v59  ;;  %v7460_v53 = vor.u32 %v7459_v42, %v7456_v2 }
 0x2ec   : > { %9453 = vmatmul.msk.bf16.gmra.mxu2 %vm351_vm3, %v6849_v62  ;;  %v7973_v7 = vunpack.c.l.b16 %v7894_v6  ;;  %v7465_v44 = vrot.slane %v7463_v24, 5  ;;  %v7475_v46 = vrot.slane %v7474_v30, 4  ;;  %v7032_v59 = vrot.slane %v9459_v5, 5  ;;  %v9615_v6 = vld [vmem:[%s9868_s8 + $0x88] sm:$0xe] }
 0x2ed   : > { %v11662_v17 = vadd.f32 %v5643_v8, %v5478_v10  ;;  %v9531_v8 = vor.u32 %v9734_v55, %v9530_v43  ;;  %v7461_v47 = vrot.slane %v7460_v53, 4  ;;  %v9489_v10 = vrot.slane %v9460_v27, 9  ;;  %v9616_v53 = vld [vmem:[%s9868_s8 + $0x8c] sm:$0x1] }
 0x2ee   : > { %v7989_v51 = vpack.c.b16 %v7974_v60, %v7973_v7  ;;  %v7480_v18 = vsel %vm9900_vm7, %v7475_v46, %v7479_v33  ;;  %v7033_v57 = vsel %vm9870_vm4, %v9488_v23, %v7032_v59  ;;  %v9534_v7 = vld [vmem:[%s9868_s8 + $0x80] sm:$0xf]  ;;  %v9643_v5 = vrot.slane %v9613_v3, 9  ;;  %v9462_v33 = vld [vmem:[%s9868_s8 + $0x98] sm:$0xe] }
 0x2ef   : > { %v5646_v25 = vpop.f32.mrf.mxu2  ;;  %v7466_v41 = vsel %vm9900_vm7, %v7461_v47, %v7465_v44  ;;  %v7696_v49 = vunpack.c.l.b16 %v7480_v18  ;;  %v7905_v47 = vrot.slane %v9616_v53, 5  ;;  %v9464_v3 = vld [vmem:[%s9868_s8 + $0xa0] sm:$0xe] }
 0x2f0   : > { %v4778_v56 = vpop.f32.mrf.mxu3  ;;  %v7695_v55 = vunpack.c.l.b16 %v7466_v41  ;;  %v9576_v53 = vld [vmem:[%s9868_s8 + $0xa0] sm:$0xf] }
 0x2f1   : > { %v4796_v38 = vadd.f32 %v4778_v56, %v11401_v26  ;;  %v9572_v26 = vld [vmem:[%s9868_s8 + $0x80] sm:$0xf] }
 0x2f2   : > { %v5460_v11 = vpop.f32.mrf.mxu1  ;;  %v7485_v2 = vshll.u32 %v9572_v26, 16  ;;  %v7711_v21 = vpack.c.b16 %v7696_v49, %v7695_v55  ;;  %v9617_v49 = vld [vmem:[%s9868_s8 + $0xa0] sm:$0xe] }
 0x2f3   : > { %v5479_v16 = vadd.f32 %v5460_v11, %v5201_v61  ;;  %v6295_v62 = vpop.f32.mrf.mxu0  ;;  %v5202_v29 = vadd.f32 %v5184_v50, %v4796_v38  ;;  %v7036_v61 = vrot.slane %v9461_v28, 5  ;;  %v7482_v50 = vshrl.u32 %v9572_v26, 16  ;;  %v9573_v38 = vld [vmem:[%s9868_s8 + $0x84] sm:$0x1]  ;;  %v9735_v28 = vld [vmem:[%s9868_s8 + $0x84] sm:$0xf0] }
 0x2f4   : > { %v7106_v11 = vunpack.c.l.b16 %v7033_v57  ;;  %v7491_v44 = vshll.u32 %v9573_v38, 16  ;;  %v9535_v59 = vor.u32 %v9735_v28, %v9534_v7  ;;  %v7513_v7 = vshll.u32 %v9576_v53, 16  ;;  %v9619_v28 = vld [vmem:[%s9868_s8 + $0xa8] sm:$0xe] }
 0x2f5   : > { %v11680_v32 = vadd.f32 %v5646_v25, %v5479_v16  ;;  %9412 = vmatmul.msk.bf16.gmra.mxu1 %vm351_vm3, %v9404_v14  ;;  %9503 = vmatmul.msk.bf16.vlgmr.msra.gmra.mxu3 %vm351_vm3, %v7120_v31  ;;  %v7037_v15 = vsel %vm9870_vm4, %v9489_v10, %v7036_v61  ;;  %v9614_v25 = vld [vmem:[%s9868_s8 + $0x84] sm:$0x1]  ;;  %v7484_v24 = vrot.slane %v7482_v50, 4  ;;  %v9575_v14 = vld [vmem:[%s9868_s8 + $0x8c] sm:$0x1]  ;;  %v7498_v31 = vrot.slane %v7496_v34, 4 }
 0x2f6   : > { %9560 = vmatmul.msk.bf16.vlgmr.msra.gmra.mxu0 %vm351_vm3, %v9531_v8  ;;  %v7107_v8 = vunpack.c.l.b16 %v7037_v15  ;;  %v7901_v16 = vrot.slane %v9614_v25, 5  ;;  %v7505_v26 = vshll.u32 %v9575_v14, 16  ;;  %v9463_v10 = vld [vmem:[%s9868_s8 + $0x9c] sm:$0x1]  ;;  %v7493_v37 = vrot.slane %v7491_v44, 5 }
 0x2f7   : > { %v5648_v42 = vpop.f32.mrf.mxu2  ;;  %v7502_v46 = vor.u32 %v7501_v58, %v7498_v31  ;;  %v7040_v25 = vrot.slane %v9463_v10, 5  ;;  %v9646_v10 = vrot.slane %v9619_v28, 9 }
 0x2f8   : > { %v6017_v52 = vpop.f32.mrf.mxu3  ;;  %v7121_v50 = vpack.c.b16 %v7107_v8, %v7106_v11  ;;  %v9618_v11 = vld [vmem:[%s9868_s8 + $0xa4] sm:$0x1]  ;;  %v7510_v8 = vshrl.u32 %v9576_v53, 16 }
 0x2f9   : > { %v6057_v39 = vadd.f32 %v6017_v52, %v11419_v19  ;;  %v7487_v19 = vrot.slane %v7485_v2, 5  ;;  %v7902_v2 = vsel %vm9870_vm4, %v9643_v5, %v7901_v16  ;;  %v7507_v52 = vrot.slane %v7505_v26, 5  ;;  %v9620_v16 = vld [vmem:[%s9868_s8 + $0xac] sm:$0x1] }
 0x2fa   : > { %v5462_v43 = vpop.f32.mrf.mxu1  ;;  %v7503_v15 = vrot.slane %v7502_v46, 4 }
 0x2fb   : > { %v5480_v56 = vadd.f32 %v5462_v43, %v5202_v29  ;;  %v6297_v30 = vpop.f32.mrf.mxu0  ;;  %v6335_v35 = vadd.f32 %v6295_v62, %v6057_v39  ;;  %v9644_v29 = vrot.slane %v9615_v6, 9  ;;  %v7488_v62 = vor.u32 %v7487_v19, %v7484_v24 }
 0x2fc   : > { %9658 = vmatmul.msk.bf16.vlgmr.msra.gmra.mxu2 %vm351_vm3, %v7989_v51  ;;  %v9490_v51 = vrot.slane %v9462_v33, 9  ;;  %v7975_v43 = vunpack.c.l.b16 %v7902_v2  ;;  %v9491_v24 = vrot.slane %v9464_v3, 9  ;;  %v7508_v38 = vsel %vm9900_vm7, %v7503_v15, %v7507_v52 }
 0x2fd   : > { %v11702_v27 = vadd.f32 %v5648_v42, %v5480_v56  ;;  %v7906_v42 = vsel %vm9870_vm4, %v9644_v29, %v7905_v47  ;;  %v7489_v34 = vrot.slane %v7488_v62, 4  ;;  %v9578_v56 = vld [vmem:[%s9868_s8 + $0xa8] sm:$0xf]  ;;  %v7698_v26 = vunpack.c.l.b16 %v7508_v38 }
 0x2fe   : > { %v7976_v55 = vunpack.c.l.b16 %v7906_v42  ;;  %v7041_v14 = vsel %vm9870_vm4, %v9490_v51, %v7040_v25  ;;  %v7524_v29 = vshrl.u32 %v9578_v56, 16  ;;  %v7527_v47 = vshll.u32 %v9578_v56, 16 }
 0x2ff   : > { %v6886_v60 = vpop.f32.mrf.mxu2  ;;  %v7108_v46 = vunpack.c.l.b16 %v7041_v14  ;;  %v7512_v2 = vrot.slane %v7510_v8, 4  ;;  %v7515_v42 = vrot.slane %v7513_v7, 5 }
 0x300   : > { %v6019_v23 = vpop.f32.mrf.mxu3  ;;  %v7990_v58 = vpack.c.b16 %v7976_v55, %v7975_v43  ;;  %v7526_v52 = vrot.slane %v7524_v29, 4  ;;  %v7529_v51 = vrot.slane %v7527_v47, 5 }
 0x301   : > { %v6058_v61 = vadd.f32 %v6019_v23, %v11447_v45  ;;  %v9465_v45 = vld [vmem:[%s9868_s8 + $0xa4] sm:$0x1]  ;;  %v7516_v43 = vor.u32 %v7515_v42, %v7512_v2 }
 0x302   : > { %v6480_v41 = vpop.f32.mrf.mxu1  ;;  %v7044_v19 = vrot.slane %v9465_v45, 5  ;;  %v7530_v56 = vor.u32 %v7529_v51, %v7526_v52 }
 0x303   : > { %v6520_v39 = vadd.f32 %v6480_v41, %v6335_v35  ;;  %v6300_v18 = vpop.f32.mrf.mxu0  ;;  %v6336_v57 = vadd.f32 %v6297_v30, %v6058_v61  ;;  %v7494_v35 = vsel %vm9900_vm7, %v7489_v34, %v7493_v37  ;;  %v7913_v61 = vrot.slane %v9620_v16, 5  ;;  %v9579_v37 = vld [vmem:[%s9868_s8 + $0xac] sm:$0x1] }
 0x304   : > { %v7697_v44 = vunpack.c.l.b16 %v7494_v35  ;;  %v7533_v55 = vshll.u32 %v9579_v37, 16  ;;  %v9467_v35 = vld [vmem:[%s9868_s8 + $0xac] sm:$0x1] }
 0x305   : > { %v11714_v6 = vadd.f32 %v6886_v60, %v6520_v39  ;;  %9601 = vmatmul.msk.bf16.vlgmr.msra.gmra.mxu1 %vm351_vm3, %v7711_v21  ;;  %9504 = vmatmul.msk.bf16.gmra.mxu3 %vm351_vm3, %v7121_v50  ;;  %v7045_v60 = vsel %vm9870_vm4, %v9491_v24, %v7044_v19  ;;  %v9577_v50 = vld [vmem:[%s9868_s8 + $0xa4] sm:$0x1]  ;;  %v7914_v25 = vsel %vm9870_vm4, %v9646_v10, %v7913_v61  ;;  %v7048_v47 = vrot.slane %v9467_v35, 5  ;;  %v9624_v10 = vld [vmem:[%s9868_s8 + $0xbc] sm:$0x1] }
 0x306   : > { %9561 = vmatmul.msk.bf16.gmra.mxu0 %vm351_vm3, %v9535_v59  ;;  %v9645_v59 = vrot.slane %v9617_v49, 9  ;;  %v7109_v34 = vunpack.c.l.b16 %v7045_v60  ;;  %v7519_v3 = vshll.u32 %v9577_v50, 16  ;;  %v7712_v24 = vpack.c.b16 %v7698_v26, %v7697_v44  ;;  %v9469_v49 = vld [vmem:[%s9868_s8 + $0xb4] sm:$0x1] }
 0x307   : > { %v6888_v30 = vpop.f32.mrf.mxu2  ;;  %v7535_v16 = vrot.slane %v7533_v55, 5  ;;  %v7531_v26 = vrot.slane %v7530_v56, 4 }
 0x308   : > { %v6022_v31 = vpop.f32.mrf.mxu3  ;;  %v7122_v19 = vpack.c.b16 %v7109_v34, %v7108_v46  ;;  %v7521_v28 = vrot.slane %v7519_v3, 5  ;;  %v7052_v46 = vrot.slane %v9469_v49, 5 }
 0x309   : > { %v6059_v5 = vadd.f32 %v6022_v31, %v11465_v1  ;;  %v7909_v1 = vrot.slane %v9618_v11, 5 }
 0x30a   : > { %v6482_v62 = vpop.f32.mrf.mxu1 }
 0x30b   : > { %v6521_v33 = vadd.f32 %v6482_v62, %v6336_v57  ;;  %v6302_v23 = vpop.f32.mrf.mxu0  ;;  %v6337_v21 = vadd.f32 %v6300_v18, %v6059_v5  ;;  %v9538_v18 = vld [vmem:[%s9868_s8 + $0xa0] sm:$0xf]  ;;  %v9736_v57 = vld [vmem:[%s9868_s8 + $0xa4] sm:$0xf0]  ;;  %v7910_v15 = vsel %vm9870_vm4, %v9645_v59, %v7909_v1  ;;  %v7978_v5 = vunpack.c.l.b16 %v7914_v25  ;;  %v9580_v62 = vld [vmem:[%s9868_s8 + $0xb0] sm:$0xf] }
 0x30c   : > { %9659 = vmatmul.msk.bf16.gmra.mxu2 %vm351_vm3, %v7990_v58  ;;  %v9539_v14 = vor.u32 %v9736_v57, %v9538_v18  ;;  %v7977_v31 = vunpack.c.l.b16 %v7910_v15  ;;  %v9468_v58 = vld [vmem:[%s9868_s8 + $0xb0] sm:$0xe]  ;;  %v9623_v1 = vld [vmem:[%s9868_s8 + $0xb8] sm:$0xe]  ;;  %v7538_v61 = vshrl.u32 %v9580_v62, 16  ;;  %v7541_v50 = vshll.u32 %v9580_v62, 16 }
 0x30d   : > { %v11736_v41 = vadd.f32 %v6888_v30, %v6521_v33  ;;  %v9466_v30 = vld [vmem:[%s9868_s8 + $0xa8] sm:$0xe]  ;;  %v9493_v60 = vrot.slane %v9468_v58, 9  ;;  %v9582_v33 = vld [vmem:[%s9868_s8 + $0xb8] sm:$0xf]  ;;  %v9648_v25 = vrot.slane %v9623_v1, 9 }
 0x30e   : > { %v9492_v29 = vrot.slane %v9466_v30, 9  ;;  %v7991_v42 = vpack.c.b16 %v7978_v5, %v7977_v31  ;;  %v7552_v37 = vshrl.u32 %v9582_v33, 16  ;;  %v7555_v52 = vshll.u32 %v9582_v33, 16  ;;  %v9581_v30 = vld [vmem:[%s9868_s8 + $0xb4] sm:$0x1] }
 0x30f   : > { %v6891_v39 = vpop.f32.mrf.mxu2  ;;  %v7053_v57 = vsel %vm9870_vm4, %v9493_v60, %v7052_v46  ;;  %v9542_v5 = vld [vmem:[%s9868_s8 + $0xb0] sm:$0xf] }
 0x310   : > { %v6024_v45 = vpop.f32.mrf.mxu3  ;;  %v7049_v18 = vsel %vm9870_vm4, %v9492_v29, %v7048_v47  ;;  %v7554_v35 = vrot.slane %v7552_v37, 4  ;;  %v7111_v49 = vunpack.c.l.b16 %v7053_v57  ;;  %v7547_v29 = vshll.u32 %v9581_v30, 16 }
 0x311   : > { %v6060_v53 = vadd.f32 %v6024_v45, %v11490_v20  ;;  %v7517_v20 = vrot.slane %v7516_v43, 4  ;;  %v7921_v43 = vrot.slane %v9624_v10, 5  ;;  %v7110_v58 = vunpack.c.l.b16 %v7049_v18 }
 0x312   : > { %v6485_v38 = vpop.f32.mrf.mxu1 }
 0x313   : > { %v6522_v11 = vadd.f32 %v6485_v38, %v6337_v21  ;;  %v6305_v8 = vpop.f32.mrf.mxu0  ;;  %v6338_v7 = vadd.f32 %v6302_v23, %v6060_v53  ;;  %v9621_v23 = vld [vmem:[%s9868_s8 + $0xb0] sm:$0xe]  ;;  %v9622_v21 = vld [vmem:[%s9868_s8 + $0xb4] sm:$0x1]  ;;  %v7522_v34 = vsel %vm9900_vm7, %v7517_v20, %v7521_v28  ;;  %v7557_v38 = vrot.slane %v7555_v52, 5 }
 0x314   : > { %v9647_v3 = vrot.slane %v9621_v23, 9  ;;  %v7917_v45 = vrot.slane %v9622_v21, 5  ;;  %v7699_v56 = vunpack.c.l.b16 %v7522_v34  ;;  %v9737_v28 = vld [vmem:[%s9868_s8 + $0xb4] sm:$0xf0]  ;;  %v7922_v20 = vsel %vm9870_vm4, %v9648_v25, %v7921_v43  ;;  %v9470_v23 = vld [vmem:[%s9868_s8 + $0xc8] sm:$0xe] }
 0x315   : > { %v11751_v44 = vadd.f32 %v6891_v39, %v6522_v11  ;;  %9602 = vmatmul.msk.bf16.gmra.mxu1 %vm351_vm3, %v7712_v24  ;;  %9505 = vmatmul.msk.bf16.gmra.mxu3 %vm351_vm3, %v7122_v19  ;;  %v7536_v39 = vsel %vm9900_vm7, %v7531_v26, %v7535_v16  ;;  %v7540_v24 = vrot.slane %v7538_v61, 4  ;;  %v7543_v19 = vrot.slane %v7541_v50, 5  ;;  %v9583_v11 = vld [vmem:[%s9868_s8 + $0xbc] sm:$0x1]  ;;  %v9471_v21 = vld [vmem:[%s9868_s8 + $0xcc] sm:$0x1] }
 0x316   : > { %9562 = vmatmul.msk.bf16.gmra.mxu0 %vm351_vm3, %v9539_v14  ;;  %v7700_v31 = vunpack.c.l.b16 %v7536_v39  ;;  %v7558_v62 = vor.u32 %v7557_v38, %v7554_v35  ;;  %v7561_v26 = vshll.u32 %v9583_v11, 16  ;;  %v7123_v33 = vpack.c.b16 %v7111_v49, %v7110_v58  ;;  %v9472_v50 = vld [vmem:[%s9868_s8 + $0xd0] sm:$0xe]  ;;  %v9586_v43 = vld [vmem:[%s9868_s8 + $0xd8] sm:$0xf] }
 0x317   : > { %v6893_v59 = vpop.f32.mrf.mxu2  ;;  %v7544_v16 = vor.u32 %v7543_v19, %v7540_v24  ;;  %v9543_v1 = vor.u32 %v9737_v28, %v9542_v5  ;;  %v7980_v61 = vunpack.c.l.b16 %v7922_v20  ;;  %v9494_v18 = vrot.slane %v9470_v23, 9  ;;  %v9626_v24 = vld [vmem:[%s9868_s8 + $0xd4] sm:$0x1]  ;;  %v9627_v11 = vld [vmem:[%s9868_s8 + $0xd8] sm:$0xe] }
 0x318   : > { %v6027_v2 = vpop.f32.mrf.mxu3  ;;  %v7713_v46 = vpack.c.b16 %v7700_v31, %v7699_v56  ;;  %v7563_v39 = vrot.slane %v7561_v26, 5  ;;  %v7056_v57 = vrot.slane %v9471_v21, 5  ;;  %v7583_v5 = vshll.u32 %v9586_v43, 16  ;;  %v9628_v20 = vld [vmem:[%s9868_s8 + $0xdc] sm:$0x1] }
 0x319   : > { %v6061_v51 = vadd.f32 %v6027_v2, %v11508_v63  ;;  %v9473_v2 = vld [vmem:[%s9868_s8 + $0xd4] sm:$0x1]  ;;  %v7545_v52 = vrot.slane %v7544_v16, 4  ;;  %v9650_v21 = vrot.slane %v9627_v11, 9 }
 0x31a   : > { %v6487_v15 = vpop.f32.mrf.mxu1  ;;  %v7060_v25 = vrot.slane %v9473_v2, 5  ;;  %v7057_v31 = vsel %vm9870_vm4, %v9494_v18, %v7056_v57  ;;  %v7585_v2 = vrot.slane %v7583_v5, 5 }
 0x31b   : > { %v6523_v55 = vadd.f32 %v6487_v15, %v6338_v7  ;;  %v6307_v53 = vpop.f32.mrf.mxu0  ;;  %v6339_v63 = vadd.f32 %v6305_v8, %v6061_v51  ;;  %v7918_v8 = vsel %vm9870_vm4, %v9647_v3, %v7917_v45  ;;  %v7549_v51 = vrot.slane %v7547_v29, 5  ;;  %v9584_v15 = vld [vmem:[%s9868_s8 + $0xd0] sm:$0xf] }
 0x31c   : > { %9660 = vmatmul.msk.bf16.gmra.mxu2 %vm351_vm3, %v7991_v42  ;;  %v7979_v10 = vunpack.c.l.b16 %v7918_v8  ;;  %v9495_v45 = vrot.slane %v9472_v50, 9  ;;  %v7566_v19 = vshrl.u32 %v9584_v15, 16  ;;  %v7569_v56 = vshll.u32 %v9584_v15, 16 }
 0x31d   : > { %v11772_v14 = vadd.f32 %v6893_v59, %v6523_v55  ;;  %v7925_v29 = vrot.slane %v9626_v24, 5 }
 0x31e   : > { %v7992_v35 = vpack.c.b16 %v7980_v61, %v7979_v10  ;;  %v7061_v49 = vsel %vm9870_vm4, %v9495_v45, %v7060_v25  ;;  %v7929_v10 = vrot.slane %v9628_v20, 5  ;;  %v9587_v61 = vld [vmem:[%s9868_s8 + $0xdc] sm:$0x1] }
 0x31f   : > { %v6896_v7 = vpop.f32.mrf.mxu2  ;;  %v7113_v23 = vunpack.c.l.b16 %v7061_v49  ;;  %v7589_v57 = vshll.u32 %v9587_v61, 16 }
 0x320   : > { %v6029_v47 = vpop.f32.mrf.mxu3  ;;  %v7930_v25 = vsel %vm9870_vm4, %v9650_v21, %v7929_v10 }
 0x321   : > { %v6062_v60 = vadd.f32 %v6029_v47, %v11529_v40  ;;  %v7559_v40 = vrot.slane %v7558_v62, 4  ;;  %v7982_v11 = vunpack.c.l.b16 %v7930_v25 }
 0x322   : > { %v6490_v59 = vpop.f32.mrf.mxu1 }
 0x323   : > { %v6524_v42 = vadd.f32 %v6490_v59, %v6339_v63  ;;  %v6310_v34 = vpop.f32.mrf.mxu0  ;;  %v6340_v37 = vadd.f32 %v6307_v53, %v6062_v60  ;;  %v7550_v53 = vsel %vm9900_vm7, %v7545_v52, %v7549_v51  ;;  %v9625_v63 = vld [vmem:[%s9868_s8 + $0xd0] sm:$0xe]  ;;  %v7564_v38 = vsel %vm9900_vm7, %v7559_v40, %v7563_v39  ;;  %v9585_v59 = vld [vmem:[%s9868_s8 + $0xd4] sm:$0x1] }
 0x324   : > { %v7701_v8 = vunpack.c.l.b16 %v7550_v53  ;;  %v9649_v16 = vrot.slane %v9625_v63, 9  ;;  %v7568_v60 = vrot.slane %v7566_v19, 4  ;;  %v7575_v40 = vshll.u32 %v9585_v59, 16  ;;  %v9475_v53 = vld [vmem:[%s9868_s8 + $0xdc] sm:$0x1] }
 0x325   : > { %v11787_v3 = vadd.f32 %v6896_v7, %v6524_v42  ;;  %9603 = vmatmul.msk.bf16.gmra.mxu1 %vm351_vm3, %v7713_v46  ;;  %9506 = vmatmul.msk.bf16.gmra.mxu3 %vm351_vm3, %v7123_v33  ;;  %v7580_v7 = vshrl.u32 %v9586_v43, 16  ;;  %v7702_v46 = vunpack.c.l.b16 %v7564_v38  ;;  %v7112_v33 = vunpack.c.l.b16 %v7057_v31 }
 0x326   : > { %9563 = vmatmul.msk.bf16.gmra.mxu0 %vm351_vm3, %v9543_v1  ;;  %v7926_v52 = vsel %vm9870_vm4, %v9649_v16, %v7925_v29  ;;  %v7577_v49 = vrot.slane %v7575_v40, 5 }
 0x327   : > { %v6898_v55 = vpop.f32.mrf.mxu2  ;;  %v7582_v50 = vrot.slane %v7580_v7, 4  ;;  %v7714_v18 = vpack.c.b16 %v7702_v46, %v7701_v8  ;;  %v7124_v45 = vpack.c.b16 %v7113_v23, %v7112_v33  ;;  %v7981_v19 = vunpack.c.l.b16 %v7926_v52  ;;  %v9590_v8 = vld [vmem:[%s9868_s8 + $0xe8] sm:$0xf] }
 0x328   : > { %v6032_v30 = vpop.f32.mrf.mxu3  ;;  %v7591_v7 = vrot.slane %v7589_v57, 5  ;;  %v7608_v46 = vshrl.u32 %v9590_v8, 16  ;;  %v7611_v33 = vshll.u32 %v9590_v8, 16  ;;  %v9631_v52 = vld [vmem:[%s9868_s8 + $0xe8] sm:$0xe] }
 0x329   : > { %v6063_v58 = vadd.f32 %v6032_v30, %v11546_v22  ;;  %v7571_v22 = vrot.slane %v7569_v56, 5  ;;  %v7586_v43 = vor.u32 %v7585_v2, %v7582_v50  ;;  %v9476_v56 = vld [vmem:[%s9868_s8 + $0xe0] sm:$0xe]  ;;  %v9477_v30 = vld [vmem:[%s9868_s8 + $0xe4] sm:$0x1]  ;;  %v7993_v21 = vpack.c.b16 %v7982_v11, %v7981_v19 }
 0x32a   : > { %v6492_v28 = vpop.f32.mrf.mxu1  ;;  %v9497_v29 = vrot.slane %v9476_v56, 9  ;;  %v9629_v2 = vld [vmem:[%s9868_s8 + $0xe0] sm:$0xe]  ;;  %v7610_v25 = vrot.slane %v7608_v46, 4 }
 0x32b   : > { %v6525_v47 = vadd.f32 %v6492_v28, %v6340_v37  ;;  %v6312_v62 = vpop.f32.mrf.mxu0  ;;  %v6341_v26 = vadd.f32 %v6310_v34, %v6063_v58  ;;  %v9546_v34 = vld [vmem:[%s9868_s8 + $0xd0] sm:$0xf]  ;;  %v9738_v37 = vld [vmem:[%s9868_s8 + $0xd4] sm:$0xf0]  ;;  %v7572_v51 = vor.u32 %v7571_v22, %v7568_v60  ;;  %v7064_v28 = vrot.slane %v9475_v53, 5 }
 0x32c   : > { %9661 = vmatmul.msk.bf16.gmra.mxu2 %vm351_vm3, %v7992_v35  ;;  %v9547_v24 = vor.u32 %v9738_v37, %v9546_v34  ;;  %v7587_v16 = vrot.slane %v7586_v43, 4  ;;  %v7613_v43 = vrot.slane %v7611_v33, 5 }
 0x32d   : > { %v11808_v1 = vadd.f32 %v6898_v55, %v6525_v47  ;;  %v9474_v55 = vld [vmem:[%s9868_s8 + $0xd8] sm:$0xe]  ;;  %v7573_v58 = vrot.slane %v7572_v51, 4  ;;  %v7068_v47 = vrot.slane %v9477_v30, 5  ;;  %v9632_v51 = vld [vmem:[%s9868_s8 + $0xec] sm:$0x1] }
 0x32e   : > { %v9496_v5 = vrot.slane %v9474_v55, 9  ;;  %v7592_v10 = vsel %vm9900_vm7, %v7587_v16, %v7591_v7  ;;  %v9652_v30 = vrot.slane %v9631_v52, 9  ;;  %v7614_v7 = vor.u32 %v7613_v43, %v7610_v25 }
 0x32f   : > { %v6901_v42 = vpop.f32.mrf.mxu2  ;;  %v7578_v22 = vsel %vm9900_vm7, %v7573_v58, %v7577_v49  ;;  %v7069_v50 = vsel %vm9870_vm4, %v9497_v29, %v7068_v47  ;;  %v7704_v55 = vunpack.c.l.b16 %v7592_v10  ;;  %v9739_v58 = vld [vmem:[%s9868_s8 + $0xe4] sm:$0xf0]  ;;  %v9479_v29 = vld [vmem:[%s9868_s8 + $0xfc] sm:$0x1] }
 0x330   : > { %v6034_v39 = vpop.f32.mrf.mxu3  ;;  %v7065_v61 = vsel %vm9870_vm4, %v9496_v5, %v7064_v28  ;;  %v7703_v37 = vunpack.c.l.b16 %v7578_v22  ;;  %v9478_v5 = vld [vmem:[%s9868_s8 + $0xf8] sm:$0xe] }
 0x331   : > { %v6064_v15 = vadd.f32 %v6034_v39, %v11565_v4  ;;  %v9588_v4 = vld [vmem:[%s9868_s8 + $0xe0] sm:$0xf]  ;;  %v7114_v53 = vunpack.c.l.b16 %v7065_v61 }
 0x332   : > { %v6495_v63 = vpop.f32.mrf.mxu1  ;;  %v7715_v8 = vpack.c.b16 %v7704_v55, %v7703_v37  ;;  %v9633_v55 = vld [vmem:[%s9868_s8 + $0x100] sm:$0xe] }
 0x333   : > { %v6526_v35 = vadd.f32 %v6495_v63, %v6341_v26  ;;  %v6315_v38 = vpop.f32.mrf.mxu0  ;;  %v6342_v31 = vadd.f32 %v6312_v62, %v6064_v15  ;;  %v7594_v62 = vshrl.u32 %v9588_v4, 16  ;;  %v7597_v26 = vshll.u32 %v9588_v4, 16  ;;  %v9589_v15 = vld [vmem:[%s9868_s8 + $0xe4] sm:$0x1] }
 0x334   : > { %v7115_v63 = vunpack.c.l.b16 %v7069_v50  ;;  %v7603_v49 = vshll.u32 %v9589_v15, 16  ;;  %v7615_v50 = vrot.slane %v7614_v7, 4 }
 0x335   : > { %v11824_v20 = vadd.f32 %v6901_v42, %v6526_v35  ;;  %9604 = vmatmul.msk.bf16.gmra.mxu1 %vm351_vm3, %v7714_v18  ;;  %9507 = vmatmul.msk.bf16.gmra.mxu3 %vm351_vm3, %v7124_v45  ;;  %v9630_v42 = vld [vmem:[%s9868_s8 + $0xe4] sm:$0x1]  ;;  %v7596_v40 = vrot.slane %v7594_v62, 4  ;;  %v7599_v39 = vrot.slane %v7597_v26, 5  ;;  %v9591_v45 = vld [vmem:[%s9868_s8 + $0xec] sm:$0x1] }
 0x336   : > { %9564 = vmatmul.msk.bf16.gmra.mxu0 %vm351_vm3, %v9547_v24  ;;  %v9651_v24 = vrot.slane %v9629_v2, 9  ;;  %v7933_v56 = vrot.slane %v9630_v42, 5  ;;  %v7937_v35 = vrot.slane %v9632_v51, 5  ;;  %v7617_v4 = vshll.u32 %v9591_v45, 16  ;;  %v9480_v2 = vld [vmem:[%s9868_s8 + $0x100] sm:$0xe] }
 0x337   : > { %v6903_v60 = vpop.f32.mrf.mxu2  ;;  %v7125_v16 = vpack.c.b16 %v7115_v63, %v7114_v53  ;;  %v7605_v33 = vrot.slane %v7603_v49, 5  ;;  %v7072_v42 = vrot.slane %v9479_v29, 5  ;;  %v9592_v51 = vld [vmem:[%s9868_s8 + $0x100] sm:$0xf]  ;;  %v9634_v53 = vld [vmem:[%s9868_s8 + $0x104] sm:$0x1] }
 0x338   : > { %v6037_v23 = vpop.f32.mrf.mxu3  ;;  %v7934_v26 = vsel %vm9870_vm4, %v9651_v24, %v7933_v56  ;;  %v7622_v63 = vshrl.u32 %v9592_v51, 16  ;;  %v7625_v24 = vshll.u32 %v9592_v51, 16 }
 0x339   : > { %v6065_v59 = vadd.f32 %v6037_v23, %v11580_v9  ;;  %v7619_v23 = vrot.slane %v7617_v4, 5 }
 0x33a   : > { %v6497_v34 = vpop.f32.mrf.mxu1 }
 0x33b   : > { %v6527_v18 = vadd.f32 %v6497_v34, %v6342_v31  ;;  %v6317_v9 = vpop.f32.mrf.mxu0  ;;  %v6343_v57 = vadd.f32 %v6315_v38, %v6065_v59  ;;  %v9550_v31 = vld [vmem:[%s9868_s8 + $0xe0] sm:$0xf]  ;;  %v7600_v38 = vor.u32 %v7599_v39, %v7596_v40  ;;  %v7983_v34 = vunpack.c.l.b16 %v7934_v26 }
 0x33c   : > { %9662 = vmatmul.msk.bf16.gmra.mxu2 %vm351_vm3, %v7993_v21  ;;  %v9551_v62 = vor.u32 %v9739_v58, %v9550_v31  ;;  %v9498_v21 = vrot.slane %v9478_v5, 9  ;;  %v9499_v40 = vrot.slane %v9480_v2, 9  ;;  %v7620_v15 = vsel %vm9900_vm7, %v7615_v50, %v7619_v23 }
 0x33d   : > { %v11845_v19 = vadd.f32 %v6903_v60, %v6527_v18  ;;  %v7938_v60 = vsel %vm9870_vm4, %v9652_v30, %v7937_v35  ;;  %v7601_v46 = vrot.slane %v7600_v38, 4  ;;  %v9594_v18 = vld [vmem:[%s9868_s8 + $0x108] sm:$0xf]  ;;  %v9636_v35 = vld [vmem:[%s9868_s8 + $0x10c] sm:$0x1]  ;;  %v7706_v4 = vunpack.c.l.b16 %v7620_v15 }
 0x33e   : > { %v7984_v37 = vunpack.c.l.b16 %v7938_v60  ;;  %v7073_v45 = vsel %vm9870_vm4, %v9498_v21, %v7072_v42  ;;  %v9635_v30 = vld [vmem:[%s9868_s8 + $0x108] sm:$0xe]  ;;  %v7636_v31 = vshrl.u32 %v9594_v18, 16  ;;  %v7639_v58 = vshll.u32 %v9594_v18, 16 }
 0x33f   : > { %v6906_v11 = vpop.f32.mrf.mxu2  ;;  %v7116_v7 = vunpack.c.l.b16 %v7073_v45  ;;  %v9654_v29 = vrot.slane %v9635_v30, 9  ;;  %v7624_v26 = vrot.slane %v7622_v63, 4  ;;  %v7627_v60 = vrot.slane %v7625_v24, 5 }
 0x340   : > { %v6039_v28 = vpop.f32.mrf.mxu3  ;;  %v7994_v43 = vpack.c.b16 %v7984_v37, %v7983_v34  ;;  %v7638_v23 = vrot.slane %v7636_v31, 4  ;;  %v7641_v21 = vrot.slane %v7639_v58, 5 }
 0x341   : > { %v6066_v47 = vadd.f32 %v6039_v28, %v11600_v48  ;;  %v9481_v48 = vld [vmem:[%s9868_s8 + $0x104] sm:$0x1]  ;;  %v7628_v34 = vor.u32 %v7627_v60, %v7624_v26  ;;  %v9637_v60 = vld [vmem:[%s9868_s8 + $0x110] sm:$0xe] }
 0x342   : > { %v6500_v22 = vpop.f32.mrf.mxu1  ;;  %v7076_v39 = vrot.slane %v9481_v48, 5  ;;  %v7642_v18 = vor.u32 %v7641_v21, %v7638_v23  ;;  %v9640_v21 = vld [vmem:[%s9868_s8 + $0x11c] sm:$0x1] }
 0x343   : > { %v6528_v59 = vadd.f32 %v6500_v22, %v6343_v57  ;;  %v6320_v10 = vpop.f32.mrf.mxu0  ;;  %v6344_v61 = vadd.f32 %v6317_v9, %v6066_v47  ;;  %v7606_v57 = vsel %vm9900_vm7, %v7601_v46, %v7605_v33  ;;  %v7945_v47 = vrot.slane %v9636_v35, 5  ;;  %v9595_v33 = vld [vmem:[%s9868_s8 + $0x10c] sm:$0x1] }
 0x344   : > { %v7705_v49 = vunpack.c.l.b16 %v7606_v57  ;;  %v7645_v37 = vshll.u32 %v9595_v33, 16  ;;  %v9483_v57 = vld [vmem:[%s9868_s8 + $0x10c] sm:$0x1]  ;;  %v7629_v35 = vrot.slane %v7628_v34, 4  ;;  %v9639_v33 = vld [vmem:[%s9868_s8 + $0x118] sm:$0xe] }
 0x345   : > { %v11858_v52 = vadd.f32 %v6906_v11, %v6528_v59  ;;  %9605 = vmatmul.msk.bf16.gmra.mxu1 %vm351_vm3, %v7715_v8  ;;  %9508 = vmatmul.msk.bf16.gmra.mxu3 %vm351_vm3, %v7125_v16  ;;  %v7077_v11 = vsel %vm9870_vm4, %v9499_v40, %v7076_v39  ;;  %v9653_v16 = vrot.slane %v9633_v55, 9  ;;  %v7946_v42 = vsel %vm9870_vm4, %v9654_v29, %v7945_v47  ;;  %v9485_v55 = vld [vmem:[%s9868_s8 + $0x114] sm:$0x1] }
 0x346   : > { %9565 = vmatmul.msk.bf16.gmra.mxu0 %vm351_vm3, %v9551_v62  ;;  %v9593_v62 = vld [vmem:[%s9868_s8 + $0x104] sm:$0x1]  ;;  %v7117_v46 = vunpack.c.l.b16 %v7077_v11  ;;  %v7716_v40 = vpack.c.b16 %v7706_v4, %v7705_v49  ;;  %v7647_v31 = vrot.slane %v7645_v37, 5  ;;  %v7080_v58 = vrot.slane %v9483_v57, 5 }
 0x347   : > { %v6908_v9 = vpop.f32.mrf.mxu2  ;;  %v7631_v2 = vshll.u32 %v9593_v62, 16  ;;  %v7643_v49 = vrot.slane %v7642_v18, 4  ;;  %v7084_v11 = vrot.slane %v9485_v55, 5  ;;  %v9558_v18 = vld [vmem:[%s9868_s8 + $0x110] sm:$0xf]  ;;  %v9656_v57 = vrot.slane %v9639_v33, 9 }
 0x348   : > { %v6042_v25 = vpop.f32.mrf.mxu3  ;;  %v7126_v39 = vpack.c.b16 %v7117_v46, %v7116_v7  ;;  %v9638_v46 = vld [vmem:[%s9868_s8 + $0x114] sm:$0x1] }
 0x349   : > { %v6067_v56 = vadd.f32 %v6042_v25, %v11614_v13  ;;  %v7941_v13 = vrot.slane %v9634_v53, 5  ;;  %v7633_v30 = vrot.slane %v7631_v2, 5  ;;  %v7648_v47 = vsel %vm9900_vm7, %v7643_v49, %v7647_v31 }
 0x34a   : > { %v6502_v38 = vpop.f32.mrf.mxu1  ;;  %v7708_v34 = vunpack.c.l.b16 %v7648_v47 }
 0x34b   : > { %v6529_v5 = vadd.f32 %v6502_v38, %v6344_v61  ;;  %v6322_v28 = vpop.f32.mrf.mxu0  ;;  %v6345_v8 = vadd.f32 %v6320_v10, %v6067_v56  ;;  %v9554_v10 = vld [vmem:[%s9868_s8 + $0x100] sm:$0xf]  ;;  %v9740_v61 = vld [vmem:[%s9868_s8 + $0x104] sm:$0xf0]  ;;  %v7942_v50 = vsel %vm9870_vm4, %v9653_v16, %v7941_v13  ;;  %v7986_v56 = vunpack.c.l.b16 %v7946_v42 }
 0x34c   : > { %9663 = vmatmul.msk.bf16.gmra.mxu2 %vm351_vm3, %v7994_v43  ;;  %v9555_v45 = vor.u32 %v9740_v61, %v9554_v10  ;;  %v7985_v25 = vunpack.c.l.b16 %v7942_v50  ;;  %v9484_v43 = vld [vmem:[%s9868_s8 + $0x110] sm:$0xe]  ;;  %v7634_v13 = vsel %vm9900_vm7, %v7629_v35, %v7633_v30 }
 0x34d   : > { %v11880_v22 = vadd.f32 %v6908_v9, %v6529_v5  ;;  %v9482_v9 = vld [vmem:[%s9868_s8 + $0x108] sm:$0xe]  ;;  %v9501_v4 = vrot.slane %v9484_v43, 9  ;;  %v9596_v5 = vld [vmem:[%s9868_s8 + $0x110] sm:$0xf]  ;;  %v7707_v42 = vunpack.c.l.b16 %v7634_v13 }
 0x34e   : > { %v7995_v16 = vpack.c.b16 %v7986_v56, %v7985_v25  ;;  %v7653_v10 = vshll.u32 %v9596_v5, 16  ;;  %v9599_v56 = vld [vmem:[%s9868_s8 + $0x11c] sm:$0x1] }
 0x34f   : > { %v6911_v59 = vpop.f32.mrf.mxu2  ;;  %v7085_v26 = vsel %vm9870_vm4, %v9501_v4, %v7084_v11  ;;  %v7717_v35 = vpack.c.b16 %v7708_v34, %v7707_v42 }
 0x350   : > { %v6044_v48 = vpop.f32.mrf.mxu3  ;;  %v7655_v43 = vrot.slane %v7653_v10, 5 }
 0x351   : > { %v6068_v51 = vadd.f32 %v6044_v48, %v11632_v36  ;;  %v9500_v36 = vrot.slane %v9482_v9, 9  ;;  %v7949_v9 = vrot.slane %v9638_v46, 5 }
 0x352   : > { %v6505_v15 = vpop.f32.mrf.mxu1 }
 0x353   : > { %v6530_v53 = vadd.f32 %v6505_v15, %v6345_v8  ;;  %v6325_v63 = vpop.f32.mrf.mxu0  ;;  %v6346_v24 = vadd.f32 %v6322_v28, %v6068_v51  ;;  %v9598_v28 = vld [vmem:[%s9868_s8 + $0x118] sm:$0xf]  ;;  %v7081_v62 = vsel %vm9870_vm4, %v9500_v36, %v7080_v58  ;;  %v7119_v51 = vunpack.c.l.b16 %v7085_v26 }
 0x354   : > { %v7664_v61 = vshrl.u32 %v9598_v28, 16  ;;  %v7118_v37 = vunpack.c.l.b16 %v7081_v62  ;;  %v7953_v15 = vrot.slane %v9640_v21, 5 }
 0x355   : > { %v11894_v38 = vadd.f32 %v6911_v59, %v6530_v53  ;;  %9606 = vmatmul.msk.bf16.gmra.mxu1 %vm351_vm3, %v7716_v40  ;;  %9509 = vmatmul.msk.bf16.gmra.mxu3 %vm351_vm3, %v7126_v39  ;;  %v7650_v59 = vshrl.u32 %v9596_v5, 16  ;;  %v9655_v40 = vrot.slane %v9637_v60, 9 }
 0x356   : > { %9566 = vmatmul.msk.bf16.gmra.mxu0 %vm351_vm3, %v9555_v45  ;;  %v9741_v45 = vld [vmem:[%s9868_s8 + $0x114] sm:$0xf0]  ;;  %v7666_v55 = vrot.slane %v7664_v61, 4  ;;  %v7127_v31 = vpack.c.b16 %v7119_v51, %v7118_v37  ;;  %v7954_v4 = vsel %vm9870_vm4, %v9656_v57, %v7953_v15 }
 0x357   : > { %v6913_v7 = vpop.f32.mrf.mxu2  ;;  %v7652_v25 = vrot.slane %v7650_v59, 4  ;;  %v9559_v58 = vor.u32 %v9741_v45, %v9558_v18  ;;  %v7950_v49 = vsel %vm9870_vm4, %v9655_v40, %v7949_v9  ;;  %v7988_v62 = vunpack.c.l.b16 %v7954_v4 }
 0x358   : > { %v6047_v8 = vpop.f32.mrf.mxu3  ;;  %v7987_v47 = vunpack.c.l.b16 %v7950_v49 }
 0x359   : > { %v6069_v29 = vadd.f32 %v6047_v8, %v11645_v0  ;;  %v7667_v0 = vshll.u32 %v9598_v28, 16  ;;  %v7673_v8 = vshll.u32 %v9599_v56, 16 }
 0x35a   : > { %v6507_v23 = vpop.f32.mrf.mxu1  ;;  %v7996_v21 = vpack.c.b16 %v7988_v62, %v7987_v47 }
 0x35b   : > { %v6531_v50 = vadd.f32 %v6507_v23, %v6346_v24  ;;  %v6327_v2 = vpop.f32.mrf.mxu0  ;;  %v6347_v48 = vadd.f32 %v6325_v63, %v6069_v29  ;;  %v7669_v53 = vrot.slane %v7667_v0, 5  ;;  %v9597_v24 = vld [vmem:[%s9868_s8 + $0x114] sm:$0x1]  ;;  %v7675_v46 = vrot.slane %v7673_v8, 5  ;;  %s9668_s8 = sshll.u32 %s12048_s15, 7 }
 0x35c   : > { %9664 = vmatmul.msk.bf16.gmra.mxu2 %vm351_vm3, %v7995_v16  ;;  %v7659_v5 = vshll.u32 %v9597_v24, 16  ;;  %s11950_s11 = scalar_lea.vmem %s12037_s3, %s9668_s8  ;;  %s11963_s19 = scalar_lea.vmem %s12038_s4, %s9668_s8 }
 0x35d   : > { %v11915_v39 = vadd.f32 %v6913_v7, %v6531_v50  ;;  %v7656_v7 = vor.u32 %v7655_v43, %v7652_v25  ;;  %v7670_v28 = vor.u32 %v7669_v53, %v7666_v55 }
 0x35f   : > { %v6916_v63 = vpop.f32.mrf.mxu2  ;;  %v7657_v12 = vrot.slane %v7656_v7, 4  ;;  %v7671_v60 = vrot.slane %v7670_v28, 4 }
 0x360   : > { %v6049_v30 = vpop.f32.mrf.mxu3 }
 0x361   : > { %v6070_v36 = vadd.f32 %v6049_v30, %v11662_v17  ;;  %v7661_v17 = vrot.slane %v7659_v5, 5  ;;  %v7676_v0 = vsel %vm9900_vm7, %v7671_v60, %v7675_v46 }
 0x362   : > { %v6510_v11 = vpop.f32.mrf.mxu1  ;;  %v7710_v37 = vunpack.c.l.b16 %v7676_v0 }
 0x363   : > { %v6532_v16 = vadd.f32 %v6510_v11, %v6347_v48  ;;  %v6330_v13 = vpop.f32.mrf.mxu0  ;;  %v6348_v29 = vadd.f32 %v6327_v2, %v6070_v36  ;;  %v7662_v61 = vsel %vm9900_vm7, %v7657_v12, %v7661_v17  ;;  %v8141_v11 = vld [vmem:[%s11950_s11] sm:$0xff]  ;;  %v8142_v17 = vld [vmem:[%s11950_s11 + $0x8] sm:$0xff] }
 0x364   : > { %v7709_v34 = vunpack.c.l.b16 %v7662_v61 }
 0x365   : > { %v11926_v26 = vadd.f32 %v6916_v63, %v6532_v16  ;;  %9607 = vmatmul.msk.bf16.gmra.mxu1 %vm351_vm3, %v7717_v35  ;;  %9510 = vmatmul.msk.bf16.gmra.mxu3 %vm351_vm3, %v7127_v31 }
 0x366   : > { %9567 = vmatmul.msk.bf16.gmra.mxu0 %vm351_vm3, %v9559_v58  ;;  %v7718_v18 = vpack.c.b16 %v7710_v37, %v7709_v34  ;;  %v11955_v58 = vld [vmem:[%s12036_s2] ss:$0 sm:$0xff] }
 0x367   : > { %v6918_v33 = vpop.f32.mrf.mxu2 }
 0x368   : > { %v6052_v23 = vpop.f32.mrf.mxu3 }
 0x369   : > { %v6071_v59 = vadd.f32 %v6052_v23, %v11680_v32 }
 0x36a   : > { %v6512_v10 = vpop.f32.mrf.mxu1 }
 0x36b   : > { %v6533_v50 = vadd.f32 %v6512_v10, %v6348_v29  ;;  %v6332_v2 = vpop.f32.mrf.mxu0  ;;  %v6349_v48 = vadd.f32 %v6330_v13, %v6071_v59 }
 0x36c   : > { %9665 = vmatmul.msk.bf16.gmra.mxu2 %vm351_vm3, %v7996_v21 }
 0x36d   : > { %v11937_v42 = vadd.f32 %v6918_v33, %v6533_v50 }
 0x36f   : > { %v6921_v51 = vpop.f32.mrf.mxu2 }
 0x370   : > { %v6054_v40 = vpop.f32.mrf.mxu3 }
 0x371   : > { %v6072_v32 = vadd.f32 %v6054_v40, %v11702_v27 }
 0x372   : > { %v6515_v9 = vpop.f32.mrf.mxu1 }
 0x373   : > { %v6534_v57 = vadd.f32 %v6515_v9, %v6349_v48  ;;  %v7349_v15 = vpop.f32.mrf.mxu0  ;;  %v6350_v54 = vadd.f32 %v6332_v2, %v6072_v32  ;;  %v8143_v2 = vld [vmem:[%s11950_s11 + $0x10] sm:$0xff] }
 0x375   : > { %v11940_v45 = vadd.f32 %v6921_v51, %v6534_v57  ;;  %9608 = vmatmul.msk.bf16.gmra.mxu1 %vm351_vm3, %v7718_v18 }
 0x377   : > { %v6923_v25 = vpop.f32.mrf.mxu2 }
 0x378   : > { %v7164_v43 = vpop.f32.mrf.mxu3 }
 0x379   : > { %v7204_v63 = vadd.f32 %v7164_v43, %v11714_v6 }
 0x37a   : > { %v6517_v55 = vpop.f32.mrf.mxu1 }
 0x37b   : > { %v6535_v53 = vadd.f32 %v6517_v55, %v6350_v54  ;;  %v7351_v24 = vpop.f32.mrf.mxu0  ;;  %v7389_v27 = vadd.f32 %v7349_v15, %v7204_v63  ;;  %v8144_v54 = vld [vmem:[%s11950_s11 + $0x18] sm:$0xff] }
 0x37d   : > { %v11944_v56 = vadd.f32 %v6923_v25, %v6535_v53 }
 0x37f   : > { %v8033_v30 = vpop.f32.mrf.mxu2 }
 0x380   : > { %v7166_v35 = vpop.f32.mrf.mxu3 }
 0x381   : > { %v7205_v6 = vadd.f32 %v7166_v35, %v11736_v41 }
 0x382   : > { %v7755_v31 = vpop.f32.mrf.mxu1 }
 0x383   : > { %v7795_v36 = vadd.f32 %v7755_v31, %v7389_v27  ;;  %v7354_v49 = vpop.f32.mrf.mxu0  ;;  %v7390_v5 = vadd.f32 %v7351_v24, %v7205_v6 }
 0x385   : > { %v8073_v4 = vadd.f32 %v8033_v30, %v7795_v36  ;;  %v8145_v36 = vld [vmem:[%s11950_s11 + $0x20] sm:$0xff] }
 0x387   : > { %v8125_v7 = vadd.f32 %v11955_v58, %v8073_v4  ;;  %v8035_v28 = vpop.f32.mrf.mxu2 }
 0x388   : > { %v7169_v8 = vpop.f32.mrf.mxu3 }
 0x389   : > { %v8157_v16 = vadd.f32 %v8141_v11, %v8125_v7  ;;  %v7206_v41 = vadd.f32 %v7169_v8, %v11751_v44 }
 0x38a   : > { %v7757_v13 = vpop.f32.mrf.mxu1 }
 0x38b   : > { %v8173_v29 = vmax.f32 %v8157_v16, 0.0  ;;  %v7796_v47 = vadd.f32 %v7757_v13, %v7390_v5  ;;  %v7356_v62 = vpop.f32.mrf.mxu0  ;;  %v7391_v46 = vadd.f32 %v7354_v49, %v7206_v41 }
 0x38d   : > { %8189 = vst [vmem:[%s11963_s19] sm:$0xff] %v8173_v29  ;;  %v8074_v12 = vadd.f32 %v8035_v28, %v7796_v47  ;;  %v8146_v29 = vld [vmem:[%s11950_s11 + $0x28] sm:$0xff] }
 0x38f   : > { %v8126_v60 = vadd.f32 %v11955_v58, %v8074_v12  ;;  %v8038_v33 = vpop.f32.mrf.mxu2 }
 0x390   : > { %v7171_v23 = vpop.f32.mrf.mxu3 }
 0x391   : > { %v8158_v21 = vadd.f32 %v8142_v17, %v8126_v60  ;;  %v7207_v0 = vadd.f32 %v7171_v23, %v11772_v14 }
 0x392   : > { %v7760_v59 = vpop.f32.mrf.mxu1 }
 0x393   : > { %v8174_v10 = vmax.f32 %v8158_v21, 0.0  ;;  %v7797_v61 = vadd.f32 %v7760_v59, %v7391_v46  ;;  %v7359_v50 = vpop.f32.mrf.mxu0  ;;  %v7392_v34 = vadd.f32 %v7356_v62, %v7207_v0  ;;  %v8147_v59 = vld [vmem:[%s11950_s11 + $0x30] sm:$0xff] }
 0x395   : > { %8190 = vst [vmem:[%s11963_s19 + $0x8] sm:$0xff] %v8174_v10  ;;  %v8075_v44 = vadd.f32 %v8038_v33, %v7797_v61 }
 0x397   : > { %v8127_v48 = vadd.f32 %v11955_v58, %v8075_v44  ;;  %v8040_v37 = vpop.f32.mrf.mxu2 }
 0x398   : > { %v7174_v51 = vpop.f32.mrf.mxu3 }
 0x399   : > { %v8159_v40 = vadd.f32 %v8143_v2, %v8127_v48  ;;  %v7208_v57 = vadd.f32 %v7174_v51, %v11787_v3 }
 0x39a   : > { %v7762_v32 = vpop.f32.mrf.mxu1 }
 0x39b   : > { %v8175_v18 = vmax.f32 %v8159_v40, 0.0  ;;  %v7798_v9 = vadd.f32 %v7762_v32, %v7392_v34  ;;  %v7361_v15 = vpop.f32.mrf.mxu0  ;;  %v7393_v43 = vadd.f32 %v7359_v50, %v7208_v57  ;;  %v8148_v40 = vld [vmem:[%s11950_s11 + $0x38] sm:$0xff] }
 0x39d   : > { %8191 = vst [vmem:[%s11963_s19 + $0x10] sm:$0xff] %v8175_v18  ;;  %v8076_v14 = vadd.f32 %v8040_v37, %v7798_v9 }
 0x39f   : > { %v8128_v25 = vadd.f32 %v11955_v58, %v8076_v14  ;;  %v8043_v55 = vpop.f32.mrf.mxu2 }
 0x3a0   : > { %v7176_v53 = vpop.f32.mrf.mxu3 }
 0x3a1   : > { %v8160_v63 = vadd.f32 %v8144_v54, %v8128_v25  ;;  %v7209_v35 = vadd.f32 %v7176_v53, %v11808_v1  ;;  %v8149_v53 = vld [vmem:[%s11950_s11 + $0x40] sm:$0xff] }
 0x3a2   : > { %v7765_v24 = vpop.f32.mrf.mxu1 }
 0x3a3   : > { %v8176_v27 = vmax.f32 %v8160_v63, 0.0  ;;  %v7799_v30 = vadd.f32 %v7765_v24, %v7393_v43  ;;  %v7364_v31 = vpop.f32.mrf.mxu0  ;;  %v7394_v49 = vadd.f32 %v7361_v15, %v7209_v35 }
 0x3a5   : > { %8192 = vst [vmem:[%s11963_s19 + $0x18] sm:$0xff] %v8176_v27  ;;  %v8077_v3 = vadd.f32 %v8043_v55, %v7799_v30 }
 0x3a7   : > { %v8129_v6 = vadd.f32 %v11955_v58, %v8077_v3  ;;  %v8045_v4 = vpop.f32.mrf.mxu2 }
 0x3a8   : > { %v7179_v11 = vpop.f32.mrf.mxu3 }
 0x3a9   : > { %v8161_v7 = vadd.f32 %v8145_v36, %v8129_v6  ;;  %v7210_v16 = vadd.f32 %v7179_v11, %v11824_v20 }
 0x3aa   : > { %v7767_v5 = vpop.f32.mrf.mxu1 }
 0x3ab   : > { %v8177_v28 = vmax.f32 %v8161_v7, 0.0  ;;  %v7800_v8 = vadd.f32 %v7767_v5, %v7394_v49  ;;  %v7366_v13 = vpop.f32.mrf.mxu0  ;;  %v7395_v41 = vadd.f32 %v7364_v31, %v7210_v16  ;;  %v8150_v49 = vld [vmem:[%s11950_s11 + $0x48] sm:$0xff] }
 0x3ad   : > { %8193 = vst [vmem:[%s11963_s19 + $0x20] sm:$0xff] %v8177_v28  ;;  %v8078_v1 = vadd.f32 %v8045_v4, %v7800_v8 }
 0x3af   : > { %v8130_v47 = vadd.f32 %v11955_v58, %v8078_v1  ;;  %v8048_v62 = vpop.f32.mrf.mxu2 }
 0x3b0   : > { %v7181_v12 = vpop.f32.mrf.mxu3 }
 0x3b1   : > { %v8162_v17 = vadd.f32 %v8146_v29, %v8130_v47  ;;  %v7211_v23 = vadd.f32 %v7181_v12, %v11845_v19  ;;  %v8151_v47 = vld [vmem:[%s11950_s11 + $0x50] sm:$0xff] }
 0x3b2   : > { %v7770_v60 = vpop.f32.mrf.mxu1 }
 0x3b3   : > { %v8178_v46 = vmax.f32 %v8162_v17, 0.0  ;;  %v7801_v33 = vadd.f32 %v7770_v60, %v7395_v41  ;;  %v7369_v21 = vpop.f32.mrf.mxu0  ;;  %v7396_v61 = vadd.f32 %v7366_v13, %v7211_v23 }
 0x3b5   : > { %8194 = vst [vmem:[%s11963_s19 + $0x28] sm:$0xff] %v8178_v46  ;;  %v8079_v20 = vadd.f32 %v8048_v62, %v7801_v33 }
 0x3b7   : > { %v8131_v10 = vadd.f32 %v11955_v58, %v8079_v20  ;;  %v8050_v0 = vpop.f32.mrf.mxu2 }
 0x3b8   : > { %v7184_v50 = vpop.f32.mrf.mxu3 }
 0x3b9   : > { %v8163_v44 = vadd.f32 %v8147_v59, %v8131_v10  ;;  %v7212_v37 = vadd.f32 %v7184_v50, %v11858_v52  ;;  %v8152_v59 = vld [vmem:[%s11950_s11 + $0x58] sm:$0xff] }
 0x3ba   : > { %v7772_v2 = vpop.f32.mrf.mxu1 }
 0x3bb   : > { %v8179_v48 = vmax.f32 %v8163_v44, 0.0  ;;  %v7802_v34 = vadd.f32 %v7772_v2, %v7396_v61  ;;  %v7371_v51 = vpop.f32.mrf.mxu0  ;;  %v7397_v18 = vadd.f32 %v7369_v21, %v7212_v37 }
 0x3bd   : > { %8195 = vst [vmem:[%s11963_s19 + $0x30] sm:$0xff] %v8179_v48  ;;  %v8080_v19 = vadd.f32 %v8050_v0, %v7802_v34 }
 0x3bf   : > { %v8132_v32 = vadd.f32 %v11955_v58, %v8080_v19  ;;  %v8053_v9 = vpop.f32.mrf.mxu2  ;;  %v8153_v19 = vld [vmem:[%s11950_s11 + $0x60] sm:$0xff] }
 0x3c0   : > { %v7186_v57 = vpop.f32.mrf.mxu3 }
 0x3c1   : > { %v8164_v15 = vadd.f32 %v8148_v40, %v8132_v32  ;;  %v7213_v43 = vadd.f32 %v7186_v57, %v11880_v22 }
 0x3c2   : > { %v7775_v14 = vpop.f32.mrf.mxu1 }
 0x3c3   : > { %v8180_v54 = vmax.f32 %v8164_v15, 0.0  ;;  %v7803_v25 = vadd.f32 %v7775_v14, %v7397_v18  ;;  %v7374_v55 = vpop.f32.mrf.mxu0  ;;  %v7398_v24 = vadd.f32 %v7371_v51, %v7213_v43 }
 0x3c5   : > { %8196 = vst [vmem:[%s11963_s19 + $0x38] sm:$0xff] %v8180_v54  ;;  %v8081_v52 = vadd.f32 %v8053_v9, %v7803_v25 }
 0x3c7   : > { %v8133_v63 = vadd.f32 %v11955_v58, %v8081_v52  ;;  %v8055_v27 = vpop.f32.mrf.mxu2 }
 0x3c8   : > { %v7189_v30 = vpop.f32.mrf.mxu3 }
 0x3c9   : > { %v8165_v35 = vadd.f32 %v8149_v53, %v8133_v63  ;;  %v7214_v6 = vadd.f32 %v7189_v30, %v11894_v38 }
 0x3ca   : > { %v7777_v31 = vpop.f32.mrf.mxu1 }
 0x3cb   : > { %v8181_v3 = vmax.f32 %v8165_v35, 0.0  ;;  %v7804_v36 = vadd.f32 %v7777_v31, %v7398_v24  ;;  %v7376_v4 = vpop.f32.mrf.mxu0  ;;  %v7399_v7 = vadd.f32 %v7374_v55, %v7214_v6  ;;  %v8154_v55 = vld [vmem:[%s11950_s11 + $0x68] sm:$0xff]  ;;  %v8155_v6 = vld [vmem:[%s11950_s11 + $0x70] sm:$0xff] }
 0x3cd   : > { %8197 = vst [vmem:[%s11963_s19 + $0x40] sm:$0xff] %v8181_v3  ;;  %v8082_v22 = vadd.f32 %v8055_v27, %v7804_v36 }
 0x3cf   : > { %v8134_v11 = vadd.f32 %v11955_v58, %v8082_v22  ;;  %v8058_v5 = vpop.f32.mrf.mxu2 }
 0x3d0   : > { %v7191_v28 = vpop.f32.mrf.mxu3 }
 0x3d1   : > { %v8166_v8 = vadd.f32 %v8150_v49, %v8134_v11  ;;  %v7215_v29 = vadd.f32 %v7191_v28, %v11915_v39 }
 0x3d2   : > { %v7780_v16 = vpop.f32.mrf.mxu1 }
 0x3d3   : > { %v8182_v13 = vmax.f32 %v8166_v8, 0.0  ;;  %v7805_v1 = vadd.f32 %v7780_v16, %v7399_v7  ;;  %v7400_v62 = vadd.f32 %v7376_v4, %v7215_v29  ;;  %v7379_v17 = vpop.f32.mrf.mxu0  ;;  %v8156_v16 = vld [vmem:[%s11950_s11 + $0x78] sm:$0xff] }
 0x3d5   : > { %8198 = vst [vmem:[%s11963_s19 + $0x48] sm:$0xff] %v8182_v13  ;;  %v8083_v38 = vadd.f32 %v8058_v5, %v7805_v1 }
 0x3d7   : > { %v8135_v41 = vadd.f32 %v11955_v58, %v8083_v38  ;;  %v8060_v12 = vpop.f32.mrf.mxu2 }
 0x3d8   : > { %v7194_v60 = vpop.f32.mrf.mxu3 }
 0x3d9   : > { %v8167_v46 = vadd.f32 %v8151_v47, %v8135_v41  ;;  %v7216_v20 = vadd.f32 %v7194_v60, %v11926_v26 }
 0x3da   : > { %v7782_v33 = vpop.f32.mrf.mxu1 }
 0x3db   : > { %v8183_v23 = vmax.f32 %v8167_v46, 0.0  ;;  %v7806_v21 = vadd.f32 %v7782_v33, %v7400_v62  ;;  %v7401_v61 = vadd.f32 %v7379_v17, %v7216_v20  ;;  %v7381_v2 = vpop.f32.mrf.mxu0 }
 0x3dd   : > { %8199 = vst [vmem:[%s11963_s19 + $0x50] sm:$0xff] %v8183_v23  ;;  %v8084_v39 = vadd.f32 %v8060_v12, %v7806_v21 }
 0x3df   : > { %v8136_v10 = vadd.f32 %v11955_v58, %v8084_v39  ;;  %v8063_v0 = vpop.f32.mrf.mxu2 }
 0x3e0   : > { %v7196_v50 = vpop.f32.mrf.mxu3 }
 0x3e1   : > { %v8168_v44 = vadd.f32 %v8152_v59, %v8136_v10  ;;  %v7217_v51 = vadd.f32 %v7196_v50, %v11937_v42 }
 0x3e2   : > { %v7785_v48 = vpop.f32.mrf.mxu1 }
 0x3e3   : > { %v8184_v34 = vmax.f32 %v8168_v44, 0.0  ;;  %v7807_v37 = vadd.f32 %v7785_v48, %v7401_v61  ;;  %v7402_v32 = vadd.f32 %v7381_v2, %v7217_v51  ;;  %v7384_v43 = vpop.f32.mrf.mxu0 }
 0x3e5   : > { %8200 = vst [vmem:[%s11963_s19 + $0x58] sm:$0xff] %v8184_v34  ;;  %v8085_v26 = vadd.f32 %v8063_v0, %v7807_v37 }
 0x3e7   : > { %v8137_v40 = vadd.f32 %v11955_v58, %v8085_v26  ;;  %v8065_v18 = vpop.f32.mrf.mxu2 }
 0x3e8   : > { %v7199_v9 = vpop.f32.mrf.mxu3 }
 0x3e9   : > { %v8169_v57 = vadd.f32 %v8153_v19, %v8137_v40  ;;  %v7218_v25 = vadd.f32 %v7199_v9, %v11940_v45 }
 0x3ea   : > { %v7787_v15 = vpop.f32.mrf.mxu1 }
 0x3eb   : > { %v8185_v14 = vmax.f32 %v8169_v57, 0.0  ;;  %v7808_v54 = vadd.f32 %v7787_v15, %v7402_v32  ;;  %v7403_v53 = vadd.f32 %v7384_v43, %v7218_v25  ;;  %v7386_v36 = vpop.f32.mrf.mxu0 }
 0x3ed   : > { %8201 = vst [vmem:[%s11963_s19 + $0x60] sm:$0xff] %v8185_v14  ;;  %v8086_v42 = vadd.f32 %v8065_v18, %v7808_v54 }
 0x3ef   : > { %v8138_v52 = vadd.f32 %v11955_v58, %v8086_v42  ;;  %v8068_v30 = vpop.f32.mrf.mxu2 }
 0x3f0   : > { %v7201_v63 = vpop.f32.mrf.mxu3 }
 0x3f1   : > { %v8170_v24 = vadd.f32 %v8154_v55, %v8138_v52  ;;  %v7219_v3 = vadd.f32 %v7201_v63, %v11944_v56 }
 0x3f2   : > { %v7790_v27 = vpop.f32.mrf.mxu1 }
 0x3f3   : > { %v8186_v35 = vmax.f32 %v8170_v24, 0.0  ;;  %v7809_v31 = vadd.f32 %v7790_v27, %v7403_v53  ;;  %v7404_v49 = vadd.f32 %v7386_v36, %v7219_v3 }
 0x3f5   : > { %8202 = vst [vmem:[%s11963_s19 + $0x68] sm:$0xff] %v8186_v35  ;;  %v8087_v45 = vadd.f32 %v8068_v30, %v7809_v31 }
 0x3f7   : > { %v8139_v22 = vadd.f32 %v11955_v58, %v8087_v45  ;;  %v8070_v28 = vpop.f32.mrf.mxu2 }
 0x3f9   : > { %v8171_v4 = vadd.f32 %v8155_v6, %v8139_v22 }
 0x3fa   : > { %v7792_v11 = vpop.f32.mrf.mxu1 }
 0x3fb   : > { %v8187_v7 = vmax.f32 %v8171_v4, 0.0  ;;  %v7810_v5 = vadd.f32 %v7792_v11, %v7404_v49 }
 0x3fd   : > { %8203 = vst [vmem:[%s11963_s19 + $0x70] sm:$0xff] %v8187_v7  ;;  %v8088_v8 = vadd.f32 %v8070_v28, %v7810_v5 }
 0x3ff   : > { %v8140_v13 = vadd.f32 %v11955_v58, %v8088_v8 }
 0x401   : > { %v8172_v1 = vadd.f32 %v8156_v16, %v8140_v13 }
 0x403   : > { %v8188_v56 = vmax.f32 %v8172_v1, 0.0 }
 0x405   : > { %8204 = vst [vmem:[%s11963_s19 + $0x78] sm:$0xff] %v8188_v56 }
 0x406 PF: > { %s14_s17 = sadd.s32 1, %s9793_s17   ;;  %s12043_s15 = smov %s9789_s16 }
 0x407   : > { %p11_p5 = scmp.ge.s32.totalorder %s14_s17, 4   ;;  %s12044_s16 = smov %s12046_s18 }
 0x409   :  { %13 = sbr.rel (!%p11_p5) target bundleno = 2 (0x2), region = 104 }

</bundles_post_ra>
